<compile_context>
chip_gen: v7x
topology: tpu7x:2x2x1
jax: 0.10.0
libtpu: 0.0.40
codegen_flags: <defaults>
</compile_context>

<pallas_src>
import jax
import jax.numpy as jnp
import numpy as np
from jax.experimental import pallas as pl
from jax.experimental.pallas import tpu as pltpu

IN_CH = 3
OUT_CH = 10
SPATIAL = 112          # 112 -> 56 -> 28 -> 14 -> 7, so flatten = 7*7*32 = 1568
BATCH = 2
VMEM_LIMIT = 48 * 1024 * 1024


# ----------------------------------------------------------------------------
# Pallas kernels
# ----------------------------------------------------------------------------
def _conv_relu_pool_kernel(x_ref, w_ref, b_ref, o_ref):
    """Fused 3x3 conv (stride=1, pad=1) + bias + ReLU + 2x2/2 max-pool.

    x_ref : (1, 4*PB, 9*Cin) bf16  quadrant-stacked im2col patches
                                   (rows q*PB+i = pool-window position q,
                                    pooled pixel i).
    w_ref : (9*Cin, Cout)    bf16
    b_ref : (1, Cout)        f32
    o_ref : (1, PB, Cout)    bf16  pooled output pixels.
    """
    pb = o_ref.shape[1]
    # One large-M MXU matmul for all four pool-window positions.
    y = jnp.dot(x_ref[0], w_ref[...], preferred_element_type=jnp.float32)
    # max over the 4 conv pixels of each pool window (bias/ReLU commute w/ max)
    m = jnp.maximum(jnp.maximum(y[0 * pb:1 * pb], y[1 * pb:2 * pb]),
                    jnp.maximum(y[2 * pb:3 * pb], y[3 * pb:4 * pb]))
    o_ref[0] = jnp.maximum(m + b_ref[...], 0.0).astype(o_ref.dtype)


def _mlp_logsoftmax_kernel(x_ref, w1_ref, b1_ref, w2_ref, b2_ref,
                           w3_ref, b3_ref, o_ref):
    """relu(x@W1+b1) -> relu(@W2+b2) -> @W3+b3 -> log_softmax, all in VMEM."""
    h = jnp.dot(x_ref[...], w1_ref[...],
                preferred_element_type=jnp.float32) + b1_ref[...]
    h = jnp.maximum(h, 0.0).astype(jnp.bfloat16)
    h = jnp.dot(h, w2_ref[...],
                preferred_element_type=jnp.float32) + b2_ref[...]
    h = jnp.maximum(h, 0.0).astype(jnp.bfloat16)
    y = jnp.dot(h, w3_ref[...],
                preferred_element_type=jnp.float32) + b3_ref[...]
    m = jnp.max(y, axis=-1, keepdims=True)
    s = y - m
    lse = jnp.log(jnp.sum(jnp.exp(s), axis=-1, keepdims=True))
    o_ref[...] = s - lse


# ----------------------------------------------------------------------------
# Wrappers
# ----------------------------------------------------------------------------
def _im2col_pool_quadrants(x_nhwc):
    """(N,H,W,C) -> (N, 4, Ho*Wo, 9*C) patches for 3x3/pad-1 conv + 2x2 pool.

    Quadrant q=(a,b) holds, for every pooled pixel, the 3x3xC patch of the
    conv-output pixel (2j+a, 2x+b).  Feature order = (dy, dx, ci), matching
    w_hwio.reshape(9*Cin, Cout).
    """
    N, H, W, C = x_nhwc.shape
    Ho, Wo = H // 2, W // 2
    xp = jnp.pad(x_nhwc, ((0, 0), (1, 1), (1, 1), (0, 0)))
    quads = []
    for a in range(2):
        for b in range(2):
            taps = [xp[:, a + dy: a + dy + 2 * Ho - 1: 2,
                       b + dx: b + dx + 2 * Wo - 1: 2, :]
                    for dy in range(3) for dx in range(3)]
            q = jnp.concatenate(taps, axis=-1)           # (N, Ho, Wo, 9*C)
            quads.append(q.reshape(N, Ho * Wo, 9 * C))
    return jnp.stack(quads, axis=1)                      # (N, 4, Ho*Wo, 9*C)


def conv3x3_relu_pool(x_nhwc, w_mat, b):
    """Fused relu(conv3x3(x)) + max_pool2d(2).  Returns (N, H/2, W/2, Cout) bf16."""
    N, H, W, _ = x_nhwc.shape
    Ho, Wo = H // 2, W // 2
    P = Ho * Wo
    K, Cout = w_mat.shape

    patches = _im2col_pool_quadrants(x_nhwc)             # (N, 4, P, K) bf16
    Pp = ((P + 7) // 8) * 8                              # sublane-align pixels
    if Pp != P:
        patches = jnp.pad(patches, ((0, 0), (0, 0), (0, Pp - P), (0, 0)))

    # conv1 only: 2 pixel blocks per image (DMA/compute overlap + VMEM headroom)
    nb = 2 if (Pp >= 2048 and Pp % 16 == 0) else 1
    PB = Pp // nb
    # (N,4,Pp,K) -> (N,nb,4,PB,K) -> (N*nb, 4*PB, K): quadrant-major rows / block
    patches = patches.reshape(N, 4, nb, PB, K).transpose(0, 2, 1, 3, 4)
    patches = patches.reshape(N * nb, 4 * PB, K)

    flops = 2 * N * 4 * Pp * K * Cout
    bytes_acc = int(patches.size * 2 + w_mat.size * 2 + N * Pp * Cout * 2
                    + Cout * 4)

    out = pl.pallas_call(
        _conv_relu_pool_kernel,
        out_shape=jax.ShapeDtypeStruct((N * nb, PB, Cout), jnp.bfloat16),
        grid=(N * nb,),
        in_specs=[
            pl.BlockSpec((1, 4 * PB, K), lambda g: (g, 0, 0)),
            pl.BlockSpec((K, Cout), lambda g: (0, 0)),
            pl.BlockSpec((1, Cout), lambda g: (0, 0)),
        ],
        out_specs=pl.BlockSpec((1, PB, Cout), lambda g: (g, 0, 0)),
        compiler_params=pltpu.CompilerParams(
            dimension_semantics=("parallel",),
            vmem_limit_bytes=VMEM_LIMIT),
        cost_estimate=pl.CostEstimate(flops=flops, transcendentals=0,
                                      bytes_accessed=bytes_acc),
    )(patches, w_mat, b.reshape(1, -1))

    out = out.reshape(N, Pp, Cout)[:, :P, :]
    return out.reshape(N, Ho, Wo, Cout)


def mlp_logsoftmax(x, h1, h2, out_p):
    (w1, b1), (w2, b2), (w3, b3) = h1, h2, out_p
    B = x.shape[0]
    n_cls = w3.shape[1]
    flops = 2 * B * (w1.shape[0] * w1.shape[1] + w2.shape[0] * w2.shape[1]
                     + w3.shape[0] * w3.shape[1])
    bytes_acc = int(2 * (x.size + w1.size + w2.size + w3.size)
                    + 4 * (b1.size + b2.size + b3.size + B * n_cls))
    vspec = lambda: pl.BlockSpec(memory_space=pltpu.MemorySpace.VMEM)
    return pl.pallas_call(
        _mlp_logsoftmax_kernel,
        out_shape=jax.ShapeDtypeStruct((B, n_cls), jnp.float32),
        in_specs=[vspec() for _ in range(7)],
        out_specs=vspec(),
        compiler_params=pltpu.CompilerParams(vmem_limit_bytes=VMEM_LIMIT),
        cost_estimate=pl.CostEstimate(flops=flops, transcendentals=B * n_cls,
                                      bytes_accessed=bytes_acc),
    )(x, w1, b1.reshape(1, -1), w2, b2.reshape(1, -1), w3, b3.reshape(1, -1))


# ----------------------------------------------------------------------------
# Full forward (Pallas) and a precision-matched pure-JAX reference
# ----------------------------------------------------------------------------
@jax.jit
def classifier_forward(x_nchw, pparams):
    x = jnp.transpose(x_nchw, (0, 2, 3, 1)).astype(jnp.bfloat16)  # NCHW->NHWC
    for name in ("conv1", "conv2", "conv3", "conv4"):
        w, b = pparams[name]
        x = conv3x3_relu_pool(x, w, b)                   # fused conv+relu+pool
    N = x.shape[0]
    x = x.reshape(N, -1)                                 # (N, 1568), (h,w,c) order
    return mlp_logsoftmax(x, pparams["h1"], pparams["h2"], pparams["out"])


def reference_forward(x_nchw, params):
    """Pure-JAX reference using the same (bf16-exact) weights and the same
    bf16 activation-storage points as the Pallas path."""
    x = jnp.transpose(x_nchw, (0, 2, 3, 1))
    x = x.astype(jnp.bfloat16).astype(jnp.float32)
    for name in ("conv1", "conv2", "conv3", "conv4"):
        w, b = params[name]
        x = jax.lax.conv_general_dilated(
            x, w, window_strides=(1, 1), padding=[(1, 1), (1, 1)],
            dimension_numbers=("NHWC", "HWIO", "NHWC"))
        x = jax.nn.relu(x + b.reshape(1, 1, 1, -1))
        x = jax.lax.reduce_window(x, -jnp.inf, jax.lax.max,
                                  (1, 2, 2, 1), (1, 2, 2, 1), "VALID")
        x = x.astype(jnp.bfloat16).astype(jnp.float32)
    N = x.shape[0]
    x = jnp.transpose(x, (0, 3, 1, 2)).reshape(N, -1)    # torch flatten order
    w, b = params["h1"]
    x = jax.nn.relu(x @ w + b).astype(jnp.bfloat16).astype(jnp.float32)
    w, b = params["h2"]
    x = jax.nn.relu(x @ w + b).astype(jnp.bfloat16).astype(jnp.float32)
    w, b = params["out"]
    logits = x @ w + b
    return jax.nn.log_softmax(logits, axis=1)


# ----------------------------------------------------------------------------
# Deterministic Bayesian-by-backprop parameter sampling (setup / glue)
# ----------------------------------------------------------------------------
def _sample_bbb(key, shape, fan_in):
    """w = w_mu + softplus(w_rho) * eps, rounded to bf16-exact f32 values."""
    k_mu, k_eps = jax.random.split(key)
    scale = 1.0 / np.sqrt(max(fan_in, 1))
    mu = scale * jax.random.normal(k_mu, shape, jnp.float32)
    rho = jnp.full(shape, -5.0, jnp.float32)
    eps = jax.random.normal(k_eps, shape, jnp.float32)
    sigma = jnp.log1p(jnp.exp(rho))                      # softplus
    w = mu + sigma * eps
    return w.astype(jnp.bfloat16).astype(jnp.float32)    # shared rounding point


def init_params(key):
    params = {}
    conv_dims = [(IN_CH, 6), (6, 16), (16, 26), (26, 32)]
    for i, (ci, co) in enumerate(conv_dims, start=1):
        key, kw = jax.random.split(key)
        key, kb = jax.random.split(key)
        w_oihw = _sample_bbb(kw, (co, ci, 3, 3), fan_in=ci * 9)   # torch layout
        b = _sample_bbb(kb, (co,), fan_in=ci * 9)
        params[f"conv{i}"] = (jnp.transpose(w_oihw, (2, 3, 1, 0)), b)  # HWIO
    lin_dims = {"h1": (7 * 7 * 32, 120), "h2": (120, 84), "out": (84, OUT_CH)}
    for name, (fi, fo) in lin_dims.items():
        key, kw = jax.random.split(key)
        key, kb = jax.random.split(key)
        w_oi = _sample_bbb(kw, (fo, fi), fan_in=fi)               # torch layout
        b = _sample_bbb(kb, (fo,), fan_in=fi)
        params[name] = (jnp.transpose(w_oi), b)                   # (in, out)
    return params


def prepare_pallas_params(params):
    """One-time weight re-layout / bf16 cast for the Pallas kernels."""
    p = {}
    for name in ("conv1", "conv2", "conv3", "conv4"):
        w, b = params[name]                              # (3,3,Cin,Cout) HWIO
        p[name] = (w.reshape(-1, w.shape[-1]).astype(jnp.bfloat16), b)
    # h1 rows are in torch (C,H,W)-flatten order c*49+s; the Pallas conv stack
    # flattens in (H,W,C) order s*32+c -> permute rows once (removes the
    # NHWC->NCHW transpose before the linear layers).
    w1, b1 = params["h1"]
    j = np.arange(7 * 7 * 32)
    perm = (j % 32) * 49 + (j // 32)
    p["h1"] = (w1[perm].astype(jnp.bfloat16), b1)
    w2, b2 = params["h2"]
    p["h2"] = (w2.astype(jnp.bfloat16), b2)
    w3, b3 = params["out"]
    p["out"] = (w3.astype(jnp.bfloat16), b3)
    return p


# TODO(synk): log_prior / log_post / sample_elbo / posterior_samples are
# training-time scalar bookkeeping (not part of the forward pass) and are not
# implemented as Pallas kernels.

if __name__ == "__main__":
    key = jax.random.PRNGKey(0)
    key, k_x, k_p = jax.random.split(key, 3)
    x = jax.random.normal(k_x, (BATCH, IN_CH, SPATIAL, SPATIAL), jnp.float32)
    params = init_params(k_p)
    pparams = prepare_pallas_params(params)

    out = classifier_forward(x, pparams)
    out = jax.block_until_ready(out)

    # sanity: shape, finiteness, log-probs normalize, match reference
    assert out.shape == (BATCH, OUT_CH)
    assert bool(jnp.all(jnp.isfinite(out)))
    probs_sum = jnp.sum(jnp.exp(out), axis=1)
    assert bool(jnp.allclose(probs_sum, 1.0, atol=1e-3))
    ref = reference_forward(x, params)
    max_diff = float(jnp.max(jnp.abs(out - ref)))
    assert bool(jnp.allclose(out, ref, rtol=2e-2, atol=2e-2)), (
        f"mismatch vs reference: max abs diff {max_diff}")

    print("KERNEL_OK")
</pallas_src>

<mosaic_0001>
module attributes {stable_mosaic.version = 11 : i64} {
  func.func @_conv_relu_pool_kernel(%arg0: i32, %arg1: memref<1x6272x27xbf16, #tpu.memory_space<vmem>>, %arg2: memref<27x6xbf16, #tpu.memory_space<vmem>>, %arg3: memref<1x6xf32, #tpu.memory_space<vmem>>, %arg4: memref<1x1568x6xbf16, #tpu.memory_space<vmem>>) attributes {dimension_semantics = [#tpu.dimension_semantics<parallel>], iteration_bounds = array<i64: 4>, scalar_prefetch = 0 : i64, scratch_operands = 0 : i64, tpu.core_type = #tpu.core_type<tc>, window_params = [{transform_indices = @transform_0, window_bounds = array<i64: 1, 6272, 27>}, {pipeline_mode = #tpu.pipeline_mode<synchronous>, transform_indices = @transform_1, window_bounds = array<i64: 27, 6>}, {pipeline_mode = #tpu.pipeline_mode<synchronous>, transform_indices = @transform_2, window_bounds = array<i64: 1, 6>}, {transform_indices = @transform_3, window_bounds = array<i64: 1, 1568, 6>}]} {
    %c0 = arith.constant 0 : index
    %c0_0 = arith.constant 0 : index
    %c0_1 = arith.constant 0 : index
    %0 = vector.load %arg1[%c0, %c0_0, %c0_1] : memref<1x6272x27xbf16, #tpu.memory_space<vmem>>, vector<1x6272x27xbf16>
    %1 = vector.shape_cast %0 : vector<1x6272x27xbf16> to vector<6272x27xbf16>
    %c0_2 = arith.constant 0 : index
    %c0_3 = arith.constant 0 : index
    %2 = vector.load %arg2[%c0_2, %c0_3] : memref<27x6xbf16, #tpu.memory_space<vmem>>, vector<27x6xbf16>
    %cst = arith.constant dense<0.000000e+00> : vector<6272x6xf32>
    %3 = tpu.matmul %1, %2, %cst {dimension_numbers = #tpu.dot_dimension_numbers<[1], [0], [0], [1], [0, 0, 1, 1], [], []>} : vector<6272x27xbf16>, vector<27x6xbf16>, vector<6272x6xf32> -> vector<6272x6xf32>
    %4 = vector.extract_strided_slice %3 {offsets = [0, 0], sizes = [1568, 6], strides = [1, 1]} : vector<6272x6xf32> to vector<1568x6xf32>
    %5 = vector.extract_strided_slice %3 {offsets = [1568, 0], sizes = [1568, 6], strides = [1, 1]} : vector<6272x6xf32> to vector<1568x6xf32>
    %6 = arith.maximumf %4, %5 : vector<1568x6xf32>
    %7 = vector.extract_strided_slice %3 {offsets = [3136, 0], sizes = [1568, 6], strides = [1, 1]} : vector<6272x6xf32> to vector<1568x6xf32>
    %8 = vector.extract_strided_slice %3 {offsets = [4704, 0], sizes = [1568, 6], strides = [1, 1]} : vector<6272x6xf32> to vector<1568x6xf32>
    %9 = arith.maximumf %7, %8 : vector<1568x6xf32>
    %10 = arith.maximumf %6, %9 : vector<1568x6xf32>
    %c0_4 = arith.constant 0 : index
    %c0_5 = arith.constant 0 : index
    %11 = vector.load %arg3[%c0_4, %c0_5] : memref<1x6xf32, #tpu.memory_space<vmem>>, vector<1x6xf32>
    %12 = vector.broadcast %11 : vector<1x6xf32> to vector<1568x6xf32>
    %13 = arith.addf %10, %12 : vector<1568x6xf32>
    %cst_6 = arith.constant 0.000000e+00 : f32
    %14 = vector.broadcast %cst_6 : f32 to vector<1568x6xf32>
    %15 = arith.maximumf %13, %14 : vector<1568x6xf32>
    %16 = arith.truncf %15 : vector<1568x6xf32> to vector<1568x6xbf16>
    %c0_7 = arith.constant 0 : index
    %c0_8 = arith.constant 0 : index
    %c0_9 = arith.constant 0 : index
    %17 = vector.load %arg4[%c0_7, %c0_8, %c0_9] : memref<1x1568x6xbf16, #tpu.memory_space<vmem>>, vector<1x1568x6xbf16>
    %18 = vector.shape_cast %17 : vector<1x1568x6xbf16> to vector<1568x6xbf16>
    %19 = vector.shape_cast %16 : vector<1568x6xbf16> to vector<1x1568x6xbf16>
    tpu.vector_store %arg4[%c0_7, %c0_8, %c0_9], %19 {strides = array<i32>} : memref<1x1568x6xbf16, #tpu.memory_space<vmem>>, vector<1x1568x6xbf16>,
    return
  }
  func.func @transform_0(%arg0: i32) -> (i32, i32, i32) {
    %c0_i32 = arith.constant 0 : i32
    %c0_i32_0 = arith.constant 0 : i32
    %c0_i32_1 = arith.constant 0 : i32
    return %arg0, %c0_i32, %c0_i32_0 : i32, i32, i32
  }
  func.func @transform_1(%arg0: i32) -> (i32, i32) {
    %c0_i32 = arith.constant 0 : i32
    %c0_i32_0 = arith.constant 0 : i32
    %c0_i32_1 = arith.constant 0 : i32
    return %c0_i32, %c0_i32_0 : i32, i32
  }
  func.func @transform_2(%arg0: i32) -> (i32, i32) {
    %c0_i32 = arith.constant 0 : i32
    %c0_i32_0 = arith.constant 0 : i32
    %c0_i32_1 = arith.constant 0 : i32
    return %c0_i32, %c0_i32_0 : i32, i32
  }
  func.func @transform_3(%arg0: i32) -> (i32, i32, i32) {
    %c0_i32 = arith.constant 0 : i32
    %c0_i32_0 = arith.constant 0 : i32
    %c0_i32_1 = arith.constant 0 : i32
    return %arg0, %c0_i32, %c0_i32_0 : i32, i32, i32
  }
}

module attributes {stable_mosaic.version = 11 : i64} {
  func.func @_conv_relu_pool_kernel(%arg0: i32, %arg1: memref<1x3136x54xbf16, #tpu.memory_space<vmem>>, %arg2: memref<54x16xbf16, #tpu.memory_space<vmem>>, %arg3: memref<1x16xf32, #tpu.memory_space<vmem>>, %arg4: memref<1x784x16xbf16, #tpu.memory_space<vmem>>) attributes {dimension_semantics = [#tpu.dimension_semantics<parallel>], iteration_bounds = array<i64: 2>, scalar_prefetch = 0 : i64, scratch_operands = 0 : i64, tpu.core_type = #tpu.core_type<tc>, window_params = [{transform_indices = @transform_0, window_bounds = array<i64: 1, 3136, 54>}, {pipeline_mode = #tpu.pipeline_mode<synchronous>, transform_indices = @transform_1, window_bounds = array<i64: 54, 16>}, {pipeline_mode = #tpu.pipeline_mode<synchronous>, transform_indices = @transform_2, window_bounds = array<i64: 1, 16>}, {transform_indices = @transform_3, window_bounds = array<i64: 1, 784, 16>}]} {
    %c0 = arith.constant 0 : index
    %c0_0 = arith.constant 0 : index
    %c0_1 = arith.constant 0 : index
    %0 = vector.load %arg1[%c0, %c0_0, %c0_1] : memref<1x3136x54xbf16, #tpu.memory_space<vmem>>, vector<1x3136x54xbf16>
    %1 = vector.shape_cast %0 : vector<1x3136x54xbf16> to vector<3136x54xbf16>
    %c0_2 = arith.constant 0 : index
    %c0_3 = arith.constant 0 : index
    %2 = vector.load %arg2[%c0_2, %c0_3] : memref<54x16xbf16, #tpu.memory_space<vmem>>, vector<54x16xbf16>
    %cst = arith.constant dense<0.000000e+00> : vector<3136x16xf32>
    %3 = tpu.matmul %1, %2, %cst {dimension_numbers = #tpu.dot_dimension_numbers<[1], [0], [0], [1], [0, 0, 1, 1], [], []>} : vector<3136x54xbf16>, vector<54x16xbf16>, vector<3136x16xf32> -> vector<3136x16xf32>
    %4 = vector.extract_strided_slice %3 {offsets = [0, 0], sizes = [784, 16], strides = [1, 1]} : vector<3136x16xf32> to vector<784x16xf32>
    %5 = vector.extract_strided_slice %3 {offsets = [784, 0], sizes = [784, 16], strides = [1, 1]} : vector<3136x16xf32> to vector<784x16xf32>
    %6 = arith.maximumf %4, %5 : vector<784x16xf32>
    %7 = vector.extract_strided_slice %3 {offsets = [1568, 0], sizes = [784, 16], strides = [1, 1]} : vector<3136x16xf32> to vector<784x16xf32>
    %8 = vector.extract_strided_slice %3 {offsets = [2352, 0], sizes = [784, 16], strides = [1, 1]} : vector<3136x16xf32> to vector<784x16xf32>
    %9 = arith.maximumf %7, %8 : vector<784x16xf32>
    %10 = arith.maximumf %6, %9 : vector<784x16xf32>
    %c0_4 = arith.constant 0 : index
    %c0_5 = arith.constant 0 : index
    %11 = vector.load %arg3[%c0_4, %c0_5] : memref<1x16xf32, #tpu.memory_space<vmem>>, vector<1x16xf32>
    %12 = vector.broadcast %11 : vector<1x16xf32> to vector<784x16xf32>
    %13 = arith.addf %10, %12 : vector<784x16xf32>
    %cst_6 = arith.constant 0.000000e+00 : f32
    %14 = vector.broadcast %cst_6 : f32 to vector<784x16xf32>
    %15 = arith.maximumf %13, %14 : vector<784x16xf32>
    %16 = arith.truncf %15 : vector<784x16xf32> to vector<784x16xbf16>
    %c0_7 = arith.constant 0 : index
    %c0_8 = arith.constant 0 : index
    %c0_9 = arith.constant 0 : index
    %17 = vector.load %arg4[%c0_7, %c0_8, %c0_9] : memref<1x784x16xbf16, #tpu.memory_space<vmem>>, vector<1x784x16xbf16>
    %18 = vector.shape_cast %17 : vector<1x784x16xbf16> to vector<784x16xbf16>
    %19 = vector.shape_cast %16 : vector<784x16xbf16> to vector<1x784x16xbf16>
    tpu.vector_store %arg4[%c0_7, %c0_8, %c0_9], %19 {strides = array<i32>} : memref<1x784x16xbf16, #tpu.memory_space<vmem>>, vector<1x784x16xbf16>,
    return
  }
  func.func @transform_0(%arg0: i32) -> (i32, i32, i32) {
    %c0_i32 = arith.constant 0 : i32
    %c0_i32_0 = arith.constant 0 : i32
    %c0_i32_1 = arith.constant 0 : i32
    return %arg0, %c0_i32, %c0_i32_0 : i32, i32, i32
  }
  func.func @transform_1(%arg0: i32) -> (i32, i32) {
    %c0_i32 = arith.constant 0 : i32
    %c0_i32_0 = arith.constant 0 : i32
    %c0_i32_1 = arith.constant 0 : i32
    return %c0_i32, %c0_i32_0 : i32, i32
  }
  func.func @transform_2(%arg0: i32) -> (i32, i32) {
    %c0_i32 = arith.constant 0 : i32
    %c0_i32_0 = arith.constant 0 : i32
    %c0_i32_1 = arith.constant 0 : i32
    return %c0_i32, %c0_i32_0 : i32, i32
  }
  func.func @transform_3(%arg0: i32) -> (i32, i32, i32) {
    %c0_i32 = arith.constant 0 : i32
    %c0_i32_0 = arith.constant 0 : i32
    %c0_i32_1 = arith.constant 0 : i32
    return %arg0, %c0_i32, %c0_i32_0 : i32, i32, i32
  }
}

module attributes {stable_mosaic.version = 11 : i64} {
  func.func @_conv_relu_pool_kernel(%arg0: i32, %arg1: memref<1x800x144xbf16, #tpu.memory_space<vmem>>, %arg2: memref<144x26xbf16, #tpu.memory_space<vmem>>, %arg3: memref<1x26xf32, #tpu.memory_space<vmem>>, %arg4: memref<1x200x26xbf16, #tpu.memory_space<vmem>>) attributes {dimension_semantics = [#tpu.dimension_semantics<parallel>], iteration_bounds = array<i64: 2>, scalar_prefetch = 0 : i64, scratch_operands = 0 : i64, tpu.core_type = #tpu.core_type<tc>, window_params = [{transform_indices = @transform_0, window_bounds = array<i64: 1, 800, 144>}, {pipeline_mode = #tpu.pipeline_mode<synchronous>, transform_indices = @transform_1, window_bounds = array<i64: 144, 26>}, {pipeline_mode = #tpu.pipeline_mode<synchronous>, transform_indices = @transform_2, window_bounds = array<i64: 1, 26>}, {transform_indices = @transform_3, window_bounds = array<i64: 1, 200, 26>}]} {
    %c0 = arith.constant 0 : index
    %c0_0 = arith.constant 0 : index
    %c0_1 = arith.constant 0 : index
    %0 = vector.load %arg1[%c0, %c0_0, %c0_1] : memref<1x800x144xbf16, #tpu.memory_space<vmem>>, vector<1x800x144xbf16>
    %1 = vector.shape_cast %0 : vector<1x800x144xbf16> to vector<800x144xbf16>
    %c0_2 = arith.constant 0 : index
    %c0_3 = arith.constant 0 : index
    %2 = vector.load %arg2[%c0_2, %c0_3] : memref<144x26xbf16, #tpu.memory_space<vmem>>, vector<144x26xbf16>
    %cst = arith.constant dense<0.000000e+00> : vector<800x26xf32>
    %3 = tpu.matmul %1, %2, %cst {dimension_numbers = #tpu.dot_dimension_numbers<[1], [0], [0], [1], [0, 0, 1, 1], [], []>} : vector<800x144xbf16>, vector<144x26xbf16>, vector<800x26xf32> -> vector<800x26xf32>
    %4 = vector.extract_strided_slice %3 {offsets = [0, 0], sizes = [200, 26], strides = [1, 1]} : vector<800x26xf32> to vector<200x26xf32>
    %5 = vector.extract_strided_slice %3 {offsets = [200, 0], sizes = [200, 26], strides = [1, 1]} : vector<800x26xf32> to vector<200x26xf32>
    %6 = arith.maximumf %4, %5 : vector<200x26xf32>
    %7 = vector.extract_strided_slice %3 {offsets = [400, 0], sizes = [200, 26], strides = [1, 1]} : vector<800x26xf32> to vector<200x26xf32>
    %8 = vector.extract_strided_slice %3 {offsets = [600, 0], sizes = [200, 26], strides = [1, 1]} : vector<800x26xf32> to vector<200x26xf32>
    %9 = arith.maximumf %7, %8 : vector<200x26xf32>
    %10 = arith.maximumf %6, %9 : vector<200x26xf32>
    %c0_4 = arith.constant 0 : index
    %c0_5 = arith.constant 0 : index
    %11 = vector.load %arg3[%c0_4, %c0_5] : memref<1x26xf32, #tpu.memory_space<vmem>>, vector<1x26xf32>
    %12 = vector.broadcast %11 : vector<1x26xf32> to vector<200x26xf32>
    %13 = arith.addf %10, %12 : vector<200x26xf32>
    %cst_6 = arith.constant 0.000000e+00 : f32
    %14 = vector.broadcast %cst_6 : f32 to vector<200x26xf32>
    %15 = arith.maximumf %13, %14 : vector<200x26xf32>
    %16 = arith.truncf %15 : vector<200x26xf32> to vector<200x26xbf16>
    %c0_7 = arith.constant 0 : index
    %c0_8 = arith.constant 0 : index
    %c0_9 = arith.constant 0 : index
    %17 = vector.load %arg4[%c0_7, %c0_8, %c0_9] : memref<1x200x26xbf16, #tpu.memory_space<vmem>>, vector<1x200x26xbf16>
    %18 = vector.shape_cast %17 : vector<1x200x26xbf16> to vector<200x26xbf16>
    %19 = vector.shape_cast %16 : vector<200x26xbf16> to vector<1x200x26xbf16>
    tpu.vector_store %arg4[%c0_7, %c0_8, %c0_9], %19 {strides = array<i32>} : memref<1x200x26xbf16, #tpu.memory_space<vmem>>, vector<1x200x26xbf16>,
    return
  }
  func.func @transform_0(%arg0: i32) -> (i32, i32, i32) {
    %c0_i32 = arith.constant 0 : i32
    %c0_i32_0 = arith.constant 0 : i32
    %c0_i32_1 = arith.constant 0 : i32
    return %arg0, %c0_i32, %c0_i32_0 : i32, i32, i32
  }
  func.func @transform_1(%arg0: i32) -> (i32, i32) {
    %c0_i32 = arith.constant 0 : i32
    %c0_i32_0 = arith.constant 0 : i32
    %c0_i32_1 = arith.constant 0 : i32
    return %c0_i32, %c0_i32_0 : i32, i32
  }
  func.func @transform_2(%arg0: i32) -> (i32, i32) {
    %c0_i32 = arith.constant 0 : i32
    %c0_i32_0 = arith.constant 0 : i32
    %c0_i32_1 = arith.constant 0 : i32
    return %c0_i32, %c0_i32_0 : i32, i32
  }
  func.func @transform_3(%arg0: i32) -> (i32, i32, i32) {
    %c0_i32 = arith.constant 0 : i32
    %c0_i32_0 = arith.constant 0 : i32
    %c0_i32_1 = arith.constant 0 : i32
    return %arg0, %c0_i32, %c0_i32_0 : i32, i32, i32
  }
}

module attributes {stable_mosaic.version = 11 : i64} {
  func.func @_conv_relu_pool_kernel(%arg0: i32, %arg1: memref<1x224x234xbf16, #tpu.memory_space<vmem>>, %arg2: memref<234x32xbf16, #tpu.memory_space<vmem>>, %arg3: memref<1x32xf32, #tpu.memory_space<vmem>>, %arg4: memref<1x56x32xbf16, #tpu.memory_space<vmem>>) attributes {dimension_semantics = [#tpu.dimension_semantics<parallel>], iteration_bounds = array<i64: 2>, scalar_prefetch = 0 : i64, scratch_operands = 0 : i64, tpu.core_type = #tpu.core_type<tc>, window_params = [{transform_indices = @transform_0, window_bounds = array<i64: 1, 224, 234>}, {pipeline_mode = #tpu.pipeline_mode<synchronous>, transform_indices = @transform_1, window_bounds = array<i64: 234, 32>}, {pipeline_mode = #tpu.pipeline_mode<synchronous>, transform_indices = @transform_2, window_bounds = array<i64: 1, 32>}, {transform_indices = @transform_3, window_bounds = array<i64: 1, 56, 32>}]} {
    %c0 = arith.constant 0 : index
    %c0_0 = arith.constant 0 : index
    %c0_1 = arith.constant 0 : index
    %0 = vector.load %arg1[%c0, %c0_0, %c0_1] : memref<1x224x234xbf16, #tpu.memory_space<vmem>>, vector<1x224x234xbf16>
    %1 = vector.shape_cast %0 : vector<1x224x234xbf16> to vector<224x234xbf16>
    %c0_2 = arith.constant 0 : index
    %c0_3 = arith.constant 0 : index
    %2 = vector.load %arg2[%c0_2, %c0_3] : memref<234x32xbf16, #tpu.memory_space<vmem>>, vector<234x32xbf16>
    %cst = arith.constant dense<0.000000e+00> : vector<224x32xf32>
    %3 = tpu.matmul %1, %2, %cst {dimension_numbers = #tpu.dot_dimension_numbers<[1], [0], [0], [1], [0, 0, 1, 1], [], []>} : vector<224x234xbf16>, vector<234x32xbf16>, vector<224x32xf32> -> vector<224x32xf32>
    %4 = vector.extract_strided_slice %3 {offsets = [0, 0], sizes = [56, 32], strides = [1, 1]} : vector<224x32xf32> to vector<56x32xf32>
    %5 = vector.extract_strided_slice %3 {offsets = [56, 0], sizes = [56, 32], strides = [1, 1]} : vector<224x32xf32> to vector<56x32xf32>
    %6 = arith.maximumf %4, %5 : vector<56x32xf32>
    %7 = vector.extract_strided_slice %3 {offsets = [112, 0], sizes = [56, 32], strides = [1, 1]} : vector<224x32xf32> to vector<56x32xf32>
    %8 = vector.extract_strided_slice %3 {offsets = [168, 0], sizes = [56, 32], strides = [1, 1]} : vector<224x32xf32> to vector<56x32xf32>
    %9 = arith.maximumf %7, %8 : vector<56x32xf32>
    %10 = arith.maximumf %6, %9 : vector<56x32xf32>
    %c0_4 = arith.constant 0 : index
    %c0_5 = arith.constant 0 : index
    %11 = vector.load %arg3[%c0_4, %c0_5] : memref<1x32xf32, #tpu.memory_space<vmem>>, vector<1x32xf32>
    %12 = vector.broadcast %11 : vector<1x32xf32> to vector<56x32xf32>
    %13 = arith.addf %10, %12 : vector<56x32xf32>
    %cst_6 = arith.constant 0.000000e+00 : f32
    %14 = vector.broadcast %cst_6 : f32 to vector<56x32xf32>
    %15 = arith.maximumf %13, %14 : vector<56x32xf32>
    %16 = arith.truncf %15 : vector<56x32xf32> to vector<56x32xbf16>
    %c0_7 = arith.constant 0 : index
    %c0_8 = arith.constant 0 : index
    %c0_9 = arith.constant 0 : index
    %17 = vector.load %arg4[%c0_7, %c0_8, %c0_9] : memref<1x56x32xbf16, #tpu.memory_space<vmem>>, vector<1x56x32xbf16>
    %18 = vector.shape_cast %17 : vector<1x56x32xbf16> to vector<56x32xbf16>
    %19 = vector.shape_cast %16 : vector<56x32xbf16> to vector<1x56x32xbf16>
    tpu.vector_store %arg4[%c0_7, %c0_8, %c0_9], %19 {strides = array<i32>} : memref<1x56x32xbf16, #tpu.memory_space<vmem>>, vector<1x56x32xbf16>,
    return
  }
  func.func @transform_0(%arg0: i32) -> (i32, i32, i32) {
    %c0_i32 = arith.constant 0 : i32
    %c0_i32_0 = arith.constant 0 : i32
    %c0_i32_1 = arith.constant 0 : i32
    return %arg0, %c0_i32, %c0_i32_0 : i32, i32, i32
  }
  func.func @transform_1(%arg0: i32) -> (i32, i32) {
    %c0_i32 = arith.constant 0 : i32
    %c0_i32_0 = arith.constant 0 : i32
    %c0_i32_1 = arith.constant 0 : i32
    return %c0_i32, %c0_i32_0 : i32, i32
  }
  func.func @transform_2(%arg0: i32) -> (i32, i32) {
    %c0_i32 = arith.constant 0 : i32
    %c0_i32_0 = arith.constant 0 : i32
    %c0_i32_1 = arith.constant 0 : i32
    return %c0_i32, %c0_i32_0 : i32, i32
  }
  func.func @transform_3(%arg0: i32) -> (i32, i32, i32) {
    %c0_i32 = arith.constant 0 : i32
    %c0_i32_0 = arith.constant 0 : i32
    %c0_i32_1 = arith.constant 0 : i32
    return %arg0, %c0_i32, %c0_i32_0 : i32, i32, i32
  }
}

module attributes {stable_mosaic.version = 11 : i64} {
  func.func @_mlp_logsoftmax_kernel(%arg0: memref<2x1568xbf16, #tpu.memory_space<vmem>>, %arg1: memref<1568x120xbf16, #tpu.memory_space<vmem>>, %arg2: memref<1x120xf32, #tpu.memory_space<vmem>>, %arg3: memref<120x84xbf16, #tpu.memory_space<vmem>>, %arg4: memref<1x84xf32, #tpu.memory_space<vmem>>, %arg5: memref<84x10xbf16, #tpu.memory_space<vmem>>, %arg6: memref<1x10xf32, #tpu.memory_space<vmem>>, %arg7: memref<2x10xf32, #tpu.memory_space<vmem>>) attributes {dimension_semantics = [], scalar_prefetch = 0 : i64, scratch_operands = 0 : i64, tpu.core_type = #tpu.core_type<tc>} {
    %c0 = arith.constant 0 : index
    %c0_0 = arith.constant 0 : index
    %0 = vector.load %arg0[%c0, %c0_0] : memref<2x1568xbf16, #tpu.memory_space<vmem>>, vector<2x1568xbf16>
    %c0_1 = arith.constant 0 : index
    %c0_2 = arith.constant 0 : index
    %1 = vector.load %arg1[%c0_1, %c0_2] : memref<1568x120xbf16, #tpu.memory_space<vmem>>, vector<1568x120xbf16>
    %cst = arith.constant dense<0.000000e+00> : vector<2x120xf32>
    %2 = tpu.matmul %0, %1, %cst {dimension_numbers = #tpu.dot_dimension_numbers<[1], [0], [0], [1], [0, 0, 1, 1], [], []>} : vector<2x1568xbf16>, vector<1568x120xbf16>, vector<2x120xf32> -> vector<2x120xf32>
    %c0_3 = arith.constant 0 : index
    %c0_4 = arith.constant 0 : index
    %3 = vector.load %arg2[%c0_3, %c0_4] : memref<1x120xf32, #tpu.memory_space<vmem>>, vector<1x120xf32>
    %4 = vector.broadcast %3 : vector<1x120xf32> to vector<2x120xf32>
    %5 = arith.addf %2, %4 : vector<2x120xf32>
    %cst_5 = arith.constant 0.000000e+00 : f32
    %6 = vector.broadcast %cst_5 : f32 to vector<2x120xf32>
    %7 = arith.maximumf %5, %6 : vector<2x120xf32>
    %8 = arith.truncf %7 : vector<2x120xf32> to vector<2x120xbf16>
    %c0_6 = arith.constant 0 : index
    %c0_7 = arith.constant 0 : index
    %9 = vector.load %arg3[%c0_6, %c0_7] : memref<120x84xbf16, #tpu.memory_space<vmem>>, vector<120x84xbf16>
    %cst_8 = arith.constant dense<0.000000e+00> : vector<2x84xf32>
    %10 = tpu.matmul %8, %9, %cst_8 {dimension_numbers = #tpu.dot_dimension_numbers<[1], [0], [0], [1], [0, 0, 1, 1], [], []>} : vector<2x120xbf16>, vector<120x84xbf16>, vector<2x84xf32> -> vector<2x84xf32>
    %c0_9 = arith.constant 0 : index
    %c0_10 = arith.constant 0 : index
    %11 = vector.load %arg4[%c0_9, %c0_10] : memref<1x84xf32, #tpu.memory_space<vmem>>, vector<1x84xf32>
    %12 = vector.broadcast %11 : vector<1x84xf32> to vector<2x84xf32>
    %13 = arith.addf %10, %12 : vector<2x84xf32>
    %cst_11 = arith.constant 0.000000e+00 : f32
    %14 = vector.broadcast %cst_11 : f32 to vector<2x84xf32>
    %15 = arith.maximumf %13, %14 : vector<2x84xf32>
    %16 = arith.truncf %15 : vector<2x84xf32> to vector<2x84xbf16>
    %c0_12 = arith.constant 0 : index
    %c0_13 = arith.constant 0 : index
    %17 = vector.load %arg5[%c0_12, %c0_13] : memref<84x10xbf16, #tpu.memory_space<vmem>>, vector<84x10xbf16>
    %cst_14 = arith.constant dense<0.000000e+00> : vector<2x10xf32>
    %18 = tpu.matmul %16, %17, %cst_14 {dimension_numbers = #tpu.dot_dimension_numbers<[1], [0], [0], [1], [0, 0, 1, 1], [], []>} : vector<2x84xbf16>, vector<84x10xbf16>, vector<2x10xf32> -> vector<2x10xf32>
    %c0_15 = arith.constant 0 : index
    %c0_16 = arith.constant 0 : index
    %19 = vector.load %arg6[%c0_15, %c0_16] : memref<1x10xf32, #tpu.memory_space<vmem>>, vector<1x10xf32>
    %20 = vector.broadcast %19 : vector<1x10xf32> to vector<2x10xf32>
    %21 = arith.addf %18, %20 : vector<2x10xf32>
    %cst_17 = arith.constant dense<0xFF800000> : vector<2xf32>
    %22 = vector.multi_reduction <maximumf>, %21, %cst_17 [1] : vector<2x10xf32> to vector<2xf32>
    %23 = vector.shape_cast %22 : vector<2xf32> to vector<2x1xf32>
    %24 = vector.broadcast %23 : vector<2x1xf32> to vector<2x10xf32>
    %25 = arith.subf %21, %24 : vector<2x10xf32>
    %26 = math.exp %25 : vector<2x10xf32>
    %cst_18 = arith.constant dense<0.000000e+00> : vector<2xf32>
    %27 = vector.multi_reduction <add>, %26, %cst_18 [1] : vector<2x10xf32> to vector<2xf32>
    %28 = vector.shape_cast %27 : vector<2xf32> to vector<2x1xf32>
    %29 = math.log %28 : vector<2x1xf32>
    %30 = vector.broadcast %29 : vector<2x1xf32> to vector<2x10xf32>
    %31 = arith.subf %25, %30 : vector<2x10xf32>
    %c0_19 = arith.constant 0 : index
    %c0_20 = arith.constant 0 : index
    %32 = vector.load %arg7[%c0_19, %c0_20] : memref<2x10xf32, #tpu.memory_space<vmem>>, vector<2x10xf32>
    tpu.vector_store %arg7[%c0_19, %c0_20], %31 {strides = array<i32>} : memref<2x10xf32, #tpu.memory_space<vmem>>, vector<2x10xf32>,
    return
  }
}

</mosaic_0001>

<bundles_post_ra>
// kernel: classifier_forward.5
= control target key start
LH: loop header
LB: loop body
LE: loop exit
PB: predicated region body
PF: predicated region fallthrough
CT: control target
= control target key end

     0   :  { %s12118_s12 = smov 0   ;;  %s14717_s0 = inlined_call_operand.vmem [shape: bf16[4,6272,27], index: 0, kind: input, shape index: {}]   ;;  %s14718_s1 = inlined_call_operand.vmem [shape: bf16[27,6], index: 1, kind: input, shape index: {}]   ;;  %s14719_s2 = inlined_call_operand.vmem [shape: f32[1,6], index: 2, kind: input, shape index: {}]   ;;  %s14720_s3 = inlined_call_operand.vmem [shape: bf16[4,1568,6], index: 3, kind: output, shape index: {}]  }
   0x1 LB: > { %s9307_s13 = sadd.s32 4294967295, %s12095_s12   ;;  %p9311_p0 = scmp.ge.s32.totalorder %s12095_s12, 1  ;;  %s12095_s12 = sphi %s12118_s12, %s13_s12  }
   0x2   : > { %p137_p1 = scmp.lt.s32.totalorder %s12095_s12, 5 }
   0x4   : > { %p138_p2 = pnand %p9311_p0, %p137_p1 }
   0x6   : > { %141 = sbr.rel (%p138_p2) target bundleno = 1025 (0x401), region = 32 }
   0xd   : > { %v11692_v0 = vld [vmem:[%s14718_s1] sm:$0xff]   ;;  %vm4108_vm0 = vcmask 1044480   ;;  %v11693_v1 = vld [vmem:[%s14718_s1 + $0x8] sm:$0x3f]   ;;  %vm4109_vm1 = vcmask 1045504   ;;  %p161_p3 = scmp.lt.s32.totalorder %s9307_s13, 3 }
   0xe   : > { %10889 = vmatprep.subr.bf16.mxu0 %v11692_v0  ;;  %11677 = vmatprep.subr.bf16.mxu1 %v11692_v0  ;;  %v12097_v2 = vmov 65535   ;;  %vm2931_vm2 = vcmask 220160   ;;  %vm9055_vm3 = vcmask 44032  }
   0xf   : > { %10890 = vmatpush3.bf16.msra.mxu0 %v11692_v0  ;;  %11679 = vmatpush3.bf16.msra.mxu1 %v11692_v0  ;;  %v4110_v3 = vsel %vm4108_vm0, 4294967295, %v12097_v2  ;;  %s15414_s13 = smov (!%p161_p3, %s9307_s13), 3 }
  0x10   : > { %v4111_v4 = vsel %vm4109_vm1, %v4110_v3, 0  ;;  %s11681_s18 = smul.u32 3136, %s15414_s13 }
  0x11   : > { %v4113_v5 = vand.u32 %v11693_v1, %v4111_v4  ;;  %s11682_s24 = smul.u32 784, %s15414_s13 }
  0x12   : > { %s12138_s21 = scalar_lea.vmem %s14717_s0, %s11681_s18 }
  0x13   : > { %10891 = vmatprep.subr.bf16.mxu0 %v4113_v5  ;;  %11678 = vmatprep.subr.bf16.mxu1 %v4113_v5  ;;  %v11694_v6 = vld [vmem:[%s12138_s21] sm:$0xff]   ;;  %v11696_v8 = vld [vmem:[%s12138_s21 + $0x8] sm:$0xff]   ;;  %v11698_v10 = vld [vmem:[%s12138_s21 + $0x10] sm:$0xff]   ;;  %s13564_s27 = scalar_lea.vmem %s14720_s3, %s11682_s24 }
  0x14   : > { %10892 = vmatpush3.bf16.msra.mxu0 %v4113_v5  ;;  %11680 = vmatpush3.bf16.msra.mxu1 %v4113_v5  ;;  %v11695_v7 = vld [vmem:[%s12138_s21 + $0x620] sm:$0xff]   ;;  %v11697_v9 = vld [vmem:[%s12138_s21 + $0x628] sm:$0xff]   ;;  %v11699_v11 = vld [vmem:[%s12138_s21 + $0x630] sm:$0xff]  }
  0x15   : > { %10893 = vmatprep.mubr.msk.bf16.mxu0 %vm2931_vm2, %v11694_v6  ;;  %11285 = vmatprep.mubr.msk.bf16.mxu1 %vm2931_vm2, %v11695_v7  ;;  %v11700_v12 = vld [vmem:[%s12138_s21 + $0x18] sm:$0xff]   ;;  %v11702_v14 = vld [vmem:[%s12138_s21 + $0x20] sm:$0xff]   ;;  %v11704_v16 = vld [vmem:[%s12138_s21 + $0x28] sm:$0xff]  }
  0x16   : > { %v11701_v13 = vld [vmem:[%s12138_s21 + $0x638] sm:$0xff]   ;;  %v11703_v15 = vld [vmem:[%s12138_s21 + $0x640] sm:$0xff]   ;;  %v11705_v17 = vld [vmem:[%s12138_s21 + $0x648] sm:$0xff]  }
  0x17   : > { %10894 = vmatmul.mubr.msk.bf16.vlgmr.msra.gmra.mrb[0].mxu0 %vm2931_vm2, %v11696_v8  ;;  %11286 = vmatmul.mubr.msk.bf16.vlgmr.msra.gmra.mrb[0].mxu1 %vm2931_vm2, %v11697_v9  ;;  %v11706_v18 = vld [vmem:[%s12138_s21 + $0x30] sm:$0xff]   ;;  %v11708_v20 = vld [vmem:[%s12138_s21 + $0x38] sm:$0xff]   ;;  %v11710_v22 = vld [vmem:[%s12138_s21 + $0x40] sm:$0xff]  }
  0x18   : > { %10897 = vmatprep.mubr.msk.bf16.mxu0 %vm2931_vm2, %v11698_v10  ;;  %11289 = vmatprep.mubr.msk.bf16.mxu1 %vm2931_vm2, %v11699_v11  ;;  %v11707_v19 = vld [vmem:[%s12138_s21 + $0x650] sm:$0xff]   ;;  %v11709_v21 = vld [vmem:[%s12138_s21 + $0x658] sm:$0xff]   ;;  %v11711_v23 = vld [vmem:[%s12138_s21 + $0x660] sm:$0xff]  }
  0x19   : > { %v11712_v24 = vld [vmem:[%s12138_s21 + $0x48] sm:$0xff]   ;;  %v11714_v26 = vld [vmem:[%s12138_s21 + $0x50] sm:$0xff]   ;;  %v11716_v28 = vld [vmem:[%s12138_s21 + $0x58] sm:$0xff]  }
  0x1a   : > { %v11713_v25 = vld [vmem:[%s12138_s21 + $0x668] sm:$0xff]   ;;  %v11715_v27 = vld [vmem:[%s12138_s21 + $0x670] sm:$0xff]   ;;  %v11717_v29 = vld [vmem:[%s12138_s21 + $0x678] sm:$0xff]  }
  0x1b   : > { %v11718_v30 = vld [vmem:[%s12138_s21 + $0x60] sm:$0xff]   ;;  %v11720_v32 = vld [vmem:[%s12138_s21 + $0x68] sm:$0xff]   ;;  %v11722_v34 = vld [vmem:[%s12138_s21 + $0x70] sm:$0xff]  }
  0x1c   : > { %v11719_v31 = vld [vmem:[%s12138_s21 + $0x680] sm:$0xff]   ;;  %v11721_v33 = vld [vmem:[%s12138_s21 + $0x688] sm:$0xff]   ;;  %v11723_v35 = vld [vmem:[%s12138_s21 + $0x690] sm:$0xff]  }
  0x1d   : > { %v11724_v36 = vld [vmem:[%s12138_s21 + $0x78] sm:$0xff]   ;;  %v11726_v38 = vld [vmem:[%s12138_s21 + $0x80] sm:$0xff]   ;;  %v11728_v40 = vld [vmem:[%s12138_s21 + $0x88] sm:$0xff]  }
  0x1e   : > { %v11725_v37 = vld [vmem:[%s12138_s21 + $0x698] sm:$0xff]   ;;  %v11727_v39 = vld [vmem:[%s12138_s21 + $0x6a0] sm:$0xff]   ;;  %v11729_v41 = vld [vmem:[%s12138_s21 + $0x6a8] sm:$0xff]  }
  0x1f   : > { %10898 = vmatmul.mubr.msk.bf16.gmra.mrb[4].mxu0 %vm2931_vm2, %v11700_v12  ;;  %11290 = vmatmul.mubr.msk.bf16.gmra.mrb[4].mxu1 %vm2931_vm2, %v11701_v13  ;;  %v11730_v42 = vld [vmem:[%s12138_s21 + $0x90] sm:$0xff]   ;;  %v11732_v44 = vld [vmem:[%s12138_s21 + $0x98] sm:$0xff]   ;;  %v11734_v46 = vld [vmem:[%s12138_s21 + $0xa0] sm:$0xff]  }
  0x20   : > { %10901 = vmatprep.mubr.msk.bf16.mxu0 %vm2931_vm2, %v11702_v14  ;;  %11293 = vmatprep.mubr.msk.bf16.mxu1 %vm2931_vm2, %v11703_v15  ;;  %v11731_v43 = vld [vmem:[%s12138_s21 + $0x6b0] sm:$0xff]   ;;  %v11733_v45 = vld [vmem:[%s12138_s21 + $0x6b8] sm:$0xff]   ;;  %v11735_v47 = vld [vmem:[%s12138_s21 + $0x6c0] sm:$0xff]  }
  0x21   : > { %v11736_v48 = vld [vmem:[%s12138_s21 + $0xa8] sm:$0xff]   ;;  %v11738_v50 = vld [vmem:[%s12138_s21 + $0xb0] sm:$0xff]   ;;  %v11740_v52 = vld [vmem:[%s12138_s21 + $0xb8] sm:$0xff]  }
  0x22   : > { %v11737_v49 = vld [vmem:[%s12138_s21 + $0x6c8] sm:$0xff]   ;;  %v11739_v51 = vld [vmem:[%s12138_s21 + $0x6d0] sm:$0xff]   ;;  %v11741_v53 = vld [vmem:[%s12138_s21 + $0x6d8] sm:$0xff]  }
  0x23   : > { %v11742_v54 = vld [vmem:[%s12138_s21 + $0xc0] sm:$0xff]   ;;  %v11744_v56 = vld [vmem:[%s12138_s21 + $0xc8] sm:$0xff]   ;;  %v11746_v58 = vld [vmem:[%s12138_s21 + $0xd0] sm:$0xff]  }
  0x24   : > { %v11743_v55 = vld [vmem:[%s12138_s21 + $0x6e0] sm:$0xff]   ;;  %v11745_v57 = vld [vmem:[%s12138_s21 + $0x6e8] sm:$0xff]   ;;  %v11747_v59 = vld [vmem:[%s12138_s21 + $0x6f0] sm:$0xff]  }
  0x25   : > { %v11748_v60 = vld [vmem:[%s12138_s21 + $0xd8] sm:$0xff]   ;;  %v11750_v62 = vld [vmem:[%s12138_s21 + $0xe0] sm:$0xff]   ;;  %v11752_v0 = vld [vmem:[%s12138_s21 + $0xe8] sm:$0xff]  }
  0x26   : > { %v11749_v61 = vld [vmem:[%s12138_s21 + $0x6f8] sm:$0xff]   ;;  %v11751_v63 = vld [vmem:[%s12138_s21 + $0x700] sm:$0xff]   ;;  %v11753_v1 = vld [vmem:[%s12138_s21 + $0x708] sm:$0xff]  }
  0x27   : > { %10902 = vmatmul.mubr.msk.bf16.gmra.mrb[8].mxu0 %vm2931_vm2, %v11704_v16  ;;  %11294 = vmatmul.mubr.msk.bf16.gmra.mrb[8].mxu1 %vm2931_vm2, %v11705_v17  ;;  %v11754_v2 = vld [vmem:[%s12138_s21 + $0xf0] sm:$0xff]   ;;  %v11756_v4 = vld [vmem:[%s12138_s21 + $0xf8] sm:$0xff]   ;;  %v11758_v6 = vld [vmem:[%s12138_s21 + $0x100] sm:$0xff]  }
  0x28   : > { %10905 = vmatprep.mubr.msk.bf16.mxu0 %vm2931_vm2, %v11706_v18  ;;  %11297 = vmatprep.mubr.msk.bf16.mxu1 %vm2931_vm2, %v11707_v19  ;;  %v11755_v3 = vld [vmem:[%s12138_s21 + $0x710] sm:$0xff]   ;;  %v11757_v5 = vld [vmem:[%s12138_s21 + $0x718] sm:$0xff]   ;;  %v11759_v7 = vld [vmem:[%s12138_s21 + $0x720] sm:$0xff]  }
  0x29   : > { %v11760_v8 = vld [vmem:[%s12138_s21 + $0x108] sm:$0xff]   ;;  %v11762_v10 = vld [vmem:[%s12138_s21 + $0x110] sm:$0xff]   ;;  %v11764_v12 = vld [vmem:[%s12138_s21 + $0x118] sm:$0xff]  }
  0x2a   : > { %v11761_v9 = vld [vmem:[%s12138_s21 + $0x728] sm:$0xff]   ;;  %v11763_v11 = vld [vmem:[%s12138_s21 + $0x730] sm:$0xff]   ;;  %v11765_v13 = vld [vmem:[%s12138_s21 + $0x738] sm:$0xff]  }
  0x2b   : > { %v11766_v14 = vld [vmem:[%s12138_s21 + $0x120] sm:$0xff]   ;;  %v11768_v16 = vld [vmem:[%s12138_s21 + $0x128] sm:$0xff]   ;;  %v11770_v18 = vld [vmem:[%s12138_s21 + $0x130] sm:$0xff]  }
  0x2c   : > { %v11767_v15 = vld [vmem:[%s12138_s21 + $0x740] sm:$0xff]   ;;  %v11769_v17 = vld [vmem:[%s12138_s21 + $0x748] sm:$0xff]   ;;  %v11771_v19 = vld [vmem:[%s12138_s21 + $0x750] sm:$0xff]  }
  0x2f   : > { %10906 = vmatmul.mubr.msk.bf16.gmra.mrb[12].mxu0 %vm2931_vm2, %v11708_v20  ;;  %11298 = vmatmul.mubr.msk.bf16.gmra.mrb[12].mxu1 %vm2931_vm2, %v11709_v21  ;;  %v11772_v20 = vld [vmem:[%s12138_s21 + $0x138] sm:$0xff]  }
  0x30   : > { %10909 = vmatprep.mubr.msk.bf16.mxu0 %vm2931_vm2, %v11710_v22  ;;  %11301 = vmatprep.mubr.msk.bf16.mxu1 %vm2931_vm2, %v11711_v23  ;;  %v11773_v21 = vld [vmem:[%s12138_s21 + $0x758] sm:$0xff]   ;;  %v11774_v22 = vld [vmem:[%s12138_s21 + $0x140] sm:$0xff]  }
  0x31   : > { %v11775_v23 = vld [vmem:[%s12138_s21 + $0x760] sm:$0xff]  }
  0x37   : > { %10910 = vmatmul.mubr.msk.bf16.gmra.mrb[16].mxu0 %vm2931_vm2, %v11712_v24  ;;  %11302 = vmatmul.mubr.msk.bf16.gmra.mrb[16].mxu1 %vm2931_vm2, %v11713_v25  ;;  %v11776_v24 = vld [vmem:[%s12138_s21 + $0x148] sm:$0xff]  }
  0x38   : > { %10913 = vmatprep.mubr.msk.bf16.mxu0 %vm2931_vm2, %v11714_v26  ;;  %11305 = vmatprep.mubr.msk.bf16.mxu1 %vm2931_vm2, %v11715_v27  ;;  %v11777_v25 = vld [vmem:[%s12138_s21 + $0x768] sm:$0xff]   ;;  %v11778_v26 = vld [vmem:[%s12138_s21 + $0x150] sm:$0xff]  }
  0x39   : > { %v11779_v27 = vld [vmem:[%s12138_s21 + $0x770] sm:$0xff]  }
  0x3f   : > { %10914 = vmatmul.mubr.msk.bf16.gmra.mrb[20].mxu0 %vm2931_vm2, %v11716_v28  ;;  %11306 = vmatmul.mubr.msk.bf16.gmra.mrb[20].mxu1 %vm2931_vm2, %v11717_v29  ;;  %v11780_v28 = vld [vmem:[%s12138_s21 + $0x158] sm:$0xff]  }
  0x40   : > { %10917 = vmatprep.mubr.msk.bf16.mxu0 %vm2931_vm2, %v11718_v30  ;;  %11309 = vmatprep.mubr.msk.bf16.mxu1 %vm2931_vm2, %v11719_v31  ;;  %v11781_v29 = vld [vmem:[%s12138_s21 + $0x778] sm:$0xff]   ;;  %v11782_v30 = vld [vmem:[%s12138_s21 + $0x160] sm:$0xff]  }
  0x41   : > { %v11783_v31 = vld [vmem:[%s12138_s21 + $0x780] sm:$0xff]  }
  0x47   : > { %10918 = vmatmul.mubr.msk.bf16.gmra.mrb[24].mxu0 %vm2931_vm2, %v11720_v32  ;;  %11310 = vmatmul.mubr.msk.bf16.gmra.mrb[24].mxu1 %vm2931_vm2, %v11721_v33  ;;  %v11784_v32 = vld [vmem:[%s12138_s21 + $0x168] sm:$0xff]  }
  0x48   : > { %10921 = vmatprep.mubr.msk.bf16.mxu0 %vm2931_vm2, %v11722_v34  ;;  %11313 = vmatprep.mubr.msk.bf16.mxu1 %vm2931_vm2, %v11723_v35  ;;  %v11785_v33 = vld [vmem:[%s12138_s21 + $0x788] sm:$0xff]   ;;  %v11786_v34 = vld [vmem:[%s12138_s21 + $0x170] sm:$0xff]  }
  0x49   : > { %v11787_v35 = vld [vmem:[%s12138_s21 + $0x790] sm:$0xff]  }
  0x4f   : > { %10922 = vmatmul.mubr.msk.bf16.gmra.mrb[28].mxu0 %vm2931_vm2, %v11724_v36  ;;  %11314 = vmatmul.mubr.msk.bf16.gmra.mrb[28].mxu1 %vm2931_vm2, %v11725_v37  ;;  %v11788_v36 = vld [vmem:[%s12138_s21 + $0x178] sm:$0xff]  }
  0x50   : > { %10925 = vmatprep.mubr.msk.bf16.mxu0 %vm2931_vm2, %v11726_v38  ;;  %11317 = vmatprep.mubr.msk.bf16.mxu1 %vm2931_vm2, %v11727_v39  ;;  %v11789_v37 = vld [vmem:[%s12138_s21 + $0x798] sm:$0xff]   ;;  %v11790_v38 = vld [vmem:[%s12138_s21 + $0x180] sm:$0xff]  }
  0x51   : > { %v11791_v39 = vld [vmem:[%s12138_s21 + $0x7a0] sm:$0xff]  }
  0x57   : > { %10926 = vmatmul.mubr.msk.bf16.gmra.mrb[32].mxu0 %vm2931_vm2, %v11728_v40  ;;  %11318 = vmatmul.mubr.msk.bf16.gmra.mrb[32].mxu1 %vm2931_vm2, %v11729_v41  ;;  %v11792_v40 = vld [vmem:[%s12138_s21 + $0x188] sm:$0xff]  }
  0x58   : > { %10929 = vmatprep.mubr.msk.bf16.mxu0 %vm2931_vm2, %v11730_v42  ;;  %11321 = vmatprep.mubr.msk.bf16.mxu1 %vm2931_vm2, %v11731_v43  ;;  %v11793_v41 = vld [vmem:[%s12138_s21 + $0x7a8] sm:$0xff]   ;;  %v11794_v42 = vld [vmem:[%s12138_s21 + $0x190] sm:$0xff]  }
  0x59   : > { %v11795_v43 = vld [vmem:[%s12138_s21 + $0x7b0] sm:$0xff]  }
  0x5f   : > { %10930 = vmatmul.mubr.msk.bf16.gmra.mrb[36].mxu0 %vm2931_vm2, %v11732_v44  ;;  %11322 = vmatmul.mubr.msk.bf16.gmra.mrb[36].mxu1 %vm2931_vm2, %v11733_v45  ;;  %v11796_v44 = vld [vmem:[%s12138_s21 + $0x198] sm:$0xff]  }
  0x60   : > { %10933 = vmatprep.mubr.msk.bf16.mxu0 %vm2931_vm2, %v11734_v46  ;;  %11325 = vmatprep.mubr.msk.bf16.mxu1 %vm2931_vm2, %v11735_v47  ;;  %v11797_v45 = vld [vmem:[%s12138_s21 + $0x7b8] sm:$0xff]   ;;  %v11798_v46 = vld [vmem:[%s12138_s21 + $0x1a0] sm:$0xff]  }
  0x61   : > { %v11799_v47 = vld [vmem:[%s12138_s21 + $0x7c0] sm:$0xff]  }
  0x67   : > { %10934 = vmatmul.mubr.msk.bf16.gmra.mrb[40].mxu0 %vm2931_vm2, %v11736_v48  ;;  %11326 = vmatmul.mubr.msk.bf16.gmra.mrb[40].mxu1 %vm2931_vm2, %v11737_v49  ;;  %v11800_v48 = vld [vmem:[%s12138_s21 + $0x1a8] sm:$0xff]  }
  0x68   : > { %10937 = vmatprep.mubr.msk.bf16.mxu0 %vm2931_vm2, %v11738_v50  ;;  %11329 = vmatprep.mubr.msk.bf16.mxu1 %vm2931_vm2, %v11739_v51  ;;  %v11801_v49 = vld [vmem:[%s12138_s21 + $0x7c8] sm:$0xff]   ;;  %v11802_v50 = vld [vmem:[%s12138_s21 + $0x1b0] sm:$0xff]  }
  0x69   : > { %v11803_v51 = vld [vmem:[%s12138_s21 + $0x7d0] sm:$0xff]  }
  0x6f   : > { %10938 = vmatmul.mubr.msk.bf16.gmra.mrb[44].mxu0 %vm2931_vm2, %v11740_v52  ;;  %11330 = vmatmul.mubr.msk.bf16.gmra.mrb[44].mxu1 %vm2931_vm2, %v11741_v53  ;;  %v11804_v52 = vld [vmem:[%s12138_s21 + $0x1b8] sm:$0xff]  }
  0x70   : > { %10941 = vmatprep.mubr.msk.bf16.mxu0 %vm2931_vm2, %v11742_v54  ;;  %11333 = vmatprep.mubr.msk.bf16.mxu1 %vm2931_vm2, %v11743_v55  ;;  %v11805_v54 = vld [vmem:[%s12138_s21 + $0x7d8] sm:$0xff]   ;;  %v11806_v55 = vld [vmem:[%s12138_s21 + $0x1c0] sm:$0xff]  }
  0x77   : > { %10942 = vmatmul.mubr.msk.bf16.gmra.mrb[48].mxu0 %vm2931_vm2, %v11744_v56  ;;  %11334 = vmatmul.mubr.msk.bf16.gmra.mrb[48].mxu1 %vm2931_vm2, %v11745_v57 }
  0x78   : > { %10945 = vmatprep.mubr.msk.bf16.mxu0 %vm2931_vm2, %v11746_v58  ;;  %11337 = vmatprep.mubr.msk.bf16.mxu1 %vm2931_vm2, %v11747_v59 }
  0x7f   : > { %10946 = vmatmul.mubr.msk.bf16.gmra.mrb[52].mxu0 %vm2931_vm2, %v11748_v60  ;;  %11338 = vmatmul.mubr.msk.bf16.gmra.mrb[52].mxu1 %vm2931_vm2, %v11749_v61 }
  0x80   : > { %10949 = vmatprep.mubr.msk.bf16.mxu0 %vm2931_vm2, %v11750_v62  ;;  %11341 = vmatprep.mubr.msk.bf16.mxu1 %vm2931_vm2, %v11751_v63  ;;  %v11807_v62 = vld [vmem:[%s12138_s21 + $0x7e0] sm:$0xff]  }
  0x87   : > { %10950 = vmatmul.mubr.msk.bf16.gmra.mrb[56].mxu0 %vm2931_vm2, %v11752_v0  ;;  %11342 = vmatmul.mubr.msk.bf16.gmra.mrb[56].mxu1 %vm2931_vm2, %v11753_v1  ;;  %v11808_v0 = vld [vmem:[%s12138_s21 + $0x1c8] sm:$0xff]  }
  0x88   : > { %10953 = vmatprep.mubr.msk.bf16.mxu0 %vm2931_vm2, %v11754_v2  ;;  %11345 = vmatprep.mubr.msk.bf16.mxu1 %vm2931_vm2, %v11755_v3  ;;  %v11809_v2 = vld [vmem:[%s12138_s21 + $0x7e8] sm:$0xff]   ;;  %v11810_v3 = vld [vmem:[%s12138_s21 + $0x1d0] sm:$0xff]  }
  0x8f   : > { %10954 = vmatmul.mubr.msk.bf16.gmra.mrb[60].mxu0 %vm2931_vm2, %v11756_v4  ;;  %11346 = vmatmul.mubr.msk.bf16.gmra.mrb[60].mxu1 %vm2931_vm2, %v11757_v5 }
  0x90   : > { %10957 = vmatprep.mubr.msk.bf16.mxu0 %vm2931_vm2, %v11758_v6  ;;  %11349 = vmatprep.mubr.msk.bf16.mxu1 %vm2931_vm2, %v11759_v7 }
  0x97   : > { %10958 = vmatmul.mubr.msk.bf16.gmra.mrb[64].mxu0 %vm2931_vm2, %v11760_v8  ;;  %11350 = vmatmul.mubr.msk.bf16.gmra.mrb[64].mxu1 %vm2931_vm2, %v11761_v9 }
  0x98   : > { %10961 = vmatprep.mubr.msk.bf16.mxu0 %vm2931_vm2, %v11762_v10  ;;  %11353 = vmatprep.mubr.msk.bf16.mxu1 %vm2931_vm2, %v11763_v11  ;;  %v11811_v10 = vld [vmem:[%s12138_s21 + $0x7f0] sm:$0xff]  }
  0x9f   : > { %10962 = vmatmul.mubr.msk.bf16.gmra.mrb[68].mxu0 %vm2931_vm2, %v11764_v12  ;;  %11354 = vmatmul.mubr.msk.bf16.gmra.mrb[68].mxu1 %vm2931_vm2, %v11765_v13  ;;  %v11812_v12 = vld [vmem:[%s12138_s21 + $0x1d8] sm:$0xff]  }
  0xa0   : > { %10965 = vmatprep.mubr.msk.bf16.mxu0 %vm2931_vm2, %v11766_v14  ;;  %11357 = vmatprep.mubr.msk.bf16.mxu1 %vm2931_vm2, %v11767_v15  ;;  %v11813_v14 = vld [vmem:[%s12138_s21 + $0x7f8] sm:$0xff]   ;;  %v11814_v15 = vld [vmem:[%s12138_s21 + $0x1e0] sm:$0xff]  }
  0xa7   : > { %10966 = vmatmul.mubr.msk.bf16.gmra.mrb[72].mxu0 %vm2931_vm2, %v11768_v16  ;;  %11358 = vmatmul.mubr.msk.bf16.gmra.mrb[72].mxu1 %vm2931_vm2, %v11769_v17 }
  0xa8   : > { %10969 = vmatprep.mubr.msk.bf16.mxu0 %vm2931_vm2, %v11770_v18  ;;  %11361 = vmatprep.mubr.msk.bf16.mxu1 %vm2931_vm2, %v11771_v19 }
  0xaf   : > { %10970 = vmatmul.mubr.msk.bf16.gmra.mrb[76].mxu0 %vm2931_vm2, %v11772_v20  ;;  %11362 = vmatmul.mubr.msk.bf16.gmra.mrb[76].mxu1 %vm2931_vm2, %v11773_v21 }
  0xb0   : > { %10973 = vmatprep.mubr.msk.bf16.mxu0 %vm2931_vm2, %v11774_v22  ;;  %11365 = vmatprep.mubr.msk.bf16.mxu1 %vm2931_vm2, %v11775_v23  ;;  %v11815_v22 = vld [vmem:[%s12138_s21 + $0x800] sm:$0xff]  }
  0xb7   : > { %10974 = vmatmul.mubr.msk.bf16.gmra.mrb[80].mxu0 %vm2931_vm2, %v11776_v24  ;;  %11366 = vmatmul.mubr.msk.bf16.gmra.mrb[80].mxu1 %vm2931_vm2, %v11777_v25  ;;  %v11816_v24 = vld [vmem:[%s12138_s21 + $0x1e8] sm:$0xff]  }
  0xb8   : > { %10977 = vmatprep.mubr.msk.bf16.mxu0 %vm2931_vm2, %v11778_v26  ;;  %11369 = vmatprep.mubr.msk.bf16.mxu1 %vm2931_vm2, %v11779_v27  ;;  %v11817_v26 = vld [vmem:[%s12138_s21 + $0x808] sm:$0xff]   ;;  %v11818_v27 = vld [vmem:[%s12138_s21 + $0x1f0] sm:$0xff]  }
  0xbf   : > { %10978 = vmatmul.mubr.msk.bf16.gmra.mrb[84].mxu0 %vm2931_vm2, %v11780_v28  ;;  %11370 = vmatmul.mubr.msk.bf16.gmra.mrb[84].mxu1 %vm2931_vm2, %v11781_v29 }
  0xc0   : > { %10981 = vmatprep.mubr.msk.bf16.mxu0 %vm2931_vm2, %v11782_v30  ;;  %11373 = vmatprep.mubr.msk.bf16.mxu1 %vm2931_vm2, %v11783_v31 }
  0xc7   : > { %10982 = vmatmul.mubr.msk.bf16.gmra.mrb[88].mxu0 %vm2931_vm2, %v11784_v32  ;;  %11374 = vmatmul.mubr.msk.bf16.gmra.mrb[88].mxu1 %vm2931_vm2, %v11785_v33 }
  0xc8   : > { %10985 = vmatprep.mubr.msk.bf16.mxu0 %vm2931_vm2, %v11786_v34  ;;  %11377 = vmatprep.mubr.msk.bf16.mxu1 %vm2931_vm2, %v11787_v35  ;;  %v11819_v34 = vld [vmem:[%s12138_s21 + $0x810] sm:$0xff]  }
  0xcf   : > { %10986 = vmatmul.mubr.msk.bf16.gmra.mrb[92].mxu0 %vm2931_vm2, %v11788_v36  ;;  %11378 = vmatmul.mubr.msk.bf16.gmra.mrb[92].mxu1 %vm2931_vm2, %v11789_v37  ;;  %v11820_v36 = vld [vmem:[%s12138_s21 + $0x1f8] sm:$0xff]  }
  0xd0   : > { %10989 = vmatprep.mubr.msk.bf16.mxu0 %vm2931_vm2, %v11790_v38  ;;  %11381 = vmatprep.mubr.msk.bf16.mxu1 %vm2931_vm2, %v11791_v39  ;;  %v11821_v38 = vld [vmem:[%s12138_s21 + $0x818] sm:$0xff]   ;;  %v11822_v39 = vld [vmem:[%s12138_s21 + $0x200] sm:$0xff]  }
  0xd7   : > { %10990 = vmatmul.mubr.msk.bf16.gmra.mrb[96].mxu0 %vm2931_vm2, %v11792_v40  ;;  %11382 = vmatmul.mubr.msk.bf16.gmra.mrb[96].mxu1 %vm2931_vm2, %v11793_v41 }
  0xd8   : > { %10993 = vmatprep.mubr.msk.bf16.mxu0 %vm2931_vm2, %v11794_v42  ;;  %11385 = vmatprep.mubr.msk.bf16.mxu1 %vm2931_vm2, %v11795_v43 }
  0xdf   : > { %10994 = vmatmul.mubr.msk.bf16.gmra.mrb[100].mxu0 %vm2931_vm2, %v11796_v44  ;;  %11386 = vmatmul.mubr.msk.bf16.gmra.mrb[100].mxu1 %vm2931_vm2, %v11797_v45 }
  0xe0   : > { %10997 = vmatprep.mubr.msk.bf16.mxu0 %vm2931_vm2, %v11798_v46  ;;  %11389 = vmatprep.mubr.msk.bf16.mxu1 %vm2931_vm2, %v11799_v47  ;;  %v11823_v46 = vld [vmem:[%s12138_s21 + $0x820] sm:$0xff]  }
  0xe7   : > { %10998 = vmatmul.mubr.msk.bf16.gmra.mrb[104].mxu0 %vm2931_vm2, %v11800_v48  ;;  %11390 = vmatmul.mubr.msk.bf16.gmra.mrb[104].mxu1 %vm2931_vm2, %v11801_v49  ;;  %v11824_v48 = vld [vmem:[%s12138_s21 + $0x208] sm:$0xff]  }
  0xe8   : > { %11001 = vmatprep.mubr.msk.bf16.mxu0 %vm2931_vm2, %v11802_v50  ;;  %11393 = vmatprep.mubr.msk.bf16.mxu1 %vm2931_vm2, %v11803_v51  ;;  %v11825_v50 = vld [vmem:[%s12138_s21 + $0x828] sm:$0xff]   ;;  %v11826_v51 = vld [vmem:[%s12138_s21 + $0x210] sm:$0xff]  }
  0xea   : > { %v12361_v53 = vpop.f32.mrb[0].mxu0  ;;  %v12365_v56 = vpop.f32.mrb[0].mxu1 }
  0xeb   : > { %v12367_v57 = vpop.f32.mrb[1].mxu0  ;;  %v12369_v58 = vpop.f32.mrb[1].mxu1 }
  0xec   : > { %v12371_v59 = vpop.f32.mrb[2].mxu0  ;;  %v12373_v60 = vpop.f32.mrb[2].mxu1 }
  0xed   : > { %v12375_v61 = vpop.f32.mrb[3].mxu0  ;;  %v12378_v63 = vpop.f32.mrb[3].mxu1 }
  0xef   : > { %11002 = vmatmul.mubr.msk.bf16.gmra.mrb[108].mxu0 %vm2931_vm2, %v11804_v52  ;;  %11394 = vmatmul.mubr.msk.bf16.gmra.mrb[108].mxu1 %vm2931_vm2, %v11805_v54 }
  0xf0   : > { %11005 = vmatprep.mubr.msk.bf16.mxu0 %vm2931_vm2, %v11806_v55  ;;  %11397 = vmatprep.mubr.msk.bf16.mxu1 %vm2931_vm2, %v11807_v62 }
  0xf2   : > { %v12385_v1 = vpop.f32.mrb[4].mxu0  ;;  %v12389_v4 = vpop.f32.mrb[4].mxu1 }
  0xf3   : > { %v12391_v5 = vpop.f32.mrb[5].mxu0  ;;  %v12393_v6 = vpop.f32.mrb[5].mxu1 }
  0xf4   : > { %v12395_v7 = vpop.f32.mrb[6].mxu0  ;;  %v12397_v8 = vpop.f32.mrb[6].mxu1 }
  0xf5   : > { %v12399_v9 = vpop.f32.mrb[7].mxu0  ;;  %v12402_v11 = vpop.f32.mrb[7].mxu1 }
  0xf7   : > { %11006 = vmatmul.mubr.msk.bf16.gmra.mrb[112].mxu0 %vm2931_vm2, %v11808_v0  ;;  %11398 = vmatmul.mubr.msk.bf16.gmra.mrb[112].mxu1 %vm2931_vm2, %v11809_v2 }
  0xf8   : > { %11009 = vmatprep.mubr.msk.bf16.mxu0 %vm2931_vm2, %v11810_v3  ;;  %11401 = vmatprep.mubr.msk.bf16.mxu1 %vm2931_vm2, %v11811_v10  ;;  %v11827_v3 = vld [vmem:[%s12138_s21 + $0x830] sm:$0xff]  }
  0xfa   : > { %v12409_v13 = vpop.f32.mrb[8].mxu0  ;;  %v12413_v16 = vpop.f32.mrb[8].mxu1 }
  0xfb   : > { %v12415_v17 = vpop.f32.mrb[9].mxu0  ;;  %v12417_v18 = vpop.f32.mrb[9].mxu1 }
  0xfc   : > { %v12419_v19 = vpop.f32.mrb[10].mxu0  ;;  %v12421_v20 = vpop.f32.mrb[10].mxu1 }
  0xfd   : > { %v12423_v21 = vpop.f32.mrb[11].mxu0  ;;  %v12426_v23 = vpop.f32.mrb[11].mxu1 }
  0xff   : > { %11010 = vmatmul.mubr.msk.bf16.gmra.mrb[116].mxu0 %vm2931_vm2, %v11812_v12  ;;  %11402 = vmatmul.mubr.msk.bf16.gmra.mrb[116].mxu1 %vm2931_vm2, %v11813_v14  ;;  %v11828_v12 = vld [vmem:[%s12138_s21 + $0x218] sm:$0xff]  }
 0x100   : > { %11013 = vmatprep.mubr.msk.bf16.mxu0 %vm2931_vm2, %v11814_v15  ;;  %11405 = vmatprep.mubr.msk.bf16.mxu1 %vm2931_vm2, %v11815_v22  ;;  %v11829_v15 = vld [vmem:[%s12138_s21 + $0x838] sm:$0xff]   ;;  %v11830_v22 = vld [vmem:[%s12138_s21 + $0x220] sm:$0xff]  }
 0x102   : > { %v12433_v25 = vpop.f32.mrb[12].mxu0  ;;  %v12437_v28 = vpop.f32.mrb[12].mxu1 }
 0x103   : > { %v12439_v29 = vpop.f32.mrb[13].mxu0  ;;  %v12441_v30 = vpop.f32.mrb[13].mxu1 }
 0x104   : > { %v12443_v31 = vpop.f32.mrb[14].mxu0  ;;  %v12445_v32 = vpop.f32.mrb[14].mxu1 }
 0x105   : > { %v12447_v33 = vpop.f32.mrb[15].mxu0  ;;  %v12450_v35 = vpop.f32.mrb[15].mxu1 }
 0x107   : > { %11014 = vmatmul.mubr.msk.bf16.gmra.mrb[120].mxu0 %vm2931_vm2, %v11816_v24  ;;  %11406 = vmatmul.mubr.msk.bf16.gmra.mrb[120].mxu1 %vm2931_vm2, %v11817_v26 }
 0x108   : > { %11017 = vmatprep.mubr.msk.bf16.mxu0 %vm2931_vm2, %v11818_v27  ;;  %11409 = vmatprep.mubr.msk.bf16.mxu1 %vm2931_vm2, %v11819_v34 }
 0x10a   : > { %v12457_v37 = vpop.f32.mrb[16].mxu0  ;;  %v12461_v40 = vpop.f32.mrb[16].mxu1 }
 0x10b   : > { %v12463_v41 = vpop.f32.mrb[17].mxu0  ;;  %v12465_v42 = vpop.f32.mrb[17].mxu1 }
 0x10c   : > { %v12467_v43 = vpop.f32.mrb[18].mxu0  ;;  %v12469_v44 = vpop.f32.mrb[18].mxu1 }
 0x10d   : > { %v12471_v45 = vpop.f32.mrb[19].mxu0  ;;  %v12474_v47 = vpop.f32.mrb[19].mxu1 }
 0x10f   : > { %11018 = vmatmul.mubr.msk.bf16.gmra.mrb[124].mxu0 %vm2931_vm2, %v11820_v36  ;;  %11410 = vmatmul.mubr.msk.bf16.gmra.mrb[124].mxu1 %vm2931_vm2, %v11821_v38 }
 0x110   : > { %11021 = vmatprep.mubr.msk.bf16.mxu0 %vm2931_vm2, %v11822_v39  ;;  %11413 = vmatprep.mubr.msk.bf16.mxu1 %vm2931_vm2, %v11823_v46  ;;  %v11831_v39 = vld [vmem:[%s12138_s21 + $0x840] sm:$0xff]  }
 0x112   : > { %v12481_v49 = vpop.f32.mrb[20].mxu0  ;;  %v12485_v52 = vpop.f32.mrb[20].mxu1 }
 0x113   : > { %v12487_v54 = vpop.f32.mrb[21].mxu0  ;;  %v12489_v55 = vpop.f32.mrb[21].mxu1 }
 0x114   : > { %v12491_v62 = vpop.f32.mrb[22].mxu0  ;;  %v12493_v0 = vpop.f32.mrb[22].mxu1 }
 0x115   : > { %v12495_v2 = vpop.f32.mrb[23].mxu0  ;;  %v12498_v10 = vpop.f32.mrb[23].mxu1 }
 0x116   : > { %14721 = vst [vmem:[#allocation2_spill] sm:$0xff] %v12495_v2  ;;  %14722 = vst [vmem:[#allocation3_spill] sm:$0xff] %v12498_v10 }
 0x117   : > { %11022 = vmatmul.mubr.msk.bf16.gmra.mrb[128].mxu0 %vm2931_vm2, %v11824_v48  ;;  %11414 = vmatmul.mubr.msk.bf16.gmra.mrb[128].mxu1 %vm2931_vm2, %v11825_v50  ;;  %v11832_v48 = vld [vmem:[%s12138_s21 + $0x228] sm:$0xff]  }
 0x118   : > { %11025 = vmatprep.mubr.msk.bf16.mxu0 %vm2931_vm2, %v11826_v51  ;;  %11417 = vmatprep.mubr.msk.bf16.mxu1 %vm2931_vm2, %v11827_v3  ;;  %v11833_v51 = vld [vmem:[%s12138_s21 + $0x848] sm:$0xff]   ;;  %v11834_v3 = vld [vmem:[%s12138_s21 + $0x230] sm:$0xff]  }
 0x11a   : > { %v12505_v14 = vpop.f32.mrb[24].mxu0  ;;  %v12509_v24 = vpop.f32.mrb[24].mxu1 }
 0x11b   : > { %14723 = vst [vmem:[#allocation4_spill] sm:$0xff] %v12505_v14  ;;  %14724 = vst [vmem:[#allocation5_spill] sm:$0xff] %v12509_v24  ;;  %v12511_v26 = vpop.f32.mrb[25].mxu0  ;;  %v12513_v27 = vpop.f32.mrb[25].mxu1  ;;  %v12003_v24 = vld [vmem:[%s12138_s21 + $0xaf0] sm:$0xff]  }
 0x11c   : > { %14725 = vst [vmem:[#allocation6_spill] sm:$0xff] %v12511_v26  ;;  %14726 = vst [vmem:[#allocation7_spill] sm:$0xff] %v12513_v27  ;;  %v12515_v34 = vpop.f32.mrb[26].mxu0  ;;  %v12517_v36 = vpop.f32.mrb[26].mxu1  ;;  %v12001_v27 = vld [vmem:[%s12138_s21 + $0xae8] sm:$0xff]  }
 0x11d   : > { %14727 = vst [vmem:[#allocation8_spill] sm:$0xff] %v12515_v34  ;;  %14728 = vst [vmem:[#allocation9_spill] sm:$0xff] %v12517_v36  ;;  %v12519_v38 = vpop.f32.mrb[27].mxu0  ;;  %v12522_v46 = vpop.f32.mrb[27].mxu1 }
 0x11e   : > { %14729 = vst [vmem:[#allocation10_spill] sm:$0xff] %v12519_v38  ;;  %14730 = vst [vmem:[#allocation11_spill] sm:$0xff] %v12522_v46 }
 0x11f   : > { %11026 = vmatmul.mubr.msk.bf16.gmra.mrb[132].mxu0 %vm2931_vm2, %v11828_v12  ;;  %11418 = vmatmul.mubr.msk.bf16.gmra.mrb[132].mxu1 %vm2931_vm2, %v11829_v15 }
 0x120   : > { %11029 = vmatprep.mubr.msk.bf16.mxu0 %vm2931_vm2, %v11830_v22  ;;  %11421 = vmatprep.mubr.msk.bf16.mxu1 %vm2931_vm2, %v11831_v39  ;;  %v11835_v39 = vld [vmem:[%s12138_s21 + $0x850] sm:$0xff]  }
 0x122   : > { %v12529_v50 = vpop.f32.mrb[28].mxu0  ;;  %v12533_v38 = vpop.f32.mrb[28].mxu1 }
 0x123   : > { %14731 = vst [vmem:[#allocation12_spill] sm:$0xff] %v12529_v50  ;;  %14732 = vst [vmem:[#allocation13_spill] sm:$0xff] %v12533_v38  ;;  %v12535_v36 = vpop.f32.mrb[29].mxu0  ;;  %v12537_v46 = vpop.f32.mrb[29].mxu1 }
 0x124   : > { %14733 = vst [vmem:[#allocation14_spill] sm:$0xff] %v12535_v36  ;;  %14734 = vst [vmem:[#allocation15_spill] sm:$0xff] %v12537_v46  ;;  %v12539_v12 = vpop.f32.mrb[30].mxu0  ;;  %v12541_v15 = vpop.f32.mrb[30].mxu1  ;;  %v11836_v36 = vld [vmem:[%s12138_s21 + $0x238] sm:$0xff]  }
 0x125   : > { %14735 = vst [vmem:[#allocation16_spill] sm:$0xff] %v12539_v12  ;;  %14736 = vst [vmem:[#allocation17_spill] sm:$0xff] %v12541_v15  ;;  %v12543_v22 = vpop.f32.mrb[31].mxu0  ;;  %v12546_v34 = vpop.f32.mrb[31].mxu1  ;;  %v11837_v12 = vld [vmem:[%s12138_s21 + $0x858] sm:$0xff]   ;;  %v11838_v15 = vld [vmem:[%s12138_s21 + $0x240] sm:$0xff]  }
 0x126   : > { %14737 = vst [vmem:[#allocation18_spill] sm:$0xff] %v12543_v22  ;;  %14738 = vst [vmem:[#allocation19_spill] sm:$0xff] %v12546_v34 }
 0x127   : > { %11030 = vmatmul.mubr.msk.bf16.gmra.mrb[136].mxu0 %vm2931_vm2, %v11832_v48  ;;  %11422 = vmatmul.mubr.msk.bf16.gmra.mrb[136].mxu1 %vm2931_vm2, %v11833_v51 }
 0x128   : > { %11033 = vmatprep.mubr.msk.bf16.mxu0 %vm2931_vm2, %v11834_v3  ;;  %11425 = vmatprep.mubr.msk.bf16.mxu1 %vm2931_vm2, %v11835_v39  ;;  %v11839_v39 = vld [vmem:[%s12138_s21 + $0x860] sm:$0xff]  }
 0x12a   : > { %v12553_v46 = vpop.f32.mrb[32].mxu0  ;;  %v12557_v22 = vpop.f32.mrb[32].mxu1 }
 0x12b   : > { %14739 = vst [vmem:[#allocation20_spill] sm:$0xff] %v12553_v46  ;;  %14740 = vst [vmem:[#allocation21_spill] sm:$0xff] %v12557_v22  ;;  %v12559_v38 = vpop.f32.mrb[33].mxu0  ;;  %v12561_v34 = vpop.f32.mrb[33].mxu1 }
 0x12c   : > { %14741 = vst [vmem:[#allocation22_spill] sm:$0xff] %v12559_v38  ;;  %14742 = vst [vmem:[#allocation23_spill] sm:$0xff] %v12561_v34  ;;  %v12563_v48 = vpop.f32.mrb[34].mxu0  ;;  %v12565_v51 = vpop.f32.mrb[34].mxu1  ;;  %v11840_v38 = vld [vmem:[%s12138_s21 + $0x248] sm:$0xff]  }
 0x12d   : > { %14743 = vst [vmem:[#allocation24_spill] sm:$0xff] %v12563_v48  ;;  %14744 = vst [vmem:[#allocation25_spill] sm:$0xff] %v12565_v51  ;;  %v12567_v3 = vpop.f32.mrb[35].mxu0  ;;  %v12570_v50 = vpop.f32.mrb[35].mxu1  ;;  %v11841_v48 = vld [vmem:[%s12138_s21 + $0x868] sm:$0xff]   ;;  %v11842_v51 = vld [vmem:[%s12138_s21 + $0x250] sm:$0xff]  }
 0x12e   : > { %14745 = vst [vmem:[#allocation26_spill] sm:$0xff] %v12567_v3  ;;  %14746 = vst [vmem:[#allocation27_spill] sm:$0xff] %v12570_v50 }
 0x12f   : > { %11034 = vmatmul.mubr.msk.bf16.gmra.mrb[140].mxu0 %vm2931_vm2, %v11836_v36  ;;  %11426 = vmatmul.mubr.msk.bf16.gmra.mrb[140].mxu1 %vm2931_vm2, %v11837_v12 }
 0x130   : > { %11037 = vmatprep.mubr.msk.bf16.mxu0 %vm2931_vm2, %v11838_v15  ;;  %11429 = vmatprep.mubr.msk.bf16.mxu1 %vm2931_vm2, %v11839_v39  ;;  %v11843_v39 = vld [vmem:[%s12138_s21 + $0x870] sm:$0xff]  }
 0x132   : > { %v12577_v34 = vpop.f32.mrb[36].mxu0  ;;  %v12581_v3 = vpop.f32.mrb[36].mxu1 }
 0x133   : > { %14747 = vst [vmem:[#allocation28_spill] sm:$0xff] %v12577_v34  ;;  %14748 = vst [vmem:[#allocation29_spill] sm:$0xff] %v12581_v3  ;;  %v12583_v22 = vpop.f32.mrb[37].mxu0  ;;  %v12585_v50 = vpop.f32.mrb[37].mxu1 }
 0x134   : > { %14749 = vst [vmem:[#allocation30_spill] sm:$0xff] %v12583_v22  ;;  %14750 = vst [vmem:[#allocation31_spill] sm:$0xff] %v12585_v50  ;;  %v12587_v36 = vpop.f32.mrb[38].mxu0  ;;  %v12589_v12 = vpop.f32.mrb[38].mxu1  ;;  %v11844_v22 = vld [vmem:[%s12138_s21 + $0x258] sm:$0xff]  }
 0x135   : > { %14751 = vst [vmem:[#allocation32_spill] sm:$0xff] %v12587_v36  ;;  %14752 = vst [vmem:[#allocation33_spill] sm:$0xff] %v12589_v12  ;;  %v12591_v15 = vpop.f32.mrb[39].mxu0  ;;  %v12594_v46 = vpop.f32.mrb[39].mxu1  ;;  %v11845_v36 = vld [vmem:[%s12138_s21 + $0x878] sm:$0xff]   ;;  %v11846_v12 = vld [vmem:[%s12138_s21 + $0x260] sm:$0xff]  }
 0x136   : > { %14753 = vst [vmem:[#allocation34_spill] sm:$0xff] %v12591_v15  ;;  %14754 = vst [vmem:[#allocation35_spill] sm:$0xff] %v12594_v46 }
 0x137   : > { %11038 = vmatmul.mubr.msk.bf16.gmra.mrb[144].mxu0 %vm2931_vm2, %v11840_v38  ;;  %11430 = vmatmul.mubr.msk.bf16.gmra.mrb[144].mxu1 %vm2931_vm2, %v11841_v48 }
 0x138   : > { %11041 = vmatprep.mubr.msk.bf16.mxu0 %vm2931_vm2, %v11842_v51  ;;  %11433 = vmatprep.mubr.msk.bf16.mxu1 %vm2931_vm2, %v11843_v39  ;;  %v11847_v39 = vld [vmem:[%s12138_s21 + $0x880] sm:$0xff]  }
 0x13a   : > { %v12601_v50 = vpop.f32.mrb[40].mxu0  ;;  %v12605_v15 = vpop.f32.mrb[40].mxu1 }
 0x13b   : > { %14755 = vst [vmem:[#allocation36_spill] sm:$0xff] %v12601_v50  ;;  %14756 = vst [vmem:[#allocation37_spill] sm:$0xff] %v12605_v15  ;;  %v12607_v3 = vpop.f32.mrb[41].mxu0  ;;  %v12609_v46 = vpop.f32.mrb[41].mxu1 }
 0x13c   : > { %14757 = vst [vmem:[#allocation38_spill] sm:$0xff] %v12607_v3  ;;  %14758 = vst [vmem:[#allocation39_spill] sm:$0xff] %v12609_v46  ;;  %v12611_v38 = vpop.f32.mrb[42].mxu0  ;;  %v12613_v48 = vpop.f32.mrb[42].mxu1  ;;  %v11848_v3 = vld [vmem:[%s12138_s21 + $0x268] sm:$0xff]  }
 0x13d   : > { %14759 = vst [vmem:[#allocation40_spill] sm:$0xff] %v12611_v38  ;;  %14760 = vst [vmem:[#allocation41_spill] sm:$0xff] %v12613_v48  ;;  %v12615_v51 = vpop.f32.mrb[43].mxu0  ;;  %v12618_v34 = vpop.f32.mrb[43].mxu1  ;;  %v11849_v38 = vld [vmem:[%s12138_s21 + $0x888] sm:$0xff]   ;;  %v11850_v48 = vld [vmem:[%s12138_s21 + $0x270] sm:$0xff]  }
 0x13e   : > { %14761 = vst [vmem:[#allocation42_spill] sm:$0xff] %v12615_v51  ;;  %14762 = vst [vmem:[#allocation43_spill] sm:$0xff] %v12618_v34 }
 0x13f   : > { %11042 = vmatmul.mubr.msk.bf16.gmra.mrb[148].mxu0 %vm2931_vm2, %v11844_v22  ;;  %11434 = vmatmul.mubr.msk.bf16.gmra.mrb[148].mxu1 %vm2931_vm2, %v11845_v36 }
 0x140   : > { %11045 = vmatprep.mubr.msk.bf16.mxu0 %vm2931_vm2, %v11846_v12  ;;  %11437 = vmatprep.mubr.msk.bf16.mxu1 %vm2931_vm2, %v11847_v39  ;;  %v11851_v39 = vld [vmem:[%s12138_s21 + $0x890] sm:$0xff]  }
 0x142   : > { %v12625_v46 = vpop.f32.mrb[44].mxu0  ;;  %v12629_v51 = vpop.f32.mrb[44].mxu1 }
 0x143   : > { %14763 = vst [vmem:[#allocation44_spill] sm:$0xff] %v12625_v46  ;;  %14764 = vst [vmem:[#allocation45_spill] sm:$0xff] %v12629_v51  ;;  %v12631_v15 = vpop.f32.mrb[45].mxu0  ;;  %v12633_v34 = vpop.f32.mrb[45].mxu1 }
 0x144   : > { %14765 = vst [vmem:[#allocation46_spill] sm:$0xff] %v12631_v15  ;;  %14766 = vst [vmem:[#allocation47_spill] sm:$0xff] %v12633_v34  ;;  %v12635_v22 = vpop.f32.mrb[46].mxu0  ;;  %v12637_v36 = vpop.f32.mrb[46].mxu1  ;;  %v11852_v15 = vld [vmem:[%s12138_s21 + $0x278] sm:$0xff]  }
 0x145   : > { %14767 = vst [vmem:[#allocation48_spill] sm:$0xff] %v12635_v22  ;;  %14768 = vst [vmem:[#allocation49_spill] sm:$0xff] %v12637_v36  ;;  %v12639_v12 = vpop.f32.mrb[47].mxu0  ;;  %v12642_v50 = vpop.f32.mrb[47].mxu1  ;;  %v11853_v22 = vld [vmem:[%s12138_s21 + $0x898] sm:$0xff]   ;;  %v11854_v36 = vld [vmem:[%s12138_s21 + $0x280] sm:$0xff]  }
 0x146   : > { %14769 = vst [vmem:[#allocation50_spill] sm:$0xff] %v12639_v12  ;;  %14770 = vst [vmem:[#allocation51_spill] sm:$0xff] %v12642_v50 }
 0x147   : > { %11046 = vmatmul.mubr.msk.bf16.gmra.mrb[152].mxu0 %vm2931_vm2, %v11848_v3  ;;  %11438 = vmatmul.mubr.msk.bf16.gmra.mrb[152].mxu1 %vm2931_vm2, %v11849_v38 }
 0x148   : > { %11049 = vmatprep.mubr.msk.bf16.mxu0 %vm2931_vm2, %v11850_v48  ;;  %11441 = vmatprep.mubr.msk.bf16.mxu1 %vm2931_vm2, %v11851_v39  ;;  %v11855_v39 = vld [vmem:[%s12138_s21 + $0x8a0] sm:$0xff]  }
 0x14a   : > { %v12649_v34 = vpop.f32.mrb[48].mxu0  ;;  %v12653_v12 = vpop.f32.mrb[48].mxu1 }
 0x14b   : > { %14771 = vst [vmem:[#allocation52_spill] sm:$0xff] %v12649_v34  ;;  %14772 = vst [vmem:[#allocation53_spill] sm:$0xff] %v12653_v12  ;;  %v12655_v51 = vpop.f32.mrb[49].mxu0  ;;  %v12657_v50 = vpop.f32.mrb[49].mxu1 }
 0x14c   : > { %14773 = vst [vmem:[#allocation54_spill] sm:$0xff] %v12655_v51  ;;  %14774 = vst [vmem:[#allocation55_spill] sm:$0xff] %v12657_v50  ;;  %v12659_v3 = vpop.f32.mrb[50].mxu0  ;;  %v12661_v38 = vpop.f32.mrb[50].mxu1  ;;  %v11856_v51 = vld [vmem:[%s12138_s21 + $0x288] sm:$0xff]  }
 0x14d   : > { %14775 = vst [vmem:[#allocation56_spill] sm:$0xff] %v12659_v3  ;;  %14776 = vst [vmem:[#allocation57_spill] sm:$0xff] %v12661_v38  ;;  %v12663_v48 = vpop.f32.mrb[51].mxu0  ;;  %v12666_v46 = vpop.f32.mrb[51].mxu1  ;;  %v11857_v3 = vld [vmem:[%s12138_s21 + $0x8a8] sm:$0xff]   ;;  %v11858_v38 = vld [vmem:[%s12138_s21 + $0x290] sm:$0xff]  }
 0x14e   : > { %14777 = vst [vmem:[#allocation58_spill] sm:$0xff] %v12663_v48  ;;  %14778 = vst [vmem:[#allocation59_spill] sm:$0xff] %v12666_v46 }
 0x14f   : > { %11050 = vmatmul.mubr.msk.bf16.gmra.mrb[156].mxu0 %vm2931_vm2, %v11852_v15  ;;  %11442 = vmatmul.mubr.msk.bf16.gmra.mrb[156].mxu1 %vm2931_vm2, %v11853_v22 }
 0x150   : > { %11053 = vmatprep.mubr.msk.bf16.mxu0 %vm2931_vm2, %v11854_v36  ;;  %11445 = vmatprep.mubr.msk.bf16.mxu1 %vm2931_vm2, %v11855_v39  ;;  %v11859_v39 = vld [vmem:[%s12138_s21 + $0x8b0] sm:$0xff]  }
 0x152   : > { %v12673_v50 = vpop.f32.mrb[52].mxu0  ;;  %v12677_v48 = vpop.f32.mrb[52].mxu1 }
 0x153   : > { %14779 = vst [vmem:[#allocation60_spill] sm:$0xff] %v12673_v50  ;;  %14780 = vst [vmem:[#allocation61_spill] sm:$0xff] %v12677_v48  ;;  %v12679_v12 = vpop.f32.mrb[53].mxu0  ;;  %v12681_v46 = vpop.f32.mrb[53].mxu1 }
 0x154   : > { %14781 = vst [vmem:[#allocation62_spill] sm:$0xff] %v12679_v12  ;;  %14782 = vst [vmem:[#allocation63_spill] sm:$0xff] %v12681_v46  ;;  %v12683_v15 = vpop.f32.mrb[54].mxu0  ;;  %v12685_v22 = vpop.f32.mrb[54].mxu1  ;;  %v11860_v12 = vld [vmem:[%s12138_s21 + $0x298] sm:$0xff]  }
 0x155   : > { %14783 = vst [vmem:[#allocation64_spill] sm:$0xff] %v12683_v15  ;;  %14784 = vst [vmem:[#allocation65_spill] sm:$0xff] %v12685_v22  ;;  %v12687_v36 = vpop.f32.mrb[55].mxu0  ;;  %v12690_v34 = vpop.f32.mrb[55].mxu1  ;;  %v11861_v15 = vld [vmem:[%s12138_s21 + $0x8b8] sm:$0xff]   ;;  %v11862_v22 = vld [vmem:[%s12138_s21 + $0x2a0] sm:$0xff]  }
 0x156   : > { %14785 = vst [vmem:[#allocation66_spill] sm:$0xff] %v12687_v36  ;;  %14786 = vst [vmem:[#allocation67_spill] sm:$0xff] %v12690_v34 }
 0x157   : > { %11054 = vmatmul.mubr.msk.bf16.gmra.mrb[160].mxu0 %vm2931_vm2, %v11856_v51  ;;  %11446 = vmatmul.mubr.msk.bf16.gmra.mrb[160].mxu1 %vm2931_vm2, %v11857_v3 }
 0x158   : > { %11057 = vmatprep.mubr.msk.bf16.mxu0 %vm2931_vm2, %v11858_v38  ;;  %11449 = vmatprep.mubr.msk.bf16.mxu1 %vm2931_vm2, %v11859_v39  ;;  %v11863_v39 = vld [vmem:[%s12138_s21 + $0x8c0] sm:$0xff]  }
 0x15a   : > { %v12697_v46 = vpop.f32.mrb[56].mxu0  ;;  %v12701_v36 = vpop.f32.mrb[56].mxu1 }
 0x15b   : > { %14787 = vst [vmem:[#allocation68_spill] sm:$0xff] %v12697_v46  ;;  %14788 = vst [vmem:[#allocation69_spill] sm:$0xff] %v12701_v36  ;;  %v12703_v48 = vpop.f32.mrb[57].mxu0  ;;  %v12705_v34 = vpop.f32.mrb[57].mxu1 }
 0x15c   : > { %14789 = vst [vmem:[#allocation70_spill] sm:$0xff] %v12703_v48  ;;  %14790 = vst [vmem:[#allocation71_spill] sm:$0xff] %v12705_v34  ;;  %v12707_v51 = vpop.f32.mrb[58].mxu0  ;;  %v12709_v3 = vpop.f32.mrb[58].mxu1  ;;  %v11864_v48 = vld [vmem:[%s12138_s21 + $0x2a8] sm:$0xff]  }
 0x15d   : > { %14791 = vst [vmem:[#allocation72_spill] sm:$0xff] %v12707_v51  ;;  %14792 = vst [vmem:[#allocation73_spill] sm:$0xff] %v12709_v3  ;;  %v12711_v38 = vpop.f32.mrb[59].mxu0  ;;  %v12714_v50 = vpop.f32.mrb[59].mxu1  ;;  %v11865_v51 = vld [vmem:[%s12138_s21 + $0x8c8] sm:$0xff]   ;;  %v11866_v3 = vld [vmem:[%s12138_s21 + $0x2b0] sm:$0xff]  }
 0x15e   : > { %14793 = vst [vmem:[#allocation74_spill] sm:$0xff] %v12711_v38  ;;  %14794 = vst [vmem:[#allocation75_spill] sm:$0xff] %v12714_v50 }
 0x15f   : > { %11058 = vmatmul.mubr.msk.bf16.gmra.mrb[164].mxu0 %vm2931_vm2, %v11860_v12  ;;  %11450 = vmatmul.mubr.msk.bf16.gmra.mrb[164].mxu1 %vm2931_vm2, %v11861_v15 }
 0x160   : > { %11061 = vmatprep.mubr.msk.bf16.mxu0 %vm2931_vm2, %v11862_v22  ;;  %11453 = vmatprep.mubr.msk.bf16.mxu1 %vm2931_vm2, %v11863_v39  ;;  %v11867_v39 = vld [vmem:[%s12138_s21 + $0x8d0] sm:$0xff]  }
 0x162   : > { %v12721_v34 = vpop.f32.mrb[60].mxu0  ;;  %v12725_v38 = vpop.f32.mrb[60].mxu1 }
 0x163   : > { %14795 = vst [vmem:[#allocation76_spill] sm:$0xff] %v12721_v34  ;;  %14796 = vst [vmem:[#allocation77_spill] sm:$0xff] %v12725_v38  ;;  %v12727_v36 = vpop.f32.mrb[61].mxu0  ;;  %v12729_v50 = vpop.f32.mrb[61].mxu1 }
 0x164   : > { %14797 = vst [vmem:[#allocation78_spill] sm:$0xff] %v12727_v36  ;;  %14798 = vst [vmem:[#allocation79_spill] sm:$0xff] %v12729_v50  ;;  %v12731_v12 = vpop.f32.mrb[62].mxu0  ;;  %v12733_v15 = vpop.f32.mrb[62].mxu1  ;;  %v11868_v36 = vld [vmem:[%s12138_s21 + $0x2b8] sm:$0xff]  }
 0x165   : > { %14799 = vst [vmem:[#allocation80_spill] sm:$0xff] %v12731_v12  ;;  %14800 = vst [vmem:[#allocation81_spill] sm:$0xff] %v12733_v15  ;;  %v12735_v22 = vpop.f32.mrb[63].mxu0  ;;  %v12738_v46 = vpop.f32.mrb[63].mxu1  ;;  %v11869_v12 = vld [vmem:[%s12138_s21 + $0x8d8] sm:$0xff]   ;;  %v11870_v15 = vld [vmem:[%s12138_s21 + $0x2c0] sm:$0xff]  }
 0x166   : > { %14801 = vst [vmem:[#allocation82_spill] sm:$0xff] %v12735_v22  ;;  %14802 = vst [vmem:[#allocation83_spill] sm:$0xff] %v12738_v46 }
 0x167   : > { %11062 = vmatmul.mubr.msk.bf16.gmra.mrb[168].mxu0 %vm2931_vm2, %v11864_v48  ;;  %11454 = vmatmul.mubr.msk.bf16.gmra.mrb[168].mxu1 %vm2931_vm2, %v11865_v51 }
 0x168   : > { %11065 = vmatprep.mubr.msk.bf16.mxu0 %vm2931_vm2, %v11866_v3  ;;  %11457 = vmatprep.mubr.msk.bf16.mxu1 %vm2931_vm2, %v11867_v39  ;;  %v11871_v39 = vld [vmem:[%s12138_s21 + $0x8e0] sm:$0xff]  }
 0x16a   : > { %v12745_v50 = vpop.f32.mrb[64].mxu0  ;;  %v12749_v22 = vpop.f32.mrb[64].mxu1 }
 0x16b   : > { %14803 = vst [vmem:[#allocation84_spill] sm:$0xff] %v12745_v50  ;;  %14804 = vst [vmem:[#allocation85_spill] sm:$0xff] %v12749_v22  ;;  %v12751_v38 = vpop.f32.mrb[65].mxu0  ;;  %v12753_v46 = vpop.f32.mrb[65].mxu1 }
 0x16c   : > { %14805 = vst [vmem:[#allocation86_spill] sm:$0xff] %v12751_v38  ;;  %14806 = vst [vmem:[#allocation87_spill] sm:$0xff] %v12753_v46  ;;  %v12755_v48 = vpop.f32.mrb[66].mxu0  ;;  %v12757_v51 = vpop.f32.mrb[66].mxu1  ;;  %v11872_v38 = vld [vmem:[%s12138_s21 + $0x2c8] sm:$0xff]  }
 0x16d   : > { %14807 = vst [vmem:[#allocation88_spill] sm:$0xff] %v12755_v48  ;;  %14808 = vst [vmem:[#allocation89_spill] sm:$0xff] %v12757_v51  ;;  %v12759_v3 = vpop.f32.mrb[67].mxu0  ;;  %v12762_v34 = vpop.f32.mrb[67].mxu1  ;;  %v11873_v48 = vld [vmem:[%s12138_s21 + $0x8e8] sm:$0xff]   ;;  %v11874_v51 = vld [vmem:[%s12138_s21 + $0x2d0] sm:$0xff]  }
 0x16e   : > { %14809 = vst [vmem:[#allocation90_spill] sm:$0xff] %v12759_v3  ;;  %14810 = vst [vmem:[#allocation91_spill] sm:$0xff] %v12762_v34 }
 0x16f   : > { %11066 = vmatmul.mubr.msk.bf16.gmra.mrb[172].mxu0 %vm2931_vm2, %v11868_v36  ;;  %11458 = vmatmul.mubr.msk.bf16.gmra.mrb[172].mxu1 %vm2931_vm2, %v11869_v12 }
 0x170   : > { %11069 = vmatprep.mubr.msk.bf16.mxu0 %vm2931_vm2, %v11870_v15  ;;  %11461 = vmatprep.mubr.msk.bf16.mxu1 %vm2931_vm2, %v11871_v39  ;;  %v11875_v39 = vld [vmem:[%s12138_s21 + $0x8f0] sm:$0xff]  }
 0x172   : > { %v12769_v46 = vpop.f32.mrb[68].mxu0  ;;  %v12773_v22 = vpop.f32.mrb[68].mxu1 }
 0x173   : > { %14811 = vst [vmem:[#allocation92_spill] sm:$0xff] %v12769_v46  ;;  %14812 = vst [vmem:[#allocation93_spill] sm:$0xff] %v12773_v22  ;;  %v12775_v3 = vpop.f32.mrb[69].mxu0  ;;  %v12777_v50 = vpop.f32.mrb[69].mxu1 }
 0x174   : > { %14813 = vst [vmem:[#allocation94_spill] sm:$0xff] %v12775_v3  ;;  %14814 = vst [vmem:[#allocation95_spill] sm:$0xff] %v12777_v50  ;;  %v12779_v36 = vpop.f32.mrb[70].mxu0  ;;  %v12781_v12 = vpop.f32.mrb[70].mxu1 }
 0x175   : > { %14815 = vst [vmem:[#allocation96_spill] sm:$0xff] %v12779_v36  ;;  %14816 = vst [vmem:[#allocation97_spill] sm:$0xff] %v12781_v12  ;;  %v12783_v15 = vpop.f32.mrb[71].mxu0  ;;  %v12786_v46 = vpop.f32.mrb[71].mxu1  ;;  %v11876_v36 = vld [vmem:[%s12138_s21 + $0x2d8] sm:$0xff]  }
 0x176   : > { %14817 = vst [vmem:[#allocation98_spill] sm:$0xff] %v12783_v15  ;;  %14818 = vst [vmem:[#allocation99_spill] sm:$0xff] %v12786_v46  ;;  %v11877_v46 = vld [vmem:[%s12138_s21 + $0x8f8] sm:$0xff]  }
 0x177   : > { %11070 = vmatmul.mubr.msk.bf16.gmra.mrb[176].mxu0 %vm2931_vm2, %v11872_v38  ;;  %11462 = vmatmul.mubr.msk.bf16.gmra.mrb[176].mxu1 %vm2931_vm2, %v11873_v48  ;;  %v11878_v38 = vld [vmem:[%s12138_s21 + $0x2e0] sm:$0xff]  }
 0x178   : > { %11073 = vmatprep.mubr.msk.bf16.mxu0 %vm2931_vm2, %v11874_v51  ;;  %11465 = vmatprep.mubr.msk.bf16.mxu1 %vm2931_vm2, %v11875_v39  ;;  %v11879_v39 = vld [vmem:[%s12138_s21 + $0x900] sm:$0xff]  }
 0x17a   : > { %v12792_v50 = vpop.f32.mrb[72].mxu0  ;;  %v12795_v3 = vpop.f32.mrb[72].mxu1 }
 0x17b   : > { %14819 = vst [vmem:[#allocation100_spill] sm:$0xff] %v12792_v50  ;;  %14820 = vst [vmem:[#allocation101_spill] sm:$0xff] %v12795_v3  ;;  %v12797_v12 = vpop.f32.mrb[73].mxu0  ;;  %v12799_v15 = vpop.f32.mrb[73].mxu1 }
 0x17c   : > { %14821 = vst [vmem:[#allocation102_spill] sm:$0xff] %v12797_v12  ;;  %14822 = vst [vmem:[#allocation103_spill] sm:$0xff] %v12799_v15  ;;  %v12801_v22 = vpop.f32.mrb[74].mxu0  ;;  %v12805_v48 = vpop.f32.mrb[74].mxu1 }
 0x17d   : > { %14823 = vst [vmem:[#allocation104_spill] sm:$0xff] %v12801_v22  ;;  %14824 = vst [vmem:[#allocation105_spill] sm:$0xff] %v12805_v48  ;;  %v12807_v51 = vpop.f32.mrb[75].mxu0  ;;  %v12810_v50 = vpop.f32.mrb[75].mxu1  ;;  %v11880_v48 = vld [vmem:[%s12138_s21 + $0x2e8] sm:$0xff]  }
 0x17e   : > { %14825 = vst [vmem:[#allocation106_spill] sm:$0xff] %v12807_v51  ;;  %14826 = vst [vmem:[#allocation107_spill] sm:$0xff] %v12810_v50  ;;  %v11881_v50 = vld [vmem:[%s12138_s21 + $0x908] sm:$0xff]  }
 0x17f   : > { %11074 = vmatmul.mubr.msk.bf16.gmra.mrb[180].mxu0 %vm2931_vm2, %v11876_v36  ;;  %11466 = vmatmul.mubr.msk.bf16.gmra.mrb[180].mxu1 %vm2931_vm2, %v11877_v46  ;;  %v11882_v36 = vld [vmem:[%s12138_s21 + $0x2f0] sm:$0xff]  }
 0x180   : > { %11077 = vmatprep.mubr.msk.bf16.mxu0 %vm2931_vm2, %v11878_v38  ;;  %11469 = vmatprep.mubr.msk.bf16.mxu1 %vm2931_vm2, %v11879_v39  ;;  %v11883_v39 = vld [vmem:[%s12138_s21 + $0x910] sm:$0xff]  }
 0x182   : > { %v12816_v22 = vpop.f32.mrb[76].mxu0  ;;  %v12818_v15 = vpop.f32.mrb[76].mxu1 }
 0x183   : > { %14827 = vst [vmem:[#allocation108_spill] sm:$0xff] %v12816_v22  ;;  %14828 = vst [vmem:[#allocation109_spill] sm:$0xff] %v12818_v15  ;;  %v12820_v12 = vpop.f32.mrb[77].mxu0  ;;  %v12823_v51 = vpop.f32.mrb[77].mxu1 }
 0x184   : > { %14829 = vst [vmem:[#allocation110_spill] sm:$0xff] %v12820_v12  ;;  %14830 = vst [vmem:[#allocation111_spill] sm:$0xff] %v12823_v51  ;;  %v12825_v3 = vpop.f32.mrb[78].mxu0  ;;  %v12829_v46 = vpop.f32.mrb[78].mxu1 }
 0x185   : > { %14831 = vst [vmem:[#allocation112_spill] sm:$0xff] %v12825_v3  ;;  %14832 = vst [vmem:[#allocation113_spill] sm:$0xff] %v12829_v46  ;;  %v12831_v38 = vpop.f32.mrb[79].mxu0  ;;  %v12834_v22 = vpop.f32.mrb[79].mxu1  ;;  %v11884_v46 = vld [vmem:[%s12138_s21 + $0x2f8] sm:$0xff]  }
 0x186   : > { %14833 = vst [vmem:[#allocation114_spill] sm:$0xff] %v12831_v38  ;;  %14834 = vst [vmem:[#allocation115_spill] sm:$0xff] %v12834_v22  ;;  %v11885_v22 = vld [vmem:[%s12138_s21 + $0x918] sm:$0xff]  }
 0x187   : > { %11078 = vmatmul.mubr.msk.bf16.gmra.mrb[184].mxu0 %vm2931_vm2, %v11880_v48  ;;  %11470 = vmatmul.mubr.msk.bf16.gmra.mrb[184].mxu1 %vm2931_vm2, %v11881_v50  ;;  %v11886_v48 = vld [vmem:[%s12138_s21 + $0x300] sm:$0xff]  }
 0x188   : > { %11081 = vmatprep.mubr.msk.bf16.mxu0 %vm2931_vm2, %v11882_v36  ;;  %11473 = vmatprep.mubr.msk.bf16.mxu1 %vm2931_vm2, %v11883_v39  ;;  %v11887_v39 = vld [vmem:[%s12138_s21 + $0x920] sm:$0xff]  }
 0x18a   : > { %v12840_v3 = vpop.f32.mrb[80].mxu0  ;;  %v12842_v51 = vpop.f32.mrb[80].mxu1 }
 0x18b   : > { %14835 = vst [vmem:[#allocation116_spill] sm:$0xff] %v12840_v3  ;;  %14836 = vst [vmem:[#allocation117_spill] sm:$0xff] %v12842_v51  ;;  %v12844_v12 = vpop.f32.mrb[81].mxu0  ;;  %v12847_v38 = vpop.f32.mrb[81].mxu1 }
 0x18c   : > { %14837 = vst [vmem:[#allocation118_spill] sm:$0xff] %v12844_v12  ;;  %14838 = vst [vmem:[#allocation119_spill] sm:$0xff] %v12847_v38  ;;  %v12849_v15 = vpop.f32.mrb[82].mxu0  ;;  %v12853_v50 = vpop.f32.mrb[82].mxu1 }
 0x18d   : > { %14839 = vst [vmem:[#allocation120_spill] sm:$0xff] %v12849_v15  ;;  %14840 = vst [vmem:[#allocation121_spill] sm:$0xff] %v12853_v50  ;;  %v12855_v36 = vpop.f32.mrb[83].mxu0  ;;  %v12858_v3 = vpop.f32.mrb[83].mxu1  ;;  %v11888_v50 = vld [vmem:[%s12138_s21 + $0x308] sm:$0xff]  }
 0x18e   : > { %14841 = vst [vmem:[#allocation122_spill] sm:$0xff] %v12855_v36  ;;  %14842 = vst [vmem:[#allocation123_spill] sm:$0xff] %v12858_v3  ;;  %v11889_v3 = vld [vmem:[%s12138_s21 + $0x928] sm:$0xff]  }
 0x18f   : > { %11082 = vmatmul.mubr.msk.bf16.gmra.mrb[188].mxu0 %vm2931_vm2, %v11884_v46  ;;  %11474 = vmatmul.mubr.msk.bf16.gmra.mrb[188].mxu1 %vm2931_vm2, %v11885_v22  ;;  %v11890_v46 = vld [vmem:[%s12138_s21 + $0x310] sm:$0xff]  }
 0x190   : > { %11085 = vmatprep.mubr.msk.bf16.mxu0 %vm2931_vm2, %v11886_v48  ;;  %11477 = vmatprep.mubr.msk.bf16.mxu1 %vm2931_vm2, %v11887_v39  ;;  %v11891_v39 = vld [vmem:[%s12138_s21 + $0x930] sm:$0xff]  }
 0x192   : > { %v12864_v15 = vpop.f32.mrb[84].mxu0  ;;  %v12866_v38 = vpop.f32.mrb[84].mxu1 }
 0x193   : > { %14843 = vst [vmem:[#allocation124_spill] sm:$0xff] %v12864_v15  ;;  %14844 = vst [vmem:[#allocation125_spill] sm:$0xff] %v12866_v38  ;;  %v12868_v12 = vpop.f32.mrb[85].mxu0  ;;  %v12871_v36 = vpop.f32.mrb[85].mxu1 }
 0x194   : > { %14845 = vst [vmem:[#allocation126_spill] sm:$0xff] %v12868_v12  ;;  %14846 = vst [vmem:[#allocation127_spill] sm:$0xff] %v12871_v36  ;;  %v12873_v51 = vpop.f32.mrb[86].mxu0  ;;  %v12877_v22 = vpop.f32.mrb[86].mxu1 }
 0x195   : > { %14847 = vst [vmem:[#allocation128_spill] sm:$0xff] %v12873_v51  ;;  %14848 = vst [vmem:[#allocation129_spill] sm:$0xff] %v12877_v22  ;;  %v12879_v48 = vpop.f32.mrb[87].mxu0  ;;  %v12882_v15 = vpop.f32.mrb[87].mxu1  ;;  %v11892_v22 = vld [vmem:[%s12138_s21 + $0x318] sm:$0xff]  }
 0x196   : > { %14849 = vst [vmem:[#allocation130_spill] sm:$0xff] %v12879_v48  ;;  %14850 = vst [vmem:[#allocation131_spill] sm:$0xff] %v12882_v15  ;;  %v11893_v15 = vld [vmem:[%s12138_s21 + $0x938] sm:$0xff]  }
 0x197   : > { %11086 = vmatmul.mubr.msk.bf16.gmra.mrb[192].mxu0 %vm2931_vm2, %v11888_v50  ;;  %11478 = vmatmul.mubr.msk.bf16.gmra.mrb[192].mxu1 %vm2931_vm2, %v11889_v3  ;;  %v11894_v50 = vld [vmem:[%s12138_s21 + $0x320] sm:$0xff]  }
 0x198   : > { %11089 = vmatprep.mubr.msk.bf16.mxu0 %vm2931_vm2, %v11890_v46  ;;  %11481 = vmatprep.mubr.msk.bf16.mxu1 %vm2931_vm2, %v11891_v39  ;;  %v11895_v39 = vld [vmem:[%s12138_s21 + $0x940] sm:$0xff]  }
 0x19a   : > { %v12888_v51 = vpop.f32.mrb[88].mxu0  ;;  %v12890_v36 = vpop.f32.mrb[88].mxu1 }
 0x19b   : > { %14851 = vst [vmem:[#allocation132_spill] sm:$0xff] %v12888_v51  ;;  %14852 = vst [vmem:[#allocation133_spill] sm:$0xff] %v12890_v36  ;;  %v12892_v12 = vpop.f32.mrb[89].mxu0  ;;  %v12895_v48 = vpop.f32.mrb[89].mxu1 }
 0x19c   : > { %14853 = vst [vmem:[#allocation134_spill] sm:$0xff] %v12892_v12  ;;  %14854 = vst [vmem:[#allocation135_spill] sm:$0xff] %v12895_v48  ;;  %v12897_v38 = vpop.f32.mrb[90].mxu0  ;;  %v12901_v3 = vpop.f32.mrb[90].mxu1 }
 0x19d   : > { %14855 = vst [vmem:[#allocation136_spill] sm:$0xff] %v12897_v38  ;;  %14856 = vst [vmem:[#allocation137_spill] sm:$0xff] %v12901_v3  ;;  %v12903_v46 = vpop.f32.mrb[91].mxu0  ;;  %v12906_v51 = vpop.f32.mrb[91].mxu1  ;;  %v11896_v3 = vld [vmem:[%s12138_s21 + $0x328] sm:$0xff]  }
 0x19e   : > { %14857 = vst [vmem:[#allocation138_spill] sm:$0xff] %v12903_v46  ;;  %14858 = vst [vmem:[#allocation139_spill] sm:$0xff] %v12906_v51  ;;  %v11897_v51 = vld [vmem:[%s12138_s21 + $0x948] sm:$0xff]  }
 0x19f   : > { %11090 = vmatmul.mubr.msk.bf16.gmra.mrb[196].mxu0 %vm2931_vm2, %v11892_v22  ;;  %11482 = vmatmul.mubr.msk.bf16.gmra.mrb[196].mxu1 %vm2931_vm2, %v11893_v15  ;;  %v11898_v22 = vld [vmem:[%s12138_s21 + $0x330] sm:$0xff]  }
 0x1a0   : > { %11093 = vmatprep.mubr.msk.bf16.mxu0 %vm2931_vm2, %v11894_v50  ;;  %11485 = vmatprep.mubr.msk.bf16.mxu1 %vm2931_vm2, %v11895_v39  ;;  %v11899_v39 = vld [vmem:[%s12138_s21 + $0x950] sm:$0xff]  }
 0x1a2   : > { %v12912_v38 = vpop.f32.mrb[92].mxu0  ;;  %v12914_v48 = vpop.f32.mrb[92].mxu1 }
 0x1a3   : > { %14859 = vst [vmem:[#allocation140_spill] sm:$0xff] %v12912_v38  ;;  %14860 = vst [vmem:[#allocation141_spill] sm:$0xff] %v12914_v48  ;;  %v12916_v12 = vpop.f32.mrb[93].mxu0  ;;  %v12919_v46 = vpop.f32.mrb[93].mxu1 }
 0x1a4   : > { %14861 = vst [vmem:[#allocation142_spill] sm:$0xff] %v12916_v12  ;;  %14862 = vst [vmem:[#allocation143_spill] sm:$0xff] %v12919_v46  ;;  %v12921_v36 = vpop.f32.mrb[94].mxu0  ;;  %v12925_v15 = vpop.f32.mrb[94].mxu1 }
 0x1a5   : > { %14863 = vst [vmem:[#allocation144_spill] sm:$0xff] %v12921_v36  ;;  %14864 = vst [vmem:[#allocation145_spill] sm:$0xff] %v12925_v15  ;;  %v12927_v50 = vpop.f32.mrb[95].mxu0  ;;  %v12930_v38 = vpop.f32.mrb[95].mxu1  ;;  %v11900_v15 = vld [vmem:[%s12138_s21 + $0x338] sm:$0xff]  }
 0x1a6   : > { %14865 = vst [vmem:[#allocation146_spill] sm:$0xff] %v12927_v50  ;;  %14866 = vst [vmem:[#allocation147_spill] sm:$0xff] %v12930_v38  ;;  %v11901_v38 = vld [vmem:[%s12138_s21 + $0x958] sm:$0xff]  }
 0x1a7   : > { %11094 = vmatmul.mubr.msk.bf16.gmra.mrb[200].mxu0 %vm2931_vm2, %v11896_v3  ;;  %11486 = vmatmul.mubr.msk.bf16.gmra.mrb[200].mxu1 %vm2931_vm2, %v11897_v51  ;;  %v11902_v3 = vld [vmem:[%s12138_s21 + $0x340] sm:$0xff]  }
 0x1a8   : > { %11097 = vmatprep.mubr.msk.bf16.mxu0 %vm2931_vm2, %v11898_v22  ;;  %11489 = vmatprep.mubr.msk.bf16.mxu1 %vm2931_vm2, %v11899_v39  ;;  %v11903_v39 = vld [vmem:[%s12138_s21 + $0x960] sm:$0xff]  }
 0x1aa   : > { %v12936_v36 = vpop.f32.mrb[96].mxu0  ;;  %v12938_v46 = vpop.f32.mrb[96].mxu1 }
 0x1ab   : > { %14867 = vst [vmem:[#allocation148_spill] sm:$0xff] %v12936_v36  ;;  %14868 = vst [vmem:[#allocation149_spill] sm:$0xff] %v12938_v46  ;;  %v12940_v12 = vpop.f32.mrb[97].mxu0  ;;  %v12943_v50 = vpop.f32.mrb[97].mxu1 }
 0x1ac   : > { %14869 = vst [vmem:[#allocation150_spill] sm:$0xff] %v12940_v12  ;;  %14870 = vst [vmem:[#allocation151_spill] sm:$0xff] %v12943_v50  ;;  %v12945_v48 = vpop.f32.mrb[98].mxu0  ;;  %v12949_v51 = vpop.f32.mrb[98].mxu1 }
 0x1ad   : > { %14871 = vst [vmem:[#allocation152_spill] sm:$0xff] %v12945_v48  ;;  %14872 = vst [vmem:[#allocation153_spill] sm:$0xff] %v12949_v51  ;;  %v12951_v22 = vpop.f32.mrb[99].mxu0  ;;  %v12954_v36 = vpop.f32.mrb[99].mxu1  ;;  %v11904_v51 = vld [vmem:[%s12138_s21 + $0x348] sm:$0xff]  }
 0x1ae   : > { %14873 = vst [vmem:[#allocation154_spill] sm:$0xff] %v12951_v22  ;;  %14874 = vst [vmem:[#allocation155_spill] sm:$0xff] %v12954_v36  ;;  %v11905_v36 = vld [vmem:[%s12138_s21 + $0x968] sm:$0xff]  }
 0x1af   : > { %11098 = vmatmul.mubr.msk.bf16.gmra.mrb[204].mxu0 %vm2931_vm2, %v11900_v15  ;;  %11490 = vmatmul.mubr.msk.bf16.gmra.mrb[204].mxu1 %vm2931_vm2, %v11901_v38  ;;  %v11906_v15 = vld [vmem:[%s12138_s21 + $0x350] sm:$0xff]  }
 0x1b0   : > { %11101 = vmatprep.mubr.msk.bf16.mxu0 %vm2931_vm2, %v11902_v3  ;;  %11493 = vmatprep.mubr.msk.bf16.mxu1 %vm2931_vm2, %v11903_v39  ;;  %v11907_v39 = vld [vmem:[%s12138_s21 + $0x970] sm:$0xff]  }
 0x1b2   : > { %v12960_v48 = vpop.f32.mrb[100].mxu0  ;;  %v12962_v50 = vpop.f32.mrb[100].mxu1 }
 0x1b3   : > { %14875 = vst [vmem:[#allocation156_spill] sm:$0xff] %v12960_v48  ;;  %14876 = vst [vmem:[#allocation157_spill] sm:$0xff] %v12962_v50  ;;  %v12964_v12 = vpop.f32.mrb[101].mxu0  ;;  %v12967_v22 = vpop.f32.mrb[101].mxu1 }
 0x1b4   : > { %14877 = vst [vmem:[#allocation158_spill] sm:$0xff] %v12964_v12  ;;  %14878 = vst [vmem:[#allocation159_spill] sm:$0xff] %v12967_v22  ;;  %v12969_v46 = vpop.f32.mrb[102].mxu0  ;;  %v12973_v38 = vpop.f32.mrb[102].mxu1 }
 0x1b5   : > { %14879 = vst [vmem:[#allocation160_spill] sm:$0xff] %v12969_v46  ;;  %14880 = vst [vmem:[#allocation161_spill] sm:$0xff] %v12973_v38  ;;  %v12975_v3 = vpop.f32.mrb[103].mxu0  ;;  %v12978_v48 = vpop.f32.mrb[103].mxu1  ;;  %v11908_v38 = vld [vmem:[%s12138_s21 + $0x358] sm:$0xff]  }
 0x1b6   : > { %14881 = vst [vmem:[#allocation162_spill] sm:$0xff] %v12975_v3  ;;  %14882 = vst [vmem:[#allocation163_spill] sm:$0xff] %v12978_v48  ;;  %v11909_v48 = vld [vmem:[%s12138_s21 + $0x978] sm:$0xff]  }
 0x1b7   : > { %11102 = vmatmul.mubr.msk.bf16.gmra.mrb[208].mxu0 %vm2931_vm2, %v11904_v51  ;;  %11494 = vmatmul.mubr.msk.bf16.gmra.mrb[208].mxu1 %vm2931_vm2, %v11905_v36  ;;  %v11910_v51 = vld [vmem:[%s12138_s21 + $0x360] sm:$0xff]  }
 0x1b8   : > { %11105 = vmatprep.mubr.msk.bf16.mxu0 %vm2931_vm2, %v11906_v15  ;;  %11497 = vmatprep.mubr.msk.bf16.mxu1 %vm2931_vm2, %v11907_v39  ;;  %v11911_v39 = vld [vmem:[%s12138_s21 + $0x980] sm:$0xff]  }
 0x1ba   : > { %v12984_v46 = vpop.f32.mrb[104].mxu0  ;;  %v12986_v22 = vpop.f32.mrb[104].mxu1 }
 0x1bb   : > { %14883 = vst [vmem:[#allocation164_spill] sm:$0xff] %v12984_v46  ;;  %14884 = vst [vmem:[#allocation165_spill] sm:$0xff] %v12986_v22  ;;  %v12988_v12 = vpop.f32.mrb[105].mxu0  ;;  %v12991_v3 = vpop.f32.mrb[105].mxu1 }
 0x1bc   : > { %14885 = vst [vmem:[#allocation166_spill] sm:$0xff] %v12988_v12  ;;  %14886 = vst [vmem:[#allocation167_spill] sm:$0xff] %v12991_v3  ;;  %v12993_v50 = vpop.f32.mrb[106].mxu0  ;;  %v12997_v36 = vpop.f32.mrb[106].mxu1 }
 0x1bd   : > { %14887 = vst [vmem:[#allocation168_spill] sm:$0xff] %v12993_v50  ;;  %14888 = vst [vmem:[#allocation169_spill] sm:$0xff] %v12997_v36  ;;  %v12999_v15 = vpop.f32.mrb[107].mxu0  ;;  %v13002_v46 = vpop.f32.mrb[107].mxu1  ;;  %v11912_v36 = vld [vmem:[%s12138_s21 + $0x368] sm:$0xff]  }
 0x1be   : > { %14889 = vst [vmem:[#allocation170_spill] sm:$0xff] %v12999_v15  ;;  %14890 = vst [vmem:[#allocation171_spill] sm:$0xff] %v13002_v46  ;;  %v11913_v46 = vld [vmem:[%s12138_s21 + $0x988] sm:$0xff]  }
 0x1bf   : > { %11106 = vmatmul.mubr.msk.bf16.gmra.mrb[212].mxu0 %vm2931_vm2, %v11908_v38  ;;  %11498 = vmatmul.mubr.msk.bf16.gmra.mrb[212].mxu1 %vm2931_vm2, %v11909_v48  ;;  %v11914_v38 = vld [vmem:[%s12138_s21 + $0x370] sm:$0xff]  }
 0x1c0   : > { %11109 = vmatprep.mubr.msk.bf16.mxu0 %vm2931_vm2, %v11910_v51  ;;  %11501 = vmatprep.mubr.msk.bf16.mxu1 %vm2931_vm2, %v11911_v39  ;;  %v11915_v39 = vld [vmem:[%s12138_s21 + $0x990] sm:$0xff]  }
 0x1c2   : > { %v13008_v50 = vpop.f32.mrb[108].mxu0  ;;  %v13010_v3 = vpop.f32.mrb[108].mxu1 }
 0x1c3   : > { %14891 = vst [vmem:[#allocation172_spill] sm:$0xff] %v13008_v50  ;;  %14892 = vst [vmem:[#allocation173_spill] sm:$0xff] %v13010_v3  ;;  %v13012_v12 = vpop.f32.mrb[109].mxu0  ;;  %v13015_v15 = vpop.f32.mrb[109].mxu1 }
 0x1c4   : > { %14893 = vst [vmem:[#allocation174_spill] sm:$0xff] %v13012_v12  ;;  %14894 = vst [vmem:[#allocation175_spill] sm:$0xff] %v13015_v15  ;;  %v13017_v22 = vpop.f32.mrb[110].mxu0  ;;  %v13021_v48 = vpop.f32.mrb[110].mxu1 }
 0x1c5   : > { %14895 = vst [vmem:[#allocation176_spill] sm:$0xff] %v13017_v22  ;;  %14896 = vst [vmem:[#allocation177_spill] sm:$0xff] %v13021_v48  ;;  %v13023_v51 = vpop.f32.mrb[111].mxu0  ;;  %v13026_v50 = vpop.f32.mrb[111].mxu1  ;;  %v11916_v48 = vld [vmem:[%s12138_s21 + $0x378] sm:$0xff]  }
 0x1c6   : > { %14897 = vst [vmem:[#allocation178_spill] sm:$0xff] %v13023_v51  ;;  %14898 = vst [vmem:[#allocation179_spill] sm:$0xff] %v13026_v50  ;;  %v11917_v50 = vld [vmem:[%s12138_s21 + $0x998] sm:$0xff]  }
 0x1c7   : > { %11110 = vmatmul.mubr.msk.bf16.gmra.mrb[216].mxu0 %vm2931_vm2, %v11912_v36  ;;  %11502 = vmatmul.mubr.msk.bf16.gmra.mrb[216].mxu1 %vm2931_vm2, %v11913_v46  ;;  %v11918_v36 = vld [vmem:[%s12138_s21 + $0x380] sm:$0xff]  }
 0x1c8   : > { %11113 = vmatprep.mubr.msk.bf16.mxu0 %vm2931_vm2, %v11914_v38  ;;  %11505 = vmatprep.mubr.msk.bf16.mxu1 %vm2931_vm2, %v11915_v39  ;;  %v11919_v39 = vld [vmem:[%s12138_s21 + $0x9a0] sm:$0xff]  }
 0x1ca   : > { %v13032_v22 = vpop.f32.mrb[112].mxu0  ;;  %v13034_v15 = vpop.f32.mrb[112].mxu1 }
 0x1cb   : > { %14899 = vst [vmem:[#allocation180_spill] sm:$0xff] %v13032_v22  ;;  %14900 = vst [vmem:[#allocation181_spill] sm:$0xff] %v13034_v15  ;;  %v13036_v12 = vpop.f32.mrb[113].mxu0  ;;  %v13039_v51 = vpop.f32.mrb[113].mxu1 }
 0x1cc   : > { %14901 = vst [vmem:[#allocation182_spill] sm:$0xff] %v13036_v12  ;;  %14902 = vst [vmem:[#allocation183_spill] sm:$0xff] %v13039_v51  ;;  %v13041_v3 = vpop.f32.mrb[114].mxu0  ;;  %v13045_v46 = vpop.f32.mrb[114].mxu1 }
 0x1cd   : > { %14903 = vst [vmem:[#allocation184_spill] sm:$0xff] %v13041_v3  ;;  %14904 = vst [vmem:[#allocation185_spill] sm:$0xff] %v13045_v46  ;;  %v13047_v38 = vpop.f32.mrb[115].mxu0  ;;  %v13050_v22 = vpop.f32.mrb[115].mxu1  ;;  %v11920_v46 = vld [vmem:[%s12138_s21 + $0x388] sm:$0xff]  }
 0x1ce   : > { %14905 = vst [vmem:[#allocation186_spill] sm:$0xff] %v13047_v38  ;;  %14906 = vst [vmem:[#allocation187_spill] sm:$0xff] %v13050_v22  ;;  %v11921_v22 = vld [vmem:[%s12138_s21 + $0x9a8] sm:$0xff]  }
 0x1cf   : > { %11114 = vmatmul.mubr.msk.bf16.gmra.mrb[220].mxu0 %vm2931_vm2, %v11916_v48  ;;  %11506 = vmatmul.mubr.msk.bf16.gmra.mrb[220].mxu1 %vm2931_vm2, %v11917_v50  ;;  %v11922_v48 = vld [vmem:[%s12138_s21 + $0x390] sm:$0xff]  }
 0x1d0   : > { %11117 = vmatprep.mubr.msk.bf16.mxu0 %vm2931_vm2, %v11918_v36  ;;  %11509 = vmatprep.mubr.msk.bf16.mxu1 %vm2931_vm2, %v11919_v39  ;;  %v11923_v39 = vld [vmem:[%s12138_s21 + $0x9b0] sm:$0xff]  }
 0x1d2   : > { %v13056_v3 = vpop.f32.mrb[116].mxu0  ;;  %v13058_v51 = vpop.f32.mrb[116].mxu1 }
 0x1d3   : > { %14907 = vst [vmem:[#allocation188_spill] sm:$0xff] %v13056_v3  ;;  %14908 = vst [vmem:[#allocation189_spill] sm:$0xff] %v13058_v51  ;;  %v13060_v12 = vpop.f32.mrb[117].mxu0  ;;  %v13063_v38 = vpop.f32.mrb[117].mxu1 }
 0x1d4   : > { %14909 = vst [vmem:[#allocation190_spill] sm:$0xff] %v13060_v12  ;;  %14910 = vst [vmem:[#allocation191_spill] sm:$0xff] %v13063_v38  ;;  %v13065_v15 = vpop.f32.mrb[118].mxu0  ;;  %v13069_v50 = vpop.f32.mrb[118].mxu1 }
 0x1d5   : > { %14911 = vst [vmem:[#allocation192_spill] sm:$0xff] %v13065_v15  ;;  %14912 = vst [vmem:[#allocation193_spill] sm:$0xff] %v13069_v50  ;;  %v13071_v36 = vpop.f32.mrb[119].mxu0  ;;  %v13074_v3 = vpop.f32.mrb[119].mxu1  ;;  %v11924_v50 = vld [vmem:[%s12138_s21 + $0x398] sm:$0xff]  }
 0x1d6   : > { %14913 = vst [vmem:[#allocation194_spill] sm:$0xff] %v13071_v36  ;;  %14914 = vst [vmem:[#allocation195_spill] sm:$0xff] %v13074_v3  ;;  %v11925_v3 = vld [vmem:[%s12138_s21 + $0x9b8] sm:$0xff]  }
 0x1d7   : > { %11118 = vmatmul.mubr.msk.bf16.gmra.mrb[224].mxu0 %vm2931_vm2, %v11920_v46  ;;  %11510 = vmatmul.mubr.msk.bf16.gmra.mrb[224].mxu1 %vm2931_vm2, %v11921_v22  ;;  %v11926_v46 = vld [vmem:[%s12138_s21 + $0x3a0] sm:$0xff]  }
 0x1d8   : > { %11121 = vmatprep.mubr.msk.bf16.mxu0 %vm2931_vm2, %v11922_v48  ;;  %11513 = vmatprep.mubr.msk.bf16.mxu1 %vm2931_vm2, %v11923_v39  ;;  %v11927_v39 = vld [vmem:[%s12138_s21 + $0x9c0] sm:$0xff]  }
 0x1da   : > { %v13080_v15 = vpop.f32.mrb[120].mxu0  ;;  %v13082_v38 = vpop.f32.mrb[120].mxu1 }
 0x1db   : > { %14915 = vst [vmem:[#allocation196_spill] sm:$0xff] %v13080_v15  ;;  %14916 = vst [vmem:[#allocation197_spill] sm:$0xff] %v13082_v38  ;;  %v13084_v12 = vpop.f32.mrb[121].mxu0  ;;  %v13087_v36 = vpop.f32.mrb[121].mxu1 }
 0x1dc   : > { %14917 = vst [vmem:[#allocation198_spill] sm:$0xff] %v13084_v12  ;;  %14918 = vst [vmem:[#allocation199_spill] sm:$0xff] %v13087_v36  ;;  %v13089_v51 = vpop.f32.mrb[122].mxu0  ;;  %v13093_v22 = vpop.f32.mrb[122].mxu1 }
 0x1dd   : > { %14919 = vst [vmem:[#allocation200_spill] sm:$0xff] %v13089_v51  ;;  %14920 = vst [vmem:[#allocation201_spill] sm:$0xff] %v13093_v22  ;;  %v13095_v48 = vpop.f32.mrb[123].mxu0  ;;  %v13098_v15 = vpop.f32.mrb[123].mxu1  ;;  %v11928_v22 = vld [vmem:[%s12138_s21 + $0x3a8] sm:$0xff]  }
 0x1de   : > { %14921 = vst [vmem:[#allocation202_spill] sm:$0xff] %v13095_v48  ;;  %14922 = vst [vmem:[#allocation203_spill] sm:$0xff] %v13098_v15  ;;  %v11929_v15 = vld [vmem:[%s12138_s21 + $0x9c8] sm:$0xff]  }
 0x1df   : > { %11122 = vmatmul.mubr.msk.bf16.gmra.mrb[228].mxu0 %vm2931_vm2, %v11924_v50  ;;  %11514 = vmatmul.mubr.msk.bf16.gmra.mrb[228].mxu1 %vm2931_vm2, %v11925_v3  ;;  %v11930_v50 = vld [vmem:[%s12138_s21 + $0x3b0] sm:$0xff]  }
 0x1e0   : > { %11125 = vmatprep.mubr.msk.bf16.mxu0 %vm2931_vm2, %v11926_v46  ;;  %11517 = vmatprep.mubr.msk.bf16.mxu1 %vm2931_vm2, %v11927_v39  ;;  %v11931_v39 = vld [vmem:[%s12138_s21 + $0x9d0] sm:$0xff]  }
 0x1e2   : > { %v13104_v51 = vpop.f32.mrb[124].mxu0  ;;  %v13106_v36 = vpop.f32.mrb[124].mxu1 }
 0x1e3   : > { %14923 = vst [vmem:[#allocation204_spill] sm:$0xff] %v13104_v51  ;;  %14924 = vst [vmem:[#allocation205_spill] sm:$0xff] %v13106_v36  ;;  %v13108_v12 = vpop.f32.mrb[125].mxu0  ;;  %v13111_v48 = vpop.f32.mrb[125].mxu1 }
 0x1e4   : > { %14925 = vst [vmem:[#allocation206_spill] sm:$0xff] %v13108_v12  ;;  %14926 = vst [vmem:[#allocation207_spill] sm:$0xff] %v13111_v48  ;;  %v13113_v38 = vpop.f32.mrb[126].mxu0  ;;  %v13117_v3 = vpop.f32.mrb[126].mxu1 }
 0x1e5   : > { %14927 = vst [vmem:[#allocation208_spill] sm:$0xff] %v13113_v38  ;;  %14928 = vst [vmem:[#allocation209_spill] sm:$0xff] %v13117_v3  ;;  %v13119_v46 = vpop.f32.mrb[127].mxu0  ;;  %v13122_v51 = vpop.f32.mrb[127].mxu1  ;;  %v11932_v3 = vld [vmem:[%s12138_s21 + $0x3b8] sm:$0xff]  }
 0x1e6   : > { %14929 = vst [vmem:[#allocation210_spill] sm:$0xff] %v13119_v46  ;;  %14930 = vst [vmem:[#allocation211_spill] sm:$0xff] %v13122_v51  ;;  %v11933_v51 = vld [vmem:[%s12138_s21 + $0x9d8] sm:$0xff]  }
 0x1e7   : > { %11126 = vmatmul.mubr.msk.bf16.gmra.mrb[232].mxu0 %vm2931_vm2, %v11928_v22  ;;  %11518 = vmatmul.mubr.msk.bf16.gmra.mrb[232].mxu1 %vm2931_vm2, %v11929_v15  ;;  %v11934_v22 = vld [vmem:[%s12138_s21 + $0x3c0] sm:$0xff]  }
 0x1e8   : > { %11129 = vmatprep.mubr.msk.bf16.mxu0 %vm2931_vm2, %v11930_v50  ;;  %11521 = vmatprep.mubr.msk.bf16.mxu1 %vm2931_vm2, %v11931_v39  ;;  %v11935_v39 = vld [vmem:[%s12138_s21 + $0x9e0] sm:$0xff]  }
 0x1ea   : > { %v13128_v38 = vpop.f32.mrb[128].mxu0  ;;  %v13130_v48 = vpop.f32.mrb[128].mxu1 }
 0x1eb   : > { %14931 = vst [vmem:[#allocation212_spill] sm:$0xff] %v13128_v38  ;;  %14932 = vst [vmem:[#allocation213_spill] sm:$0xff] %v13130_v48  ;;  %v13132_v12 = vpop.f32.mrb[129].mxu0  ;;  %v13135_v46 = vpop.f32.mrb[129].mxu1 }
 0x1ec   : > { %14933 = vst [vmem:[#allocation214_spill] sm:$0xff] %v13132_v12  ;;  %14934 = vst [vmem:[#allocation215_spill] sm:$0xff] %v13135_v46  ;;  %v13137_v36 = vpop.f32.mrb[130].mxu0  ;;  %v13141_v15 = vpop.f32.mrb[130].mxu1 }
 0x1ed   : > { %14935 = vst [vmem:[#allocation216_spill] sm:$0xff] %v13137_v36  ;;  %14936 = vst [vmem:[#allocation217_spill] sm:$0xff] %v13141_v15  ;;  %v13143_v50 = vpop.f32.mrb[131].mxu0  ;;  %v13146_v38 = vpop.f32.mrb[131].mxu1  ;;  %v11936_v15 = vld [vmem:[%s12138_s21 + $0x3c8] sm:$0xff]  }
 0x1ee   : > { %14937 = vst [vmem:[#allocation218_spill] sm:$0xff] %v13143_v50  ;;  %14938 = vst [vmem:[#allocation219_spill] sm:$0xff] %v13146_v38  ;;  %v11937_v38 = vld [vmem:[%s12138_s21 + $0x9e8] sm:$0xff]  }
 0x1ef   : > { %11130 = vmatmul.mubr.msk.bf16.gmra.mrb[236].mxu0 %vm2931_vm2, %v11932_v3  ;;  %11522 = vmatmul.mubr.msk.bf16.gmra.mrb[236].mxu1 %vm2931_vm2, %v11933_v51  ;;  %v11938_v3 = vld [vmem:[%s12138_s21 + $0x3d0] sm:$0xff]  }
 0x1f0   : > { %11133 = vmatprep.mubr.msk.bf16.mxu0 %vm2931_vm2, %v11934_v22  ;;  %11525 = vmatprep.mubr.msk.bf16.mxu1 %vm2931_vm2, %v11935_v39  ;;  %v11939_v39 = vld [vmem:[%s12138_s21 + $0x9f0] sm:$0xff]  }
 0x1f2   : > { %v13152_v36 = vpop.f32.mrb[132].mxu0  ;;  %v13154_v46 = vpop.f32.mrb[132].mxu1 }
 0x1f3   : > { %14939 = vst [vmem:[#allocation220_spill] sm:$0xff] %v13152_v36  ;;  %14940 = vst [vmem:[#allocation221_spill] sm:$0xff] %v13154_v46  ;;  %v13156_v12 = vpop.f32.mrb[133].mxu0  ;;  %v13159_v50 = vpop.f32.mrb[133].mxu1 }
 0x1f4   : > { %14941 = vst [vmem:[#allocation222_spill] sm:$0xff] %v13156_v12  ;;  %14942 = vst [vmem:[#allocation223_spill] sm:$0xff] %v13159_v50  ;;  %v13161_v48 = vpop.f32.mrb[134].mxu0  ;;  %v13165_v51 = vpop.f32.mrb[134].mxu1 }
 0x1f5   : > { %14943 = vst [vmem:[#allocation224_spill] sm:$0xff] %v13161_v48  ;;  %14944 = vst [vmem:[#allocation225_spill] sm:$0xff] %v13165_v51  ;;  %v13167_v22 = vpop.f32.mrb[135].mxu0  ;;  %v13170_v36 = vpop.f32.mrb[135].mxu1  ;;  %v11940_v51 = vld [vmem:[%s12138_s21 + $0x3d8] sm:$0xff]  }
 0x1f6   : > { %14945 = vst [vmem:[#allocation226_spill] sm:$0xff] %v13167_v22  ;;  %14946 = vst [vmem:[#allocation227_spill] sm:$0xff] %v13170_v36  ;;  %v11941_v36 = vld [vmem:[%s12138_s21 + $0x9f8] sm:$0xff]  }
 0x1f7   : > { %11134 = vmatmul.mubr.msk.bf16.gmra.mrb[240].mxu0 %vm2931_vm2, %v11936_v15  ;;  %11526 = vmatmul.mubr.msk.bf16.gmra.mrb[240].mxu1 %vm2931_vm2, %v11937_v38  ;;  %v11942_v15 = vld [vmem:[%s12138_s21 + $0x3e0] sm:$0xff]  }
 0x1f8   : > { %11137 = vmatprep.mubr.msk.bf16.mxu0 %vm2931_vm2, %v11938_v3  ;;  %11529 = vmatprep.mubr.msk.bf16.mxu1 %vm2931_vm2, %v11939_v39  ;;  %v11943_v39 = vld [vmem:[%s12138_s21 + $0xa00] sm:$0xff]  }
 0x1fa   : > { %v13176_v48 = vpop.f32.mrb[136].mxu0  ;;  %v13178_v50 = vpop.f32.mrb[136].mxu1 }
 0x1fb   : > { %14947 = vst [vmem:[#allocation228_spill] sm:$0xff] %v13176_v48  ;;  %14948 = vst [vmem:[#allocation229_spill] sm:$0xff] %v13178_v50  ;;  %v13180_v12 = vpop.f32.mrb[137].mxu0  ;;  %v13183_v22 = vpop.f32.mrb[137].mxu1 }
 0x1fc   : > { %14949 = vst [vmem:[#allocation230_spill] sm:$0xff] %v13180_v12  ;;  %14950 = vst [vmem:[#allocation231_spill] sm:$0xff] %v13183_v22  ;;  %v13185_v46 = vpop.f32.mrb[138].mxu0  ;;  %v13189_v38 = vpop.f32.mrb[138].mxu1 }
 0x1fd   : > { %14951 = vst [vmem:[#allocation232_spill] sm:$0xff] %v13185_v46  ;;  %14952 = vst [vmem:[#allocation233_spill] sm:$0xff] %v13189_v38  ;;  %v13191_v3 = vpop.f32.mrb[139].mxu0  ;;  %v13194_v48 = vpop.f32.mrb[139].mxu1  ;;  %v11944_v38 = vld [vmem:[%s12138_s21 + $0x3e8] sm:$0xff]  }
 0x1fe   : > { %14953 = vst [vmem:[#allocation234_spill] sm:$0xff] %v13191_v3  ;;  %14954 = vst [vmem:[#allocation235_spill] sm:$0xff] %v13194_v48  ;;  %v11945_v48 = vld [vmem:[%s12138_s21 + $0xa08] sm:$0xff]  }
 0x1ff   : > { %11138 = vmatmul.mubr.msk.bf16.gmra.mrb[244].mxu0 %vm2931_vm2, %v11940_v51  ;;  %11530 = vmatmul.mubr.msk.bf16.gmra.mrb[244].mxu1 %vm2931_vm2, %v11941_v36  ;;  %v11946_v51 = vld [vmem:[%s12138_s21 + $0x3f0] sm:$0xff]  }
 0x200   : > { %11141 = vmatprep.mubr.msk.bf16.mxu0 %vm2931_vm2, %v11942_v15  ;;  %11533 = vmatprep.mubr.msk.bf16.mxu1 %vm2931_vm2, %v11943_v39  ;;  %v11947_v39 = vld [vmem:[%s12138_s21 + $0xa10] sm:$0xff]  }
 0x202   : > { %v13200_v46 = vpop.f32.mrb[140].mxu0  ;;  %v13202_v22 = vpop.f32.mrb[140].mxu1 }
 0x203   : > { %14955 = vst [vmem:[#allocation236_spill] sm:$0xff] %v13200_v46  ;;  %14956 = vst [vmem:[#allocation237_spill] sm:$0xff] %v13202_v22  ;;  %v13204_v12 = vpop.f32.mrb[141].mxu0  ;;  %v13207_v3 = vpop.f32.mrb[141].mxu1 }
 0x204   : > { %14957 = vst [vmem:[#allocation238_spill] sm:$0xff] %v13204_v12  ;;  %14958 = vst [vmem:[#allocation239_spill] sm:$0xff] %v13207_v3  ;;  %v13209_v50 = vpop.f32.mrb[142].mxu0  ;;  %v13213_v36 = vpop.f32.mrb[142].mxu1 }
 0x205   : > { %14959 = vst [vmem:[#allocation240_spill] sm:$0xff] %v13209_v50  ;;  %14960 = vst [vmem:[#allocation241_spill] sm:$0xff] %v13213_v36  ;;  %v13215_v15 = vpop.f32.mrb[143].mxu0  ;;  %v13218_v46 = vpop.f32.mrb[143].mxu1  ;;  %v11948_v36 = vld [vmem:[%s12138_s21 + $0x3f8] sm:$0xff]  }
 0x206   : > { %14961 = vst [vmem:[#allocation242_spill] sm:$0xff] %v13215_v15  ;;  %14962 = vst [vmem:[#allocation243_spill] sm:$0xff] %v13218_v46  ;;  %v11949_v46 = vld [vmem:[%s12138_s21 + $0xa18] sm:$0xff]  }
 0x207   : > { %11142 = vmatmul.mubr.msk.bf16.gmra.mrb[248].mxu0 %vm2931_vm2, %v11944_v38  ;;  %11534 = vmatmul.mubr.msk.bf16.gmra.mrb[248].mxu1 %vm2931_vm2, %v11945_v48  ;;  %v11950_v38 = vld [vmem:[%s12138_s21 + $0x400] sm:$0xff]  }
 0x208   : > { %11145 = vmatprep.mubr.msk.bf16.mxu0 %vm2931_vm2, %v11946_v51  ;;  %11537 = vmatprep.mubr.msk.bf16.mxu1 %vm2931_vm2, %v11947_v39  ;;  %v11951_v39 = vld [vmem:[%s12138_s21 + $0xa20] sm:$0xff]  }
 0x20a   : > { %v13224_v50 = vpop.f32.mrb[144].mxu0  ;;  %v13226_v3 = vpop.f32.mrb[144].mxu1 }
 0x20b   : > { %14963 = vst [vmem:[#allocation244_spill] sm:$0xff] %v13224_v50  ;;  %14964 = vst [vmem:[#allocation245_spill] sm:$0xff] %v13226_v3  ;;  %v13228_v12 = vpop.f32.mrb[145].mxu0  ;;  %v13231_v15 = vpop.f32.mrb[145].mxu1 }
 0x20c   : > { %14965 = vst [vmem:[#allocation246_spill] sm:$0xff] %v13228_v12  ;;  %14966 = vst [vmem:[#allocation247_spill] sm:$0xff] %v13231_v15  ;;  %v13233_v22 = vpop.f32.mrb[146].mxu0  ;;  %v13237_v48 = vpop.f32.mrb[146].mxu1 }
 0x20d   : > { %14967 = vst [vmem:[#allocation248_spill] sm:$0xff] %v13233_v22  ;;  %14968 = vst [vmem:[#allocation249_spill] sm:$0xff] %v13237_v48  ;;  %v13239_v51 = vpop.f32.mrb[147].mxu0  ;;  %v13242_v50 = vpop.f32.mrb[147].mxu1  ;;  %v11952_v48 = vld [vmem:[%s12138_s21 + $0x408] sm:$0xff]  }
 0x20e   : > { %14969 = vst [vmem:[#allocation250_spill] sm:$0xff] %v13239_v51  ;;  %14970 = vst [vmem:[#allocation251_spill] sm:$0xff] %v13242_v50  ;;  %v11953_v50 = vld [vmem:[%s12138_s21 + $0xa28] sm:$0xff]  }
 0x20f   : > { %11146 = vmatmul.mubr.msk.bf16.gmra.mrb[252].mxu0 %vm2931_vm2, %v11948_v36  ;;  %11538 = vmatmul.mubr.msk.bf16.gmra.mrb[252].mxu1 %vm2931_vm2, %v11949_v46  ;;  %v11954_v36 = vld [vmem:[%s12138_s21 + $0x410] sm:$0xff]  }
 0x210   : > { %11149 = vmatprep.mubr.msk.bf16.mxu0 %vm2931_vm2, %v11950_v38  ;;  %11541 = vmatprep.mubr.msk.bf16.mxu1 %vm2931_vm2, %v11951_v39  ;;  %v11955_v39 = vld [vmem:[%s12138_s21 + $0xa30] sm:$0xff]  }
 0x212   : > { %v13248_v22 = vpop.f32.mrb[148].mxu0  ;;  %v13250_v15 = vpop.f32.mrb[148].mxu1 }
 0x213   : > { %14971 = vst [vmem:[#allocation252_spill] sm:$0xff] %v13248_v22  ;;  %14972 = vst [vmem:[#allocation253_spill] sm:$0xff] %v13250_v15  ;;  %v13252_v12 = vpop.f32.mrb[149].mxu0  ;;  %v13255_v51 = vpop.f32.mrb[149].mxu1 }
 0x214   : > { %14973 = vst [vmem:[#allocation254_spill] sm:$0xff] %v13252_v12  ;;  %14974 = vst [vmem:[#allocation255_spill] sm:$0xff] %v13255_v51  ;;  %v13257_v3 = vpop.f32.mrb[150].mxu0  ;;  %v13261_v46 = vpop.f32.mrb[150].mxu1 }
 0x215   : > { %14975 = vst [vmem:[#allocation256_spill] sm:$0xff] %v13257_v3  ;;  %14976 = vst [vmem:[#allocation257_spill] sm:$0xff] %v13261_v46  ;;  %v13263_v38 = vpop.f32.mrb[151].mxu0  ;;  %v13266_v22 = vpop.f32.mrb[151].mxu1  ;;  %v11956_v46 = vld [vmem:[%s12138_s21 + $0x418] sm:$0xff]  }
 0x216   : > { %14977 = vst [vmem:[#allocation258_spill] sm:$0xff] %v13263_v38  ;;  %14978 = vst [vmem:[#allocation259_spill] sm:$0xff] %v13266_v22  ;;  %v11957_v22 = vld [vmem:[%s12138_s21 + $0xa38] sm:$0xff]  }
 0x217   : > { %11150 = vmatmul.mubr.msk.bf16.gmra.mrb[0].mxu0 %vm2931_vm2, %v11952_v48  ;;  %11542 = vmatmul.mubr.msk.bf16.gmra.mrb[0].mxu1 %vm2931_vm2, %v11953_v50  ;;  %v11958_v48 = vld [vmem:[%s12138_s21 + $0x420] sm:$0xff]  }
 0x218   : > { %11153 = vmatprep.mubr.msk.bf16.mxu0 %vm2931_vm2, %v11954_v36  ;;  %11545 = vmatprep.mubr.msk.bf16.mxu1 %vm2931_vm2, %v11955_v39  ;;  %v11959_v39 = vld [vmem:[%s12138_s21 + $0xa40] sm:$0xff]  }
 0x21a   : > { %v13272_v3 = vpop.f32.mrb[152].mxu0  ;;  %v13274_v51 = vpop.f32.mrb[152].mxu1 }
 0x21b   : > { %14979 = vst [vmem:[#allocation260_spill] sm:$0xff] %v13272_v3  ;;  %14980 = vst [vmem:[#allocation261_spill] sm:$0xff] %v13274_v51  ;;  %v13276_v12 = vpop.f32.mrb[153].mxu0  ;;  %v13279_v38 = vpop.f32.mrb[153].mxu1 }
 0x21c   : > { %14981 = vst [vmem:[#allocation262_spill] sm:$0xff] %v13276_v12  ;;  %14982 = vst [vmem:[#allocation263_spill] sm:$0xff] %v13279_v38  ;;  %v13281_v15 = vpop.f32.mrb[154].mxu0  ;;  %v13285_v50 = vpop.f32.mrb[154].mxu1 }
 0x21d   : > { %14983 = vst [vmem:[#allocation264_spill] sm:$0xff] %v13281_v15  ;;  %14984 = vst [vmem:[#allocation265_spill] sm:$0xff] %v13285_v50  ;;  %v13287_v36 = vpop.f32.mrb[155].mxu0  ;;  %v13290_v3 = vpop.f32.mrb[155].mxu1  ;;  %v11960_v50 = vld [vmem:[%s12138_s21 + $0x428] sm:$0xff]  }
 0x21e   : > { %14985 = vst [vmem:[#allocation266_spill] sm:$0xff] %v13287_v36  ;;  %14986 = vst [vmem:[#allocation267_spill] sm:$0xff] %v13290_v3  ;;  %v11961_v3 = vld [vmem:[%s12138_s21 + $0xa48] sm:$0xff]  }
 0x21f   : > { %11154 = vmatmul.mubr.msk.bf16.gmra.mrb[4].mxu0 %vm2931_vm2, %v11956_v46  ;;  %11546 = vmatmul.mubr.msk.bf16.gmra.mrb[4].mxu1 %vm2931_vm2, %v11957_v22  ;;  %v11962_v46 = vld [vmem:[%s12138_s21 + $0x430] sm:$0xff]  }
 0x220   : > { %11157 = vmatprep.mubr.msk.bf16.mxu0 %vm2931_vm2, %v11958_v48  ;;  %11549 = vmatprep.mubr.msk.bf16.mxu1 %vm2931_vm2, %v11959_v39  ;;  %v11963_v39 = vld [vmem:[%s12138_s21 + $0xa50] sm:$0xff]  }
 0x222   : > { %v13296_v15 = vpop.f32.mrb[156].mxu0  ;;  %v13298_v38 = vpop.f32.mrb[156].mxu1 }
 0x223   : > { %14987 = vst [vmem:[#allocation268_spill] sm:$0xff] %v13296_v15  ;;  %14988 = vst [vmem:[#allocation269_spill] sm:$0xff] %v13298_v38  ;;  %v13300_v12 = vpop.f32.mrb[157].mxu0  ;;  %v13303_v36 = vpop.f32.mrb[157].mxu1 }
 0x224   : > { %14989 = vst [vmem:[#allocation270_spill] sm:$0xff] %v13300_v12  ;;  %14990 = vst [vmem:[#allocation271_spill] sm:$0xff] %v13303_v36  ;;  %v13305_v51 = vpop.f32.mrb[158].mxu0  ;;  %v13309_v22 = vpop.f32.mrb[158].mxu1 }
 0x225   : > { %14991 = vst [vmem:[#allocation272_spill] sm:$0xff] %v13305_v51  ;;  %14992 = vst [vmem:[#allocation273_spill] sm:$0xff] %v13309_v22  ;;  %v13311_v48 = vpop.f32.mrb[159].mxu0  ;;  %v13314_v15 = vpop.f32.mrb[159].mxu1  ;;  %v11964_v22 = vld [vmem:[%s12138_s21 + $0x438] sm:$0xff]  }
 0x226   : > { %14993 = vst [vmem:[#allocation274_spill] sm:$0xff] %v13311_v48  ;;  %14994 = vst [vmem:[#allocation275_spill] sm:$0xff] %v13314_v15  ;;  %v11965_v15 = vld [vmem:[%s12138_s21 + $0xa58] sm:$0xff]  }
 0x227   : > { %11158 = vmatmul.mubr.msk.bf16.gmra.mrb[8].mxu0 %vm2931_vm2, %v11960_v50  ;;  %11550 = vmatmul.mubr.msk.bf16.gmra.mrb[8].mxu1 %vm2931_vm2, %v11961_v3  ;;  %v11966_v50 = vld [vmem:[%s12138_s21 + $0x440] sm:$0xff]  }
 0x228   : > { %11161 = vmatprep.mubr.msk.bf16.mxu0 %vm2931_vm2, %v11962_v46  ;;  %11553 = vmatprep.mubr.msk.bf16.mxu1 %vm2931_vm2, %v11963_v39  ;;  %v11967_v39 = vld [vmem:[%s12138_s21 + $0xa60] sm:$0xff]  }
 0x22a   : > { %v13320_v51 = vpop.f32.mrb[160].mxu0  ;;  %v13322_v36 = vpop.f32.mrb[160].mxu1 }
 0x22b   : > { %14995 = vst [vmem:[#allocation276_spill] sm:$0xff] %v13320_v51  ;;  %14996 = vst [vmem:[#allocation277_spill] sm:$0xff] %v13322_v36  ;;  %v13324_v12 = vpop.f32.mrb[161].mxu0  ;;  %v13327_v48 = vpop.f32.mrb[161].mxu1 }
 0x22c   : > { %14997 = vst [vmem:[#allocation278_spill] sm:$0xff] %v13324_v12  ;;  %14998 = vst [vmem:[#allocation279_spill] sm:$0xff] %v13327_v48  ;;  %v13329_v38 = vpop.f32.mrb[162].mxu0  ;;  %v13333_v3 = vpop.f32.mrb[162].mxu1 }
 0x22d   : > { %14999 = vst [vmem:[#allocation280_spill] sm:$0xff] %v13329_v38  ;;  %15000 = vst [vmem:[#allocation281_spill] sm:$0xff] %v13333_v3  ;;  %v13335_v46 = vpop.f32.mrb[163].mxu0  ;;  %v13338_v51 = vpop.f32.mrb[163].mxu1  ;;  %v11968_v3 = vld [vmem:[%s12138_s21 + $0x448] sm:$0xff]  }
 0x22e   : > { %15001 = vst [vmem:[#allocation282_spill] sm:$0xff] %v13335_v46  ;;  %15002 = vst [vmem:[#allocation283_spill] sm:$0xff] %v13338_v51  ;;  %v11969_v51 = vld [vmem:[%s12138_s21 + $0xa68] sm:$0xff]  }
 0x22f   : > { %11162 = vmatmul.mubr.msk.bf16.gmra.mrb[12].mxu0 %vm2931_vm2, %v11964_v22  ;;  %11554 = vmatmul.mubr.msk.bf16.gmra.mrb[12].mxu1 %vm2931_vm2, %v11965_v15  ;;  %v11970_v22 = vld [vmem:[%s12138_s21 + $0x450] sm:$0xff]  }
 0x230   : > { %11165 = vmatprep.mubr.msk.bf16.mxu0 %vm2931_vm2, %v11966_v50  ;;  %11557 = vmatprep.mubr.msk.bf16.mxu1 %vm2931_vm2, %v11967_v39  ;;  %v11971_v39 = vld [vmem:[%s12138_s21 + $0xa70] sm:$0xff]  }
 0x232   : > { %v13344_v38 = vpop.f32.mrb[164].mxu0  ;;  %v13346_v48 = vpop.f32.mrb[164].mxu1 }
 0x233   : > { %15003 = vst [vmem:[#allocation284_spill] sm:$0xff] %v13344_v38  ;;  %15004 = vst [vmem:[#allocation285_spill] sm:$0xff] %v13346_v48  ;;  %v13348_v12 = vpop.f32.mrb[165].mxu0  ;;  %v13351_v46 = vpop.f32.mrb[165].mxu1 }
 0x234   : > { %15005 = vst [vmem:[#allocation286_spill] sm:$0xff] %v13348_v12  ;;  %15006 = vst [vmem:[#allocation287_spill] sm:$0xff] %v13351_v46  ;;  %v13353_v36 = vpop.f32.mrb[166].mxu0  ;;  %v13357_v15 = vpop.f32.mrb[166].mxu1 }
 0x235   : > { %15007 = vst [vmem:[#allocation288_spill] sm:$0xff] %v13353_v36  ;;  %15008 = vst [vmem:[#allocation289_spill] sm:$0xff] %v13357_v15  ;;  %v13359_v50 = vpop.f32.mrb[167].mxu0  ;;  %v13362_v38 = vpop.f32.mrb[167].mxu1  ;;  %v11972_v15 = vld [vmem:[%s12138_s21 + $0x458] sm:$0xff]  }
 0x236   : > { %15009 = vst [vmem:[#allocation290_spill] sm:$0xff] %v13359_v50  ;;  %15010 = vst [vmem:[#allocation291_spill] sm:$0xff] %v13362_v38  ;;  %v11973_v38 = vld [vmem:[%s12138_s21 + $0xa78] sm:$0xff]  }
 0x237   : > { %11166 = vmatmul.mubr.msk.bf16.gmra.mrb[16].mxu0 %vm2931_vm2, %v11968_v3  ;;  %11558 = vmatmul.mubr.msk.bf16.gmra.mrb[16].mxu1 %vm2931_vm2, %v11969_v51  ;;  %v11974_v3 = vld [vmem:[%s12138_s21 + $0x460] sm:$0xff]  }
 0x238   : > { %11169 = vmatprep.mubr.msk.bf16.mxu0 %vm2931_vm2, %v11970_v22  ;;  %11561 = vmatprep.mubr.msk.bf16.mxu1 %vm2931_vm2, %v11971_v39  ;;  %v11975_v39 = vld [vmem:[%s12138_s21 + $0xa80] sm:$0xff]  }
 0x23a   : > { %v13368_v36 = vpop.f32.mrb[168].mxu0  ;;  %v13370_v46 = vpop.f32.mrb[168].mxu1 }
 0x23b   : > { %15011 = vst [vmem:[#allocation292_spill] sm:$0xff] %v13368_v36  ;;  %15012 = vst [vmem:[#allocation293_spill] sm:$0xff] %v13370_v46  ;;  %v13372_v12 = vpop.f32.mrb[169].mxu0  ;;  %v13375_v50 = vpop.f32.mrb[169].mxu1 }
 0x23c   : > { %15013 = vst [vmem:[#allocation294_spill] sm:$0xff] %v13372_v12  ;;  %15014 = vst [vmem:[#allocation295_spill] sm:$0xff] %v13375_v50  ;;  %v13377_v48 = vpop.f32.mrb[170].mxu0  ;;  %v13381_v51 = vpop.f32.mrb[170].mxu1 }
 0x23d   : > { %15015 = vst [vmem:[#allocation296_spill] sm:$0xff] %v13377_v48  ;;  %15016 = vst [vmem:[#allocation297_spill] sm:$0xff] %v13381_v51  ;;  %v13383_v22 = vpop.f32.mrb[171].mxu0  ;;  %v13386_v36 = vpop.f32.mrb[171].mxu1  ;;  %v11976_v51 = vld [vmem:[%s12138_s21 + $0x468] sm:$0xff]  }
 0x23e   : > { %15017 = vst [vmem:[#allocation298_spill] sm:$0xff] %v13383_v22  ;;  %15018 = vst [vmem:[#allocation299_spill] sm:$0xff] %v13386_v36  ;;  %v11977_v36 = vld [vmem:[%s12138_s21 + $0xa88] sm:$0xff]  }
 0x23f   : > { %11170 = vmatmul.mubr.msk.bf16.gmra.mrb[20].mxu0 %vm2931_vm2, %v11972_v15  ;;  %11562 = vmatmul.mubr.msk.bf16.gmra.mrb[20].mxu1 %vm2931_vm2, %v11973_v38  ;;  %v11978_v15 = vld [vmem:[%s12138_s21 + $0x470] sm:$0xff]  }
 0x240   : > { %11173 = vmatprep.mubr.msk.bf16.mxu0 %vm2931_vm2, %v11974_v3  ;;  %11565 = vmatprep.mubr.msk.bf16.mxu1 %vm2931_vm2, %v11975_v39  ;;  %v11979_v39 = vld [vmem:[%s12138_s21 + $0xa90] sm:$0xff]  }
 0x242   : > { %v13392_v48 = vpop.f32.mrb[172].mxu0  ;;  %v13394_v50 = vpop.f32.mrb[172].mxu1 }
 0x243   : > { %15019 = vst [vmem:[#allocation300_spill] sm:$0xff] %v13392_v48  ;;  %15020 = vst [vmem:[#allocation301_spill] sm:$0xff] %v13394_v50  ;;  %v13396_v12 = vpop.f32.mrb[173].mxu0  ;;  %v13399_v22 = vpop.f32.mrb[173].mxu1 }
 0x244   : > { %15021 = vst [vmem:[#allocation302_spill] sm:$0xff] %v13396_v12  ;;  %15022 = vst [vmem:[#allocation303_spill] sm:$0xff] %v13399_v22  ;;  %v13401_v46 = vpop.f32.mrb[174].mxu0  ;;  %v13405_v38 = vpop.f32.mrb[174].mxu1 }
 0x245   : > { %15023 = vst [vmem:[#allocation304_spill] sm:$0xff] %v13401_v46  ;;  %15024 = vst [vmem:[#allocation305_spill] sm:$0xff] %v13405_v38  ;;  %v13407_v3 = vpop.f32.mrb[175].mxu0  ;;  %v13410_v48 = vpop.f32.mrb[175].mxu1  ;;  %v11980_v38 = vld [vmem:[%s12138_s21 + $0x478] sm:$0xff]  }
 0x246   : > { %15025 = vst [vmem:[#allocation306_spill] sm:$0xff] %v13407_v3  ;;  %15026 = vst [vmem:[#allocation307_spill] sm:$0xff] %v13410_v48  ;;  %v11981_v48 = vld [vmem:[%s12138_s21 + $0xa98] sm:$0xff]  }
 0x247   : > { %11174 = vmatmul.mubr.msk.bf16.gmra.mrb[24].mxu0 %vm2931_vm2, %v11976_v51  ;;  %11566 = vmatmul.mubr.msk.bf16.gmra.mrb[24].mxu1 %vm2931_vm2, %v11977_v36  ;;  %v11982_v51 = vld [vmem:[%s12138_s21 + $0x480] sm:$0xff]  }
 0x248   : > { %11177 = vmatprep.mubr.msk.bf16.mxu0 %vm2931_vm2, %v11978_v15  ;;  %11569 = vmatprep.mubr.msk.bf16.mxu1 %vm2931_vm2, %v11979_v39  ;;  %v11983_v39 = vld [vmem:[%s12138_s21 + $0xaa0] sm:$0xff]  }
 0x24a   : > { %v13416_v46 = vpop.f32.mrb[176].mxu0  ;;  %v13418_v22 = vpop.f32.mrb[176].mxu1 }
 0x24b   : > { %15027 = vst [vmem:[#allocation308_spill] sm:$0xff] %v13416_v46  ;;  %15028 = vst [vmem:[#allocation309_spill] sm:$0xff] %v13418_v22  ;;  %v13420_v12 = vpop.f32.mrb[177].mxu0  ;;  %v13423_v3 = vpop.f32.mrb[177].mxu1 }
 0x24c   : > { %15029 = vst [vmem:[#allocation310_spill] sm:$0xff] %v13420_v12  ;;  %15030 = vst [vmem:[#allocation311_spill] sm:$0xff] %v13423_v3  ;;  %v13425_v50 = vpop.f32.mrb[178].mxu0  ;;  %v13429_v36 = vpop.f32.mrb[178].mxu1 }
 0x24d   : > { %15031 = vst [vmem:[#allocation312_spill] sm:$0xff] %v13425_v50  ;;  %15032 = vst [vmem:[#allocation313_spill] sm:$0xff] %v13429_v36  ;;  %v13431_v15 = vpop.f32.mrb[179].mxu0  ;;  %v13434_v46 = vpop.f32.mrb[179].mxu1  ;;  %v11984_v36 = vld [vmem:[%s12138_s21 + $0x488] sm:$0xff]  }
 0x24e   : > { %15033 = vst [vmem:[#allocation314_spill] sm:$0xff] %v13431_v15  ;;  %15034 = vst [vmem:[#allocation315_spill] sm:$0xff] %v13434_v46  ;;  %v11985_v46 = vld [vmem:[%s12138_s21 + $0xaa8] sm:$0xff]  }
 0x24f   : > { %11178 = vmatmul.mubr.msk.bf16.gmra.mrb[28].mxu0 %vm2931_vm2, %v11980_v38  ;;  %11570 = vmatmul.mubr.msk.bf16.gmra.mrb[28].mxu1 %vm2931_vm2, %v11981_v48  ;;  %v11986_v38 = vld [vmem:[%s12138_s21 + $0x490] sm:$0xff]  }
 0x250   : > { %11181 = vmatprep.mubr.msk.bf16.mxu0 %vm2931_vm2, %v11982_v51  ;;  %11573 = vmatprep.mubr.msk.bf16.mxu1 %vm2931_vm2, %v11983_v39  ;;  %v11987_v39 = vld [vmem:[%s12138_s21 + $0xab0] sm:$0xff]  }
 0x252   : > { %v13440_v50 = vpop.f32.mrb[180].mxu0  ;;  %v13442_v3 = vpop.f32.mrb[180].mxu1 }
 0x253   : > { %15035 = vst [vmem:[#allocation316_spill] sm:$0xff] %v13440_v50  ;;  %15036 = vst [vmem:[#allocation317_spill] sm:$0xff] %v13442_v3  ;;  %v13444_v12 = vpop.f32.mrb[181].mxu0  ;;  %v13447_v15 = vpop.f32.mrb[181].mxu1 }
 0x254   : > { %15037 = vst [vmem:[#allocation318_spill] sm:$0xff] %v13444_v12  ;;  %15038 = vst [vmem:[#allocation319_spill] sm:$0xff] %v13447_v15  ;;  %v13449_v22 = vpop.f32.mrb[182].mxu0  ;;  %v13453_v48 = vpop.f32.mrb[182].mxu1 }
 0x255   : > { %15039 = vst [vmem:[#allocation320_spill] sm:$0xff] %v13449_v22  ;;  %15040 = vst [vmem:[#allocation321_spill] sm:$0xff] %v13453_v48  ;;  %v13455_v51 = vpop.f32.mrb[183].mxu0  ;;  %v13458_v50 = vpop.f32.mrb[183].mxu1  ;;  %v11988_v48 = vld [vmem:[%s12138_s21 + $0x498] sm:$0xff]  }
 0x256   : > { %15041 = vst [vmem:[#allocation322_spill] sm:$0xff] %v13455_v51  ;;  %15042 = vst [vmem:[#allocation323_spill] sm:$0xff] %v13458_v50  ;;  %v11989_v50 = vld [vmem:[%s12138_s21 + $0xab8] sm:$0xff]  }
 0x257   : > { %11182 = vmatmul.mubr.msk.bf16.gmra.mrb[32].mxu0 %vm2931_vm2, %v11984_v36  ;;  %11574 = vmatmul.mubr.msk.bf16.gmra.mrb[32].mxu1 %vm2931_vm2, %v11985_v46  ;;  %v11990_v36 = vld [vmem:[%s12138_s21 + $0x4a0] sm:$0xff]  }
 0x258   : > { %11185 = vmatprep.mubr.msk.bf16.mxu0 %vm2931_vm2, %v11986_v38  ;;  %11577 = vmatprep.mubr.msk.bf16.mxu1 %vm2931_vm2, %v11987_v39  ;;  %v11991_v39 = vld [vmem:[%s12138_s21 + $0xac0] sm:$0xff]  }
 0x25a   : > { %v13464_v22 = vpop.f32.mrb[184].mxu0  ;;  %v13466_v15 = vpop.f32.mrb[184].mxu1 }
 0x25b   : > { %15043 = vst [vmem:[#allocation324_spill] sm:$0xff] %v13464_v22  ;;  %15044 = vst [vmem:[#allocation325_spill] sm:$0xff] %v13466_v15  ;;  %v13468_v12 = vpop.f32.mrb[185].mxu0  ;;  %v13471_v51 = vpop.f32.mrb[185].mxu1 }
 0x25c   : > { %15045 = vst [vmem:[#allocation326_spill] sm:$0xff] %v13468_v12  ;;  %15046 = vst [vmem:[#allocation327_spill] sm:$0xff] %v13471_v51  ;;  %v13473_v3 = vpop.f32.mrb[186].mxu0  ;;  %v13477_v46 = vpop.f32.mrb[186].mxu1 }
 0x25d   : > { %15047 = vst [vmem:[#allocation328_spill] sm:$0xff] %v13473_v3  ;;  %15048 = vst [vmem:[#allocation329_spill] sm:$0xff] %v13477_v46  ;;  %v13479_v38 = vpop.f32.mrb[187].mxu0  ;;  %v13482_v22 = vpop.f32.mrb[187].mxu1  ;;  %v11992_v46 = vld [vmem:[%s12138_s21 + $0x4a8] sm:$0xff]  }
 0x25e   : > { %15049 = vst [vmem:[#allocation330_spill] sm:$0xff] %v13479_v38  ;;  %15050 = vst [vmem:[#allocation331_spill] sm:$0xff] %v13482_v22  ;;  %v11993_v22 = vld [vmem:[%s12138_s21 + $0xac8] sm:$0xff]  }
 0x25f   : > { %11186 = vmatmul.mubr.msk.bf16.gmra.mrb[36].mxu0 %vm2931_vm2, %v11988_v48  ;;  %11578 = vmatmul.mubr.msk.bf16.gmra.mrb[36].mxu1 %vm2931_vm2, %v11989_v50  ;;  %v11994_v48 = vld [vmem:[%s12138_s21 + $0x4b0] sm:$0xff]  }
 0x260   : > { %11189 = vmatprep.mubr.msk.bf16.mxu0 %vm2931_vm2, %v11990_v36  ;;  %11581 = vmatprep.mubr.msk.bf16.mxu1 %vm2931_vm2, %v11991_v39  ;;  %v11995_v39 = vld [vmem:[%s12138_s21 + $0xad0] sm:$0xff]  }
 0x262   : > { %v13488_v3 = vpop.f32.mrb[188].mxu0  ;;  %v13490_v51 = vpop.f32.mrb[188].mxu1 }
 0x263   : > { %15051 = vst [vmem:[#allocation332_spill] sm:$0xff] %v13488_v3  ;;  %15052 = vst [vmem:[#allocation333_spill] sm:$0xff] %v13490_v51  ;;  %v13492_v12 = vpop.f32.mrb[189].mxu0  ;;  %v13495_v38 = vpop.f32.mrb[189].mxu1 }
 0x264   : > { %15053 = vst [vmem:[#allocation334_spill] sm:$0xff] %v13492_v12  ;;  %15054 = vst [vmem:[#allocation335_spill] sm:$0xff] %v13495_v38  ;;  %v13497_v15 = vpop.f32.mrb[190].mxu0  ;;  %v13501_v50 = vpop.f32.mrb[190].mxu1 }
 0x265   : > { %15055 = vst [vmem:[#allocation336_spill] sm:$0xff] %v13497_v15  ;;  %15056 = vst [vmem:[#allocation337_spill] sm:$0xff] %v13501_v50  ;;  %v13503_v36 = vpop.f32.mrb[191].mxu0  ;;  %v13506_v3 = vpop.f32.mrb[191].mxu1  ;;  %v11996_v50 = vld [vmem:[%s12138_s21 + $0x4b8] sm:$0xff]  }
 0x266   : > { %15057 = vst [vmem:[#allocation338_spill] sm:$0xff] %v13503_v36  ;;  %15058 = vst [vmem:[#allocation339_spill] sm:$0xff] %v13506_v3  ;;  %v11997_v3 = vld [vmem:[%s12138_s21 + $0xad8] sm:$0xff]  }
 0x267   : > { %11190 = vmatmul.mubr.msk.bf16.gmra.mrb[40].mxu0 %vm2931_vm2, %v11992_v46  ;;  %11582 = vmatmul.mubr.msk.bf16.gmra.mrb[40].mxu1 %vm2931_vm2, %v11993_v22  ;;  %v11998_v46 = vld [vmem:[%s12138_s21 + $0x4c0] sm:$0xff]  }
 0x268   : > { %11193 = vmatprep.mubr.msk.bf16.mxu0 %vm2931_vm2, %v11994_v48  ;;  %11585 = vmatprep.mubr.msk.bf16.mxu1 %vm2931_vm2, %v11995_v39  ;;  %v11999_v48 = vld [vmem:[%s12138_s21 + $0xae0] sm:$0xff]  }
 0x26a   : > { %v13512_v15 = vpop.f32.mrb[192].mxu0  ;;  %v13514_v38 = vpop.f32.mrb[192].mxu1 }
 0x26b   : > { %15059 = vst [vmem:[#allocation340_spill] sm:$0xff] %v13512_v15  ;;  %15060 = vst [vmem:[#allocation341_spill] sm:$0xff] %v13514_v38  ;;  %v13516_v12 = vpop.f32.mrb[193].mxu0  ;;  %v13519_v36 = vpop.f32.mrb[193].mxu1 }
 0x26c   : > { %15061 = vst [vmem:[#allocation342_spill] sm:$0xff] %v13516_v12  ;;  %15062 = vst [vmem:[#allocation343_spill] sm:$0xff] %v13519_v36  ;;  %v13521_v51 = vpop.f32.mrb[194].mxu0  ;;  %v13525_v34 = vpop.f32.mrb[194].mxu1 }
 0x26d   : > { %15063 = vst [vmem:[#allocation344_spill] sm:$0xff] %v13521_v51  ;;  %15064 = vst [vmem:[#allocation345_spill] sm:$0xff] %v13525_v34  ;;  %v13527_v22 = vpop.f32.mrb[195].mxu0  ;;  %v13530_v39 = vpop.f32.mrb[195].mxu1 }
 0x26e   : > { %15065 = vst [vmem:[#allocation346_spill] sm:$0xff] %v13527_v22  ;;  %15066 = vst [vmem:[#allocation347_spill] sm:$0xff] %v13530_v39  ;;  %v12000_v22 = vld [vmem:[%s12138_s21 + $0x4c8] sm:$0xff]  }
 0x26f   : > { %11194 = vmatmul.mubr.msk.bf16.gmra.mrb[44].mxu0 %vm2931_vm2, %v11996_v50  ;;  %11586 = vmatmul.mubr.msk.bf16.gmra.mrb[44].mxu1 %vm2931_vm2, %v11997_v3  ;;  %v12002_v3 = vld [vmem:[%s12138_s21 + $0x4d0] sm:$0xff]  }
 0x270   : > { %11197 = vmatprep.mubr.msk.bf16.mxu0 %vm2931_vm2, %v11998_v46  ;;  %11589 = vmatprep.mubr.msk.bf16.mxu1 %vm2931_vm2, %v11999_v48  ;;  %v13545_v46 = vld [vmem:[%s14719_s2] ss:$0 sm:$0xff] }
 0x272   : > { %v11091_v51 = vpop.f32.mrb[196].mxu0  ;;  %v11483_v34 = vpop.f32.mrb[196].mxu1 }
 0x273   : > { %v7286_v36 = vmax.f32 %v12361_v53, %v11091_v51  ;;  %v4933_v12 = vpop.f32.mrb[197].mxu0  ;;  %v7482_v38 = vmax.f32 %v12365_v56, %v11483_v34  ;;  %v6501_v15 = vpop.f32.mrb[197].mxu1 }
 0x274   : > { %v7284_v39 = vmax.f32 %v12367_v57, %v4933_v12  ;;  %v11092_v50 = vpop.f32.mrb[198].mxu0  ;;  %v7480_v48 = vmax.f32 %v12369_v58, %v6501_v15  ;;  %v11484_v51 = vpop.f32.mrb[198].mxu1 }
 0x275   : > { %v7287_v53 = vmax.f32 %v12371_v59, %v11092_v50  ;;  %v4936_v26 = vpop.f32.mrb[199].mxu0  ;;  %v7678_v56 = vmax.f32 %v7286_v36, %v7482_v38  ;;  %v7483_v34 = vmax.f32 %v12373_v60, %v11484_v51  ;;  %v6504_v12 = vpop.f32.mrb[199].mxu1 }
 0x276   : > { %v7285_v57 = vmax.f32 %v12375_v61, %v4936_v26  ;;  %v7676_v14 = vmax.f32 %v7284_v39, %v7480_v48  ;;  %v7481_v10 = vmax.f32 %v12378_v63, %v6504_v12  ;;  %v12005_v48 = vld [vmem:[%s12138_s21 + $0xaf8] sm:$0xff]  }
 0x277   : > { %11198 = vmatmul.mubr.msk.bf16.gmra.mrb[48].mxu0 %vm2931_vm2, %v12000_v22  ;;  %v7881_v2 = vadd.f32 %v13545_v46, %v7678_v56  ;;  %v7679_v58 = vmax.f32 %v7287_v53, %v7483_v34  ;;  %11590 = vmatmul.mubr.msk.bf16.gmra.mrb[48].mxu1 %vm2931_vm2, %v12001_v27  ;;  %v12006_v53 = vld [vmem:[%s12138_s21 + $0x4e0] sm:$0xff]  }
 0x278   : > { %11201 = vmatprep.mubr.msk.bf16.mxu0 %vm2931_vm2, %v12002_v3  ;;  %v7879_v59 = vadd.f32 %v13545_v46, %v7676_v14  ;;  %v7677_v60 = vmax.f32 %v7285_v57, %v7481_v10  ;;  %11593 = vmatprep.mubr.msk.bf16.mxu1 %vm2931_vm2, %v12003_v24 }
 0x279   : > { %v8077_v61 = vmax.f32 %v7881_v2, 0.0  ;;  %v7882_v26 = vadd.f32 %v13545_v46, %v7679_v58  ;;  %v12004_v2 = vld [vmem:[%s12138_s21 + $0x4d8] sm:$0xff]   ;;  %v12007_v58 = vld [vmem:[%s12138_s21 + $0xb00] sm:$0xff]  }
 0x27a   : > { %v11095_v63 = vpop.f32.mrb[200].mxu0  ;;  %v8075_v27 = vmax.f32 %v7879_v59, 0.0  ;;  %v7880_v15 = vadd.f32 %v13545_v46, %v7677_v60  ;;  %v11487_v10 = vpop.f32.mrb[200].mxu1 }
 0x27b   : > { %v7290_v14 = vmax.f32 %v12385_v1, %v11095_v63  ;;  %v4949_v38 = vpop.f32.mrb[201].mxu0  ;;  %v10301_v24 = vpack.c.bf16 %v8077_v61, %v8077_v61  ;;  %v8078_v36 = vmax.f32 %v7882_v26, 0.0  ;;  %v7486_v22 = vmax.f32 %v12389_v4, %v11487_v10  ;;  %v6517_v50 = vpop.f32.mrb[201].mxu1 }
 0x27c   : > { %v7288_v39 = vmax.f32 %v12391_v5, %v4949_v38  ;;  %v11096_v3 = vpop.f32.mrb[202].mxu0  ;;  %v10299_v51 = vpack.c.bf16 %v8075_v27, %v8075_v27  ;;  %v8076_v56 = vmax.f32 %v7880_v15, 0.0  ;;  %v7484_v1 = vmax.f32 %v12393_v6, %v6517_v50  ;;  %v11488_v57 = vpop.f32.mrb[202].mxu1 }
 0x27d   : > { %v7291_v34 = vmax.f32 %v12395_v7, %v11096_v3  ;;  %v4952_v12 = vpop.f32.mrb[203].mxu0  ;;  %9058 = vst.msk [vmem:[%s13564_s27 + $0x8] sm:$0xf] %vm9055_vm3, %v10301_v24  ;;  %v10302_v4 = vpack.c.bf16 %v8078_v36, %v8078_v36  ;;  %v7682_v5 = vmax.f32 %v7290_v14, %v7486_v22  ;;  %v7487_v59 = vmax.f32 %v12397_v8, %v11488_v57  ;;  %v6520_v61 = vpop.f32.mrb[203].mxu1  ;;  %v12008_v22 = vld [vmem:[%s12138_s21 + $0x4e8] sm:$0xff]  }
 0x27e   : > { %v7289_v60 = vmax.f32 %v12399_v9, %v4952_v12  ;;  %9056 = vst.msk [vmem:[%s13564_s27] sm:$0xf] %vm9055_vm3, %v10299_v51  ;;  %v10300_v26 = vpack.c.bf16 %v8076_v56, %v8076_v56  ;;  %v7680_v6 = vmax.f32 %v7288_v39, %v7484_v1  ;;  %v7485_v63 = vmax.f32 %v12402_v11, %v6520_v61  ;;  %v12009_v56 = vld [vmem:[%s12138_s21 + $0xb08] sm:$0xff]   ;;  %v12010_v1 = vld [vmem:[%s12138_s21 + $0x4f0] sm:$0xff]  }
 0x27f   : > { %11202 = vmatmul.mubr.msk.bf16.gmra.mrb[52].mxu0 %vm2931_vm2, %v12004_v2  ;;  %9059 = vst.msk [vmem:[%s13564_s27 + $0xc] sm:$0xf] %vm9055_vm3, %v10302_v4  ;;  %v7885_v7 = vadd.f32 %v13545_v46, %v7682_v5  ;;  %v7683_v27 = vmax.f32 %v7291_v34, %v7487_v59  ;;  %11594 = vmatmul.mubr.msk.bf16.gmra.mrb[52].mxu1 %vm2931_vm2, %v12005_v48  ;;  %v12011_v5 = vld [vmem:[%s12138_s21 + $0xb10] sm:$0xff]  }
 0x280   : > { %11205 = vmatprep.mubr.msk.bf16.mxu0 %vm2931_vm2, %v12006_v53  ;;  %9057 = vst.msk [vmem:[%s13564_s27 + $0x4] sm:$0xf] %vm9055_vm3, %v10300_v26  ;;  %v7883_v8 = vadd.f32 %v13545_v46, %v7680_v6  ;;  %v7681_v9 = vmax.f32 %v7289_v60, %v7485_v63  ;;  %11597 = vmatprep.mubr.msk.bf16.mxu1 %vm2931_vm2, %v12007_v58 }
 0x281   : > { %v8081_v11 = vmax.f32 %v7885_v7, 0.0  ;;  %v7886_v15 = vadd.f32 %v13545_v46, %v7683_v27 }
 0x282   : > { %v11099_v14 = vpop.f32.mrb[204].mxu0  ;;  %v8079_v10 = vmax.f32 %v7883_v8, 0.0  ;;  %v7884_v38 = vadd.f32 %v13545_v46, %v7681_v9  ;;  %v11491_v24 = vpop.f32.mrb[204].mxu1 }
 0x283   : > { %v7294_v2 = vmax.f32 %v12409_v13, %v11099_v14  ;;  %v4965_v36 = vpop.f32.mrb[205].mxu0  ;;  %v10305_v39 = vpack.c.bf16 %v8081_v11, %v8081_v11  ;;  %v8082_v50 = vmax.f32 %v7886_v15, 0.0  ;;  %v7490_v3 = vmax.f32 %v12413_v16, %v11491_v24  ;;  %v6533_v53 = vpop.f32.mrb[205].mxu1 }
 0x284   : > { %v7292_v48 = vmax.f32 %v12415_v17, %v4965_v36  ;;  %v11100_v51 = vpop.f32.mrb[206].mxu0  ;;  %v10303_v34 = vpack.c.bf16 %v8079_v10, %v8079_v10  ;;  %v8080_v57 = vmax.f32 %v7884_v38, 0.0  ;;  %v7488_v13 = vmax.f32 %v12417_v18, %v6533_v53  ;;  %v11492_v58 = vpop.f32.mrb[206].mxu1  ;;  %v12012_v10 = vld [vmem:[%s12138_s21 + $0x4f8] sm:$0xff]  }
 0x285   : > { %v7295_v12 = vmax.f32 %v12419_v19, %v11100_v51  ;;  %v4968_v4 = vpop.f32.mrb[207].mxu0  ;;  %9062 = vst.msk [vmem:[%s13564_s27 + $0x18] sm:$0xf] %vm9055_vm3, %v10305_v39  ;;  %v10306_v16 = vpack.c.bf16 %v8082_v50, %v8082_v50  ;;  %v7686_v17 = vmax.f32 %v7294_v2, %v7490_v3  ;;  %v7491_v59 = vmax.f32 %v12421_v20, %v11492_v58  ;;  %v6536_v61 = vpop.f32.mrb[207].mxu1  ;;  %v12013_v50 = vld [vmem:[%s12138_s21 + $0xb18] sm:$0xff]   ;;  %v12014_v3 = vld [vmem:[%s12138_s21 + $0x500] sm:$0xff]  }
 0x286   : > { %v7293_v60 = vmax.f32 %v12423_v21, %v4968_v4  ;;  %9060 = vst.msk [vmem:[%s13564_s27 + $0x10] sm:$0xf] %vm9055_vm3, %v10303_v34  ;;  %v10304_v26 = vpack.c.bf16 %v8080_v57, %v8080_v57  ;;  %v7684_v18 = vmax.f32 %v7292_v48, %v7488_v13  ;;  %v7489_v6 = vmax.f32 %v12426_v23, %v6536_v61  ;;  %v12015_v34 = vld [vmem:[%s12138_s21 + $0xb20] sm:$0xff]  }
 0x287   : > { %11206 = vmatmul.mubr.msk.bf16.gmra.mrb[56].mxu0 %vm2931_vm2, %v12008_v22  ;;  %9063 = vst.msk [vmem:[%s13564_s27 + $0x1c] sm:$0xf] %vm9055_vm3, %v10306_v16  ;;  %v7889_v19 = vadd.f32 %v13545_v46, %v7686_v17  ;;  %v7687_v63 = vmax.f32 %v7295_v12, %v7491_v59  ;;  %11598 = vmatmul.mubr.msk.bf16.gmra.mrb[56].mxu1 %vm2931_vm2, %v12009_v56 }
 0x288   : > { %11209 = vmatprep.mubr.msk.bf16.mxu0 %vm2931_vm2, %v12010_v1  ;;  %9061 = vst.msk [vmem:[%s13564_s27 + $0x14] sm:$0xf] %vm9055_vm3, %v10304_v26  ;;  %v7887_v20 = vadd.f32 %v13545_v46, %v7684_v18  ;;  %v7685_v21 = vmax.f32 %v7293_v60, %v7489_v6  ;;  %11601 = vmatprep.mubr.msk.bf16.mxu1 %vm2931_vm2, %v12011_v5  ;;  %v12016_v6 = vld [vmem:[%s12138_s21 + $0x508] sm:$0xff]  }
 0x289   : > { %v8085_v23 = vmax.f32 %v7889_v19, 0.0  ;;  %v7890_v7 = vadd.f32 %v13545_v46, %v7687_v63 }
 0x28a   : > { %v11103_v27 = vpop.f32.mrb[208].mxu0  ;;  %v8083_v8 = vmax.f32 %v7887_v20, 0.0  ;;  %v7888_v9 = vadd.f32 %v13545_v46, %v7685_v21  ;;  %v11495_v15 = vpop.f32.mrb[208].mxu1 }
 0x28b   : > { %v7298_v11 = vmax.f32 %v12433_v25, %v11103_v27  ;;  %v4981_v14 = vpop.f32.mrb[209].mxu0  ;;  %v10309_v38 = vpack.c.bf16 %v8085_v23, %v8085_v23  ;;  %v8086_v2 = vmax.f32 %v7890_v7, 0.0  ;;  %v7494_v24 = vmax.f32 %v12437_v28, %v11495_v15  ;;  %v6549_v22 = vpop.f32.mrb[209].mxu1  ;;  %v12017_v27 = vld [vmem:[%s12138_s21 + $0xb28] sm:$0xff]  }
 0x28c   : > { %v7296_v36 = vmax.f32 %v12439_v29, %v4981_v14  ;;  %v11104_v39 = vpop.f32.mrb[210].mxu0  ;;  %v10307_v48 = vpack.c.bf16 %v8083_v8, %v8083_v8  ;;  %v8084_v53 = vmax.f32 %v7888_v9, 0.0  ;;  %v7492_v25 = vmax.f32 %v12441_v30, %v6549_v22  ;;  %v11496_v56 = vpop.f32.mrb[210].mxu1  ;;  %v12018_v8 = vld [vmem:[%s12138_s21 + $0x510] sm:$0xff]  }
 0x28d   : > { %v7299_v51 = vmax.f32 %v12443_v31, %v11104_v39  ;;  %v4984_v1 = vpop.f32.mrb[211].mxu0  ;;  %9066 = vst.msk [vmem:[%s13564_s27 + $0x28] sm:$0xf] %vm9055_vm3, %v10309_v38  ;;  %v10310_v28 = vpack.c.bf16 %v8086_v2, %v8086_v2  ;;  %v7690_v29 = vmax.f32 %v7298_v11, %v7494_v24  ;;  %v7495_v57 = vmax.f32 %v12445_v32, %v11496_v56  ;;  %v6552_v12 = vpop.f32.mrb[211].mxu1  ;;  %v12019_v38 = vld [vmem:[%s12138_s21 + $0xb30] sm:$0xff]  }
 0x28e   : > { %v7297_v13 = vmax.f32 %v12447_v33, %v4984_v1  ;;  %9064 = vst.msk [vmem:[%s13564_s27 + $0x20] sm:$0xf] %vm9055_vm3, %v10307_v48  ;;  %v10308_v58 = vpack.c.bf16 %v8084_v53, %v8084_v53  ;;  %v7688_v30 = vmax.f32 %v7296_v36, %v7492_v25  ;;  %v7493_v4 = vmax.f32 %v12450_v35, %v6552_v12 }
 0x28f   : > { %11210 = vmatmul.mubr.msk.bf16.gmra.mrb[60].mxu0 %vm2931_vm2, %v12012_v10  ;;  %9067 = vst.msk [vmem:[%s13564_s27 + $0x2c] sm:$0xf] %vm9055_vm3, %v10310_v28  ;;  %v7893_v31 = vadd.f32 %v13545_v46, %v7690_v29  ;;  %v7691_v5 = vmax.f32 %v7299_v51, %v7495_v57  ;;  %11602 = vmatmul.mubr.msk.bf16.gmra.mrb[60].mxu1 %vm2931_vm2, %v12013_v50 }
 0x290   : > { %11213 = vmatprep.mubr.msk.bf16.mxu0 %vm2931_vm2, %v12014_v3  ;;  %9065 = vst.msk [vmem:[%s13564_s27 + $0x24] sm:$0xf] %vm9055_vm3, %v10308_v58  ;;  %v7891_v32 = vadd.f32 %v13545_v46, %v7688_v30  ;;  %v7689_v33 = vmax.f32 %v7297_v13, %v7493_v4  ;;  %11605 = vmatprep.mubr.msk.bf16.mxu1 %vm2931_vm2, %v12015_v34  ;;  %v12020_v34 = vld [vmem:[%s12138_s21 + $0x518] sm:$0xff]   ;;  %v12022_v4 = vld [vmem:[%s12138_s21 + $0x520] sm:$0xff]  }
 0x291   : > { %v8089_v35 = vmax.f32 %v7893_v31, 0.0  ;;  %v7894_v16 = vadd.f32 %v13545_v46, %v7691_v5  ;;  %v12021_v30 = vld [vmem:[%s12138_s21 + $0xb38] sm:$0xff]  }
 0x292   : > { %v11107_v17 = vpop.f32.mrb[212].mxu0  ;;  %v8087_v59 = vmax.f32 %v7891_v32, 0.0  ;;  %v7892_v60 = vadd.f32 %v13545_v46, %v7689_v33  ;;  %v11499_v26 = vpop.f32.mrb[212].mxu1 }
 0x293   : > { %v7302_v61 = vmax.f32 %v12457_v37, %v11107_v17  ;;  %v4997_v18 = vpop.f32.mrb[213].mxu0  ;;  %v10313_v19 = vpack.c.bf16 %v8089_v35, %v8089_v35  ;;  %v8090_v63 = vmax.f32 %v7894_v16, 0.0  ;;  %v7498_v20 = vmax.f32 %v12461_v40, %v11499_v26  ;;  %v6565_v23 = vpop.f32.mrb[213].mxu1  ;;  %v12023_v16 = vld [vmem:[%s12138_s21 + $0xb40] sm:$0xff]  }
 0x294   : > { %v7300_v21 = vmax.f32 %v12463_v41, %v4997_v18  ;;  %v11108_v7 = vpop.f32.mrb[214].mxu0  ;;  %v10311_v9 = vpack.c.bf16 %v8087_v59, %v8087_v59  ;;  %v8088_v11 = vmax.f32 %v7892_v60, 0.0  ;;  %v7496_v37 = vmax.f32 %v12465_v42, %v6565_v23  ;;  %v11500_v14 = vpop.f32.mrb[214].mxu1  ;;  %v15067_v59 = vld [vmem:[#allocation2_spill] sm:$0xff]  ;;  %v15068_v18 = vld [vmem:[#allocation3_spill] sm:$0xff] }
 0x295   : > { %v7303_v15 = vmax.f32 %v12467_v43, %v11108_v7  ;;  %v5000_v10 = vpop.f32.mrb[215].mxu0  ;;  %9070 = vst.msk [vmem:[%s13564_s27 + $0x38] sm:$0xf] %vm9055_vm3, %v10313_v19  ;;  %v10314_v40 = vpack.c.bf16 %v8090_v63, %v8090_v63  ;;  %v7694_v41 = vmax.f32 %v7302_v61, %v7498_v20  ;;  %v7499_v2 = vmax.f32 %v12469_v44, %v11500_v14  ;;  %v6568_v36 = vpop.f32.mrb[215].mxu1 }
 0x296   : > { %v7301_v24 = vmax.f32 %v12471_v45, %v5000_v10  ;;  %9068 = vst.msk [vmem:[%s13564_s27 + $0x30] sm:$0xf] %vm9055_vm3, %v10311_v9  ;;  %v10312_v22 = vpack.c.bf16 %v8088_v11, %v8088_v11  ;;  %v7692_v42 = vmax.f32 %v7300_v21, %v7496_v37  ;;  %v7497_v39 = vmax.f32 %v12474_v47, %v6568_v36 }
 0x297   : > { %11214 = vmatmul.mubr.msk.bf16.gmra.mrb[64].mxu0 %vm2931_vm2, %v12016_v6  ;;  %9071 = vst.msk [vmem:[%s13564_s27 + $0x3c] sm:$0xf] %vm9055_vm3, %v10314_v40  ;;  %v7897_v43 = vadd.f32 %v13545_v46, %v7694_v41  ;;  %v7695_v50 = vmax.f32 %v7303_v15, %v7499_v2  ;;  %11606 = vmatmul.mubr.msk.bf16.gmra.mrb[64].mxu1 %vm2931_vm2, %v12017_v27  ;;  %v12024_v15 = vld [vmem:[%s12138_s21 + $0x528] sm:$0xff]   ;;  %v15071_v41 = vld [vmem:[#allocation6_spill] sm:$0xff] }
 0x298   : > { %11217 = vmatprep.mubr.msk.bf16.mxu0 %vm2931_vm2, %v12018_v8  ;;  %9069 = vst.msk [vmem:[%s13564_s27 + $0x34] sm:$0xf] %vm9055_vm3, %v10312_v22  ;;  %v7895_v44 = vadd.f32 %v13545_v46, %v7692_v42  ;;  %v7693_v45 = vmax.f32 %v7301_v24, %v7497_v39  ;;  %11609 = vmatprep.mubr.msk.bf16.mxu1 %vm2931_vm2, %v12019_v38  ;;  %v15069_v8 = vld [vmem:[#allocation4_spill] sm:$0xff]  ;;  %v15070_v38 = vld [vmem:[#allocation5_spill] sm:$0xff]  ;;  %v12025_v22 = vld [vmem:[%s12138_s21 + $0xb48] sm:$0xff]  }
 0x299   : > { %v8093_v47 = vmax.f32 %v7897_v43, 0.0  ;;  %v7898_v3 = vadd.f32 %v13545_v46, %v7695_v50  ;;  %v12026_v42 = vld [vmem:[%s12138_s21 + $0x530] sm:$0xff]   ;;  %v15072_v50 = vld [vmem:[#allocation7_spill] sm:$0xff] }
 0x29a   : > { %v11111_v48 = vpop.f32.mrb[216].mxu0  ;;  %v8091_v53 = vmax.f32 %v7895_v44, 0.0  ;;  %v7896_v25 = vadd.f32 %v13545_v46, %v7693_v45  ;;  %v11503_v56 = vpop.f32.mrb[216].mxu1  ;;  %v15073_v45 = vld [vmem:[#allocation8_spill] sm:$0xff] }
 0x29b   : > { %v7306_v51 = vmax.f32 %v12481_v49, %v11111_v48  ;;  %v5013_v1 = vpop.f32.mrb[217].mxu0  ;;  %v10317_v28 = vpack.c.bf16 %v8093_v47, %v8093_v47  ;;  %v8094_v29 = vmax.f32 %v7898_v3, 0.0  ;;  %v7502_v57 = vmax.f32 %v12485_v52, %v11503_v56  ;;  %v6581_v12 = vpop.f32.mrb[217].mxu1  ;;  %v15074_v56 = vld [vmem:[#allocation9_spill] sm:$0xff] }
 0x29c   : > { %v7304_v13 = vmax.f32 %v12487_v54, %v5013_v1  ;;  %v11112_v58 = vpop.f32.mrb[218].mxu0  ;;  %v10315_v31 = vpack.c.bf16 %v8091_v53, %v8091_v53  ;;  %v8092_v5 = vmax.f32 %v7896_v25, 0.0  ;;  %v7500_v49 = vmax.f32 %v12489_v55, %v6581_v12  ;;  %v11504_v33 = vpop.f32.mrb[218].mxu1  ;;  %v12027_v53 = vld [vmem:[%s12138_s21 + $0xb50] sm:$0xff]   ;;  %v15076_v12 = vld [vmem:[#allocation11_spill] sm:$0xff] }
 0x29d   : > { %v7307_v32 = vmax.f32 %v12491_v62, %v11112_v58  ;;  %v5016_v35 = vpop.f32.mrb[219].mxu0  ;;  %9074 = vst.msk [vmem:[%s13564_s27 + $0x48] sm:$0xf] %vm9055_vm3, %v10317_v28  ;;  %v10318_v52 = vpack.c.bf16 %v8094_v29, %v8094_v29  ;;  %v7698_v54 = vmax.f32 %v7306_v51, %v7502_v57  ;;  %v7503_v17 = vmax.f32 %v12493_v0, %v11504_v33  ;;  %v6584_v61 = vpop.f32.mrb[219].mxu1 }
 0x29e   : > { %v7305_v60 = vmax.f32 %v15067_v59, %v5016_v35  ;;  %9072 = vst.msk [vmem:[%s13564_s27 + $0x40] sm:$0xf] %vm9055_vm3, %v10315_v31  ;;  %v10316_v26 = vpack.c.bf16 %v8092_v5, %v8092_v5  ;;  %v7696_v55 = vmax.f32 %v7304_v13, %v7500_v49  ;;  %v7501_v6 = vmax.f32 %v15068_v18, %v6584_v61 }
 0x29f   : > { %11218 = vmatmul.mubr.msk.bf16.gmra.mrb[68].mxu0 %vm2931_vm2, %v12020_v34  ;;  %9075 = vst.msk [vmem:[%s13564_s27 + $0x4c] sm:$0xf] %vm9055_vm3, %v10318_v52  ;;  %v7901_v62 = vadd.f32 %v13545_v46, %v7698_v54  ;;  %v7699_v19 = vmax.f32 %v7307_v32, %v7503_v17  ;;  %11610 = vmatmul.mubr.msk.bf16.gmra.mrb[68].mxu1 %vm2931_vm2, %v12021_v30  ;;  %v15075_v34 = vld [vmem:[#allocation10_spill] sm:$0xff]  ;;  %v15077_v52 = vld [vmem:[#allocation12_spill] sm:$0xff] }
 0x2a0   : > { %11221 = vmatprep.mubr.msk.bf16.mxu0 %vm2931_vm2, %v12022_v4  ;;  %9073 = vst.msk [vmem:[%s13564_s27 + $0x44] sm:$0xf] %vm9055_vm3, %v10316_v26  ;;  %v7899_v0 = vadd.f32 %v13545_v46, %v7696_v55  ;;  %v7697_v63 = vmax.f32 %v7305_v60, %v7501_v6  ;;  %11613 = vmatprep.mubr.msk.bf16.mxu1 %vm2931_vm2, %v12023_v16  ;;  %v12028_v60 = vld [vmem:[%s12138_s21 + $0x538] sm:$0xff]   ;;  %v15079_v6 = vld [vmem:[#allocation14_spill] sm:$0xff] }
 0x2a1   : > { %v8097_v20 = vmax.f32 %v7901_v62, 0.0  ;;  %v7902_v21 = vadd.f32 %v13545_v46, %v7699_v19  ;;  %v15078_v55 = vld [vmem:[#allocation13_spill] sm:$0xff] }
 0x2a2   : > { %v11115_v23 = vpop.f32.mrb[220].mxu0  ;;  %v8095_v7 = vmax.f32 %v7899_v0, 0.0  ;;  %v7900_v27 = vadd.f32 %v13545_v46, %v7697_v63  ;;  %v11507_v11 = vpop.f32.mrb[220].mxu1  ;;  %v12029_v63 = vld [vmem:[%s12138_s21 + $0xb58] sm:$0xff]  }
 0x2a3   : > { %v7310_v9 = vmax.f32 %v15069_v8, %v11115_v23  ;;  %v5029_v37 = vpop.f32.mrb[221].mxu0  ;;  %v10321_v14 = vpack.c.bf16 %v8097_v20, %v8097_v20  ;;  %v8098_v10 = vmax.f32 %v7902_v21, 0.0  ;;  %v7506_v40 = vmax.f32 %v15070_v38, %v11507_v11  ;;  %v6597_v24 = vpop.f32.mrb[221].mxu1  ;;  %v12030_v20 = vld [vmem:[%s12138_s21 + $0x540] sm:$0xff]   ;;  %v15081_v8 = vld [vmem:[#allocation16_spill] sm:$0xff]  ;;  %v15082_v38 = vld [vmem:[#allocation17_spill] sm:$0xff] }
 0x2a4   : > { %v7308_v2 = vmax.f32 %v15071_v41, %v5029_v37  ;;  %v11116_v36 = vpop.f32.mrb[222].mxu0  ;;  %v10319_v39 = vpack.c.bf16 %v8095_v7, %v8095_v7  ;;  %v8096_v43 = vmax.f32 %v7900_v27, 0.0  ;;  %v7504_v44 = vmax.f32 %v15072_v50, %v6597_v24  ;;  %v11508_v3 = vpop.f32.mrb[222].mxu1  ;;  %v15080_v7 = vld [vmem:[#allocation15_spill] sm:$0xff]  ;;  %v15083_v41 = vld [vmem:[#allocation18_spill] sm:$0xff] }
 0x2a5   : > { %v7311_v47 = vmax.f32 %v15073_v45, %v11116_v36  ;;  %v5032_v48 = vpop.f32.mrb[223].mxu0  ;;  %9078 = vst.msk [vmem:[%s13564_s27 + $0x58] sm:$0xf] %vm9055_vm3, %v10321_v14  ;;  %v10322_v25 = vpack.c.bf16 %v8098_v10, %v8098_v10  ;;  %v7702_v51 = vmax.f32 %v7310_v9, %v7506_v40  ;;  %v7507_v1 = vmax.f32 %v15074_v56, %v11508_v3  ;;  %v6600_v29 = vpop.f32.mrb[223].mxu1 }
 0x2a6   : > { %v7309_v28 = vmax.f32 %v15075_v34, %v5032_v48  ;;  %9076 = vst.msk [vmem:[%s13564_s27 + $0x50] sm:$0xf] %vm9055_vm3, %v10319_v39  ;;  %v10320_v57 = vpack.c.bf16 %v8096_v43, %v8096_v43  ;;  %v7700_v13 = vmax.f32 %v7308_v2, %v7504_v44  ;;  %v7505_v58 = vmax.f32 %v15076_v12, %v6600_v29 }
 0x2a7   : > { %11222 = vmatmul.mubr.msk.bf16.gmra.mrb[72].mxu0 %vm2931_vm2, %v12024_v15  ;;  %9079 = vst.msk [vmem:[%s13564_s27 + $0x5c] sm:$0xf] %vm9055_vm3, %v10322_v25  ;;  %v7905_v30 = vadd.f32 %v13545_v46, %v7702_v51  ;;  %v7703_v4 = vmax.f32 %v7311_v47, %v7507_v1  ;;  %11614 = vmatmul.mubr.msk.bf16.gmra.mrb[72].mxu1 %vm2931_vm2, %v12025_v22  ;;  %v12031_v15 = vld [vmem:[%s12138_s21 + $0xb60] sm:$0xff]   ;;  %v15085_v51 = vld [vmem:[#allocation20_spill] sm:$0xff] }
 0x2a8   : > { %11225 = vmatprep.mubr.msk.bf16.mxu0 %vm2931_vm2, %v12026_v42  ;;  %9077 = vst.msk [vmem:[%s13564_s27 + $0x54] sm:$0xf] %vm9055_vm3, %v10320_v57  ;;  %v7903_v31 = vadd.f32 %v13545_v46, %v7700_v13  ;;  %v7701_v5 = vmax.f32 %v7309_v28, %v7505_v58  ;;  %11617 = vmatprep.mubr.msk.bf16.mxu1 %vm2931_vm2, %v12027_v53  ;;  %v15084_v42 = vld [vmem:[#allocation19_spill] sm:$0xff]  ;;  %v15086_v13 = vld [vmem:[#allocation21_spill] sm:$0xff]  ;;  %v15087_v58 = vld [vmem:[#allocation22_spill] sm:$0xff] }
 0x2a9   : > { %v8101_v49 = vmax.f32 %v7905_v30, 0.0  ;;  %v7906_v32 = vadd.f32 %v13545_v46, %v7703_v4  ;;  %v12032_v28 = vld [vmem:[%s12138_s21 + $0x548] sm:$0xff]  }
 0x2aa   : > { %v11119_v33 = vpop.f32.mrb[224].mxu0  ;;  %v8099_v35 = vmax.f32 %v7903_v31, 0.0  ;;  %v7904_v16 = vadd.f32 %v13545_v46, %v7701_v5  ;;  %v11511_v17 = vpop.f32.mrb[224].mxu1  ;;  %v12033_v5 = vld [vmem:[%s12138_s21 + $0xb68] sm:$0xff]  }
 0x2ab   : > { %v7314_v54 = vmax.f32 %v15077_v52, %v11119_v33  ;;  %v5045_v59 = vpop.f32.mrb[225].mxu0  ;;  %v10325_v61 = vpack.c.bf16 %v8101_v49, %v8101_v49  ;;  %v8102_v26 = vmax.f32 %v7906_v32, 0.0  ;;  %v7510_v18 = vmax.f32 %v15078_v55, %v11511_v17  ;;  %v6613_v19 = vpop.f32.mrb[225].mxu1  ;;  %v12034_v49 = vld [vmem:[%s12138_s21 + $0x550] sm:$0xff]   ;;  %v15090_v55 = vld [vmem:[#allocation25_spill] sm:$0xff] }
 0x2ac   : > { %v7312_v62 = vmax.f32 %v15079_v6, %v5045_v59  ;;  %v11120_v0 = vpop.f32.mrb[226].mxu0  ;;  %v10323_v21 = vpack.c.bf16 %v8099_v35, %v8099_v35  ;;  %v8100_v23 = vmax.f32 %v7904_v16, 0.0  ;;  %v7508_v27 = vmax.f32 %v15080_v7, %v6613_v19  ;;  %v11512_v11 = vpop.f32.mrb[226].mxu1  ;;  %v15088_v35 = vld [vmem:[#allocation23_spill] sm:$0xff]  ;;  %v15089_v52 = vld [vmem:[#allocation24_spill] sm:$0xff]  ;;  %v15091_v6 = vld [vmem:[#allocation26_spill] sm:$0xff] }
 0x2ad   : > { %v7315_v9 = vmax.f32 %v15081_v8, %v11120_v0  ;;  %v5048_v37 = vpop.f32.mrb[227].mxu0  ;;  %9082 = vst.msk [vmem:[%s13564_s27 + $0x68] sm:$0xf] %vm9055_vm3, %v10325_v61  ;;  %v10326_v14 = vpack.c.bf16 %v8102_v26, %v8102_v26  ;;  %v7706_v10 = vmax.f32 %v7314_v54, %v7510_v18  ;;  %v7511_v40 = vmax.f32 %v15082_v38, %v11512_v11  ;;  %v6616_v24 = vpop.f32.mrb[227].mxu1 }
 0x2ae   : > { %v7313_v2 = vmax.f32 %v15083_v41, %v5048_v37  ;;  %9080 = vst.msk [vmem:[%s13564_s27 + $0x60] sm:$0xf] %vm9055_vm3, %v10323_v21  ;;  %v10324_v36 = vpack.c.bf16 %v8100_v23, %v8100_v23  ;;  %v7704_v22 = vmax.f32 %v7312_v62, %v7508_v27  ;;  %v7509_v39 = vmax.f32 %v15084_v42, %v6616_v24 }
 0x2af   : > { %11226 = vmatmul.mubr.msk.bf16.gmra.mrb[76].mxu0 %vm2931_vm2, %v12028_v60  ;;  %9083 = vst.msk [vmem:[%s13564_s27 + $0x6c] sm:$0xf] %vm9055_vm3, %v10326_v14  ;;  %v7909_v43 = vadd.f32 %v13545_v46, %v7706_v10  ;;  %v7707_v50 = vmax.f32 %v7315_v9, %v7511_v40  ;;  %11618 = vmatmul.mubr.msk.bf16.gmra.mrb[76].mxu1 %vm2931_vm2, %v12029_v63  ;;  %v12035_v60 = vld [vmem:[%s12138_s21 + $0xb70] sm:$0xff]  }
 0x2b0   : > { %11229 = vmatprep.mubr.msk.bf16.mxu0 %vm2931_vm2, %v12030_v20  ;;  %9081 = vst.msk [vmem:[%s13564_s27 + $0x64] sm:$0xf] %vm9055_vm3, %v10324_v36  ;;  %v7907_v44 = vadd.f32 %v13545_v46, %v7704_v22  ;;  %v7705_v45 = vmax.f32 %v7313_v2, %v7509_v39  ;;  %11621 = vmatprep.mubr.msk.bf16.mxu1 %vm2931_vm2, %v12031_v15  ;;  %v15092_v20 = vld [vmem:[#allocation27_spill] sm:$0xff]  ;;  %v15093_v10 = vld [vmem:[#allocation28_spill] sm:$0xff]  ;;  %v12036_v2 = vld [vmem:[%s12138_s21 + $0x558] sm:$0xff]  }
 0x2b1   : > { %v8105_v47 = vmax.f32 %v7909_v43, 0.0  ;;  %v7910_v3 = vadd.f32 %v13545_v46, %v7707_v50  ;;  %v15094_v22 = vld [vmem:[#allocation29_spill] sm:$0xff]  ;;  %v15095_v39 = vld [vmem:[#allocation30_spill] sm:$0xff] }
 0x2b2   : > { %v11123_v48 = vpop.f32.mrb[228].mxu0  ;;  %v8103_v53 = vmax.f32 %v7907_v44, 0.0  ;;  %v7908_v25 = vadd.f32 %v13545_v46, %v7705_v45  ;;  %v11515_v1 = vpop.f32.mrb[228].mxu1  ;;  %v12037_v45 = vld [vmem:[%s12138_s21 + $0xb78] sm:$0xff]  }
 0x2b3   : > { %v7318_v56 = vmax.f32 %v15085_v51, %v11123_v48  ;;  %v5061_v34 = vpop.f32.mrb[229].mxu0  ;;  %v10329_v29 = vpack.c.bf16 %v8105_v47, %v8105_v47  ;;  %v8106_v57 = vmax.f32 %v7910_v3, 0.0  ;;  %v7514_v12 = vmax.f32 %v15086_v13, %v11515_v1  ;;  %v6629_v4 = vpop.f32.mrb[229].mxu1  ;;  %v12038_v47 = vld [vmem:[%s12138_s21 + $0x560] sm:$0xff]   ;;  %v15097_v51 = vld [vmem:[#allocation32_spill] sm:$0xff]  ;;  %v15098_v13 = vld [vmem:[#allocation33_spill] sm:$0xff] }
 0x2b4   : > { %v7316_v30 = vmax.f32 %v15087_v58, %v5061_v34  ;;  %v11124_v31 = vpop.f32.mrb[230].mxu0  ;;  %v10327_v32 = vpack.c.bf16 %v8103_v53, %v8103_v53  ;;  %v8104_v33 = vmax.f32 %v7908_v25, 0.0  ;;  %v7512_v16 = vmax.f32 %v15088_v35, %v6629_v4  ;;  %v11516_v17 = vpop.f32.mrb[230].mxu1  ;;  %v15096_v53 = vld [vmem:[#allocation31_spill] sm:$0xff]  ;;  %v15099_v58 = vld [vmem:[#allocation34_spill] sm:$0xff] }
 0x2b5   : > { %v7319_v54 = vmax.f32 %v15089_v52, %v11124_v31  ;;  %v5064_v59 = vpop.f32.mrb[231].mxu0  ;;  %9086 = vst.msk [vmem:[%s13564_s27 + $0x78] sm:$0xf] %vm9055_vm3, %v10329_v29  ;;  %v10330_v61 = vpack.c.bf16 %v8106_v57, %v8106_v57  ;;  %v7710_v26 = vmax.f32 %v7318_v56, %v7514_v12  ;;  %v7515_v18 = vmax.f32 %v15090_v55, %v11516_v17  ;;  %v6632_v19 = vpop.f32.mrb[231].mxu1 }
 0x2b6   : > { %v7317_v62 = vmax.f32 %v15091_v6, %v5064_v59  ;;  %9084 = vst.msk [vmem:[%s13564_s27 + $0x70] sm:$0xf] %vm9055_vm3, %v10327_v32  ;;  %v10328_v0 = vpack.c.bf16 %v8104_v33, %v8104_v33  ;;  %v7708_v63 = vmax.f32 %v7316_v30, %v7512_v16  ;;  %v7513_v21 = vmax.f32 %v15092_v20, %v6632_v19 }
 0x2b7   : > { %11230 = vmatmul.mubr.msk.bf16.gmra.mrb[80].mxu0 %vm2931_vm2, %v12032_v28  ;;  %9087 = vst.msk [vmem:[%s13564_s27 + $0x7c] sm:$0xf] %vm9055_vm3, %v10330_v61  ;;  %v7913_v23 = vadd.f32 %v13545_v46, %v7710_v26  ;;  %v7711_v7 = vmax.f32 %v7319_v54, %v7515_v18  ;;  %11622 = vmatmul.mubr.msk.bf16.gmra.mrb[80].mxu1 %vm2931_vm2, %v12033_v5  ;;  %v12039_v28 = vld [vmem:[%s12138_s21 + $0xb80] sm:$0xff]   ;;  %v15101_v26 = vld [vmem:[#allocation36_spill] sm:$0xff] }
 0x2b8   : > { %11233 = vmatprep.mubr.msk.bf16.mxu0 %vm2931_vm2, %v12034_v49  ;;  %9085 = vst.msk [vmem:[%s13564_s27 + $0x74] sm:$0xf] %vm9055_vm3, %v10328_v0  ;;  %v7911_v27 = vadd.f32 %v13545_v46, %v7708_v63  ;;  %v7709_v8 = vmax.f32 %v7317_v62, %v7513_v21  ;;  %11625 = vmatprep.mubr.msk.bf16.mxu1 %vm2931_vm2, %v12035_v60  ;;  %v15100_v49 = vld [vmem:[#allocation35_spill] sm:$0xff]  ;;  %v15102_v63 = vld [vmem:[#allocation37_spill] sm:$0xff]  ;;  %v15103_v21 = vld [vmem:[#allocation38_spill] sm:$0xff] }
 0x2b9   : > { %v8109_v9 = vmax.f32 %v7913_v23, 0.0  ;;  %v7914_v11 = vadd.f32 %v13545_v46, %v7711_v7  ;;  %v12040_v62 = vld [vmem:[%s12138_s21 + $0x568] sm:$0xff]  }
 0x2ba   : > { %v11127_v37 = vpop.f32.mrb[232].mxu0  ;;  %v8107_v15 = vmax.f32 %v7911_v27, 0.0  ;;  %v7912_v14 = vadd.f32 %v13545_v46, %v7709_v8  ;;  %v11519_v40 = vpop.f32.mrb[232].mxu1  ;;  %v12041_v8 = vld [vmem:[%s12138_s21 + $0xb88] sm:$0xff]  }
 0x2bb   : > { %v7322_v38 = vmax.f32 %v15093_v10, %v11127_v37  ;;  %v5077_v41 = vpop.f32.mrb[233].mxu0  ;;  %v10333_v24 = vpack.c.bf16 %v8109_v9, %v8109_v9  ;;  %v8110_v36 = vmax.f32 %v7914_v11, 0.0  ;;  %v7518_v42 = vmax.f32 %v15094_v22, %v11519_v40  ;;  %v6645_v50 = vpop.f32.mrb[233].mxu1  ;;  %v12042_v9 = vld [vmem:[%s12138_s21 + $0x570] sm:$0xff]   ;;  %v15106_v22 = vld [vmem:[#allocation41_spill] sm:$0xff] }
 0x2bc   : > { %v7320_v43 = vmax.f32 %v15095_v39, %v5077_v41  ;;  %v11128_v44 = vpop.f32.mrb[234].mxu0  ;;  %v10331_v3 = vpack.c.bf16 %v8107_v15, %v8107_v15  ;;  %v8108_v48 = vmax.f32 %v7912_v14, 0.0  ;;  %v7516_v25 = vmax.f32 %v15096_v53, %v6645_v50  ;;  %v11520_v1 = vpop.f32.mrb[234].mxu1  ;;  %v15104_v15 = vld [vmem:[#allocation39_spill] sm:$0xff]  ;;  %v15105_v10 = vld [vmem:[#allocation40_spill] sm:$0xff]  ;;  %v15107_v39 = vld [vmem:[#allocation42_spill] sm:$0xff] }
 0x2bd   : > { %v7323_v56 = vmax.f32 %v15097_v51, %v11128_v44  ;;  %v5080_v34 = vpop.f32.mrb[235].mxu0  ;;  %9090 = vst.msk [vmem:[%s13564_s27 + $0x88] sm:$0xf] %vm9055_vm3, %v10333_v24  ;;  %v10334_v29 = vpack.c.bf16 %v8110_v36, %v8110_v36  ;;  %v7714_v57 = vmax.f32 %v7322_v38, %v7518_v42  ;;  %v7519_v12 = vmax.f32 %v15098_v13, %v11520_v1  ;;  %v6648_v4 = vpop.f32.mrb[235].mxu1 }
 0x2be   : > { %v7321_v30 = vmax.f32 %v15099_v58, %v5080_v34  ;;  %9088 = vst.msk [vmem:[%s13564_s27 + $0x80] sm:$0xf] %vm9055_vm3, %v10331_v3  ;;  %v10332_v31 = vpack.c.bf16 %v8108_v48, %v8108_v48  ;;  %v7712_v5 = vmax.f32 %v7320_v43, %v7516_v25  ;;  %v7517_v32 = vmax.f32 %v15100_v49, %v6648_v4 }
 0x2bf   : > { %11234 = vmatmul.mubr.msk.bf16.gmra.mrb[84].mxu0 %vm2931_vm2, %v12036_v2  ;;  %9091 = vst.msk [vmem:[%s13564_s27 + $0x8c] sm:$0xf] %vm9055_vm3, %v10334_v29  ;;  %v7917_v33 = vadd.f32 %v13545_v46, %v7714_v57  ;;  %v7715_v35 = vmax.f32 %v7323_v56, %v7519_v12  ;;  %11626 = vmatmul.mubr.msk.bf16.gmra.mrb[84].mxu1 %vm2931_vm2, %v12037_v45  ;;  %v12043_v2 = vld [vmem:[%s12138_s21 + $0xb90] sm:$0xff]  }
 0x2c0   : > { %11237 = vmatprep.mubr.msk.bf16.mxu0 %vm2931_vm2, %v12038_v47  ;;  %9089 = vst.msk [vmem:[%s13564_s27 + $0x84] sm:$0xf] %vm9055_vm3, %v10332_v31  ;;  %v7915_v16 = vadd.f32 %v13545_v46, %v7712_v5  ;;  %v7713_v52 = vmax.f32 %v7321_v30, %v7517_v32  ;;  %11629 = vmatprep.mubr.msk.bf16.mxu1 %vm2931_vm2, %v12039_v28  ;;  %v15108_v47 = vld [vmem:[#allocation43_spill] sm:$0xff]  ;;  %v15109_v57 = vld [vmem:[#allocation44_spill] sm:$0xff]  ;;  %v12044_v30 = vld [vmem:[%s12138_s21 + $0x578] sm:$0xff]  }
 0x2c1   : > { %v8113_v54 = vmax.f32 %v7917_v33, 0.0  ;;  %v7918_v17 = vadd.f32 %v13545_v46, %v7715_v35  ;;  %v15110_v5 = vld [vmem:[#allocation45_spill] sm:$0xff]  ;;  %v15111_v32 = vld [vmem:[#allocation46_spill] sm:$0xff] }
 0x2c2   : > { %v11131_v59 = vpop.f32.mrb[236].mxu0  ;;  %v8111_v60 = vmax.f32 %v7915_v16, 0.0  ;;  %v7916_v61 = vadd.f32 %v13545_v46, %v7713_v52  ;;  %v11523_v18 = vpop.f32.mrb[236].mxu1  ;;  %v12045_v52 = vld [vmem:[%s12138_s21 + $0xb98] sm:$0xff]  }
 0x2c3   : > { %v7326_v55 = vmax.f32 %v15101_v26, %v11131_v59  ;;  %v5093_v6 = vpop.f32.mrb[237].mxu0  ;;  %v10337_v19 = vpack.c.bf16 %v8113_v54, %v8113_v54  ;;  %v8114_v0 = vmax.f32 %v7918_v17, 0.0  ;;  %v7522_v20 = vmax.f32 %v15102_v63, %v11523_v18  ;;  %v6661_v7 = vpop.f32.mrb[237].mxu1  ;;  %v12046_v54 = vld [vmem:[%s12138_s21 + $0x580] sm:$0xff]   ;;  %v15113_v26 = vld [vmem:[#allocation48_spill] sm:$0xff]  ;;  %v15114_v63 = vld [vmem:[#allocation49_spill] sm:$0xff] }
 0x2c4   : > { %v7324_v23 = vmax.f32 %v15103_v21, %v5093_v6  ;;  %v11132_v27 = vpop.f32.mrb[238].mxu0  ;;  %v10335_v11 = vpack.c.bf16 %v8111_v60, %v8111_v60  ;;  %v8112_v37 = vmax.f32 %v7916_v61, 0.0  ;;  %v7520_v14 = vmax.f32 %v15104_v15, %v6661_v7  ;;  %v11524_v40 = vpop.f32.mrb[238].mxu1  ;;  %v15112_v60 = vld [vmem:[#allocation47_spill] sm:$0xff]  ;;  %v15115_v21 = vld [vmem:[#allocation50_spill] sm:$0xff] }
 0x2c5   : > { %v7327_v38 = vmax.f32 %v15105_v10, %v11132_v27  ;;  %v5096_v41 = vpop.f32.mrb[239].mxu0  ;;  %9094 = vst.msk [vmem:[%s13564_s27 + $0x98] sm:$0xf] %vm9055_vm3, %v10337_v19  ;;  %v10338_v24 = vpack.c.bf16 %v8114_v0, %v8114_v0  ;;  %v7718_v36 = vmax.f32 %v7326_v55, %v7522_v20  ;;  %v7523_v42 = vmax.f32 %v15106_v22, %v11524_v40  ;;  %v6664_v50 = vpop.f32.mrb[239].mxu1 }
 0x2c6   : > { %v7325_v43 = vmax.f32 %v15107_v39, %v5096_v41  ;;  %9092 = vst.msk [vmem:[%s13564_s27 + $0x90] sm:$0xf] %vm9055_vm3, %v10335_v11  ;;  %v10336_v44 = vpack.c.bf16 %v8112_v37, %v8112_v37  ;;  %v7716_v45 = vmax.f32 %v7324_v23, %v7520_v14  ;;  %v7521_v3 = vmax.f32 %v15108_v47, %v6664_v50 }
 0x2c7   : > { %11238 = vmatmul.mubr.msk.bf16.gmra.mrb[88].mxu0 %vm2931_vm2, %v12040_v62  ;;  %9095 = vst.msk [vmem:[%s13564_s27 + $0x9c] sm:$0xf] %vm9055_vm3, %v10338_v24  ;;  %v7921_v48 = vadd.f32 %v13545_v46, %v7718_v36  ;;  %v7719_v53 = vmax.f32 %v7327_v38, %v7523_v42  ;;  %11630 = vmatmul.mubr.msk.bf16.gmra.mrb[88].mxu1 %vm2931_vm2, %v12041_v8  ;;  %v12047_v62 = vld [vmem:[%s12138_s21 + $0xba0] sm:$0xff]   ;;  %v15117_v36 = vld [vmem:[#allocation52_spill] sm:$0xff] }
 0x2c8   : > { %11241 = vmatprep.mubr.msk.bf16.mxu0 %vm2931_vm2, %v12042_v9  ;;  %9093 = vst.msk [vmem:[%s13564_s27 + $0x94] sm:$0xf] %vm9055_vm3, %v10336_v44  ;;  %v7919_v25 = vadd.f32 %v13545_v46, %v7716_v45  ;;  %v7717_v51 = vmax.f32 %v7325_v43, %v7521_v3  ;;  %11633 = vmatprep.mubr.msk.bf16.mxu1 %vm2931_vm2, %v12043_v2  ;;  %v15116_v9 = vld [vmem:[#allocation51_spill] sm:$0xff]  ;;  %v15118_v45 = vld [vmem:[#allocation53_spill] sm:$0xff]  ;;  %v15119_v3 = vld [vmem:[#allocation54_spill] sm:$0xff] }
 0x2c9   : > { %v8117_v56 = vmax.f32 %v7921_v48, 0.0  ;;  %v7922_v1 = vadd.f32 %v13545_v46, %v7719_v53  ;;  %v12048_v43 = vld [vmem:[%s12138_s21 + $0x588] sm:$0xff]  }
 0x2ca   : > { %v11135_v34 = vpop.f32.mrb[240].mxu0  ;;  %v8115_v28 = vmax.f32 %v7919_v25, 0.0  ;;  %v7920_v29 = vadd.f32 %v13545_v46, %v7717_v51  ;;  %v11527_v12 = vpop.f32.mrb[240].mxu1  ;;  %v12049_v51 = vld [vmem:[%s12138_s21 + $0xba8] sm:$0xff]  }
 0x2cb   : > { %v7330_v13 = vmax.f32 %v15109_v57, %v11135_v34  ;;  %v5109_v58 = vpop.f32.mrb[241].mxu0  ;;  %v10341_v4 = vpack.c.bf16 %v8117_v56, %v8117_v56  ;;  %v8118_v31 = vmax.f32 %v7922_v1, 0.0  ;;  %v7526_v49 = vmax.f32 %v15110_v5, %v11527_v12  ;;  %v6677_v35 = vpop.f32.mrb[241].mxu1  ;;  %v12050_v56 = vld [vmem:[%s12138_s21 + $0x590] sm:$0xff]   ;;  %v15120_v34 = vld [vmem:[#allocation55_spill] sm:$0xff] }
 0x2cc   : > { %v7328_v33 = vmax.f32 %v15111_v32, %v5109_v58  ;;  %v11136_v16 = vpop.f32.mrb[242].mxu0  ;;  %v10339_v17 = vpack.c.bf16 %v8115_v28, %v8115_v28  ;;  %v8116_v59 = vmax.f32 %v7920_v29, 0.0  ;;  %v7524_v61 = vmax.f32 %v15112_v60, %v6677_v35  ;;  %v11528_v18 = vpop.f32.mrb[242].mxu1  ;;  %v15121_v29 = vld [vmem:[#allocation56_spill] sm:$0xff] }
 0x2cd   : > { %v7331_v55 = vmax.f32 %v15113_v26, %v11136_v16  ;;  %v5112_v6 = vpop.f32.mrb[243].mxu0  ;;  %9098 = vst.msk [vmem:[%s13564_s27 + $0xa8] sm:$0xf] %vm9055_vm3, %v10341_v4  ;;  %v10342_v19 = vpack.c.bf16 %v8118_v31, %v8118_v31  ;;  %v7722_v0 = vmax.f32 %v7330_v13, %v7526_v49  ;;  %v7527_v20 = vmax.f32 %v15114_v63, %v11528_v18  ;;  %v6680_v7 = vpop.f32.mrb[243].mxu1  ;;  %v12051_v58 = vld [vmem:[%s12138_s21 + $0xbb0] sm:$0xff]   ;;  %v15122_v31 = vld [vmem:[#allocation57_spill] sm:$0xff] }
 0x2ce   : > { %v7329_v23 = vmax.f32 %v15115_v21, %v5112_v6  ;;  %9096 = vst.msk [vmem:[%s13564_s27 + $0xa0] sm:$0xf] %vm9055_vm3, %v10339_v17  ;;  %v10340_v27 = vpack.c.bf16 %v8116_v59, %v8116_v59  ;;  %v7720_v8 = vmax.f32 %v7328_v33, %v7524_v61  ;;  %v7525_v11 = vmax.f32 %v15116_v9, %v6680_v7  ;;  %v15123_v49 = vld [vmem:[#allocation58_spill] sm:$0xff] }
 0x2cf   : > { %11242 = vmatmul.mubr.msk.bf16.gmra.mrb[92].mxu0 %vm2931_vm2, %v12044_v30  ;;  %9099 = vst.msk [vmem:[%s13564_s27 + $0xac] sm:$0xf] %vm9055_vm3, %v10342_v19  ;;  %v7925_v37 = vadd.f32 %v13545_v46, %v7722_v0  ;;  %v7723_v15 = vmax.f32 %v7331_v55, %v7527_v20  ;;  %11634 = vmatmul.mubr.msk.bf16.gmra.mrb[92].mxu1 %vm2931_vm2, %v12045_v52  ;;  %v15124_v52 = vld [vmem:[#allocation59_spill] sm:$0xff]  ;;  %v13897_v17 = vld [vmem:[%s14719_s2] ss:$0 sm:$0xff]  ;;  %v15125_v0 = vld [vmem:[#allocation60_spill] sm:$0xff] }
 0x2d0   : > { %11245 = vmatprep.mubr.msk.bf16.mxu0 %vm2931_vm2, %v12046_v54  ;;  %9097 = vst.msk [vmem:[%s13564_s27 + $0xa4] sm:$0xf] %vm9055_vm3, %v10340_v27  ;;  %v7923_v14 = vadd.f32 %v13545_v46, %v7720_v8  ;;  %v7721_v10 = vmax.f32 %v7329_v23, %v7525_v11  ;;  %11637 = vmatprep.mubr.msk.bf16.mxu1 %vm2931_vm2, %v12047_v62  ;;  %v12052_v23 = vld [vmem:[%s12138_s21 + $0x598] sm:$0xff]   ;;  %v15127_v11 = vld [vmem:[#allocation62_spill] sm:$0xff] }
 0x2d1   : > { %v8121_v38 = vmax.f32 %v7925_v37, 0.0  ;;  %v7926_v40 = vadd.f32 %v13545_v46, %v7723_v15  ;;  %v15126_v8 = vld [vmem:[#allocation61_spill] sm:$0xff] }
 0x2d2   : > { %v11139_v41 = vpop.f32.mrb[244].mxu0  ;;  %v8119_v2 = vmax.f32 %v7923_v14, 0.0  ;;  %v7924_v24 = vadd.f32 %v13545_v46, %v7721_v10  ;;  %v11531_v42 = vpop.f32.mrb[244].mxu1  ;;  %v12053_v10 = vld [vmem:[%s12138_s21 + $0xbb8] sm:$0xff]  }
 0x2d3   : > { %v7334_v22 = vmax.f32 %v15117_v36, %v11139_v41  ;;  %v5125_v39 = vpop.f32.mrb[245].mxu0  ;;  %v10345_v50 = vpack.c.bf16 %v8121_v38, %v8121_v38  ;;  %v8122_v44 = vmax.f32 %v7926_v40, 0.0  ;;  %v7530_v47 = vmax.f32 %v15118_v45, %v11531_v42  ;;  %v6693_v53 = vpop.f32.mrb[245].mxu1  ;;  %v12054_v38 = vld [vmem:[%s12138_s21 + $0x5a0] sm:$0xff]   ;;  %v15129_v36 = vld [vmem:[#allocation64_spill] sm:$0xff]  ;;  %v15130_v45 = vld [vmem:[#allocation65_spill] sm:$0xff] }
 0x2d4   : > { %v7332_v48 = vmax.f32 %v15119_v3, %v5125_v39  ;;  %v11140_v25 = vpop.f32.mrb[246].mxu0  ;;  %v10343_v1 = vpack.c.bf16 %v8119_v2, %v8119_v2  ;;  %v8120_v46 = vmax.f32 %v7924_v24, 0.0  ;;  %v7528_v28 = vmax.f32 %v15120_v34, %v6693_v53  ;;  %v11532_v13 = vpop.f32.mrb[246].mxu1  ;;  %v15128_v2 = vld [vmem:[#allocation63_spill] sm:$0xff]  ;;  %v15131_v3 = vld [vmem:[#allocation66_spill] sm:$0xff] }
 0x2d5   : > { %v7335_v57 = vmax.f32 %v15121_v29, %v11140_v25  ;;  %v5128_v12 = vpop.f32.mrb[247].mxu0  ;;  %9102 = vst.msk [vmem:[%s13564_s27 + $0xb8] sm:$0xf] %vm9055_vm3, %v10345_v50  ;;  %v10346_v30 = vpack.c.bf16 %v8122_v44, %v8122_v44  ;;  %v7726_v4 = vmax.f32 %v7334_v22, %v7530_v47  ;;  %v7531_v5 = vmax.f32 %v15122_v31, %v11532_v13  ;;  %v6696_v33 = vpop.f32.mrb[247].mxu1 }
 0x2d6   : > { %v7333_v32 = vmax.f32 %v15123_v49, %v5128_v12  ;;  %9100 = vst.msk [vmem:[%s13564_s27 + $0xb0] sm:$0xf] %vm9055_vm3, %v10343_v1  ;;  %v10344_v35 = vpack.c.bf16 %v8120_v46, %v8120_v46  ;;  %v7724_v16 = vmax.f32 %v7332_v48, %v7528_v28  ;;  %v7529_v54 = vmax.f32 %v15124_v52, %v6696_v33 }
 0x2d7   : > { %11246 = vmatmul.mubr.msk.bf16.gmra.mrb[96].mxu0 %vm2931_vm2, %v12048_v43  ;;  %9103 = vst.msk [vmem:[%s13564_s27 + $0xbc] sm:$0xf] %vm9055_vm3, %v10346_v30  ;;  %v7929_v59 = vadd.f32 %v13897_v17, %v7726_v4  ;;  %v7727_v60 = vmax.f32 %v7335_v57, %v7531_v5  ;;  %11638 = vmatmul.mubr.msk.bf16.gmra.mrb[96].mxu1 %vm2931_vm2, %v12049_v51  ;;  %v12055_v43 = vld [vmem:[%s12138_s21 + $0xbc0] sm:$0xff]   ;;  %v15133_v4 = vld [vmem:[#allocation68_spill] sm:$0xff] }
 0x2d8   : > { %11249 = vmatprep.mubr.msk.bf16.mxu0 %vm2931_vm2, %v12050_v56  ;;  %9101 = vst.msk [vmem:[%s13564_s27 + $0xb4] sm:$0xf] %vm9055_vm3, %v10344_v35  ;;  %v7927_v61 = vadd.f32 %v13897_v17, %v7724_v16  ;;  %v7725_v26 = vmax.f32 %v7333_v32, %v7529_v54  ;;  %11641 = vmatprep.mubr.msk.bf16.mxu1 %vm2931_vm2, %v12051_v58  ;;  %v15132_v56 = vld [vmem:[#allocation67_spill] sm:$0xff]  ;;  %v15134_v16 = vld [vmem:[#allocation69_spill] sm:$0xff]  ;;  %v15135_v54 = vld [vmem:[#allocation70_spill] sm:$0xff] }
 0x2d9   : > { %v8125_v55 = vmax.f32 %v7929_v59, 0.0  ;;  %v7930_v18 = vadd.f32 %v13897_v17, %v7727_v60  ;;  %v12056_v32 = vld [vmem:[%s12138_s21 + $0x5a8] sm:$0xff]  }
 0x2da   : > { %v11143_v6 = vpop.f32.mrb[248].mxu0  ;;  %v8123_v62 = vmax.f32 %v7927_v61, 0.0  ;;  %v7928_v19 = vadd.f32 %v13897_v17, %v7725_v26  ;;  %v11535_v20 = vpop.f32.mrb[248].mxu1  ;;  %v12057_v26 = vld [vmem:[%s12138_s21 + $0xbc8] sm:$0xff]  }
 0x2db   : > { %v7338_v63 = vmax.f32 %v15125_v0, %v11143_v6  ;;  %v5141_v21 = vpop.f32.mrb[249].mxu0  ;;  %v10349_v7 = vpack.c.bf16 %v8125_v55, %v8125_v55  ;;  %v8126_v27 = vmax.f32 %v7930_v18, 0.0  ;;  %v7534_v9 = vmax.f32 %v15126_v8, %v11535_v20  ;;  %v6709_v15 = vpop.f32.mrb[249].mxu1  ;;  %v12058_v55 = vld [vmem:[%s12138_s21 + $0x5b0] sm:$0xff]   ;;  %v15138_v8 = vld [vmem:[#allocation73_spill] sm:$0xff] }
 0x2dc   : > { %v7336_v37 = vmax.f32 %v15127_v11, %v5141_v21  ;;  %v11144_v14 = vpop.f32.mrb[250].mxu0  ;;  %v10347_v40 = vpack.c.bf16 %v8123_v62, %v8123_v62  ;;  %v8124_v41 = vmax.f32 %v7928_v19, 0.0  ;;  %v7532_v24 = vmax.f32 %v15128_v2, %v6709_v15  ;;  %v11536_v42 = vpop.f32.mrb[250].mxu1  ;;  %v15136_v62 = vld [vmem:[#allocation71_spill] sm:$0xff]  ;;  %v15137_v0 = vld [vmem:[#allocation72_spill] sm:$0xff]  ;;  %v15139_v11 = vld [vmem:[#allocation74_spill] sm:$0xff] }
 0x2dd   : > { %v7339_v22 = vmax.f32 %v15129_v36, %v11144_v14  ;;  %v5144_v39 = vpop.f32.mrb[251].mxu0  ;;  %9106 = vst.msk [vmem:[%s13564_s27 + $0xc8] sm:$0xf] %vm9055_vm3, %v10349_v7  ;;  %v10350_v50 = vpack.c.bf16 %v8126_v27, %v8126_v27  ;;  %v7730_v44 = vmax.f32 %v7338_v63, %v7534_v9  ;;  %v7535_v47 = vmax.f32 %v15130_v45, %v11536_v42  ;;  %v6712_v53 = vpop.f32.mrb[251].mxu1 }
 0x2de   : > { %v7337_v48 = vmax.f32 %v15131_v3, %v5144_v39  ;;  %9104 = vst.msk [vmem:[%s13564_s27 + $0xc0] sm:$0xf] %vm9055_vm3, %v10347_v40  ;;  %v10348_v25 = vpack.c.bf16 %v8124_v41, %v8124_v41  ;;  %v7728_v51 = vmax.f32 %v7336_v37, %v7532_v24  ;;  %v7533_v1 = vmax.f32 %v15132_v56, %v6712_v53 }
 0x2df   : > { %11250 = vmatmul.mubr.msk.bf16.gmra.mrb[100].mxu0 %vm2931_vm2, %v12052_v23  ;;  %9107 = vst.msk [vmem:[%s13564_s27 + $0xcc] sm:$0xf] %vm9055_vm3, %v10350_v50  ;;  %v7933_v46 = vadd.f32 %v13897_v17, %v7730_v44  ;;  %v7731_v34 = vmax.f32 %v7339_v22, %v7535_v47  ;;  %11642 = vmatmul.mubr.msk.bf16.gmra.mrb[100].mxu1 %vm2931_vm2, %v12053_v10  ;;  %v12059_v23 = vld [vmem:[%s12138_s21 + $0xbd0] sm:$0xff]  }
 0x2e0   : > { %11253 = vmatprep.mubr.msk.bf16.mxu0 %vm2931_vm2, %v12054_v38  ;;  %9105 = vst.msk [vmem:[%s13564_s27 + $0xc4] sm:$0xf] %vm9055_vm3, %v10348_v25  ;;  %v7931_v28 = vadd.f32 %v13897_v17, %v7728_v51  ;;  %v7729_v29 = vmax.f32 %v7337_v48, %v7533_v1  ;;  %11645 = vmatprep.mubr.msk.bf16.mxu1 %vm2931_vm2, %v12055_v43  ;;  %v15140_v38 = vld [vmem:[#allocation75_spill] sm:$0xff]  ;;  %v15141_v44 = vld [vmem:[#allocation76_spill] sm:$0xff]  ;;  %v12060_v48 = vld [vmem:[%s12138_s21 + $0x5b8] sm:$0xff]  }
 0x2e1   : > { %v8129_v57 = vmax.f32 %v7933_v46, 0.0  ;;  %v7934_v13 = vadd.f32 %v13897_v17, %v7731_v34  ;;  %v15142_v51 = vld [vmem:[#allocation77_spill] sm:$0xff]  ;;  %v15143_v1 = vld [vmem:[#allocation78_spill] sm:$0xff] }
 0x2e2   : > { %v11147_v12 = vpop.f32.mrb[252].mxu0  ;;  %v8127_v58 = vmax.f32 %v7931_v28, 0.0  ;;  %v7932_v30 = vadd.f32 %v13897_v17, %v7729_v29  ;;  %v11539_v5 = vpop.f32.mrb[252].mxu1  ;;  %v12061_v29 = vld [vmem:[%s12138_s21 + $0xbd8] sm:$0xff]  }
 0x2e3   : > { %v7342_v31 = vmax.f32 %v15133_v4, %v11147_v12  ;;  %v5157_v49 = vpop.f32.mrb[253].mxu0  ;;  %v10353_v33 = vpack.c.bf16 %v8129_v57, %v8129_v57  ;;  %v8130_v35 = vmax.f32 %v7934_v13, 0.0  ;;  %v7538_v52 = vmax.f32 %v15134_v16, %v11539_v5  ;;  %v6725_v60 = vpop.f32.mrb[253].mxu1  ;;  %v12062_v57 = vld [vmem:[%s12138_s21 + $0x5c0] sm:$0xff]   ;;  %v15145_v4 = vld [vmem:[#allocation80_spill] sm:$0xff]  ;;  %v15146_v16 = vld [vmem:[#allocation81_spill] sm:$0xff] }
 0x2e4   : > { %v7340_v59 = vmax.f32 %v15135_v54, %v5157_v49  ;;  %v11148_v61 = vpop.f32.mrb[254].mxu0  ;;  %v10351_v18 = vpack.c.bf16 %v8127_v58, %v8127_v58  ;;  %v8128_v6 = vmax.f32 %v7932_v30, 0.0  ;;  %v7536_v19 = vmax.f32 %v15136_v62, %v6725_v60  ;;  %v11540_v20 = vpop.f32.mrb[254].mxu1  ;;  %v15144_v58 = vld [vmem:[#allocation79_spill] sm:$0xff]  ;;  %v15147_v54 = vld [vmem:[#allocation82_spill] sm:$0xff] }
 0x2e5   : > { %v7343_v63 = vmax.f32 %v15137_v0, %v11148_v61  ;;  %v5160_v21 = vpop.f32.mrb[255].mxu0  ;;  %9110 = vst.msk [vmem:[%s13564_s27 + $0xd8] sm:$0xf] %vm9055_vm3, %v10353_v33  ;;  %v10354_v7 = vpack.c.bf16 %v8130_v35, %v8130_v35  ;;  %v7734_v27 = vmax.f32 %v7342_v31, %v7538_v52  ;;  %v7539_v9 = vmax.f32 %v15138_v8, %v11540_v20  ;;  %v6728_v15 = vpop.f32.mrb[255].mxu1 }
 0x2e6   : > { %v7341_v37 = vmax.f32 %v15139_v11, %v5160_v21  ;;  %9108 = vst.msk [vmem:[%s13564_s27 + $0xd0] sm:$0xf] %vm9055_vm3, %v10351_v18  ;;  %v10352_v14 = vpack.c.bf16 %v8128_v6, %v8128_v6  ;;  %v7732_v10 = vmax.f32 %v7340_v59, %v7536_v19  ;;  %v7537_v40 = vmax.f32 %v15140_v38, %v6728_v15 }
 0x2e7   : > { %11254 = vmatmul.mubr.msk.bf16.gmra.mrb[104].mxu0 %vm2931_vm2, %v12056_v32  ;;  %9111 = vst.msk [vmem:[%s13564_s27 + $0xdc] sm:$0xf] %vm9055_vm3, %v10354_v7  ;;  %v7937_v41 = vadd.f32 %v13897_v17, %v7734_v27  ;;  %v7735_v2 = vmax.f32 %v7343_v63, %v7539_v9  ;;  %11646 = vmatmul.mubr.msk.bf16.gmra.mrb[104].mxu1 %vm2931_vm2, %v12057_v26  ;;  %v12063_v32 = vld [vmem:[%s12138_s21 + $0xbe0] sm:$0xff]   ;;  %v15149_v27 = vld [vmem:[#allocation84_spill] sm:$0xff] }
 0x2e8   : > { %11257 = vmatprep.mubr.msk.bf16.mxu0 %vm2931_vm2, %v12058_v55  ;;  %9109 = vst.msk [vmem:[%s13564_s27 + $0xd4] sm:$0xf] %vm9055_vm3, %v10352_v14  ;;  %v7935_v24 = vadd.f32 %v13897_v17, %v7732_v10  ;;  %v7733_v36 = vmax.f32 %v7341_v37, %v7537_v40  ;;  %11649 = vmatprep.mubr.msk.bf16.mxu1 %vm2931_vm2, %v12059_v23  ;;  %v15148_v55 = vld [vmem:[#allocation83_spill] sm:$0xff]  ;;  %v15150_v10 = vld [vmem:[#allocation85_spill] sm:$0xff]  ;;  %v15151_v40 = vld [vmem:[#allocation86_spill] sm:$0xff] }
 0x2e9   : > { %v8133_v22 = vmax.f32 %v7937_v41, 0.0  ;;  %v7938_v42 = vadd.f32 %v13897_v17, %v7735_v2  ;;  %v12064_v37 = vld [vmem:[%s12138_s21 + $0x5c8] sm:$0xff]  }
 0x2ea   : > { %v11151_v39 = vpop.f32.mrb[0].mxu0  ;;  %v8131_v43 = vmax.f32 %v7935_v24, 0.0  ;;  %v7936_v50 = vadd.f32 %v13897_v17, %v7733_v36  ;;  %v11543_v47 = vpop.f32.mrb[0].mxu1  ;;  %v12065_v36 = vld [vmem:[%s12138_s21 + $0xbe8] sm:$0xff]  }
 0x2eb   : > { %v7346_v45 = vmax.f32 %v15141_v44, %v11151_v39  ;;  %v5173_v3 = vpop.f32.mrb[1].mxu0  ;;  %v10357_v53 = vpack.c.bf16 %v8133_v22, %v8133_v22  ;;  %v8134_v25 = vmax.f32 %v7938_v42, 0.0  ;;  %v7542_v56 = vmax.f32 %v15142_v51, %v11543_v47  ;;  %v6741_v34 = vpop.f32.mrb[1].mxu1  ;;  %v12066_v22 = vld [vmem:[%s12138_s21 + $0x5d0] sm:$0xff]   ;;  %v15154_v51 = vld [vmem:[#allocation89_spill] sm:$0xff] }
 0x2ec   : > { %v7344_v46 = vmax.f32 %v15143_v1, %v5173_v3  ;;  %v11152_v28 = vpop.f32.mrb[2].mxu0  ;;  %v10355_v13 = vpack.c.bf16 %v8131_v43, %v8131_v43  ;;  %v8132_v12 = vmax.f32 %v7936_v50, 0.0  ;;  %v7540_v30 = vmax.f32 %v15144_v58, %v6741_v34  ;;  %v11544_v5 = vpop.f32.mrb[2].mxu1  ;;  %v15152_v43 = vld [vmem:[#allocation87_spill] sm:$0xff]  ;;  %v15153_v44 = vld [vmem:[#allocation88_spill] sm:$0xff]  ;;  %v15155_v1 = vld [vmem:[#allocation90_spill] sm:$0xff] }
 0x2ed   : > { %v7347_v31 = vmax.f32 %v15145_v4, %v11152_v28  ;;  %v5176_v49 = vpop.f32.mrb[3].mxu0  ;;  %9114 = vst.msk [vmem:[%s13564_s27 + $0xe8] sm:$0xf] %vm9055_vm3, %v10357_v53  ;;  %v10358_v33 = vpack.c.bf16 %v8134_v25, %v8134_v25  ;;  %v7738_v35 = vmax.f32 %v7346_v45, %v7542_v56  ;;  %v7543_v52 = vmax.f32 %v15146_v16, %v11544_v5  ;;  %v6744_v60 = vpop.f32.mrb[3].mxu1 }
 0x2ee   : > { %v7345_v59 = vmax.f32 %v15147_v54, %v5176_v49  ;;  %9112 = vst.msk [vmem:[%s13564_s27 + $0xe0] sm:$0xf] %vm9055_vm3, %v10355_v13  ;;  %v10356_v61 = vpack.c.bf16 %v8132_v12, %v8132_v12  ;;  %v7736_v26 = vmax.f32 %v7344_v46, %v7540_v30  ;;  %v7541_v18 = vmax.f32 %v15148_v55, %v6744_v60 }
 0x2ef   : > { %11258 = vmatmul.mubr.msk.bf16.gmra.mrb[108].mxu0 %vm2931_vm2, %v12060_v48  ;;  %9115 = vst.msk [vmem:[%s13564_s27 + $0xec] sm:$0xf] %vm9055_vm3, %v10358_v33  ;;  %v7941_v6 = vadd.f32 %v13897_v17, %v7738_v35  ;;  %v7739_v62 = vmax.f32 %v7347_v31, %v7543_v52  ;;  %11650 = vmatmul.mubr.msk.bf16.gmra.mrb[108].mxu1 %vm2931_vm2, %v12061_v29  ;;  %v12067_v48 = vld [vmem:[%s12138_s21 + $0xbf0] sm:$0xff]  }
 0x2f0   : > { %11261 = vmatprep.mubr.msk.bf16.mxu0 %vm2931_vm2, %v12062_v57  ;;  %9113 = vst.msk [vmem:[%s13564_s27 + $0xe4] sm:$0xf] %vm9055_vm3, %v10356_v61  ;;  %v7939_v19 = vadd.f32 %v13897_v17, %v7736_v26  ;;  %v7737_v0 = vmax.f32 %v7345_v59, %v7541_v18  ;;  %11653 = vmatprep.mubr.msk.bf16.mxu1 %vm2931_vm2, %v12063_v32  ;;  %v15156_v57 = vld [vmem:[#allocation91_spill] sm:$0xff]  ;;  %v15157_v35 = vld [vmem:[#allocation92_spill] sm:$0xff]  ;;  %v12068_v59 = vld [vmem:[%s12138_s21 + $0x5d8] sm:$0xff]  }
 0x2f1   : > { %v8137_v63 = vmax.f32 %v7941_v6, 0.0  ;;  %v7942_v20 = vadd.f32 %v13897_v17, %v7739_v62  ;;  %v15158_v26 = vld [vmem:[#allocation93_spill] sm:$0xff]  ;;  %v15159_v18 = vld [vmem:[#allocation94_spill] sm:$0xff] }
 0x2f2   : > { %v11155_v21 = vpop.f32.mrb[4].mxu0  ;;  %v8135_v23 = vmax.f32 %v7939_v19, 0.0  ;;  %v7940_v7 = vadd.f32 %v13897_v17, %v7737_v0  ;;  %v11547_v9 = vpop.f32.mrb[4].mxu1  ;;  %v12069_v0 = vld [vmem:[%s12138_s21 + $0xbf8] sm:$0xff]  }
 0x2f3   : > { %v7350_v8 = vmax.f32 %v15149_v27, %v11155_v21  ;;  %v5189_v11 = vpop.f32.mrb[5].mxu0  ;;  %v10361_v15 = vpack.c.bf16 %v8137_v63, %v8137_v63  ;;  %v8138_v14 = vmax.f32 %v7942_v20, 0.0  ;;  %v7546_v38 = vmax.f32 %v15150_v10, %v11547_v9  ;;  %v6757_v2 = vpop.f32.mrb[5].mxu1  ;;  %v12070_v63 = vld [vmem:[%s12138_s21 + $0x5e0] sm:$0xff]   ;;  %v15161_v27 = vld [vmem:[#allocation96_spill] sm:$0xff]  ;;  %v15162_v10 = vld [vmem:[#allocation97_spill] sm:$0xff] }
 0x2f4   : > { %v7348_v41 = vmax.f32 %v15151_v40, %v5189_v11  ;;  %v11156_v24 = vpop.f32.mrb[6].mxu0  ;;  %v10359_v42 = vpack.c.bf16 %v8135_v23, %v8135_v23  ;;  %v8136_v39 = vmax.f32 %v7940_v7, 0.0  ;;  %v7544_v50 = vmax.f32 %v15152_v43, %v6757_v2  ;;  %v11548_v47 = vpop.f32.mrb[6].mxu1  ;;  %v15160_v23 = vld [vmem:[#allocation95_spill] sm:$0xff]  ;;  %v15163_v40 = vld [vmem:[#allocation98_spill] sm:$0xff] }
 0x2f5   : > { %v7351_v45 = vmax.f32 %v15153_v44, %v11156_v24  ;;  %v5192_v3 = vpop.f32.mrb[7].mxu0  ;;  %9118 = vst.msk [vmem:[%s13564_s27 + $0xf8] sm:$0xf] %vm9055_vm3, %v10361_v15  ;;  %v10362_v53 = vpack.c.bf16 %v8138_v14, %v8138_v14  ;;  %v7742_v25 = vmax.f32 %v7350_v8, %v7546_v38  ;;  %v7547_v56 = vmax.f32 %v15154_v51, %v11548_v47  ;;  %v6760_v34 = vpop.f32.mrb[7].mxu1 }
 0x2f6   : > { %v7349_v46 = vmax.f32 %v15155_v1, %v5192_v3  ;;  %9116 = vst.msk [vmem:[%s13564_s27 + $0xf0] sm:$0xf] %vm9055_vm3, %v10359_v42  ;;  %v10360_v28 = vpack.c.bf16 %v8136_v39, %v8136_v39  ;;  %v7740_v29 = vmax.f32 %v7348_v41, %v7544_v50  ;;  %v7545_v13 = vmax.f32 %v15156_v57, %v6760_v34 }
 0x2f7   : > { %11262 = vmatmul.mubr.msk.bf16.gmra.mrb[112].mxu0 %vm2931_vm2, %v12064_v37  ;;  %9119 = vst.msk [vmem:[%s13564_s27 + $0xfc] sm:$0xf] %vm9055_vm3, %v10362_v53  ;;  %v7945_v12 = vadd.f32 %v13897_v17, %v7742_v25  ;;  %v7743_v58 = vmax.f32 %v7351_v45, %v7547_v56  ;;  %11654 = vmatmul.mubr.msk.bf16.gmra.mrb[112].mxu1 %vm2931_vm2, %v12065_v36  ;;  %v12071_v37 = vld [vmem:[%s12138_s21 + $0xc00] sm:$0xff]   ;;  %v15165_v25 = vld [vmem:[#allocation100_spill] sm:$0xff] }
 0x2f8   : > { %11265 = vmatprep.mubr.msk.bf16.mxu0 %vm2931_vm2, %v12066_v22  ;;  %9117 = vst.msk [vmem:[%s13564_s27 + $0xf4] sm:$0xf] %vm9055_vm3, %v10360_v28  ;;  %v7943_v30 = vadd.f32 %v13897_v17, %v7740_v29  ;;  %v7741_v4 = vmax.f32 %v7349_v46, %v7545_v13  ;;  %11657 = vmatprep.mubr.msk.bf16.mxu1 %vm2931_vm2, %v12067_v48  ;;  %v15164_v22 = vld [vmem:[#allocation99_spill] sm:$0xff]  ;;  %v15166_v29 = vld [vmem:[#allocation101_spill] sm:$0xff]  ;;  %v15167_v13 = vld [vmem:[#allocation102_spill] sm:$0xff] }
 0x2f9   : > { %v8141_v31 = vmax.f32 %v7945_v12, 0.0  ;;  %v7946_v5 = vadd.f32 %v13897_v17, %v7743_v58  ;;  %v12072_v46 = vld [vmem:[%s12138_s21 + $0x5e8] sm:$0xff]  }
 0x2fa   : > { %v11159_v49 = vpop.f32.mrb[8].mxu0  ;;  %v8139_v32 = vmax.f32 %v7943_v30, 0.0  ;;  %v7944_v33 = vadd.f32 %v13897_v17, %v7741_v4  ;;  %v11551_v52 = vpop.f32.mrb[8].mxu1  ;;  %v12073_v4 = vld [vmem:[%s12138_s21 + $0xc08] sm:$0xff]  }
 0x2fb   : > { %v7354_v16 = vmax.f32 %v15157_v35, %v11159_v49  ;;  %v5205_v54 = vpop.f32.mrb[9].mxu0  ;;  %v10365_v60 = vpack.c.bf16 %v8141_v31, %v8141_v31  ;;  %v8142_v61 = vmax.f32 %v7946_v5, 0.0  ;;  %v7550_v55 = vmax.f32 %v15158_v26, %v11551_v52  ;;  %v6773_v62 = vpop.f32.mrb[9].mxu1  ;;  %v12074_v31 = vld [vmem:[%s12138_s21 + $0x5f0] sm:$0xff]   ;;  %v15170_v26 = vld [vmem:[#allocation105_spill] sm:$0xff] }
 0x2fc   : > { %v7352_v6 = vmax.f32 %v15159_v18, %v5205_v54  ;;  %v11160_v19 = vpop.f32.mrb[10].mxu0  ;;  %v10363_v20 = vpack.c.bf16 %v8139_v32, %v8139_v32  ;;  %v8140_v21 = vmax.f32 %v7944_v33, 0.0  ;;  %v7548_v7 = vmax.f32 %v15160_v23, %v6773_v62  ;;  %v11552_v9 = vpop.f32.mrb[10].mxu1  ;;  %v15168_v32 = vld [vmem:[#allocation103_spill] sm:$0xff]  ;;  %v15169_v35 = vld [vmem:[#allocation104_spill] sm:$0xff]  ;;  %v15171_v18 = vld [vmem:[#allocation106_spill] sm:$0xff] }
 0x2fd   : > { %v7355_v8 = vmax.f32 %v15161_v27, %v11160_v19  ;;  %v5208_v11 = vpop.f32.mrb[11].mxu0  ;;  %9122 = vst.msk [vmem:[%s13564_s27 + $0x108] sm:$0xf] %vm9055_vm3, %v10365_v60  ;;  %v10366_v15 = vpack.c.bf16 %v8142_v61, %v8142_v61  ;;  %v7746_v14 = vmax.f32 %v7354_v16, %v7550_v55  ;;  %v7551_v38 = vmax.f32 %v15162_v10, %v11552_v9  ;;  %v6776_v2 = vpop.f32.mrb[11].mxu1 }
 0x2fe   : > { %v7353_v41 = vmax.f32 %v15163_v40, %v5208_v11  ;;  %9120 = vst.msk [vmem:[%s13564_s27 + $0x100] sm:$0xf] %vm9055_vm3, %v10363_v20  ;;  %v10364_v24 = vpack.c.bf16 %v8140_v21, %v8140_v21  ;;  %v7744_v36 = vmax.f32 %v7352_v6, %v7548_v7  ;;  %v7549_v42 = vmax.f32 %v15164_v22, %v6776_v2 }
 0x2ff   : > { %11266 = vmatmul.mubr.msk.bf16.gmra.mrb[116].mxu0 %vm2931_vm2, %v12068_v59  ;;  %9123 = vst.msk [vmem:[%s13564_s27 + $0x10c] sm:$0xf] %vm9055_vm3, %v10366_v15  ;;  %v7949_v39 = vadd.f32 %v13897_v17, %v7746_v14  ;;  %v7747_v43 = vmax.f32 %v7355_v8, %v7551_v38  ;;  %11658 = vmatmul.mubr.msk.bf16.gmra.mrb[116].mxu1 %vm2931_vm2, %v12069_v0  ;;  %v12075_v59 = vld [vmem:[%s12138_s21 + $0xc10] sm:$0xff]  }
 0x300   : > { %11269 = vmatprep.mubr.msk.bf16.mxu0 %vm2931_vm2, %v12070_v63  ;;  %9121 = vst.msk [vmem:[%s13564_s27 + $0x104] sm:$0xf] %vm9055_vm3, %v10364_v24  ;;  %v7947_v50 = vadd.f32 %v13897_v17, %v7744_v36  ;;  %v7745_v44 = vmax.f32 %v7353_v41, %v7549_v42  ;;  %11661 = vmatprep.mubr.msk.bf16.mxu1 %vm2931_vm2, %v12071_v37  ;;  %v15172_v63 = vld [vmem:[#allocation107_spill] sm:$0xff]  ;;  %v15173_v14 = vld [vmem:[#allocation108_spill] sm:$0xff]  ;;  %v12076_v41 = vld [vmem:[%s12138_s21 + $0x5f8] sm:$0xff]  }
 0x301   : > { %v8145_v45 = vmax.f32 %v7949_v39, 0.0  ;;  %v7950_v47 = vadd.f32 %v13897_v17, %v7747_v43  ;;  %v15174_v36 = vld [vmem:[#allocation109_spill] sm:$0xff]  ;;  %v15175_v42 = vld [vmem:[#allocation110_spill] sm:$0xff] }
 0x302   : > { %v11163_v3 = vpop.f32.mrb[12].mxu0  ;;  %v8143_v48 = vmax.f32 %v7947_v50, 0.0  ;;  %v7948_v53 = vadd.f32 %v13897_v17, %v7745_v44  ;;  %v11555_v56 = vpop.f32.mrb[12].mxu1  ;;  %v12077_v44 = vld [vmem:[%s12138_s21 + $0xc18] sm:$0xff]  }
 0x303   : > { %v7358_v51 = vmax.f32 %v15165_v25, %v11163_v3  ;;  %v5221_v1 = vpop.f32.mrb[13].mxu0  ;;  %v10369_v34 = vpack.c.bf16 %v8145_v45, %v8145_v45  ;;  %v8146_v28 = vmax.f32 %v7950_v47, 0.0  ;;  %v7554_v57 = vmax.f32 %v15166_v29, %v11555_v56  ;;  %v6789_v58 = vpop.f32.mrb[13].mxu1  ;;  %v12078_v45 = vld [vmem:[%s12138_s21 + $0x600] sm:$0xff]   ;;  %v15177_v25 = vld [vmem:[#allocation112_spill] sm:$0xff]  ;;  %v15178_v29 = vld [vmem:[#allocation113_spill] sm:$0xff] }
 0x304   : > { %v7356_v12 = vmax.f32 %v15167_v13, %v5221_v1  ;;  %v11164_v30 = vpop.f32.mrb[14].mxu0  ;;  %v10367_v5 = vpack.c.bf16 %v8143_v48, %v8143_v48  ;;  %v8144_v49 = vmax.f32 %v7948_v53, 0.0  ;;  %v7552_v33 = vmax.f32 %v15168_v32, %v6789_v58  ;;  %v11556_v52 = vpop.f32.mrb[14].mxu1  ;;  %v15176_v48 = vld [vmem:[#allocation111_spill] sm:$0xff]  ;;  %v15179_v13 = vld [vmem:[#allocation114_spill] sm:$0xff] }
 0x305   : > { %v7359_v16 = vmax.f32 %v15169_v35, %v11164_v30  ;;  %v5224_v54 = vpop.f32.mrb[15].mxu0  ;;  %9126 = vst.msk [vmem:[%s13564_s27 + $0x118] sm:$0xf] %vm9055_vm3, %v10369_v34  ;;  %v10370_v60 = vpack.c.bf16 %v8146_v28, %v8146_v28  ;;  %v7750_v61 = vmax.f32 %v7358_v51, %v7554_v57  ;;  %v7555_v55 = vmax.f32 %v15170_v26, %v11556_v52  ;;  %v6792_v62 = vpop.f32.mrb[15].mxu1 }
 0x306   : > { %v7357_v6 = vmax.f32 %v15171_v18, %v5224_v54  ;;  %9124 = vst.msk [vmem:[%s13564_s27 + $0x110] sm:$0xf] %vm9055_vm3, %v10367_v5  ;;  %v10368_v19 = vpack.c.bf16 %v8144_v49, %v8144_v49  ;;  %v7748_v0 = vmax.f32 %v7356_v12, %v7552_v33  ;;  %v7553_v20 = vmax.f32 %v15172_v63, %v6792_v62 }
 0x307   : > { %11270 = vmatmul.mubr.msk.bf16.gmra.mrb[120].mxu0 %vm2931_vm2, %v12072_v46  ;;  %9127 = vst.msk [vmem:[%s13564_s27 + $0x11c] sm:$0xf] %vm9055_vm3, %v10370_v60  ;;  %v7953_v21 = vadd.f32 %v13897_v17, %v7750_v61  ;;  %v7751_v23 = vmax.f32 %v7359_v16, %v7555_v55  ;;  %11662 = vmatmul.mubr.msk.bf16.gmra.mrb[120].mxu1 %vm2931_vm2, %v12073_v4  ;;  %v12079_v46 = vld [vmem:[%s12138_s21 + $0xc20] sm:$0xff]   ;;  %v15181_v61 = vld [vmem:[#allocation116_spill] sm:$0xff] }
 0x308   : > { %11273 = vmatprep.mubr.msk.bf16.mxu0 %vm2931_vm2, %v12074_v31  ;;  %9125 = vst.msk [vmem:[%s13564_s27 + $0x114] sm:$0xf] %vm9055_vm3, %v10368_v19  ;;  %v7951_v7 = vadd.f32 %v13897_v17, %v7748_v0  ;;  %v7749_v27 = vmax.f32 %v7357_v6, %v7553_v20  ;;  %11665 = vmatprep.mubr.msk.bf16.mxu1 %vm2931_vm2, %v12075_v59  ;;  %v15180_v31 = vld [vmem:[#allocation115_spill] sm:$0xff]  ;;  %v15182_v0 = vld [vmem:[#allocation117_spill] sm:$0xff]  ;;  %v15183_v20 = vld [vmem:[#allocation118_spill] sm:$0xff] }
 0x309   : > { %v8149_v8 = vmax.f32 %v7953_v21, 0.0  ;;  %v7954_v9 = vadd.f32 %v13897_v17, %v7751_v23  ;;  %v12080_v6 = vld [vmem:[%s12138_s21 + $0x608] sm:$0xff]  }
 0x30a   : > { %v11167_v11 = vpop.f32.mrb[16].mxu0  ;;  %v8147_v37 = vmax.f32 %v7951_v7, 0.0  ;;  %v7952_v15 = vadd.f32 %v13897_v17, %v7749_v27  ;;  %v11559_v38 = vpop.f32.mrb[16].mxu1  ;;  %v12081_v27 = vld [vmem:[%s12138_s21 + $0xc28] sm:$0xff]  }
 0x30b   : > { %v7362_v10 = vmax.f32 %v15173_v14, %v11167_v11  ;;  %v5237_v40 = vpop.f32.mrb[17].mxu0  ;;  %v10373_v2 = vpack.c.bf16 %v8149_v8, %v8149_v8  ;;  %v8150_v24 = vmax.f32 %v7954_v9, 0.0  ;;  %v7558_v22 = vmax.f32 %v15174_v36, %v11559_v38  ;;  %v6805_v43 = vpop.f32.mrb[17].mxu1  ;;  %v12082_v8 = vld [vmem:[%s12138_s21 + $0x610] sm:$0xff]   ;;  %v15186_v36 = vld [vmem:[#allocation121_spill] sm:$0xff] }
 0x30c   : > { %v7360_v39 = vmax.f32 %v15175_v42, %v5237_v40  ;;  %v11168_v50 = vpop.f32.mrb[18].mxu0  ;;  %v10371_v47 = vpack.c.bf16 %v8147_v37, %v8147_v37  ;;  %v8148_v3 = vmax.f32 %v7952_v15, 0.0  ;;  %v7556_v53 = vmax.f32 %v15176_v48, %v6805_v43  ;;  %v11560_v56 = vpop.f32.mrb[18].mxu1  ;;  %v15184_v37 = vld [vmem:[#allocation119_spill] sm:$0xff]  ;;  %v15185_v14 = vld [vmem:[#allocation120_spill] sm:$0xff]  ;;  %v15187_v42 = vld [vmem:[#allocation122_spill] sm:$0xff] }
 0x30d   : > { %v7363_v51 = vmax.f32 %v15177_v25, %v11168_v50  ;;  %v5240_v1 = vpop.f32.mrb[19].mxu0  ;;  %9130 = vst.msk [vmem:[%s13564_s27 + $0x128] sm:$0xf] %vm9055_vm3, %v10373_v2  ;;  %v10374_v34 = vpack.c.bf16 %v8150_v24, %v8150_v24  ;;  %v7754_v28 = vmax.f32 %v7362_v10, %v7558_v22  ;;  %v7559_v57 = vmax.f32 %v15178_v29, %v11560_v56  ;;  %v6808_v58 = vpop.f32.mrb[19].mxu1 }
 0x30e   : > { %v7361_v12 = vmax.f32 %v15179_v13, %v5240_v1  ;;  %9128 = vst.msk [vmem:[%s13564_s27 + $0x120] sm:$0xf] %vm9055_vm3, %v10371_v47  ;;  %v10372_v30 = vpack.c.bf16 %v8148_v3, %v8148_v3  ;;  %v7752_v4 = vmax.f32 %v7360_v39, %v7556_v53  ;;  %v7557_v5 = vmax.f32 %v15180_v31, %v6808_v58 }
 0x30f   : > { %11274 = vmatmul.mubr.msk.bf16.gmra.mrb[124].mxu0 %vm2931_vm2, %v12076_v41  ;;  %9131 = vst.msk [vmem:[%s13564_s27 + $0x12c] sm:$0xf] %vm9055_vm3, %v10374_v34  ;;  %v7957_v49 = vadd.f32 %v13897_v17, %v7754_v28  ;;  %v7755_v32 = vmax.f32 %v7363_v51, %v7559_v57  ;;  %11666 = vmatmul.mubr.msk.bf16.gmra.mrb[124].mxu1 %vm2931_vm2, %v12077_v44  ;;  %v12083_v41 = vld [vmem:[%s12138_s21 + $0xc30] sm:$0xff]  }
 0x310   : > { %11277 = vmatprep.mubr.msk.bf16.mxu0 %vm2931_vm2, %v12078_v45  ;;  %9129 = vst.msk [vmem:[%s13564_s27 + $0x124] sm:$0xf] %vm9055_vm3, %v10372_v30  ;;  %v7955_v33 = vadd.f32 %v13897_v17, %v7752_v4  ;;  %v7753_v35 = vmax.f32 %v7361_v12, %v7557_v5  ;;  %11669 = vmatprep.mubr.msk.bf16.mxu1 %vm2931_vm2, %v12079_v46  ;;  %v15188_v45 = vld [vmem:[#allocation123_spill] sm:$0xff]  ;;  %v15189_v28 = vld [vmem:[#allocation124_spill] sm:$0xff]  ;;  %v12084_v12 = vld [vmem:[%s12138_s21 + $0x618] sm:$0xff]  }
 0x311   : > { %v8153_v16 = vmax.f32 %v7957_v49, 0.0  ;;  %v7958_v52 = vadd.f32 %v13897_v17, %v7755_v32  ;;  %v15190_v4 = vld [vmem:[#allocation125_spill] sm:$0xff]  ;;  %v15191_v5 = vld [vmem:[#allocation126_spill] sm:$0xff] }
 0x312   : > { %v11171_v54 = vpop.f32.mrb[20].mxu0  ;;  %v8151_v59 = vmax.f32 %v7955_v33, 0.0  ;;  %v7956_v60 = vadd.f32 %v13897_v17, %v7753_v35  ;;  %v11563_v55 = vpop.f32.mrb[20].mxu1  ;;  %v12085_v35 = vld [vmem:[%s12138_s21 + $0xc38] sm:$0xff]  }
 0x313   : > { %v7366_v26 = vmax.f32 %v15181_v61, %v11171_v54  ;;  %v5253_v18 = vpop.f32.mrb[21].mxu0  ;;  %v10377_v62 = vpack.c.bf16 %v8153_v16, %v8153_v16  ;;  %v8154_v19 = vmax.f32 %v7958_v52, 0.0  ;;  %v7562_v63 = vmax.f32 %v15182_v0, %v11563_v55  ;;  %v6821_v23 = vpop.f32.mrb[21].mxu1  ;;  %v15192_v54 = vld [vmem:[#allocation127_spill] sm:$0xff]  ;;  %v15195_v0 = vld [vmem:[#allocation130_spill] sm:$0xff] }
 0x314   : > { %v7364_v21 = vmax.f32 %v15183_v20, %v5253_v18  ;;  %v11172_v7 = vpop.f32.mrb[22].mxu0  ;;  %v10375_v9 = vpack.c.bf16 %v8151_v59, %v8151_v59  ;;  %v8152_v11 = vmax.f32 %v7956_v60, 0.0  ;;  %v7560_v15 = vmax.f32 %v15184_v37, %v6821_v23  ;;  %v11564_v38 = vpop.f32.mrb[22].mxu1  ;;  %v15193_v60 = vld [vmem:[#allocation128_spill] sm:$0xff] }
 0x315   : > { %v7367_v10 = vmax.f32 %v15185_v14, %v11172_v7  ;;  %v5256_v40 = vpop.f32.mrb[23].mxu0  ;;  %9134 = vst.msk [vmem:[%s13564_s27 + $0x138] sm:$0xf] %vm9055_vm3, %v10377_v62  ;;  %v10378_v2 = vpack.c.bf16 %v8154_v19, %v8154_v19  ;;  %v7758_v24 = vmax.f32 %v7366_v26, %v7562_v63  ;;  %v7563_v22 = vmax.f32 %v15186_v36, %v11564_v38  ;;  %v6824_v43 = vpop.f32.mrb[23].mxu1  ;;  %v15194_v62 = vld [vmem:[#allocation129_spill] sm:$0xff]  ;;  %v15196_v7 = vld [vmem:[#allocation131_spill] sm:$0xff] }
 0x316   : > { %v7365_v39 = vmax.f32 %v15187_v42, %v5256_v40  ;;  %9132 = vst.msk [vmem:[%s13564_s27 + $0x130] sm:$0xf] %vm9055_vm3, %v10375_v9  ;;  %v10376_v50 = vpack.c.bf16 %v8152_v11, %v8152_v11  ;;  %v7756_v44 = vmax.f32 %v7364_v21, %v7560_v15  ;;  %v7561_v47 = vmax.f32 %v15188_v45, %v6824_v43 }
 0x317   : > { %11278 = vmatmul.mubr.msk.bf16.gmra.mrb[128].mxu0 %vm2931_vm2, %v12080_v6  ;;  %9135 = vst.msk [vmem:[%s13564_s27 + $0x13c] sm:$0xf] %vm9055_vm3, %v10378_v2  ;;  %v7961_v3 = vadd.f32 %v13897_v17, %v7758_v24  ;;  %v7759_v48 = vmax.f32 %v7367_v10, %v7563_v22  ;;  %11670 = vmatmul.mubr.msk.bf16.gmra.mrb[128].mxu1 %vm2931_vm2, %v12081_v27 }
 0x318   : > { %11281 = vmatprep.mubr.msk.bf16.mxu0 %vm2931_vm2, %v12082_v8  ;;  %9133 = vst.msk [vmem:[%s13564_s27 + $0x134] sm:$0xf] %vm9055_vm3, %v10376_v50  ;;  %v7959_v53 = vadd.f32 %v13897_v17, %v7756_v44  ;;  %v7757_v25 = vmax.f32 %v7365_v39, %v7561_v47  ;;  %11673 = vmatprep.mubr.msk.bf16.mxu1 %vm2931_vm2, %v12083_v41  ;;  %v15197_v41 = vld [vmem:[#allocation132_spill] sm:$0xff]  ;;  %v15198_v39 = vld [vmem:[#allocation133_spill] sm:$0xff]  ;;  %v15199_v50 = vld [vmem:[#allocation134_spill] sm:$0xff] }
 0x319   : > { %v8157_v51 = vmax.f32 %v7961_v3, 0.0  ;;  %v7962_v56 = vadd.f32 %v13897_v17, %v7759_v48 }
 0x31a   : > { %v11175_v1 = vpop.f32.mrb[24].mxu0  ;;  %v8155_v46 = vmax.f32 %v7959_v53, 0.0  ;;  %v7960_v34 = vadd.f32 %v13897_v17, %v7757_v25  ;;  %v11567_v57 = vpop.f32.mrb[24].mxu1  ;;  %v15200_v53 = vld [vmem:[#allocation135_spill] sm:$0xff] }
 0x31b   : > { %v7370_v29 = vmax.f32 %v15189_v28, %v11175_v1  ;;  %v5269_v13 = vpop.f32.mrb[25].mxu0  ;;  %v10381_v58 = vpack.c.bf16 %v8157_v51, %v8157_v51  ;;  %v8158_v30 = vmax.f32 %v7962_v56, 0.0  ;;  %v7566_v31 = vmax.f32 %v15190_v4, %v11567_v57  ;;  %v6837_v32 = vpop.f32.mrb[25].mxu1  ;;  %v15201_v51 = vld [vmem:[#allocation136_spill] sm:$0xff] }
 0x31c   : > { %v7368_v49 = vmax.f32 %v15191_v5, %v5269_v13  ;;  %v11176_v33 = vpop.f32.mrb[26].mxu0  ;;  %v10379_v16 = vpack.c.bf16 %v8155_v46, %v8155_v46  ;;  %v8156_v52 = vmax.f32 %v7960_v34, 0.0  ;;  %v7564_v59 = vmax.f32 %v15192_v54, %v6837_v32  ;;  %v11568_v26 = vpop.f32.mrb[26].mxu1  ;;  %v15203_v13 = vld [vmem:[#allocation138_spill] sm:$0xff] }
 0x31d   : > { %v7371_v61 = vmax.f32 %v15193_v60, %v11176_v33  ;;  %v5272_v55 = vpop.f32.mrb[27].mxu0  ;;  %9138 = vst.msk [vmem:[%s13564_s27 + $0x148] sm:$0xf] %vm9055_vm3, %v10381_v58  ;;  %v10382_v18 = vpack.c.bf16 %v8158_v30, %v8158_v30  ;;  %v7762_v6 = vmax.f32 %v7370_v29, %v7566_v31  ;;  %v7567_v19 = vmax.f32 %v15194_v62, %v11568_v26  ;;  %v6840_v20 = vpop.f32.mrb[27].mxu1  ;;  %v15202_v29 = vld [vmem:[#allocation137_spill] sm:$0xff]  ;;  %v15204_v31 = vld [vmem:[#allocation139_spill] sm:$0xff] }
 0x31e   : > { %v7369_v63 = vmax.f32 %v15195_v0, %v5272_v55  ;;  %9136 = vst.msk [vmem:[%s13564_s27 + $0x140] sm:$0xf] %vm9055_vm3, %v10379_v16  ;;  %v10380_v21 = vpack.c.bf16 %v8156_v52, %v8156_v52  ;;  %v7760_v23 = vmax.f32 %v7368_v49, %v7564_v59  ;;  %v7565_v27 = vmax.f32 %v15196_v7, %v6840_v20 }
 0x31f   : > { %11282 = vmatmul.mubr.msk.bf16.gmra.mrb[132].mxu0 %vm2931_vm2, %v12084_v12  ;;  %9139 = vst.msk [vmem:[%s13564_s27 + $0x14c] sm:$0xf] %vm9055_vm3, %v10382_v18  ;;  %v7965_v8 = vadd.f32 %v13897_v17, %v7762_v6  ;;  %v7763_v9 = vmax.f32 %v7371_v61, %v7567_v19  ;;  %11674 = vmatmul.mubr.msk.bf16.gmra.mrb[132].mxu1 %vm2931_vm2, %v12085_v35  ;;  %v15205_v61 = vld [vmem:[#allocation140_spill] sm:$0xff]  ;;  %v15206_v19 = vld [vmem:[#allocation141_spill] sm:$0xff] }
 0x320   : > { %9137 = vst.msk [vmem:[%s13564_s27 + $0x144] sm:$0xf] %vm9055_vm3, %v10380_v21  ;;  %v7963_v11 = vadd.f32 %v13897_v17, %v7760_v23  ;;  %v7761_v37 = vmax.f32 %v7369_v63, %v7565_v27  ;;  %v15207_v63 = vld [vmem:[#allocation142_spill] sm:$0xff] }
 0x321   : > { %v8161_v15 = vmax.f32 %v7965_v8, 0.0  ;;  %v7966_v14 = vadd.f32 %v13897_v17, %v7763_v9  ;;  %v15208_v8 = vld [vmem:[#allocation143_spill] sm:$0xff] }
 0x322   : > { %v11179_v10 = vpop.f32.mrb[28].mxu0  ;;  %v8159_v38 = vmax.f32 %v7963_v11, 0.0  ;;  %v7964_v40 = vadd.f32 %v13897_v17, %v7761_v37  ;;  %v11571_v24 = vpop.f32.mrb[28].mxu1  ;;  %v15209_v11 = vld [vmem:[#allocation144_spill] sm:$0xff] }
 0x323   : > { %v7374_v2 = vmax.f32 %v15197_v41, %v11179_v10  ;;  %v5285_v36 = vpop.f32.mrb[29].mxu0  ;;  %v10385_v22 = vpack.c.bf16 %v8161_v15, %v8161_v15  ;;  %v8162_v42 = vmax.f32 %v7966_v14, 0.0  ;;  %v7570_v43 = vmax.f32 %v15198_v39, %v11571_v24  ;;  %v6853_v45 = vpop.f32.mrb[29].mxu1  ;;  %v15212_v39 = vld [vmem:[#allocation147_spill] sm:$0xff] }
 0x324   : > { %v7372_v44 = vmax.f32 %v15199_v50, %v5285_v36  ;;  %v11180_v47 = vpop.f32.mrb[30].mxu0  ;;  %v10383_v3 = vpack.c.bf16 %v8159_v38, %v8159_v38  ;;  %v8160_v48 = vmax.f32 %v7964_v40, 0.0  ;;  %v7568_v25 = vmax.f32 %v15200_v53, %v6853_v45  ;;  %v11572_v1 = vpop.f32.mrb[30].mxu1  ;;  %v15210_v40 = vld [vmem:[#allocation145_spill] sm:$0xff] }
 0x325   : > { %v7375_v56 = vmax.f32 %v15201_v51, %v11180_v47  ;;  %v5288_v46 = vpop.f32.mrb[31].mxu0  ;;  %9142 = vst.msk [vmem:[%s13564_s27 + $0x158] sm:$0xf] %vm9055_vm3, %v10385_v22  ;;  %v10386_v34 = vpack.c.bf16 %v8162_v42, %v8162_v42  ;;  %v7766_v28 = vmax.f32 %v7374_v2, %v7570_v43  ;;  %v7571_v57 = vmax.f32 %v15202_v29, %v11572_v1  ;;  %v6856_v58 = vpop.f32.mrb[31].mxu1  ;;  %v15211_v2 = vld [vmem:[#allocation146_spill] sm:$0xff] }
 0x326   : > { %v7373_v12 = vmax.f32 %v15203_v13, %v5288_v46  ;;  %9140 = vst.msk [vmem:[%s13564_s27 + $0x150] sm:$0xf] %vm9055_vm3, %v10383_v3  ;;  %v10384_v30 = vpack.c.bf16 %v8160_v48, %v8160_v48  ;;  %v7764_v4 = vmax.f32 %v7372_v44, %v7568_v25  ;;  %v7569_v5 = vmax.f32 %v15204_v31, %v6856_v58 }
 0x327   : > { %9143 = vst.msk [vmem:[%s13564_s27 + $0x15c] sm:$0xf] %vm9055_vm3, %v10386_v34  ;;  %v7969_v49 = vadd.f32 %v13897_v17, %v7766_v28  ;;  %v7767_v32 = vmax.f32 %v7375_v56, %v7571_v57  ;;  %v15213_v56 = vld [vmem:[#allocation148_spill] sm:$0xff]  ;;  %v15214_v57 = vld [vmem:[#allocation149_spill] sm:$0xff] }
 0x328   : > { %9141 = vst.msk [vmem:[%s13564_s27 + $0x154] sm:$0xf] %vm9055_vm3, %v10384_v30  ;;  %v7967_v33 = vadd.f32 %v13897_v17, %v7764_v4  ;;  %v7765_v35 = vmax.f32 %v7373_v12, %v7569_v5  ;;  %v15215_v12 = vld [vmem:[#allocation150_spill] sm:$0xff] }
 0x329   : > { %v8165_v16 = vmax.f32 %v7969_v49, 0.0  ;;  %v7970_v52 = vadd.f32 %v13897_v17, %v7767_v32  ;;  %v15216_v49 = vld [vmem:[#allocation151_spill] sm:$0xff] }
 0x32a   : > { %v11183_v54 = vpop.f32.mrb[32].mxu0  ;;  %v8163_v59 = vmax.f32 %v7967_v33, 0.0  ;;  %v7968_v60 = vadd.f32 %v13897_v17, %v7765_v35  ;;  %v11575_v55 = vpop.f32.mrb[32].mxu1  ;;  %v15217_v33 = vld [vmem:[#allocation152_spill] sm:$0xff] }
 0x32b   : > { %v7378_v26 = vmax.f32 %v15205_v61, %v11183_v54  ;;  %v5301_v18 = vpop.f32.mrb[33].mxu0  ;;  %v10389_v6 = vpack.c.bf16 %v8165_v16, %v8165_v16  ;;  %v8166_v62 = vmax.f32 %v7970_v52, 0.0  ;;  %v7574_v0 = vmax.f32 %v15206_v19, %v11575_v55  ;;  %v6869_v21 = vpop.f32.mrb[33].mxu1  ;;  %v15220_v19 = vld [vmem:[#allocation155_spill] sm:$0xff] }
 0x32c   : > { %v7376_v20 = vmax.f32 %v15207_v63, %v5301_v18  ;;  %v11184_v23 = vpop.f32.mrb[34].mxu0  ;;  %v10387_v7 = vpack.c.bf16 %v8163_v59, %v8163_v59  ;;  %v8164_v27 = vmax.f32 %v7968_v60, 0.0  ;;  %v7572_v9 = vmax.f32 %v15208_v8, %v6869_v21  ;;  %v11576_v15 = vpop.f32.mrb[34].mxu1  ;;  %v15218_v60 = vld [vmem:[#allocation153_spill] sm:$0xff] }
 0x32d   : > { %v7379_v37 = vmax.f32 %v15209_v11, %v11184_v23  ;;  %v5304_v14 = vpop.f32.mrb[35].mxu0  ;;  %9146 = vst.msk [vmem:[%s13564_s27 + $0x168] sm:$0xf] %vm9055_vm3, %v10389_v6  ;;  %v10390_v10 = vpack.c.bf16 %v8166_v62, %v8166_v62  ;;  %v7770_v38 = vmax.f32 %v7378_v26, %v7574_v0  ;;  %v7575_v41 = vmax.f32 %v15210_v40, %v11576_v15  ;;  %v6872_v36 = vpop.f32.mrb[35].mxu1  ;;  %v15219_v26 = vld [vmem:[#allocation154_spill] sm:$0xff]  ;;  %v15221_v15 = vld [vmem:[#allocation156_spill] sm:$0xff] }
 0x32e   : > { %v7377_v24 = vmax.f32 %v15211_v2, %v5304_v14  ;;  %9144 = vst.msk [vmem:[%s13564_s27 + $0x160] sm:$0xf] %vm9055_vm3, %v10387_v7  ;;  %v10388_v22 = vpack.c.bf16 %v8164_v27, %v8164_v27  ;;  %v7768_v42 = vmax.f32 %v7376_v20, %v7572_v9  ;;  %v7573_v43 = vmax.f32 %v15212_v39, %v6872_v36  ;;  %v14218_v11 = vld [vmem:[%s14719_s2] ss:$0 sm:$0xff]  ;;  %v15222_v2 = vld [vmem:[#allocation157_spill] sm:$0xff] }
 0x32f   : > { %9147 = vst.msk [vmem:[%s13564_s27 + $0x16c] sm:$0xf] %vm9055_vm3, %v10390_v10  ;;  %v7973_v50 = vadd.f32 %v13897_v17, %v7770_v38  ;;  %v7771_v44 = vmax.f32 %v7379_v37, %v7575_v41  ;;  %v15223_v36 = vld [vmem:[#allocation158_spill] sm:$0xff] }
 0x330   : > { %9145 = vst.msk [vmem:[%s13564_s27 + $0x164] sm:$0xf] %vm9055_vm3, %v10388_v22  ;;  %v7971_v45 = vadd.f32 %v13897_v17, %v7768_v42  ;;  %v7769_v47 = vmax.f32 %v7377_v24, %v7573_v43 }
 0x331   : > { %v8169_v3 = vmax.f32 %v7973_v50, 0.0  ;;  %v7974_v48 = vadd.f32 %v13897_v17, %v7771_v44  ;;  %v15224_v50 = vld [vmem:[#allocation159_spill] sm:$0xff] }
 0x332   : > { %v11187_v53 = vpop.f32.mrb[36].mxu0  ;;  %v8167_v25 = vmax.f32 %v7971_v45, 0.0  ;;  %v7972_v51 = vadd.f32 %v13897_v17, %v7769_v47  ;;  %v11579_v46 = vpop.f32.mrb[36].mxu1  ;;  %v15225_v45 = vld [vmem:[#allocation160_spill] sm:$0xff] }
 0x333   : > { %v7382_v1 = vmax.f32 %v15213_v56, %v11187_v53  ;;  %v5317_v34 = vpop.f32.mrb[37].mxu0  ;;  %v10393_v28 = vpack.c.bf16 %v8169_v3, %v8169_v3  ;;  %v8170_v29 = vmax.f32 %v7974_v48, 0.0  ;;  %v7578_v13 = vmax.f32 %v15214_v57, %v11579_v46  ;;  %v6885_v30 = vpop.f32.mrb[37].mxu1  ;;  %v15228_v57 = vld [vmem:[#allocation163_spill] sm:$0xff] }
 0x334   : > { %v7380_v58 = vmax.f32 %v15215_v12, %v5317_v34  ;;  %v11188_v4 = vpop.f32.mrb[38].mxu0  ;;  %v10391_v31 = vpack.c.bf16 %v8167_v25, %v8167_v25  ;;  %v8168_v5 = vmax.f32 %v7972_v51, 0.0  ;;  %v7576_v32 = vmax.f32 %v15216_v49, %v6885_v30  ;;  %v11580_v16 = vpop.f32.mrb[38].mxu1  ;;  %v15226_v51 = vld [vmem:[#allocation161_spill] sm:$0xff] }
 0x335   : > { %v7383_v35 = vmax.f32 %v15217_v33, %v11188_v4  ;;  %v5320_v52 = vpop.f32.mrb[39].mxu0  ;;  %9150 = vst.msk [vmem:[%s13564_s27 + $0x178] sm:$0xf] %vm9055_vm3, %v10393_v28  ;;  %v10394_v54 = vpack.c.bf16 %v8170_v29, %v8170_v29  ;;  %v7774_v59 = vmax.f32 %v7382_v1, %v7578_v13  ;;  %v7579_v61 = vmax.f32 %v15218_v60, %v11580_v16  ;;  %v6888_v18 = vpop.f32.mrb[39].mxu1  ;;  %v15227_v1 = vld [vmem:[#allocation162_spill] sm:$0xff] }
 0x336   : > { %v7381_v55 = vmax.f32 %v15219_v26, %v5320_v52  ;;  %9148 = vst.msk [vmem:[%s13564_s27 + $0x170] sm:$0xf] %vm9055_vm3, %v10391_v31  ;;  %v10392_v6 = vpack.c.bf16 %v8168_v5, %v8168_v5  ;;  %v7772_v62 = vmax.f32 %v7380_v58, %v7576_v32  ;;  %v7577_v0 = vmax.f32 %v15220_v19, %v6888_v18 }
 0x337   : > { %9151 = vst.msk [vmem:[%s13564_s27 + $0x17c] sm:$0xf] %vm9055_vm3, %v10394_v54  ;;  %v7977_v63 = vadd.f32 %v13897_v17, %v7774_v59  ;;  %v7775_v20 = vmax.f32 %v7383_v35, %v7579_v61  ;;  %v15229_v35 = vld [vmem:[#allocation164_spill] sm:$0xff]  ;;  %v15230_v61 = vld [vmem:[#allocation165_spill] sm:$0xff] }
 0x338   : > { %9149 = vst.msk [vmem:[%s13564_s27 + $0x174] sm:$0xf] %vm9055_vm3, %v10392_v6  ;;  %v7975_v21 = vadd.f32 %v13897_v17, %v7772_v62  ;;  %v7773_v23 = vmax.f32 %v7381_v55, %v7577_v0  ;;  %v15231_v55 = vld [vmem:[#allocation166_spill] sm:$0xff] }
 0x339   : > { %v8173_v7 = vmax.f32 %v7977_v63, 0.0  ;;  %v7978_v27 = vadd.f32 %v13897_v17, %v7775_v20  ;;  %v15232_v63 = vld [vmem:[#allocation167_spill] sm:$0xff] }
 0x33a   : > { %v11191_v8 = vpop.f32.mrb[40].mxu0  ;;  %v8171_v9 = vmax.f32 %v7975_v21, 0.0  ;;  %v7976_v37 = vadd.f32 %v14218_v11, %v7773_v23  ;;  %v11583_v10 = vpop.f32.mrb[40].mxu1  ;;  %v15233_v21 = vld [vmem:[#allocation168_spill] sm:$0xff] }
 0x33b   : > { %v7386_v14 = vmax.f32 %v15221_v15, %v11191_v8  ;;  %v5333_v38 = vpop.f32.mrb[41].mxu0  ;;  %v10397_v40 = vpack.c.bf16 %v8173_v7, %v8173_v7  ;;  %v8174_v41 = vmax.f32 %v7978_v27, 0.0  ;;  %v7582_v24 = vmax.f32 %v15222_v2, %v11583_v10  ;;  %v6901_v22 = vpop.f32.mrb[41].mxu1  ;;  %v15236_v2 = vld [vmem:[#allocation171_spill] sm:$0xff] }
 0x33c   : > { %v7384_v17 = vmax.f32 %v15223_v36, %v5333_v38  ;;  %v11192_v42 = vpop.f32.mrb[42].mxu0  ;;  %v10395_v39 = vpack.c.bf16 %v8171_v9, %v8171_v9  ;;  %v8172_v43 = vmax.f32 %v7976_v37, 0.0  ;;  %v7580_v44 = vmax.f32 %v15224_v50, %v6901_v22  ;;  %v11584_v3 = vpop.f32.mrb[42].mxu1  ;;  %v15234_v37 = vld [vmem:[#allocation169_spill] sm:$0xff] }
 0x33d   : > { %v7387_v47 = vmax.f32 %v15225_v45, %v11192_v42  ;;  %v5336_v48 = vpop.f32.mrb[43].mxu0  ;;  %9154 = vst.msk [vmem:[%s13564_s27 + $0x188] sm:$0xf] %vm9055_vm3, %v10397_v40  ;;  %v10398_v53 = vpack.c.bf16 %v8174_v41, %v8174_v41  ;;  %v7778_v25 = vmax.f32 %v7386_v14, %v7582_v24  ;;  %v7583_v56 = vmax.f32 %v15226_v51, %v11584_v3  ;;  %v6904_v34 = vpop.f32.mrb[43].mxu1  ;;  %v15235_v14 = vld [vmem:[#allocation170_spill] sm:$0xff] }
 0x33e   : > { %v7385_v46 = vmax.f32 %v15227_v1, %v5336_v48  ;;  %9152 = vst.msk [vmem:[%s13564_s27 + $0x180] sm:$0xf] %vm9055_vm3, %v10395_v39  ;;  %v10396_v28 = vpack.c.bf16 %v8172_v43, %v8172_v43  ;;  %v7776_v29 = vmax.f32 %v7384_v17, %v7580_v44  ;;  %v7581_v13 = vmax.f32 %v15228_v57, %v6904_v34 }
 0x33f   : > { %9155 = vst.msk [vmem:[%s13564_s27 + $0x18c] sm:$0xf] %vm9055_vm3, %v10398_v53  ;;  %v7981_v12 = vadd.f32 %v14218_v11, %v7778_v25  ;;  %v7779_v58 = vmax.f32 %v7387_v47, %v7583_v56  ;;  %v15237_v47 = vld [vmem:[#allocation172_spill] sm:$0xff]  ;;  %v15238_v56 = vld [vmem:[#allocation173_spill] sm:$0xff] }
 0x340   : > { %9153 = vst.msk [vmem:[%s13564_s27 + $0x184] sm:$0xf] %vm9055_vm3, %v10396_v28  ;;  %v7979_v30 = vadd.f32 %v14218_v11, %v7776_v29  ;;  %v7777_v4 = vmax.f32 %v7385_v46, %v7581_v13  ;;  %v15239_v46 = vld [vmem:[#allocation174_spill] sm:$0xff] }
 0x341   : > { %v8177_v31 = vmax.f32 %v7981_v12, 0.0  ;;  %v7982_v5 = vadd.f32 %v14218_v11, %v7779_v58  ;;  %v15240_v12 = vld [vmem:[#allocation175_spill] sm:$0xff] }
 0x342   : > { %v11195_v49 = vpop.f32.mrb[44].mxu0  ;;  %v8175_v32 = vmax.f32 %v7979_v30, 0.0  ;;  %v7980_v33 = vadd.f32 %v14218_v11, %v7777_v4  ;;  %v11587_v52 = vpop.f32.mrb[44].mxu1  ;;  %v15241_v30 = vld [vmem:[#allocation176_spill] sm:$0xff] }
 0x343   : > { %v7390_v16 = vmax.f32 %v15229_v35, %v11195_v49  ;;  %v5349_v54 = vpop.f32.mrb[45].mxu0  ;;  %v10401_v59 = vpack.c.bf16 %v8177_v31, %v8177_v31  ;;  %v8178_v60 = vmax.f32 %v7982_v5, 0.0  ;;  %v7586_v26 = vmax.f32 %v15230_v61, %v11587_v52  ;;  %v6917_v6 = vpop.f32.mrb[45].mxu1  ;;  %v15244_v61 = vld [vmem:[#allocation179_spill] sm:$0xff] }
 0x344   : > { %v7388_v18 = vmax.f32 %v15231_v55, %v5349_v54  ;;  %v11196_v62 = vpop.f32.mrb[46].mxu0  ;;  %v10399_v19 = vpack.c.bf16 %v8175_v32, %v8175_v32  ;;  %v8176_v0 = vmax.f32 %v7980_v33, 0.0  ;;  %v7584_v20 = vmax.f32 %v15232_v63, %v6917_v6  ;;  %v11588_v7 = vpop.f32.mrb[46].mxu1  ;;  %v15242_v33 = vld [vmem:[#allocation177_spill] sm:$0xff] }
 0x345   : > { %v7391_v23 = vmax.f32 %v15233_v21, %v11196_v62  ;;  %v5352_v27 = vpop.f32.mrb[47].mxu0  ;;  %9158 = vst.msk [vmem:[%s13564_s27 + $0x198] sm:$0xf] %vm9055_vm3, %v10401_v59  ;;  %v10402_v8 = vpack.c.bf16 %v8178_v60, %v8178_v60  ;;  %v7782_v9 = vmax.f32 %v7390_v16, %v7586_v26  ;;  %v7587_v15 = vmax.f32 %v15234_v37, %v11588_v7  ;;  %v6920_v38 = vpop.f32.mrb[47].mxu1  ;;  %v15243_v16 = vld [vmem:[#allocation178_spill] sm:$0xff] }
 0x346   : > { %v7389_v10 = vmax.f32 %v15235_v14, %v5352_v27  ;;  %9156 = vst.msk [vmem:[%s13564_s27 + $0x190] sm:$0xf] %vm9055_vm3, %v10399_v19  ;;  %v10400_v40 = vpack.c.bf16 %v8176_v0, %v8176_v0  ;;  %v7780_v41 = vmax.f32 %v7388_v18, %v7584_v20  ;;  %v7585_v24 = vmax.f32 %v15236_v2, %v6920_v38 }
 0x347   : > { %9159 = vst.msk [vmem:[%s13564_s27 + $0x19c] sm:$0xf] %vm9055_vm3, %v10402_v8  ;;  %v7985_v36 = vadd.f32 %v14218_v11, %v7782_v9  ;;  %v7783_v17 = vmax.f32 %v7391_v23, %v7587_v15  ;;  %v15245_v23 = vld [vmem:[#allocation180_spill] sm:$0xff]  ;;  %v15246_v15 = vld [vmem:[#allocation181_spill] sm:$0xff] }
 0x348   : > { %9157 = vst.msk [vmem:[%s13564_s27 + $0x194] sm:$0xf] %vm9055_vm3, %v10400_v40  ;;  %v7983_v22 = vadd.f32 %v14218_v11, %v7780_v41  ;;  %v7781_v42 = vmax.f32 %v7389_v10, %v7585_v24  ;;  %v15247_v10 = vld [vmem:[#allocation182_spill] sm:$0xff] }
 0x349   : > { %v8181_v39 = vmax.f32 %v7985_v36, 0.0  ;;  %v7986_v43 = vadd.f32 %v14218_v11, %v7783_v17  ;;  %v15248_v36 = vld [vmem:[#allocation183_spill] sm:$0xff] }
 0x34a   : > { %v11199_v50 = vpop.f32.mrb[48].mxu0  ;;  %v8179_v44 = vmax.f32 %v7983_v22, 0.0  ;;  %v7984_v45 = vadd.f32 %v14218_v11, %v7781_v42  ;;  %v11591_v48 = vpop.f32.mrb[48].mxu1  ;;  %v15249_v22 = vld [vmem:[#allocation184_spill] sm:$0xff] }
 0x34b   : > { %v7394_v3 = vmax.f32 %v15237_v47, %v11199_v50  ;;  %v5365_v53 = vpop.f32.mrb[49].mxu0  ;;  %v10405_v25 = vpack.c.bf16 %v8181_v39, %v8181_v39  ;;  %v8182_v51 = vmax.f32 %v7986_v43, 0.0  ;;  %v7590_v1 = vmax.f32 %v15238_v56, %v11591_v48  ;;  %v6933_v28 = vpop.f32.mrb[49].mxu1  ;;  %v15252_v56 = vld [vmem:[#allocation187_spill] sm:$0xff] }
 0x34c   : > { %v7392_v34 = vmax.f32 %v15239_v46, %v5365_v53  ;;  %v11200_v29 = vpop.f32.mrb[50].mxu0  ;;  %v10403_v57 = vpack.c.bf16 %v8179_v44, %v8179_v44  ;;  %v8180_v13 = vmax.f32 %v7984_v45, 0.0  ;;  %v7588_v58 = vmax.f32 %v15240_v12, %v6933_v28  ;;  %v11592_v31 = vpop.f32.mrb[50].mxu1  ;;  %v15250_v45 = vld [vmem:[#allocation185_spill] sm:$0xff] }
 0x34d   : > { %v7395_v4 = vmax.f32 %v15241_v30, %v11200_v29  ;;  %v5368_v5 = vpop.f32.mrb[51].mxu0  ;;  %9162 = vst.msk [vmem:[%s13564_s27 + $0x1a8] sm:$0xf] %vm9055_vm3, %v10405_v25  ;;  %v10406_v49 = vpack.c.bf16 %v8182_v51, %v8182_v51  ;;  %v7786_v32 = vmax.f32 %v7394_v3, %v7590_v1  ;;  %v7591_v35 = vmax.f32 %v15242_v33, %v11592_v31  ;;  %v6936_v54 = vpop.f32.mrb[51].mxu1  ;;  %v15251_v3 = vld [vmem:[#allocation186_spill] sm:$0xff] }
 0x34e   : > { %v7393_v52 = vmax.f32 %v15243_v16, %v5368_v5  ;;  %9160 = vst.msk [vmem:[%s13564_s27 + $0x1a0] sm:$0xf] %vm9055_vm3, %v10403_v57  ;;  %v10404_v59 = vpack.c.bf16 %v8180_v13, %v8180_v13  ;;  %v7784_v60 = vmax.f32 %v7392_v34, %v7588_v58  ;;  %v7589_v26 = vmax.f32 %v15244_v61, %v6936_v54 }
 0x34f   : > { %9163 = vst.msk [vmem:[%s13564_s27 + $0x1ac] sm:$0xf] %vm9055_vm3, %v10406_v49  ;;  %v7989_v55 = vadd.f32 %v14218_v11, %v7786_v32  ;;  %v7787_v18 = vmax.f32 %v7395_v4, %v7591_v35  ;;  %v15253_v4 = vld [vmem:[#allocation188_spill] sm:$0xff]  ;;  %v15254_v35 = vld [vmem:[#allocation189_spill] sm:$0xff] }
 0x350   : > { %9161 = vst.msk [vmem:[%s13564_s27 + $0x1a4] sm:$0xf] %vm9055_vm3, %v10404_v59  ;;  %v7987_v6 = vadd.f32 %v14218_v11, %v7784_v60  ;;  %v7785_v62 = vmax.f32 %v7393_v52, %v7589_v26  ;;  %v15255_v52 = vld [vmem:[#allocation190_spill] sm:$0xff] }
 0x351   : > { %v8185_v19 = vmax.f32 %v7989_v55, 0.0  ;;  %v7990_v0 = vadd.f32 %v14218_v11, %v7787_v18  ;;  %v15256_v55 = vld [vmem:[#allocation191_spill] sm:$0xff] }
 0x352   : > { %v11203_v63 = vpop.f32.mrb[52].mxu0  ;;  %v8183_v20 = vmax.f32 %v7987_v6, 0.0  ;;  %v7988_v21 = vadd.f32 %v14218_v11, %v7785_v62  ;;  %v11595_v27 = vpop.f32.mrb[52].mxu1  ;;  %v15257_v6 = vld [vmem:[#allocation192_spill] sm:$0xff] }
 0x353   : > { %v7398_v7 = vmax.f32 %v15245_v23, %v11203_v63  ;;  %v5381_v8 = vpop.f32.mrb[53].mxu0  ;;  %v10409_v9 = vpack.c.bf16 %v8185_v19, %v8185_v19  ;;  %v8186_v37 = vmax.f32 %v7990_v0, 0.0  ;;  %v7594_v14 = vmax.f32 %v15246_v15, %v11595_v27  ;;  %v6949_v40 = vpop.f32.mrb[53].mxu1  ;;  %v15260_v15 = vld [vmem:[#allocation195_spill] sm:$0xff] }
 0x354   : > { %v7396_v38 = vmax.f32 %v15247_v10, %v5381_v8  ;;  %v11204_v41 = vpop.f32.mrb[54].mxu0  ;;  %v10407_v2 = vpack.c.bf16 %v8183_v20, %v8183_v20  ;;  %v8184_v24 = vmax.f32 %v7988_v21, 0.0  ;;  %v7592_v17 = vmax.f32 %v15248_v36, %v6949_v40  ;;  %v11596_v39 = vpop.f32.mrb[54].mxu1  ;;  %v15258_v21 = vld [vmem:[#allocation193_spill] sm:$0xff] }
 0x355   : > { %v7399_v42 = vmax.f32 %v15249_v22, %v11204_v41  ;;  %v5384_v43 = vpop.f32.mrb[55].mxu0  ;;  %9166 = vst.msk [vmem:[%s13564_s27 + $0x1b8] sm:$0xf] %vm9055_vm3, %v10409_v9  ;;  %v10410_v50 = vpack.c.bf16 %v8186_v37, %v8186_v37  ;;  %v7790_v44 = vmax.f32 %v7398_v7, %v7594_v14  ;;  %v7595_v47 = vmax.f32 %v15250_v45, %v11596_v39  ;;  %v6952_v53 = vpop.f32.mrb[55].mxu1  ;;  %v15259_v7 = vld [vmem:[#allocation194_spill] sm:$0xff] }
 0x356   : > { %v7397_v48 = vmax.f32 %v15251_v3, %v5384_v43  ;;  %9164 = vst.msk [vmem:[%s13564_s27 + $0x1b0] sm:$0xf] %vm9055_vm3, %v10407_v2  ;;  %v10408_v25 = vpack.c.bf16 %v8184_v24, %v8184_v24  ;;  %v7788_v51 = vmax.f32 %v7396_v38, %v7592_v17  ;;  %v7593_v1 = vmax.f32 %v15252_v56, %v6952_v53 }
 0x357   : > { %9167 = vst.msk [vmem:[%s13564_s27 + $0x1bc] sm:$0xf] %vm9055_vm3, %v10410_v50  ;;  %v7993_v46 = vadd.f32 %v14218_v11, %v7790_v44  ;;  %v7791_v34 = vmax.f32 %v7399_v42, %v7595_v47  ;;  %v15261_v42 = vld [vmem:[#allocation196_spill] sm:$0xff]  ;;  %v15262_v47 = vld [vmem:[#allocation197_spill] sm:$0xff] }
 0x358   : > { %9165 = vst.msk [vmem:[%s13564_s27 + $0x1b4] sm:$0xf] %vm9055_vm3, %v10408_v25  ;;  %v7991_v28 = vadd.f32 %v14218_v11, %v7788_v51  ;;  %v7789_v29 = vmax.f32 %v7397_v48, %v7593_v1  ;;  %v15263_v48 = vld [vmem:[#allocation198_spill] sm:$0xff] }
 0x359   : > { %v8189_v57 = vmax.f32 %v7993_v46, 0.0  ;;  %v7994_v13 = vadd.f32 %v14218_v11, %v7791_v34  ;;  %v15264_v46 = vld [vmem:[#allocation199_spill] sm:$0xff] }
 0x35a   : > { %v11207_v12 = vpop.f32.mrb[56].mxu0  ;;  %v8187_v58 = vmax.f32 %v7991_v28, 0.0  ;;  %v7992_v30 = vadd.f32 %v14218_v11, %v7789_v29  ;;  %v11599_v5 = vpop.f32.mrb[56].mxu1  ;;  %v15265_v28 = vld [vmem:[#allocation200_spill] sm:$0xff] }
 0x35b   : > { %v7402_v31 = vmax.f32 %v15253_v4, %v11207_v12  ;;  %v5397_v49 = vpop.f32.mrb[57].mxu0  ;;  %v10413_v32 = vpack.c.bf16 %v8189_v57, %v8189_v57  ;;  %v8190_v33 = vmax.f32 %v7994_v13, 0.0  ;;  %v7598_v16 = vmax.f32 %v15254_v35, %v11599_v5  ;;  %v6965_v59 = vpop.f32.mrb[57].mxu1  ;;  %v15268_v35 = vld [vmem:[#allocation203_spill] sm:$0xff] }
 0x35c   : > { %v7400_v54 = vmax.f32 %v15255_v52, %v5397_v49  ;;  %v11208_v60 = vpop.f32.mrb[58].mxu0  ;;  %v10411_v61 = vpack.c.bf16 %v8187_v58, %v8187_v58  ;;  %v8188_v26 = vmax.f32 %v7992_v30, 0.0  ;;  %v7596_v18 = vmax.f32 %v15256_v55, %v6965_v59  ;;  %v11600_v19 = vpop.f32.mrb[58].mxu1  ;;  %v15266_v30 = vld [vmem:[#allocation201_spill] sm:$0xff] }
 0x35d   : > { %v7403_v62 = vmax.f32 %v15257_v6, %v11208_v60  ;;  %v5400_v0 = vpop.f32.mrb[59].mxu0  ;;  %9170 = vst.msk [vmem:[%s13564_s27 + $0x1c8] sm:$0xf] %vm9055_vm3, %v10413_v32  ;;  %v10414_v63 = vpack.c.bf16 %v8190_v33, %v8190_v33  ;;  %v7794_v20 = vmax.f32 %v7402_v31, %v7598_v16  ;;  %v7599_v23 = vmax.f32 %v15258_v21, %v11600_v19  ;;  %v6968_v8 = vpop.f32.mrb[59].mxu1  ;;  %v15267_v31 = vld [vmem:[#allocation202_spill] sm:$0xff] }
 0x35e   : > { %v7401_v27 = vmax.f32 %v15259_v7, %v5400_v0  ;;  %9168 = vst.msk [vmem:[%s13564_s27 + $0x1c0] sm:$0xf] %vm9055_vm3, %v10411_v61  ;;  %v10412_v9 = vpack.c.bf16 %v8188_v26, %v8188_v26  ;;  %v7792_v37 = vmax.f32 %v7400_v54, %v7596_v18  ;;  %v7597_v14 = vmax.f32 %v15260_v15, %v6968_v8 }
 0x35f   : > { %9171 = vst.msk [vmem:[%s13564_s27 + $0x1cc] sm:$0xf] %vm9055_vm3, %v10414_v63  ;;  %v7997_v10 = vadd.f32 %v14218_v11, %v7794_v20  ;;  %v7795_v38 = vmax.f32 %v7403_v62, %v7599_v23  ;;  %v15269_v62 = vld [vmem:[#allocation204_spill] sm:$0xff]  ;;  %v15270_v23 = vld [vmem:[#allocation205_spill] sm:$0xff] }
 0x360   : > { %9169 = vst.msk [vmem:[%s13564_s27 + $0x1c4] sm:$0xf] %vm9055_vm3, %v10412_v9  ;;  %v7995_v40 = vadd.f32 %v14218_v11, %v7792_v37  ;;  %v7793_v41 = vmax.f32 %v7401_v27, %v7597_v14  ;;  %v15271_v27 = vld [vmem:[#allocation206_spill] sm:$0xff] }
 0x361   : > { %v8193_v2 = vmax.f32 %v7997_v10, 0.0  ;;  %v7998_v24 = vadd.f32 %v14218_v11, %v7795_v38  ;;  %v15272_v10 = vld [vmem:[#allocation207_spill] sm:$0xff] }
 0x362   : > { %v11211_v36 = vpop.f32.mrb[60].mxu0  ;;  %v8191_v17 = vmax.f32 %v7995_v40, 0.0  ;;  %v7996_v22 = vadd.f32 %v14218_v11, %v7793_v41  ;;  %v11603_v43 = vpop.f32.mrb[60].mxu1  ;;  %v15273_v40 = vld [vmem:[#allocation208_spill] sm:$0xff] }
 0x363   : > { %v7406_v39 = vmax.f32 %v15261_v42, %v11211_v36  ;;  %v5413_v50 = vpop.f32.mrb[61].mxu0  ;;  %v10417_v44 = vpack.c.bf16 %v8193_v2, %v8193_v2  ;;  %v8194_v45 = vmax.f32 %v7998_v24, 0.0  ;;  %v7602_v3 = vmax.f32 %v15262_v47, %v11603_v43  ;;  %v6981_v25 = vpop.f32.mrb[61].mxu1  ;;  %v15276_v47 = vld [vmem:[#allocation211_spill] sm:$0xff] }
 0x364   : > { %v7404_v53 = vmax.f32 %v15263_v48, %v5413_v50  ;;  %v11212_v51 = vpop.f32.mrb[62].mxu0  ;;  %v10415_v56 = vpack.c.bf16 %v8191_v17, %v8191_v17  ;;  %v8192_v1 = vmax.f32 %v7996_v22, 0.0  ;;  %v7600_v34 = vmax.f32 %v15264_v46, %v6981_v25  ;;  %v11604_v57 = vpop.f32.mrb[62].mxu1  ;;  %v15274_v22 = vld [vmem:[#allocation209_spill] sm:$0xff] }
 0x365   : > { %v7407_v29 = vmax.f32 %v15265_v28, %v11212_v51  ;;  %v5416_v13 = vpop.f32.mrb[63].mxu0  ;;  %9174 = vst.msk [vmem:[%s13564_s27 + $0x1d8] sm:$0xf] %vm9055_vm3, %v10417_v44  ;;  %v10418_v12 = vpack.c.bf16 %v8194_v45, %v8194_v45  ;;  %v7798_v58 = vmax.f32 %v7406_v39, %v7602_v3  ;;  %v7603_v4 = vmax.f32 %v15266_v30, %v11604_v57  ;;  %v6984_v49 = vpop.f32.mrb[63].mxu1  ;;  %v15275_v39 = vld [vmem:[#allocation210_spill] sm:$0xff] }
 0x366   : > { %v7405_v5 = vmax.f32 %v15267_v31, %v5416_v13  ;;  %9172 = vst.msk [vmem:[%s13564_s27 + $0x1d0] sm:$0xf] %vm9055_vm3, %v10415_v56  ;;  %v10416_v32 = vpack.c.bf16 %v8192_v1, %v8192_v1  ;;  %v7796_v33 = vmax.f32 %v7404_v53, %v7600_v34  ;;  %v7601_v16 = vmax.f32 %v15268_v35, %v6984_v49 }
 0x367   : > { %9175 = vst.msk [vmem:[%s13564_s27 + $0x1dc] sm:$0xf] %vm9055_vm3, %v10418_v12  ;;  %v8001_v52 = vadd.f32 %v14218_v11, %v7798_v58  ;;  %v7799_v54 = vmax.f32 %v7407_v29, %v7603_v4  ;;  %v15277_v29 = vld [vmem:[#allocation212_spill] sm:$0xff]  ;;  %v15278_v4 = vld [vmem:[#allocation213_spill] sm:$0xff] }
 0x368   : > { %9173 = vst.msk [vmem:[%s13564_s27 + $0x1d4] sm:$0xf] %vm9055_vm3, %v10416_v32  ;;  %v7999_v59 = vadd.f32 %v14218_v11, %v7796_v33  ;;  %v7797_v60 = vmax.f32 %v7405_v5, %v7601_v16  ;;  %v15279_v5 = vld [vmem:[#allocation214_spill] sm:$0xff] }
 0x369   : > { %v8197_v61 = vmax.f32 %v8001_v52, 0.0  ;;  %v8002_v26 = vadd.f32 %v14218_v11, %v7799_v54  ;;  %v15280_v52 = vld [vmem:[#allocation215_spill] sm:$0xff] }
 0x36a   : > { %v11215_v55 = vpop.f32.mrb[64].mxu0  ;;  %v8195_v18 = vmax.f32 %v7999_v59, 0.0  ;;  %v8000_v6 = vadd.f32 %v14218_v11, %v7797_v60  ;;  %v11607_v0 = vpop.f32.mrb[64].mxu1  ;;  %v15281_v59 = vld [vmem:[#allocation216_spill] sm:$0xff] }
 0x36b   : > { %v7410_v19 = vmax.f32 %v15269_v62, %v11215_v55  ;;  %v5429_v63 = vpop.f32.mrb[65].mxu0  ;;  %v10421_v20 = vpack.c.bf16 %v8197_v61, %v8197_v61  ;;  %v8198_v21 = vmax.f32 %v8002_v26, 0.0  ;;  %v7606_v7 = vmax.f32 %v15270_v23, %v11607_v0  ;;  %v6997_v9 = vpop.f32.mrb[65].mxu1  ;;  %v15284_v23 = vld [vmem:[#allocation219_spill] sm:$0xff] }
 0x36c   : > { %v7408_v8 = vmax.f32 %v15271_v27, %v5429_v63  ;;  %v11216_v37 = vpop.f32.mrb[66].mxu0  ;;  %v10419_v15 = vpack.c.bf16 %v8195_v18, %v8195_v18  ;;  %v8196_v14 = vmax.f32 %v8000_v6, 0.0  ;;  %v7604_v38 = vmax.f32 %v15272_v10, %v6997_v9  ;;  %v11608_v2 = vpop.f32.mrb[66].mxu1  ;;  %v15282_v6 = vld [vmem:[#allocation217_spill] sm:$0xff] }
 0x36d   : > { %v7411_v41 = vmax.f32 %v15273_v40, %v11216_v37  ;;  %v5432_v24 = vpop.f32.mrb[67].mxu0  ;;  %9178 = vst.msk [vmem:[%s13564_s27 + $0x1e8] sm:$0xf] %vm9055_vm3, %v10421_v20  ;;  %v10422_v36 = vpack.c.bf16 %v8198_v21, %v8198_v21  ;;  %v7802_v17 = vmax.f32 %v7410_v19, %v7606_v7  ;;  %v7607_v42 = vmax.f32 %v15274_v22, %v11608_v2  ;;  %v7000_v50 = vpop.f32.mrb[67].mxu1  ;;  %v15283_v19 = vld [vmem:[#allocation218_spill] sm:$0xff] }
 0x36e   : > { %v7409_v43 = vmax.f32 %v15275_v39, %v5432_v24  ;;  %9176 = vst.msk [vmem:[%s13564_s27 + $0x1e0] sm:$0xf] %vm9055_vm3, %v10419_v15  ;;  %v10420_v44 = vpack.c.bf16 %v8196_v14, %v8196_v14  ;;  %v7800_v45 = vmax.f32 %v7408_v8, %v7604_v38  ;;  %v7605_v3 = vmax.f32 %v15276_v47, %v7000_v50 }
 0x36f   : > { %9179 = vst.msk [vmem:[%s13564_s27 + $0x1ec] sm:$0xf] %vm9055_vm3, %v10422_v36  ;;  %v8005_v48 = vadd.f32 %v14218_v11, %v7802_v17  ;;  %v7803_v53 = vmax.f32 %v7411_v41, %v7607_v42  ;;  %v15285_v41 = vld [vmem:[#allocation220_spill] sm:$0xff]  ;;  %v15286_v42 = vld [vmem:[#allocation221_spill] sm:$0xff] }
 0x370   : > { %9177 = vst.msk [vmem:[%s13564_s27 + $0x1e4] sm:$0xf] %vm9055_vm3, %v10420_v44  ;;  %v8003_v25 = vadd.f32 %v14218_v11, %v7800_v45  ;;  %v7801_v51 = vmax.f32 %v7409_v43, %v7605_v3  ;;  %v15287_v43 = vld [vmem:[#allocation222_spill] sm:$0xff] }
 0x371   : > { %v8201_v56 = vmax.f32 %v8005_v48, 0.0  ;;  %v8006_v1 = vadd.f32 %v14218_v11, %v7803_v53  ;;  %v15288_v48 = vld [vmem:[#allocation223_spill] sm:$0xff] }
 0x372   : > { %v11219_v46 = vpop.f32.mrb[68].mxu0  ;;  %v8199_v34 = vmax.f32 %v8003_v25, 0.0  ;;  %v8004_v28 = vadd.f32 %v14218_v11, %v7801_v51  ;;  %v11611_v13 = vpop.f32.mrb[68].mxu1  ;;  %v15289_v25 = vld [vmem:[#allocation224_spill] sm:$0xff] }
 0x373   : > { %v7414_v57 = vmax.f32 %v15277_v29, %v11219_v46  ;;  %v5445_v12 = vpop.f32.mrb[69].mxu0  ;;  %v10425_v58 = vpack.c.bf16 %v8201_v56, %v8201_v56  ;;  %v8202_v30 = vmax.f32 %v8006_v1, 0.0  ;;  %v7610_v31 = vmax.f32 %v15278_v4, %v11611_v13  ;;  %v7013_v32 = vpop.f32.mrb[69].mxu1  ;;  %v15292_v4 = vld [vmem:[#allocation227_spill] sm:$0xff] }
 0x374   : > { %v7412_v49 = vmax.f32 %v15279_v5, %v5445_v12  ;;  %v11220_v33 = vpop.f32.mrb[70].mxu0  ;;  %v10423_v35 = vpack.c.bf16 %v8199_v34, %v8199_v34  ;;  %v8200_v16 = vmax.f32 %v8004_v28, 0.0  ;;  %v7608_v54 = vmax.f32 %v15280_v52, %v7013_v32  ;;  %v11612_v61 = vpop.f32.mrb[70].mxu1  ;;  %v15290_v28 = vld [vmem:[#allocation225_spill] sm:$0xff] }
 0x375   : > { %v7415_v60 = vmax.f32 %v15281_v59, %v11220_v33  ;;  %v5448_v26 = vpop.f32.mrb[71].mxu0  ;;  %9182 = vst.msk [vmem:[%s13564_s27 + $0x1f8] sm:$0xf] %vm9055_vm3, %v10425_v58  ;;  %v10426_v55 = vpack.c.bf16 %v8202_v30, %v8202_v30  ;;  %v7806_v18 = vmax.f32 %v7414_v57, %v7610_v31  ;;  %v7611_v62 = vmax.f32 %v15282_v6, %v11612_v61  ;;  %v7016_v63 = vpop.f32.mrb[71].mxu1  ;;  %v15291_v57 = vld [vmem:[#allocation226_spill] sm:$0xff] }
 0x376   : > { %v7413_v0 = vmax.f32 %v15283_v19, %v5448_v26  ;;  %9180 = vst.msk [vmem:[%s13564_s27 + $0x1f0] sm:$0xf] %vm9055_vm3, %v10423_v35  ;;  %v10424_v20 = vpack.c.bf16 %v8200_v16, %v8200_v16  ;;  %v7804_v21 = vmax.f32 %v7412_v49, %v7608_v54  ;;  %v7609_v7 = vmax.f32 %v15284_v23, %v7016_v63 }
 0x377   : > { %9183 = vst.msk [vmem:[%s13564_s27 + $0x1fc] sm:$0xf] %vm9055_vm3, %v10426_v55  ;;  %v8009_v27 = vadd.f32 %v14218_v11, %v7806_v18  ;;  %v7807_v8 = vmax.f32 %v7415_v60, %v7611_v62  ;;  %v15293_v60 = vld [vmem:[#allocation228_spill] sm:$0xff]  ;;  %v15294_v62 = vld [vmem:[#allocation229_spill] sm:$0xff] }
 0x378   : > { %9181 = vst.msk [vmem:[%s13564_s27 + $0x1f4] sm:$0xf] %vm9055_vm3, %v10424_v20  ;;  %v8007_v9 = vadd.f32 %v14218_v11, %v7804_v21  ;;  %v7805_v37 = vmax.f32 %v7413_v0, %v7609_v7  ;;  %v15295_v0 = vld [vmem:[#allocation230_spill] sm:$0xff] }
 0x379   : > { %v8205_v15 = vmax.f32 %v8009_v27, 0.0  ;;  %v8010_v14 = vadd.f32 %v14218_v11, %v7807_v8  ;;  %v15296_v27 = vld [vmem:[#allocation231_spill] sm:$0xff] }
 0x37a   : > { %v11223_v10 = vpop.f32.mrb[72].mxu0  ;;  %v8203_v38 = vmax.f32 %v8007_v9, 0.0  ;;  %v8008_v40 = vadd.f32 %v14218_v11, %v7805_v37  ;;  %v11615_v24 = vpop.f32.mrb[72].mxu1  ;;  %v15297_v9 = vld [vmem:[#allocation232_spill] sm:$0xff] }
 0x37b   : > { %v7418_v2 = vmax.f32 %v15285_v41, %v11223_v10  ;;  %v5461_v36 = vpop.f32.mrb[73].mxu0  ;;  %v10429_v17 = vpack.c.bf16 %v8205_v15, %v8205_v15  ;;  %v8206_v22 = vmax.f32 %v8010_v14, 0.0  ;;  %v7614_v39 = vmax.f32 %v15286_v42, %v11615_v24  ;;  %v7029_v44 = vpop.f32.mrb[73].mxu1  ;;  %v15300_v42 = vld [vmem:[#allocation235_spill] sm:$0xff] }
 0x37c   : > { %v7416_v50 = vmax.f32 %v15287_v43, %v5461_v36  ;;  %v11224_v45 = vpop.f32.mrb[74].mxu0  ;;  %v10427_v47 = vpack.c.bf16 %v8203_v38, %v8203_v38  ;;  %v8204_v3 = vmax.f32 %v8008_v40, 0.0  ;;  %v7612_v53 = vmax.f32 %v15288_v48, %v7029_v44  ;;  %v11616_v56 = vpop.f32.mrb[74].mxu1  ;;  %v15298_v40 = vld [vmem:[#allocation233_spill] sm:$0xff] }
 0x37d   : > { %v7419_v51 = vmax.f32 %v15289_v25, %v11224_v45  ;;  %v5464_v1 = vpop.f32.mrb[75].mxu0  ;;  %9186 = vst.msk [vmem:[%s13564_s27 + $0x208] sm:$0xf] %vm9055_vm3, %v10429_v17  ;;  %v10430_v46 = vpack.c.bf16 %v8206_v22, %v8206_v22  ;;  %v7810_v34 = vmax.f32 %v7418_v2, %v7614_v39  ;;  %v7615_v29 = vmax.f32 %v15290_v28, %v11616_v56  ;;  %v7032_v12 = vpop.f32.mrb[75].mxu1  ;;  %v15299_v2 = vld [vmem:[#allocation234_spill] sm:$0xff] }
 0x37e   : > { %v7417_v13 = vmax.f32 %v15291_v57, %v5464_v1  ;;  %9184 = vst.msk [vmem:[%s13564_s27 + $0x200] sm:$0xf] %vm9055_vm3, %v10427_v47  ;;  %v10428_v58 = vpack.c.bf16 %v8204_v3, %v8204_v3  ;;  %v7808_v30 = vmax.f32 %v7416_v50, %v7612_v53  ;;  %v7613_v31 = vmax.f32 %v15292_v4, %v7032_v12 }
 0x37f   : > { %9187 = vst.msk [vmem:[%s13564_s27 + $0x20c] sm:$0xf] %vm9055_vm3, %v10430_v46  ;;  %v8013_v5 = vadd.f32 %v14218_v11, %v7810_v34  ;;  %v7811_v49 = vmax.f32 %v7419_v51, %v7615_v29  ;;  %v15301_v51 = vld [vmem:[#allocation236_spill] sm:$0xff]  ;;  %v15302_v29 = vld [vmem:[#allocation237_spill] sm:$0xff] }
 0x380   : > { %9185 = vst.msk [vmem:[%s13564_s27 + $0x204] sm:$0xf] %vm9055_vm3, %v10428_v58  ;;  %v8011_v32 = vadd.f32 %v14218_v11, %v7808_v30  ;;  %v7809_v33 = vmax.f32 %v7417_v13, %v7613_v31  ;;  %v15303_v13 = vld [vmem:[#allocation238_spill] sm:$0xff] }
 0x381   : > { %v8209_v35 = vmax.f32 %v8013_v5, 0.0  ;;  %v8014_v16 = vadd.f32 %v14218_v11, %v7811_v49  ;;  %v15304_v5 = vld [vmem:[#allocation239_spill] sm:$0xff] }
 0x382   : > { %v11227_v52 = vpop.f32.mrb[76].mxu0  ;;  %v8207_v54 = vmax.f32 %v8011_v32, 0.0  ;;  %v8012_v59 = vadd.f32 %v14218_v11, %v7809_v33  ;;  %v11619_v26 = vpop.f32.mrb[76].mxu1  ;;  %v15305_v32 = vld [vmem:[#allocation240_spill] sm:$0xff] }
 0x383   : > { %v7422_v61 = vmax.f32 %v15293_v60, %v11227_v52  ;;  %v5477_v55 = vpop.f32.mrb[77].mxu0  ;;  %v10433_v18 = vpack.c.bf16 %v8209_v35, %v8209_v35  ;;  %v8210_v6 = vmax.f32 %v8014_v16, 0.0  ;;  %v7618_v19 = vmax.f32 %v15294_v62, %v11619_v26  ;;  %v7045_v20 = vpop.f32.mrb[77].mxu1  ;;  %v15308_v62 = vld [vmem:[#allocation243_spill] sm:$0xff] }
 0x384   : > { %v7420_v63 = vmax.f32 %v15295_v0, %v5477_v55  ;;  %v11228_v21 = vpop.f32.mrb[78].mxu0  ;;  %v10431_v23 = vpack.c.bf16 %v8207_v54, %v8207_v54  ;;  %v8208_v7 = vmax.f32 %v8012_v59, 0.0  ;;  %v7616_v8 = vmax.f32 %v15296_v27, %v7045_v20  ;;  %v11620_v15 = vpop.f32.mrb[78].mxu1  ;;  %v15306_v59 = vld [vmem:[#allocation241_spill] sm:$0xff] }
 0x385   : > { %v7423_v37 = vmax.f32 %v15297_v9, %v11228_v21  ;;  %v5480_v14 = vpop.f32.mrb[79].mxu0  ;;  %9190 = vst.msk [vmem:[%s13564_s27 + $0x218] sm:$0xf] %vm9055_vm3, %v10433_v18  ;;  %v10434_v10 = vpack.c.bf16 %v8210_v6, %v8210_v6  ;;  %v7814_v38 = vmax.f32 %v7422_v61, %v7618_v19  ;;  %v7619_v41 = vmax.f32 %v15298_v40, %v11620_v15  ;;  %v7048_v36 = vpop.f32.mrb[79].mxu1  ;;  %v15307_v61 = vld [vmem:[#allocation242_spill] sm:$0xff] }
 0x386   : > { %v7421_v24 = vmax.f32 %v15299_v2, %v5480_v14  ;;  %9188 = vst.msk [vmem:[%s13564_s27 + $0x210] sm:$0xf] %vm9055_vm3, %v10431_v23  ;;  %v10432_v17 = vpack.c.bf16 %v8208_v7, %v8208_v7  ;;  %v7812_v22 = vmax.f32 %v7420_v63, %v7616_v8  ;;  %v7617_v39 = vmax.f32 %v15300_v42, %v7048_v36 }
 0x387   : > { %9191 = vst.msk [vmem:[%s13564_s27 + $0x21c] sm:$0xf] %vm9055_vm3, %v10434_v10  ;;  %v8017_v43 = vadd.f32 %v14218_v11, %v7814_v38  ;;  %v7815_v50 = vmax.f32 %v7423_v37, %v7619_v41  ;;  %v15309_v37 = vld [vmem:[#allocation244_spill] sm:$0xff]  ;;  %v15310_v41 = vld [vmem:[#allocation245_spill] sm:$0xff] }
 0x388   : > { %9189 = vst.msk [vmem:[%s13564_s27 + $0x214] sm:$0xf] %vm9055_vm3, %v10432_v17  ;;  %v8015_v44 = vadd.f32 %v14218_v11, %v7812_v22  ;;  %v7813_v45 = vmax.f32 %v7421_v24, %v7617_v39  ;;  %v15311_v24 = vld [vmem:[#allocation246_spill] sm:$0xff] }
 0x389   : > { %v8213_v47 = vmax.f32 %v8017_v43, 0.0  ;;  %v8018_v3 = vadd.f32 %v14218_v11, %v7815_v50  ;;  %v15312_v43 = vld [vmem:[#allocation247_spill] sm:$0xff] }
 0x38a   : > { %v11231_v48 = vpop.f32.mrb[80].mxu0  ;;  %v8211_v53 = vmax.f32 %v8015_v44, 0.0  ;;  %v8016_v25 = vadd.f32 %v14218_v11, %v7813_v45  ;;  %v11623_v1 = vpop.f32.mrb[80].mxu1  ;;  %v15313_v44 = vld [vmem:[#allocation248_spill] sm:$0xff] }
 0x38b   : > { %v7426_v56 = vmax.f32 %v15301_v51, %v11231_v48  ;;  %v5493_v46 = vpop.f32.mrb[81].mxu0  ;;  %v10437_v34 = vpack.c.bf16 %v8213_v47, %v8213_v47  ;;  %v8214_v28 = vmax.f32 %v8018_v3, 0.0  ;;  %v7622_v57 = vmax.f32 %v15302_v29, %v11623_v1  ;;  %v7061_v58 = vpop.f32.mrb[81].mxu1  ;;  %v15316_v29 = vld [vmem:[#allocation251_spill] sm:$0xff] }
 0x38c   : > { %v7424_v12 = vmax.f32 %v15303_v13, %v5493_v46  ;;  %v11232_v30 = vpop.f32.mrb[82].mxu0  ;;  %v10435_v4 = vpack.c.bf16 %v8211_v53, %v8211_v53  ;;  %v8212_v31 = vmax.f32 %v8016_v25, 0.0  ;;  %v7620_v49 = vmax.f32 %v15304_v5, %v7061_v58  ;;  %v11624_v35 = vpop.f32.mrb[82].mxu1  ;;  %v15314_v25 = vld [vmem:[#allocation249_spill] sm:$0xff] }
 0x38d   : > { %v7427_v33 = vmax.f32 %v15305_v32, %v11232_v30  ;;  %v5496_v16 = vpop.f32.mrb[83].mxu0  ;;  %9194 = vst.msk [vmem:[%s13564_s27 + $0x228] sm:$0xf] %vm9055_vm3, %v10437_v34  ;;  %v10438_v52 = vpack.c.bf16 %v8214_v28, %v8214_v28  ;;  %v7818_v54 = vmax.f32 %v7426_v56, %v7622_v57  ;;  %v7623_v60 = vmax.f32 %v15306_v59, %v11624_v35  ;;  %v7064_v55 = vpop.f32.mrb[83].mxu1  ;;  %v15315_v56 = vld [vmem:[#allocation250_spill] sm:$0xff] }
 0x38e   : > { %v7425_v26 = vmax.f32 %v15307_v61, %v5496_v16  ;;  %9192 = vst.msk [vmem:[%s13564_s27 + $0x220] sm:$0xf] %vm9055_vm3, %v10435_v4  ;;  %v10436_v18 = vpack.c.bf16 %v8212_v31, %v8212_v31  ;;  %v7816_v6 = vmax.f32 %v7424_v12, %v7620_v49  ;;  %v7621_v19 = vmax.f32 %v15308_v62, %v7064_v55 }
 0x38f   : > { %9195 = vst.msk [vmem:[%s13564_s27 + $0x22c] sm:$0xf] %vm9055_vm3, %v10438_v52  ;;  %v8021_v0 = vadd.f32 %v14218_v11, %v7818_v54  ;;  %v7819_v63 = vmax.f32 %v7427_v33, %v7623_v60  ;;  %v15317_v33 = vld [vmem:[#allocation252_spill] sm:$0xff]  ;;  %v15318_v60 = vld [vmem:[#allocation253_spill] sm:$0xff] }
 0x390   : > { %9193 = vst.msk [vmem:[%s13564_s27 + $0x224] sm:$0xf] %vm9055_vm3, %v10436_v18  ;;  %v8019_v20 = vadd.f32 %v14218_v11, %v7816_v6  ;;  %v7817_v21 = vmax.f32 %v7425_v26, %v7621_v19  ;;  %v15319_v26 = vld [vmem:[#allocation254_spill] sm:$0xff] }
 0x391   : > { %v8217_v23 = vmax.f32 %v8021_v0, 0.0  ;;  %v8022_v7 = vadd.f32 %v14218_v11, %v7819_v63  ;;  %v15320_v0 = vld [vmem:[#allocation255_spill] sm:$0xff] }
 0x392   : > { %v11235_v27 = vpop.f32.mrb[84].mxu0  ;;  %v8215_v8 = vmax.f32 %v8019_v20, 0.0  ;;  %v8020_v9 = vadd.f32 %v14218_v11, %v7817_v21  ;;  %v11627_v14 = vpop.f32.mrb[84].mxu1  ;;  %v15321_v20 = vld [vmem:[#allocation256_spill] sm:$0xff] }
 0x393   : > { %v7430_v15 = vmax.f32 %v15309_v37, %v11235_v27  ;;  %v5509_v10 = vpop.f32.mrb[85].mxu0  ;;  %v10441_v38 = vpack.c.bf16 %v8217_v23, %v8217_v23  ;;  %v8218_v40 = vmax.f32 %v8022_v7, 0.0  ;;  %v7626_v2 = vmax.f32 %v15310_v41, %v11627_v14  ;;  %v7077_v17 = vpop.f32.mrb[85].mxu1  ;;  %v15324_v41 = vld [vmem:[#allocation259_spill] sm:$0xff] }
 0x394   : > { %v7428_v36 = vmax.f32 %v15311_v24, %v5509_v10  ;;  %v11236_v22 = vpop.f32.mrb[86].mxu0  ;;  %v10439_v42 = vpack.c.bf16 %v8215_v8, %v8215_v8  ;;  %v8216_v39 = vmax.f32 %v8020_v9, 0.0  ;;  %v7624_v50 = vmax.f32 %v15312_v43, %v7077_v17  ;;  %v11628_v47 = vpop.f32.mrb[86].mxu1  ;;  %v15322_v9 = vld [vmem:[#allocation257_spill] sm:$0xff] }
 0x395   : > { %v7431_v45 = vmax.f32 %v15313_v44, %v11236_v22  ;;  %v5512_v3 = vpop.f32.mrb[87].mxu0  ;;  %9198 = vst.msk [vmem:[%s13564_s27 + $0x238] sm:$0xf] %vm9055_vm3, %v10441_v38  ;;  %v10442_v48 = vpack.c.bf16 %v8218_v40, %v8218_v40  ;;  %v7822_v53 = vmax.f32 %v7430_v15, %v7626_v2  ;;  %v7627_v51 = vmax.f32 %v15314_v25, %v11628_v47  ;;  %v7080_v46 = vpop.f32.mrb[87].mxu1  ;;  %v15323_v15 = vld [vmem:[#allocation258_spill] sm:$0xff] }
 0x396   : > { %v7429_v1 = vmax.f32 %v15315_v56, %v5512_v3  ;;  %9196 = vst.msk [vmem:[%s13564_s27 + $0x230] sm:$0xf] %vm9055_vm3, %v10439_v42  ;;  %v10440_v34 = vpack.c.bf16 %v8216_v39, %v8216_v39  ;;  %v7820_v28 = vmax.f32 %v7428_v36, %v7624_v50  ;;  %v7625_v57 = vmax.f32 %v15316_v29, %v7080_v46 }
 0x397   : > { %9199 = vst.msk [vmem:[%s13564_s27 + $0x23c] sm:$0xf] %vm9055_vm3, %v10442_v48  ;;  %v8025_v13 = vadd.f32 %v14218_v11, %v7822_v53  ;;  %v7823_v12 = vmax.f32 %v7431_v45, %v7627_v51  ;;  %v15325_v45 = vld [vmem:[#allocation260_spill] sm:$0xff]  ;;  %v15326_v51 = vld [vmem:[#allocation261_spill] sm:$0xff] }
 0x398   : > { %9197 = vst.msk [vmem:[%s13564_s27 + $0x234] sm:$0xf] %vm9055_vm3, %v10440_v34  ;;  %v8023_v58 = vadd.f32 %v14218_v11, %v7820_v28  ;;  %v7821_v30 = vmax.f32 %v7429_v1, %v7625_v57  ;;  %v15327_v1 = vld [vmem:[#allocation262_spill] sm:$0xff] }
 0x399   : > { %v8221_v4 = vmax.f32 %v8025_v13, 0.0  ;;  %v8026_v31 = vadd.f32 %v14218_v11, %v7823_v12  ;;  %v15328_v13 = vld [vmem:[#allocation263_spill] sm:$0xff] }
 0x39a   : > { %v11239_v5 = vpop.f32.mrb[88].mxu0  ;;  %v8219_v49 = vmax.f32 %v8023_v58, 0.0  ;;  %v8024_v32 = vadd.f32 %v14218_v11, %v7821_v30  ;;  %v11631_v16 = vpop.f32.mrb[88].mxu1  ;;  %v15329_v58 = vld [vmem:[#allocation264_spill] sm:$0xff] }
 0x39b   : > { %v7434_v35 = vmax.f32 %v15317_v33, %v11239_v5  ;;  %v5525_v52 = vpop.f32.mrb[89].mxu0  ;;  %v10445_v54 = vpack.c.bf16 %v8221_v4, %v8221_v4  ;;  %v8222_v59 = vmax.f32 %v8026_v31, 0.0  ;;  %v7630_v61 = vmax.f32 %v15318_v60, %v11631_v16  ;;  %v7093_v18 = vpop.f32.mrb[89].mxu1  ;;  %v15332_v60 = vld [vmem:[#allocation267_spill] sm:$0xff] }
 0x39c   : > { %v7432_v55 = vmax.f32 %v15319_v26, %v5525_v52  ;;  %v11240_v6 = vpop.f32.mrb[90].mxu0  ;;  %v10443_v62 = vpack.c.bf16 %v8219_v49, %v8219_v49  ;;  %v8220_v19 = vmax.f32 %v8024_v32, 0.0  ;;  %v7628_v63 = vmax.f32 %v15320_v0, %v7093_v18  ;;  %v11632_v23 = vpop.f32.mrb[90].mxu1  ;;  %v15330_v32 = vld [vmem:[#allocation265_spill] sm:$0xff] }
 0x39d   : > { %v7435_v21 = vmax.f32 %v15321_v20, %v11240_v6  ;;  %v5528_v7 = vpop.f32.mrb[91].mxu0  ;;  %9202 = vst.msk [vmem:[%s13564_s27 + $0x248] sm:$0xf] %vm9055_vm3, %v10445_v54  ;;  %v10446_v27 = vpack.c.bf16 %v8222_v59, %v8222_v59  ;;  %v7826_v8 = vmax.f32 %v7434_v35, %v7630_v61  ;;  %v7631_v37 = vmax.f32 %v15322_v9, %v11632_v23  ;;  %v7096_v10 = vpop.f32.mrb[91].mxu1  ;;  %v15331_v35 = vld [vmem:[#allocation266_spill] sm:$0xff] }
 0x39e   : > { %v7433_v14 = vmax.f32 %v15323_v15, %v5528_v7  ;;  %9200 = vst.msk [vmem:[%s13564_s27 + $0x240] sm:$0xf] %vm9055_vm3, %v10443_v62  ;;  %v10444_v38 = vpack.c.bf16 %v8220_v19, %v8220_v19  ;;  %v7824_v40 = vmax.f32 %v7432_v55, %v7628_v63  ;;  %v7629_v2 = vmax.f32 %v15324_v41, %v7096_v10 }
 0x39f   : > { %9203 = vst.msk [vmem:[%s13564_s27 + $0x24c] sm:$0xf] %vm9055_vm3, %v10446_v27  ;;  %v8029_v24 = vadd.f32 %v14218_v11, %v7826_v8  ;;  %v7827_v36 = vmax.f32 %v7435_v21, %v7631_v37  ;;  %v15333_v21 = vld [vmem:[#allocation268_spill] sm:$0xff]  ;;  %v15334_v37 = vld [vmem:[#allocation269_spill] sm:$0xff] }
 0x3a0   : > { %9201 = vst.msk [vmem:[%s13564_s27 + $0x244] sm:$0xf] %vm9055_vm3, %v10444_v38  ;;  %v8027_v17 = vadd.f32 %v14218_v11, %v7824_v40  ;;  %v7825_v22 = vmax.f32 %v7433_v14, %v7629_v2  ;;  %v15335_v14 = vld [vmem:[#allocation270_spill] sm:$0xff] }
 0x3a1   : > { %v8225_v42 = vmax.f32 %v8029_v24, 0.0  ;;  %v8030_v39 = vadd.f32 %v14218_v11, %v7827_v36  ;;  %v15336_v24 = vld [vmem:[#allocation271_spill] sm:$0xff] }
 0x3a2   : > { %v11243_v43 = vpop.f32.mrb[92].mxu0  ;;  %v8223_v50 = vmax.f32 %v8027_v17, 0.0  ;;  %v8028_v44 = vadd.f32 %v14218_v11, %v7825_v22  ;;  %v11635_v3 = vpop.f32.mrb[92].mxu1 }
 0x3a3   : > { %v7438_v47 = vmax.f32 %v15325_v45, %v11243_v43  ;;  %v5541_v48 = vpop.f32.mrb[93].mxu0  ;;  %v10449_v53 = vpack.c.bf16 %v8225_v42, %v8225_v42  ;;  %v8226_v25 = vmax.f32 %v8030_v39, 0.0  ;;  %v7634_v56 = vmax.f32 %v15326_v51, %v11635_v3  ;;  %v7109_v34 = vpop.f32.mrb[93].mxu1  ;;  %v15339_v45 = vld [vmem:[#allocation274_spill] sm:$0xff] }
 0x3a4   : > { %v7436_v46 = vmax.f32 %v15327_v1, %v5541_v48  ;;  %v11244_v28 = vpop.f32.mrb[94].mxu0  ;;  %v10447_v29 = vpack.c.bf16 %v8223_v50, %v8223_v50  ;;  %v8224_v57 = vmax.f32 %v8028_v44, 0.0  ;;  %v7632_v12 = vmax.f32 %v15328_v13, %v7109_v34  ;;  %v11636_v4 = vpop.f32.mrb[94].mxu1  ;;  %v15338_v50 = vld [vmem:[#allocation273_spill] sm:$0xff] }
 0x3a5   : > { %v7439_v30 = vmax.f32 %v15329_v58, %v11244_v28  ;;  %v5544_v31 = vpop.f32.mrb[95].mxu0  ;;  %9206 = vst.msk [vmem:[%s13564_s27 + $0x258] sm:$0xf] %vm9055_vm3, %v10449_v53  ;;  %v10450_v5 = vpack.c.bf16 %v8226_v25, %v8226_v25  ;;  %v7830_v49 = vmax.f32 %v7438_v47, %v7634_v56  ;;  %v7635_v33 = vmax.f32 %v15330_v32, %v11636_v4  ;;  %v7112_v52 = vpop.f32.mrb[95].mxu1  ;;  %v15340_v25 = vld [vmem:[#allocation275_spill] sm:$0xff] }
 0x3a6   : > { %v7437_v16 = vmax.f32 %v15331_v35, %v5544_v31  ;;  %9204 = vst.msk [vmem:[%s13564_s27 + $0x250] sm:$0xf] %vm9055_vm3, %v10447_v29  ;;  %v10448_v54 = vpack.c.bf16 %v8224_v57, %v8224_v57  ;;  %v7828_v59 = vmax.f32 %v7436_v46, %v7632_v12  ;;  %v7633_v61 = vmax.f32 %v15332_v60, %v7112_v52  ;;  %v14518_v56 = vld [vmem:[%s14719_s2] ss:$0 sm:$0xff] }
 0x3a7   : > { %9207 = vst.msk [vmem:[%s13564_s27 + $0x25c] sm:$0xf] %vm9055_vm3, %v10450_v5  ;;  %v8033_v26 = vadd.f32 %v14218_v11, %v7830_v49  ;;  %v7831_v55 = vmax.f32 %v7439_v30, %v7635_v33  ;;  %v15341_v30 = vld [vmem:[#allocation276_spill] sm:$0xff]  ;;  %v15342_v33 = vld [vmem:[#allocation277_spill] sm:$0xff] }
 0x3a8   : > { %9205 = vst.msk [vmem:[%s13564_s27 + $0x254] sm:$0xf] %vm9055_vm3, %v10448_v54  ;;  %v8031_v18 = vadd.f32 %v14218_v11, %v7828_v59  ;;  %v7829_v6 = vmax.f32 %v7437_v16, %v7633_v61  ;;  %v15343_v16 = vld [vmem:[#allocation278_spill] sm:$0xff] }
 0x3a9   : > { %v8229_v62 = vmax.f32 %v8033_v26, 0.0  ;;  %v8034_v19 = vadd.f32 %v14218_v11, %v7831_v55  ;;  %v15344_v26 = vld [vmem:[#allocation279_spill] sm:$0xff] }
 0x3aa   : > { %v11247_v0 = vpop.f32.mrb[96].mxu0  ;;  %v8227_v63 = vmax.f32 %v8031_v18, 0.0  ;;  %v8032_v20 = vadd.f32 %v14218_v11, %v7829_v6  ;;  %v11639_v7 = vpop.f32.mrb[96].mxu1  ;;  %v15337_v11 = vld [vmem:[#allocation272_spill] sm:$0xff] }
 0x3ab   : > { %v7442_v23 = vmax.f32 %v15333_v21, %v11247_v0  ;;  %v5557_v27 = vpop.f32.mrb[97].mxu0  ;;  %v10453_v8 = vpack.c.bf16 %v8229_v62, %v8229_v62  ;;  %v8230_v9 = vmax.f32 %v8034_v19, 0.0  ;;  %v7638_v15 = vmax.f32 %v15334_v37, %v11639_v7  ;;  %v7125_v38 = vpop.f32.mrb[97].mxu1  ;;  %v15345_v18 = vld [vmem:[#allocation280_spill] sm:$0xff]  ;;  %v15348_v37 = vld [vmem:[#allocation283_spill] sm:$0xff] }
 0x3ac   : > { %v7440_v10 = vmax.f32 %v15335_v14, %v5557_v27  ;;  %v11248_v40 = vpop.f32.mrb[98].mxu0  ;;  %v10451_v41 = vpack.c.bf16 %v8227_v63, %v8227_v63  ;;  %v8228_v2 = vmax.f32 %v8032_v20, 0.0  ;;  %v7636_v36 = vmax.f32 %v15336_v24, %v7125_v38  ;;  %v11640_v22 = vpop.f32.mrb[98].mxu1  ;;  %v15346_v20 = vld [vmem:[#allocation281_spill] sm:$0xff] }
 0x3ad   : > { %v7443_v17 = vmax.f32 %v15337_v11, %v11248_v40  ;;  %v5560_v42 = vpop.f32.mrb[99].mxu0  ;;  %9210 = vst.msk [vmem:[%s13564_s27 + $0x268] sm:$0xf] %vm9055_vm3, %v10453_v8  ;;  %v10454_v39 = vpack.c.bf16 %v8230_v9, %v8230_v9  ;;  %v7834_v43 = vmax.f32 %v7442_v23, %v7638_v15  ;;  %v7639_v44 = vmax.f32 %v15338_v50, %v11640_v22  ;;  %v7128_v3 = vpop.f32.mrb[99].mxu1  ;;  %v15347_v23 = vld [vmem:[#allocation282_spill] sm:$0xff] }
 0x3ae   : > { %v7441_v47 = vmax.f32 %v15339_v45, %v5560_v42  ;;  %9208 = vst.msk [vmem:[%s13564_s27 + $0x260] sm:$0xf] %vm9055_vm3, %v10451_v41  ;;  %v10452_v48 = vpack.c.bf16 %v8228_v2, %v8228_v2  ;;  %v7832_v53 = vmax.f32 %v7440_v10, %v7636_v36  ;;  %v7637_v51 = vmax.f32 %v15340_v25, %v7128_v3 }
 0x3af   : > { %9211 = vst.msk [vmem:[%s13564_s27 + $0x26c] sm:$0xf] %vm9055_vm3, %v10454_v39  ;;  %v8037_v1 = vadd.f32 %v14518_v56, %v7834_v43  ;;  %v7835_v46 = vmax.f32 %v7443_v17, %v7639_v44  ;;  %v15349_v17 = vld [vmem:[#allocation284_spill] sm:$0xff]  ;;  %v15350_v44 = vld [vmem:[#allocation285_spill] sm:$0xff] }
 0x3b0   : > { %9209 = vst.msk [vmem:[%s13564_s27 + $0x264] sm:$0xf] %vm9055_vm3, %v10452_v48  ;;  %v8035_v34 = vadd.f32 %v14518_v56, %v7832_v53  ;;  %v7833_v28 = vmax.f32 %v7441_v47, %v7637_v51  ;;  %v15351_v47 = vld [vmem:[#allocation286_spill] sm:$0xff] }
 0x3b1   : > { %v8233_v29 = vmax.f32 %v8037_v1, 0.0  ;;  %v8038_v57 = vadd.f32 %v14518_v56, %v7835_v46  ;;  %v15352_v1 = vld [vmem:[#allocation287_spill] sm:$0xff] }
 0x3b2   : > { %v11251_v13 = vpop.f32.mrb[100].mxu0  ;;  %v8231_v12 = vmax.f32 %v8035_v34, 0.0  ;;  %v8036_v58 = vadd.f32 %v14518_v56, %v7833_v28  ;;  %v11643_v31 = vpop.f32.mrb[100].mxu1  ;;  %v15353_v34 = vld [vmem:[#allocation288_spill] sm:$0xff] }
 0x3b3   : > { %v7446_v4 = vmax.f32 %v15341_v30, %v11251_v13  ;;  %v5573_v5 = vpop.f32.mrb[101].mxu0  ;;  %v10457_v49 = vpack.c.bf16 %v8233_v29, %v8233_v29  ;;  %v8234_v32 = vmax.f32 %v8038_v57, 0.0  ;;  %v7642_v35 = vmax.f32 %v15342_v33, %v11643_v31  ;;  %v7141_v54 = vpop.f32.mrb[101].mxu1  ;;  %v15356_v33 = vld [vmem:[#allocation291_spill] sm:$0xff] }
 0x3b4   : > { %v7444_v52 = vmax.f32 %v15343_v16, %v5573_v5  ;;  %v11252_v59 = vpop.f32.mrb[102].mxu0  ;;  %v10455_v60 = vpack.c.bf16 %v8231_v12, %v8231_v12  ;;  %v8232_v61 = vmax.f32 %v8036_v58, 0.0  ;;  %v7640_v55 = vmax.f32 %v15344_v26, %v7141_v54  ;;  %v11644_v62 = vpop.f32.mrb[102].mxu1  ;;  %v15354_v58 = vld [vmem:[#allocation289_spill] sm:$0xff] }
 0x3b5   : > { %v7447_v6 = vmax.f32 %v15345_v18, %v11252_v59  ;;  %v5576_v19 = vpop.f32.mrb[103].mxu0  ;;  %9214 = vst.msk [vmem:[%s13564_s27 + $0x278] sm:$0xf] %vm9055_vm3, %v10457_v49  ;;  %v10458_v0 = vpack.c.bf16 %v8234_v32, %v8234_v32  ;;  %v7838_v63 = vmax.f32 %v7446_v4, %v7642_v35  ;;  %v7643_v21 = vmax.f32 %v15346_v20, %v11644_v62  ;;  %v7144_v27 = vpop.f32.mrb[103].mxu1  ;;  %v15355_v4 = vld [vmem:[#allocation290_spill] sm:$0xff] }
 0x3b6   : > { %v7445_v7 = vmax.f32 %v15347_v23, %v5576_v19  ;;  %9212 = vst.msk [vmem:[%s13564_s27 + $0x270] sm:$0xf] %vm9055_vm3, %v10455_v60  ;;  %v10456_v8 = vpack.c.bf16 %v8232_v61, %v8232_v61  ;;  %v7836_v9 = vmax.f32 %v7444_v52, %v7640_v55  ;;  %v7641_v15 = vmax.f32 %v15348_v37, %v7144_v27 }
 0x3b7   : > { %9215 = vst.msk [vmem:[%s13564_s27 + $0x27c] sm:$0xf] %vm9055_vm3, %v10458_v0  ;;  %v8041_v14 = vadd.f32 %v14518_v56, %v7838_v63  ;;  %v7839_v10 = vmax.f32 %v7447_v6, %v7643_v21  ;;  %v15357_v6 = vld [vmem:[#allocation292_spill] sm:$0xff]  ;;  %v15358_v21 = vld [vmem:[#allocation293_spill] sm:$0xff] }
 0x3b8   : > { %9213 = vst.msk [vmem:[%s13564_s27 + $0x274] sm:$0xf] %vm9055_vm3, %v10456_v8  ;;  %v8039_v38 = vadd.f32 %v14518_v56, %v7836_v9  ;;  %v7837_v40 = vmax.f32 %v7445_v7, %v7641_v15  ;;  %v15359_v7 = vld [vmem:[#allocation294_spill] sm:$0xff] }
 0x3b9   : > { %v8237_v41 = vmax.f32 %v8041_v14, 0.0  ;;  %v8042_v2 = vadd.f32 %v14518_v56, %v7839_v10  ;;  %v15360_v14 = vld [vmem:[#allocation295_spill] sm:$0xff] }
 0x3ba   : > { %v11255_v24 = vpop.f32.mrb[104].mxu0  ;;  %v8235_v36 = vmax.f32 %v8039_v38, 0.0  ;;  %v8040_v11 = vadd.f32 %v14518_v56, %v7837_v40  ;;  %v11647_v42 = vpop.f32.mrb[104].mxu1  ;;  %v15361_v38 = vld [vmem:[#allocation296_spill] sm:$0xff] }
 0x3bb   : > { %v7450_v22 = vmax.f32 %v15349_v17, %v11255_v24  ;;  %v5589_v39 = vpop.f32.mrb[105].mxu0  ;;  %v10461_v43 = vpack.c.bf16 %v8237_v41, %v8237_v41  ;;  %v8238_v50 = vmax.f32 %v8042_v2, 0.0  ;;  %v7646_v45 = vmax.f32 %v15350_v44, %v11647_v42  ;;  %v7157_v48 = vpop.f32.mrb[105].mxu1  ;;  %v15364_v44 = vld [vmem:[#allocation299_spill] sm:$0xff] }
 0x3bc   : > { %v7448_v3 = vmax.f32 %v15351_v47, %v5589_v39  ;;  %v11256_v53 = vpop.f32.mrb[106].mxu0  ;;  %v10459_v25 = vpack.c.bf16 %v8235_v36, %v8235_v36  ;;  %v8236_v51 = vmax.f32 %v8040_v11, 0.0  ;;  %v7644_v46 = vmax.f32 %v15352_v1, %v7157_v48  ;;  %v11648_v29 = vpop.f32.mrb[106].mxu1  ;;  %v15362_v11 = vld [vmem:[#allocation297_spill] sm:$0xff] }
 0x3bd   : > { %v7451_v28 = vmax.f32 %v15353_v34, %v11256_v53  ;;  %v5592_v57 = vpop.f32.mrb[107].mxu0  ;;  %9218 = vst.msk [vmem:[%s13564_s27 + $0x288] sm:$0xf] %vm9055_vm3, %v10461_v43  ;;  %v10462_v13 = vpack.c.bf16 %v8238_v50, %v8238_v50  ;;  %v7842_v12 = vmax.f32 %v7450_v22, %v7646_v45  ;;  %v7647_v30 = vmax.f32 %v15354_v58, %v11648_v29  ;;  %v7160_v5 = vpop.f32.mrb[107].mxu1  ;;  %v15363_v22 = vld [vmem:[#allocation298_spill] sm:$0xff] }
 0x3be   : > { %v7449_v31 = vmax.f32 %v15355_v4, %v5592_v57  ;;  %9216 = vst.msk [vmem:[%s13564_s27 + $0x280] sm:$0xf] %vm9055_vm3, %v10459_v25  ;;  %v10460_v49 = vpack.c.bf16 %v8236_v51, %v8236_v51  ;;  %v7840_v32 = vmax.f32 %v7448_v3, %v7644_v46  ;;  %v7645_v35 = vmax.f32 %v15356_v33, %v7160_v5 }
 0x3bf   : > { %9219 = vst.msk [vmem:[%s13564_s27 + $0x28c] sm:$0xf] %vm9055_vm3, %v10462_v13  ;;  %v8045_v16 = vadd.f32 %v14518_v56, %v7842_v12  ;;  %v7843_v52 = vmax.f32 %v7451_v28, %v7647_v30  ;;  %v15365_v28 = vld [vmem:[#allocation300_spill] sm:$0xff]  ;;  %v15366_v30 = vld [vmem:[#allocation301_spill] sm:$0xff] }
 0x3c0   : > { %9217 = vst.msk [vmem:[%s13564_s27 + $0x284] sm:$0xf] %vm9055_vm3, %v10460_v49  ;;  %v8043_v54 = vadd.f32 %v14518_v56, %v7840_v32  ;;  %v7841_v59 = vmax.f32 %v7449_v31, %v7645_v35  ;;  %v15367_v31 = vld [vmem:[#allocation302_spill] sm:$0xff] }
 0x3c1   : > { %v8241_v60 = vmax.f32 %v8045_v16, 0.0  ;;  %v8046_v61 = vadd.f32 %v14518_v56, %v7843_v52  ;;  %v15368_v16 = vld [vmem:[#allocation303_spill] sm:$0xff] }
 0x3c2   : > { %v11259_v26 = vpop.f32.mrb[108].mxu0  ;;  %v8239_v55 = vmax.f32 %v8043_v54, 0.0  ;;  %v8044_v18 = vadd.f32 %v14518_v56, %v7841_v59  ;;  %v11651_v19 = vpop.f32.mrb[108].mxu1  ;;  %v15369_v54 = vld [vmem:[#allocation304_spill] sm:$0xff] }
 0x3c3   : > { %v7454_v62 = vmax.f32 %v15357_v6, %v11259_v26  ;;  %v5605_v0 = vpop.f32.mrb[109].mxu0  ;;  %v10465_v63 = vpack.c.bf16 %v8241_v60, %v8241_v60  ;;  %v8242_v20 = vmax.f32 %v8046_v61, 0.0  ;;  %v7650_v23 = vmax.f32 %v15358_v21, %v11651_v19  ;;  %v7173_v8 = vpop.f32.mrb[109].mxu1  ;;  %v15372_v21 = vld [vmem:[#allocation307_spill] sm:$0xff] }
 0x3c4   : > { %v7452_v27 = vmax.f32 %v15359_v7, %v5605_v0  ;;  %v11260_v9 = vpop.f32.mrb[110].mxu0  ;;  %v10463_v37 = vpack.c.bf16 %v8239_v55, %v8239_v55  ;;  %v8240_v15 = vmax.f32 %v8044_v18, 0.0  ;;  %v7648_v10 = vmax.f32 %v15360_v14, %v7173_v8  ;;  %v11652_v41 = vpop.f32.mrb[110].mxu1  ;;  %v15370_v18 = vld [vmem:[#allocation305_spill] sm:$0xff] }
 0x3c5   : > { %v7455_v40 = vmax.f32 %v15361_v38, %v11260_v9  ;;  %v5608_v2 = vpop.f32.mrb[111].mxu0  ;;  %9222 = vst.msk [vmem:[%s13564_s27 + $0x298] sm:$0xf] %vm9055_vm3, %v10465_v63  ;;  %v10466_v24 = vpack.c.bf16 %v8242_v20, %v8242_v20  ;;  %v7846_v36 = vmax.f32 %v7454_v62, %v7650_v23  ;;  %v7651_v17 = vmax.f32 %v15362_v11, %v11652_v41  ;;  %v7176_v39 = vpop.f32.mrb[111].mxu1  ;;  %v15371_v62 = vld [vmem:[#allocation306_spill] sm:$0xff] }
 0x3c6   : > { %v7453_v42 = vmax.f32 %v15363_v22, %v5608_v2  ;;  %9220 = vst.msk [vmem:[%s13564_s27 + $0x290] sm:$0xf] %vm9055_vm3, %v10463_v37  ;;  %v10464_v43 = vpack.c.bf16 %v8240_v15, %v8240_v15  ;;  %v7844_v50 = vmax.f32 %v7452_v27, %v7648_v10  ;;  %v7649_v45 = vmax.f32 %v15364_v44, %v7176_v39 }
 0x3c7   : > { %9223 = vst.msk [vmem:[%s13564_s27 + $0x29c] sm:$0xf] %vm9055_vm3, %v10466_v24  ;;  %v8049_v47 = vadd.f32 %v14518_v56, %v7846_v36  ;;  %v7847_v3 = vmax.f32 %v7455_v40, %v7651_v17  ;;  %v15373_v40 = vld [vmem:[#allocation308_spill] sm:$0xff]  ;;  %v15374_v17 = vld [vmem:[#allocation309_spill] sm:$0xff] }
 0x3c8   : > { %9221 = vst.msk [vmem:[%s13564_s27 + $0x294] sm:$0xf] %vm9055_vm3, %v10464_v43  ;;  %v8047_v48 = vadd.f32 %v14518_v56, %v7844_v50  ;;  %v7845_v53 = vmax.f32 %v7453_v42, %v7649_v45  ;;  %v15375_v42 = vld [vmem:[#allocation310_spill] sm:$0xff] }
 0x3c9   : > { %v8245_v25 = vmax.f32 %v8049_v47, 0.0  ;;  %v8050_v51 = vadd.f32 %v14518_v56, %v7847_v3  ;;  %v15376_v47 = vld [vmem:[#allocation311_spill] sm:$0xff] }
 0x3ca   : > { %v11263_v1 = vpop.f32.mrb[112].mxu0  ;;  %v8243_v46 = vmax.f32 %v8047_v48, 0.0  ;;  %v8048_v34 = vadd.f32 %v14518_v56, %v7845_v53  ;;  %v11655_v57 = vpop.f32.mrb[112].mxu1  ;;  %v15377_v48 = vld [vmem:[#allocation312_spill] sm:$0xff] }
 0x3cb   : > { %v7458_v29 = vmax.f32 %v15365_v28, %v11263_v1  ;;  %v5621_v13 = vpop.f32.mrb[113].mxu0  ;;  %v10469_v12 = vpack.c.bf16 %v8245_v25, %v8245_v25  ;;  %v8246_v58 = vmax.f32 %v8050_v51, 0.0  ;;  %v7654_v4 = vmax.f32 %v15366_v30, %v11655_v57  ;;  %v7189_v49 = vpop.f32.mrb[113].mxu1  ;;  %v15380_v30 = vld [vmem:[#allocation315_spill] sm:$0xff] }
 0x3cc   : > { %v7456_v5 = vmax.f32 %v15367_v31, %v5621_v13  ;;  %v11264_v32 = vpop.f32.mrb[114].mxu0  ;;  %v10467_v33 = vpack.c.bf16 %v8243_v46, %v8243_v46  ;;  %v8244_v35 = vmax.f32 %v8048_v34, 0.0  ;;  %v7652_v52 = vmax.f32 %v15368_v16, %v7189_v49  ;;  %v11656_v60 = vpop.f32.mrb[114].mxu1  ;;  %v15378_v34 = vld [vmem:[#allocation313_spill] sm:$0xff] }
 0x3cd   : > { %v7459_v59 = vmax.f32 %v15369_v54, %v11264_v32  ;;  %v5624_v61 = vpop.f32.mrb[115].mxu0  ;;  %9226 = vst.msk [vmem:[%s13564_s27 + $0x2a8] sm:$0xf] %vm9055_vm3, %v10469_v12  ;;  %v10470_v26 = vpack.c.bf16 %v8246_v58, %v8246_v58  ;;  %v7850_v55 = vmax.f32 %v7458_v29, %v7654_v4  ;;  %v7655_v6 = vmax.f32 %v15370_v18, %v11656_v60  ;;  %v7192_v0 = vpop.f32.mrb[115].mxu1  ;;  %v15379_v29 = vld [vmem:[#allocation314_spill] sm:$0xff] }
 0x3ce   : > { %v7457_v19 = vmax.f32 %v15371_v62, %v5624_v61  ;;  %9224 = vst.msk [vmem:[%s13564_s27 + $0x2a0] sm:$0xf] %vm9055_vm3, %v10467_v33  ;;  %v10468_v63 = vpack.c.bf16 %v8244_v35, %v8244_v35  ;;  %v7848_v20 = vmax.f32 %v7456_v5, %v7652_v52  ;;  %v7653_v23 = vmax.f32 %v15372_v21, %v7192_v0 }
 0x3cf   : > { %9227 = vst.msk [vmem:[%s13564_s27 + $0x2ac] sm:$0xf] %vm9055_vm3, %v10470_v26  ;;  %v8053_v7 = vadd.f32 %v14518_v56, %v7850_v55  ;;  %v7851_v27 = vmax.f32 %v7459_v59, %v7655_v6  ;;  %v15381_v59 = vld [vmem:[#allocation316_spill] sm:$0xff]  ;;  %v15382_v6 = vld [vmem:[#allocation317_spill] sm:$0xff] }
 0x3d0   : > { %9225 = vst.msk [vmem:[%s13564_s27 + $0x2a4] sm:$0xf] %vm9055_vm3, %v10468_v63  ;;  %v8051_v8 = vadd.f32 %v14518_v56, %v7848_v20  ;;  %v7849_v9 = vmax.f32 %v7457_v19, %v7653_v23  ;;  %v15383_v19 = vld [vmem:[#allocation318_spill] sm:$0xff] }
 0x3d1   : > { %v8249_v37 = vmax.f32 %v8053_v7, 0.0  ;;  %v8054_v15 = vadd.f32 %v14518_v56, %v7851_v27  ;;  %v15384_v7 = vld [vmem:[#allocation319_spill] sm:$0xff] }
 0x3d2   : > { %v11267_v14 = vpop.f32.mrb[116].mxu0  ;;  %v8247_v10 = vmax.f32 %v8051_v8, 0.0  ;;  %v8052_v38 = vadd.f32 %v14518_v56, %v7849_v9  ;;  %v11659_v2 = vpop.f32.mrb[116].mxu1  ;;  %v15385_v8 = vld [vmem:[#allocation320_spill] sm:$0xff] }
 0x3d3   : > { %v7462_v41 = vmax.f32 %v15373_v40, %v11267_v14  ;;  %v5637_v24 = vpop.f32.mrb[117].mxu0  ;;  %v10473_v36 = vpack.c.bf16 %v8249_v37, %v8249_v37  ;;  %v8250_v11 = vmax.f32 %v8054_v15, 0.0  ;;  %v7658_v22 = vmax.f32 %v15374_v17, %v11659_v2  ;;  %v7205_v43 = vpop.f32.mrb[117].mxu1  ;;  %v15388_v17 = vld [vmem:[#allocation323_spill] sm:$0xff] }
 0x3d4   : > { %v7460_v39 = vmax.f32 %v15375_v42, %v5637_v24  ;;  %v11268_v50 = vpop.f32.mrb[118].mxu0  ;;  %v10471_v44 = vpack.c.bf16 %v8247_v10, %v8247_v10  ;;  %v8248_v45 = vmax.f32 %v8052_v38, 0.0  ;;  %v7656_v3 = vmax.f32 %v15376_v47, %v7205_v43  ;;  %v11660_v25 = vpop.f32.mrb[118].mxu1  ;;  %v15386_v38 = vld [vmem:[#allocation321_spill] sm:$0xff] }
 0x3d5   : > { %v7463_v53 = vmax.f32 %v15377_v48, %v11268_v50  ;;  %v5640_v51 = vpop.f32.mrb[119].mxu0  ;;  %9230 = vst.msk [vmem:[%s13564_s27 + $0x2b8] sm:$0xf] %vm9055_vm3, %v10473_v36  ;;  %v10474_v1 = vpack.c.bf16 %v8250_v11, %v8250_v11  ;;  %v7854_v46 = vmax.f32 %v7462_v41, %v7658_v22  ;;  %v7659_v28 = vmax.f32 %v15378_v34, %v11660_v25  ;;  %v7208_v13 = vpop.f32.mrb[119].mxu1  ;;  %v15387_v41 = vld [vmem:[#allocation322_spill] sm:$0xff] }
 0x3d6   : > { %v7461_v57 = vmax.f32 %v15379_v29, %v5640_v51  ;;  %9228 = vst.msk [vmem:[%s13564_s27 + $0x2b0] sm:$0xf] %vm9055_vm3, %v10471_v44  ;;  %v10472_v12 = vpack.c.bf16 %v8248_v45, %v8248_v45  ;;  %v7852_v58 = vmax.f32 %v7460_v39, %v7656_v3  ;;  %v7657_v4 = vmax.f32 %v15380_v30, %v7208_v13 }
 0x3d7   : > { %9231 = vst.msk [vmem:[%s13564_s27 + $0x2bc] sm:$0xf] %vm9055_vm3, %v10474_v1  ;;  %v8057_v31 = vadd.f32 %v14518_v56, %v7854_v46  ;;  %v7855_v5 = vmax.f32 %v7463_v53, %v7659_v28  ;;  %v15389_v53 = vld [vmem:[#allocation324_spill] sm:$0xff]  ;;  %v15390_v28 = vld [vmem:[#allocation325_spill] sm:$0xff] }
 0x3d8   : > { %9229 = vst.msk [vmem:[%s13564_s27 + $0x2b4] sm:$0xf] %vm9055_vm3, %v10472_v12  ;;  %v8055_v49 = vadd.f32 %v14518_v56, %v7852_v58  ;;  %v7853_v32 = vmax.f32 %v7461_v57, %v7657_v4  ;;  %v15391_v57 = vld [vmem:[#allocation326_spill] sm:$0xff] }
 0x3d9   : > { %v8253_v33 = vmax.f32 %v8057_v31, 0.0  ;;  %v8058_v35 = vadd.f32 %v14518_v56, %v7855_v5  ;;  %v15392_v31 = vld [vmem:[#allocation327_spill] sm:$0xff] }
 0x3da   : > { %v11271_v16 = vpop.f32.mrb[120].mxu0  ;;  %v8251_v52 = vmax.f32 %v8055_v49, 0.0  ;;  %v8056_v54 = vadd.f32 %v14518_v56, %v7853_v32  ;;  %v11663_v61 = vpop.f32.mrb[120].mxu1  ;;  %v15393_v49 = vld [vmem:[#allocation328_spill] sm:$0xff] }
 0x3db   : > { %v7466_v60 = vmax.f32 %v15381_v59, %v11271_v16  ;;  %v5653_v26 = vpop.f32.mrb[121].mxu0  ;;  %v10477_v55 = vpack.c.bf16 %v8253_v33, %v8253_v33  ;;  %v8254_v18 = vmax.f32 %v8058_v35, 0.0  ;;  %v7662_v62 = vmax.f32 %v15382_v6, %v11663_v61  ;;  %v7221_v63 = vpop.f32.mrb[121].mxu1  ;;  %v15396_v6 = vld [vmem:[#allocation331_spill] sm:$0xff] }
 0x3dc   : > { %v7464_v0 = vmax.f32 %v15383_v19, %v5653_v26  ;;  %v11272_v20 = vpop.f32.mrb[122].mxu0  ;;  %v10475_v21 = vpack.c.bf16 %v8251_v52, %v8251_v52  ;;  %v8252_v23 = vmax.f32 %v8056_v54, 0.0  ;;  %v7660_v27 = vmax.f32 %v15384_v7, %v7221_v63  ;;  %v11664_v37 = vpop.f32.mrb[122].mxu1  ;;  %v15394_v54 = vld [vmem:[#allocation329_spill] sm:$0xff] }
 0x3dd   : > { %v7467_v9 = vmax.f32 %v15385_v8, %v11272_v20  ;;  %v5656_v15 = vpop.f32.mrb[123].mxu0  ;;  %9234 = vst.msk [vmem:[%s13564_s27 + $0x2c8] sm:$0xf] %vm9055_vm3, %v10477_v55  ;;  %v10478_v14 = vpack.c.bf16 %v8254_v18, %v8254_v18  ;;  %v7858_v10 = vmax.f32 %v7466_v60, %v7662_v62  ;;  %v7663_v40 = vmax.f32 %v15386_v38, %v11664_v37  ;;  %v7224_v24 = vpop.f32.mrb[123].mxu1  ;;  %v15395_v60 = vld [vmem:[#allocation330_spill] sm:$0xff] }
 0x3de   : > { %v7465_v2 = vmax.f32 %v15387_v41, %v5656_v15  ;;  %9232 = vst.msk [vmem:[%s13564_s27 + $0x2c0] sm:$0xf] %vm9055_vm3, %v10475_v21  ;;  %v10476_v36 = vpack.c.bf16 %v8252_v23, %v8252_v23  ;;  %v7856_v11 = vmax.f32 %v7464_v0, %v7660_v27  ;;  %v7661_v22 = vmax.f32 %v15388_v17, %v7224_v24 }
 0x3df   : > { %9235 = vst.msk [vmem:[%s13564_s27 + $0x2cc] sm:$0xf] %vm9055_vm3, %v10478_v14  ;;  %v8061_v42 = vadd.f32 %v14518_v56, %v7858_v10  ;;  %v7859_v39 = vmax.f32 %v7467_v9, %v7663_v40  ;;  %v15397_v9 = vld [vmem:[#allocation332_spill] sm:$0xff]  ;;  %v15398_v40 = vld [vmem:[#allocation333_spill] sm:$0xff] }
 0x3e0   : > { %9233 = vst.msk [vmem:[%s13564_s27 + $0x2c4] sm:$0xf] %vm9055_vm3, %v10476_v36  ;;  %v8059_v43 = vadd.f32 %v14518_v56, %v7856_v11  ;;  %v7857_v50 = vmax.f32 %v7465_v2, %v7661_v22  ;;  %v15399_v2 = vld [vmem:[#allocation334_spill] sm:$0xff] }
 0x3e1   : > { %v8257_v44 = vmax.f32 %v8061_v42, 0.0  ;;  %v8062_v45 = vadd.f32 %v14518_v56, %v7859_v39  ;;  %v15400_v42 = vld [vmem:[#allocation335_spill] sm:$0xff] }
 0x3e2   : > { %v11275_v47 = vpop.f32.mrb[124].mxu0  ;;  %v8255_v3 = vmax.f32 %v8059_v43, 0.0  ;;  %v8060_v48 = vadd.f32 %v14518_v56, %v7857_v50  ;;  %v11667_v51 = vpop.f32.mrb[124].mxu1  ;;  %v15401_v43 = vld [vmem:[#allocation336_spill] sm:$0xff] }
 0x3e3   : > { %v7470_v25 = vmax.f32 %v15389_v53, %v11275_v47  ;;  %v5669_v1 = vpop.f32.mrb[125].mxu0  ;;  %v10481_v46 = vpack.c.bf16 %v8257_v44, %v8257_v44  ;;  %v8258_v34 = vmax.f32 %v8062_v45, 0.0  ;;  %v7666_v29 = vmax.f32 %v15390_v28, %v11667_v51  ;;  %v7237_v12 = vpop.f32.mrb[125].mxu1  ;;  %v15404_v28 = vld [vmem:[#allocation339_spill] sm:$0xff] }
 0x3e4   : > { %v7468_v13 = vmax.f32 %v15391_v57, %v5669_v1  ;;  %v11276_v58 = vpop.f32.mrb[126].mxu0  ;;  %v10479_v30 = vpack.c.bf16 %v8255_v3, %v8255_v3  ;;  %v8256_v4 = vmax.f32 %v8060_v48, 0.0  ;;  %v7664_v5 = vmax.f32 %v15392_v31, %v7237_v12  ;;  %v11668_v33 = vpop.f32.mrb[126].mxu1  ;;  %v15402_v48 = vld [vmem:[#allocation337_spill] sm:$0xff] }
 0x3e5   : > { %v7471_v32 = vmax.f32 %v15393_v49, %v11276_v58  ;;  %v5672_v35 = vpop.f32.mrb[127].mxu0  ;;  %9238 = vst.msk [vmem:[%s13564_s27 + $0x2d8] sm:$0xf] %vm9055_vm3, %v10481_v46  ;;  %v10482_v16 = vpack.c.bf16 %v8258_v34, %v8258_v34  ;;  %v7862_v52 = vmax.f32 %v7470_v25, %v7666_v29  ;;  %v7667_v59 = vmax.f32 %v15394_v54, %v11668_v33  ;;  %v7240_v26 = vpop.f32.mrb[127].mxu1  ;;  %v15403_v25 = vld [vmem:[#allocation338_spill] sm:$0xff] }
 0x3e6   : > { %v7469_v61 = vmax.f32 %v15395_v60, %v5672_v35  ;;  %9236 = vst.msk [vmem:[%s13564_s27 + $0x2d0] sm:$0xf] %vm9055_vm3, %v10479_v30  ;;  %v10480_v55 = vpack.c.bf16 %v8256_v4, %v8256_v4  ;;  %v7860_v18 = vmax.f32 %v7468_v13, %v7664_v5  ;;  %v7665_v62 = vmax.f32 %v15396_v6, %v7240_v26 }
 0x3e7   : > { %9239 = vst.msk [vmem:[%s13564_s27 + $0x2dc] sm:$0xf] %vm9055_vm3, %v10482_v16  ;;  %v8065_v19 = vadd.f32 %v14518_v56, %v7862_v52  ;;  %v7863_v0 = vmax.f32 %v7471_v32, %v7667_v59  ;;  %v15405_v32 = vld [vmem:[#allocation340_spill] sm:$0xff]  ;;  %v15406_v59 = vld [vmem:[#allocation341_spill] sm:$0xff] }
 0x3e8   : > { %9237 = vst.msk [vmem:[%s13564_s27 + $0x2d4] sm:$0xf] %vm9055_vm3, %v10480_v55  ;;  %v8063_v63 = vadd.f32 %v14518_v56, %v7860_v18  ;;  %v7861_v20 = vmax.f32 %v7469_v61, %v7665_v62  ;;  %v15407_v61 = vld [vmem:[#allocation342_spill] sm:$0xff] }
 0x3e9   : > { %v8261_v21 = vmax.f32 %v8065_v19, 0.0  ;;  %v8066_v23 = vadd.f32 %v14518_v56, %v7863_v0  ;;  %v15408_v19 = vld [vmem:[#allocation343_spill] sm:$0xff] }
 0x3ea   : > { %v11279_v7 = vpop.f32.mrb[128].mxu0  ;;  %v8259_v27 = vmax.f32 %v8063_v63, 0.0  ;;  %v8064_v8 = vadd.f32 %v14518_v56, %v7861_v20  ;;  %v11671_v15 = vpop.f32.mrb[128].mxu1  ;;  %v15409_v63 = vld [vmem:[#allocation344_spill] sm:$0xff] }
 0x3eb   : > { %v7474_v37 = vmax.f32 %v15397_v9, %v11279_v7  ;;  %v5685_v14 = vpop.f32.mrb[129].mxu0  ;;  %v10485_v10 = vpack.c.bf16 %v8261_v21, %v8261_v21  ;;  %v8262_v38 = vmax.f32 %v8066_v23, 0.0  ;;  %v7670_v41 = vmax.f32 %v15398_v40, %v11671_v15  ;;  %v7253_v36 = vpop.f32.mrb[129].mxu1  ;;  %v15412_v40 = vld [vmem:[#allocation347_spill] sm:$0xff] }
 0x3ec   : > { %v7472_v24 = vmax.f32 %v15399_v2, %v5685_v14  ;;  %v11280_v11 = vpop.f32.mrb[130].mxu0  ;;  %v10483_v17 = vpack.c.bf16 %v8259_v27, %v8259_v27  ;;  %v8260_v22 = vmax.f32 %v8064_v8, 0.0  ;;  %v7668_v39 = vmax.f32 %v15400_v42, %v7253_v36  ;;  %v11672_v44 = vpop.f32.mrb[130].mxu1  ;;  %v15410_v8 = vld [vmem:[#allocation345_spill] sm:$0xff] }
 0x3ed   : > { %v7475_v50 = vmax.f32 %v15401_v43, %v11280_v11  ;;  %v5688_v45 = vpop.f32.mrb[131].mxu0  ;;  %9242 = vst.msk [vmem:[%s13564_s27 + $0x2e8] sm:$0xf] %vm9055_vm3, %v10485_v10  ;;  %v10486_v47 = vpack.c.bf16 %v8262_v38, %v8262_v38  ;;  %v7866_v3 = vmax.f32 %v7474_v37, %v7670_v41  ;;  %v7671_v53 = vmax.f32 %v15402_v48, %v11672_v44  ;;  %v7256_v1 = vpop.f32.mrb[131].mxu1  ;;  %v15411_v37 = vld [vmem:[#allocation346_spill] sm:$0xff] }
 0x3ee   : > { %v7473_v51 = vmax.f32 %v15403_v25, %v5688_v45  ;;  %9240 = vst.msk [vmem:[%s13564_s27 + $0x2e0] sm:$0xf] %vm9055_vm3, %v10483_v17  ;;  %v10484_v46 = vpack.c.bf16 %v8260_v22, %v8260_v22  ;;  %v7864_v34 = vmax.f32 %v7472_v24, %v7668_v39  ;;  %v7669_v29 = vmax.f32 %v15404_v28, %v7256_v1 }
 0x3ef   : > { %9243 = vst.msk [vmem:[%s13564_s27 + $0x2ec] sm:$0xf] %vm9055_vm3, %v10486_v47  ;;  %v8069_v57 = vadd.f32 %v14518_v56, %v7866_v3  ;;  %v7867_v13 = vmax.f32 %v7475_v50, %v7671_v53 }
 0x3f0   : > { %9241 = vst.msk [vmem:[%s13564_s27 + $0x2e4] sm:$0xf] %vm9055_vm3, %v10484_v46  ;;  %v8067_v12 = vadd.f32 %v14518_v56, %v7864_v34  ;;  %v7865_v58 = vmax.f32 %v7473_v51, %v7669_v29 }
 0x3f1   : > { %v8265_v30 = vmax.f32 %v8069_v57, 0.0  ;;  %v8070_v4 = vadd.f32 %v14518_v56, %v7867_v13 }
 0x3f2   : > { %v11283_v31 = vpop.f32.mrb[132].mxu0  ;;  %v8263_v5 = vmax.f32 %v8067_v12, 0.0  ;;  %v8068_v49 = vadd.f32 %v14518_v56, %v7865_v58  ;;  %v11675_v35 = vpop.f32.mrb[132].mxu1 }
 0x3f3   : > { %v7478_v33 = vmax.f32 %v15405_v32, %v11283_v31  ;;  %v5701_v16 = vpop.f32.mrb[133].mxu0  ;;  %v10489_v52 = vpack.c.bf16 %v8265_v30, %v8265_v30  ;;  %v8266_v54 = vmax.f32 %v8070_v4, 0.0  ;;  %v7674_v60 = vmax.f32 %v15406_v59, %v11675_v35  ;;  %v7269_v55 = vpop.f32.mrb[133].mxu1 }
 0x3f4   : > { %v7476_v26 = vmax.f32 %v15407_v61, %v5701_v16  ;;  %v11284_v18 = vpop.f32.mrb[134].mxu0  ;;  %v10487_v6 = vpack.c.bf16 %v8263_v5, %v8263_v5  ;;  %v8264_v62 = vmax.f32 %v8068_v49, 0.0  ;;  %v7672_v0 = vmax.f32 %v15408_v19, %v7269_v55  ;;  %v11676_v21 = vpop.f32.mrb[134].mxu1 }
 0x3f5   : > { %v7479_v20 = vmax.f32 %v15409_v63, %v11284_v18  ;;  %v5704_v23 = vpop.f32.mrb[135].mxu0  ;;  %9246 = vst.msk [vmem:[%s13564_s27 + $0x2f8] sm:$0xf] %vm9055_vm3, %v10489_v52  ;;  %v10490_v7 = vpack.c.bf16 %v8266_v54, %v8266_v54  ;;  %v7870_v27 = vmax.f32 %v7478_v33, %v7674_v60  ;;  %v7675_v9 = vmax.f32 %v15410_v8, %v11676_v21  ;;  %v7272_v14 = vpop.f32.mrb[135].mxu1 }
 0x3f6   : > { %v7477_v15 = vmax.f32 %v15411_v37, %v5704_v23  ;;  %9244 = vst.msk [vmem:[%s13564_s27 + $0x2f0] sm:$0xf] %vm9055_vm3, %v10487_v6  ;;  %v10488_v10 = vpack.c.bf16 %v8264_v62, %v8264_v62  ;;  %v7868_v38 = vmax.f32 %v7476_v26, %v7672_v0  ;;  %v7673_v41 = vmax.f32 %v15412_v40, %v7272_v14 }
 0x3f7   : > { %9247 = vst.msk [vmem:[%s13564_s27 + $0x2fc] sm:$0xf] %vm9055_vm3, %v10490_v7  ;;  %v8073_v2 = vadd.f32 %v14518_v56, %v7870_v27  ;;  %v7871_v24 = vmax.f32 %v7479_v20, %v7675_v9 }
 0x3f8   : > { %9245 = vst.msk [vmem:[%s13564_s27 + $0x2f4] sm:$0xf] %vm9055_vm3, %v10488_v10  ;;  %v8071_v36 = vadd.f32 %v14518_v56, %v7868_v38  ;;  %v7869_v11 = vmax.f32 %v7477_v15, %v7673_v41 }
 0x3f9   : > { %v8269_v17 = vmax.f32 %v8073_v2, 0.0  ;;  %v8074_v22 = vadd.f32 %v14518_v56, %v7871_v24 }
 0x3fa   : > { %v8267_v42 = vmax.f32 %v8071_v36, 0.0  ;;  %v8072_v39 = vadd.f32 %v14518_v56, %v7869_v11 }
 0x3fb   : > { %v10493_v43 = vpack.c.bf16 %v8269_v17, %v8269_v17  ;;  %v8270_v50 = vmax.f32 %v8074_v22, 0.0 }
 0x3fc   : > { %v10491_v44 = vpack.c.bf16 %v8267_v42, %v8267_v42  ;;  %v8268_v45 = vmax.f32 %v8072_v39, 0.0 }
 0x3fd   : > { %9250 = vst.msk [vmem:[%s13564_s27 + $0x308] sm:$0xf] %vm9055_vm3, %v10493_v43  ;;  %v10494_v47 = vpack.c.bf16 %v8270_v50, %v8270_v50 }
 0x3fe   : > { %9248 = vst.msk [vmem:[%s13564_s27 + $0x300] sm:$0xf] %vm9055_vm3, %v10491_v44  ;;  %v10492_v3 = vpack.c.bf16 %v8268_v45, %v8268_v45 }
 0x3ff   : > { %9251 = vst.msk [vmem:[%s13564_s27 + $0x30c] sm:$0xf] %vm9055_vm3, %v10494_v47 }
 0x400   : > { %9249 = vst.msk [vmem:[%s13564_s27 + $0x304] sm:$0xf] %vm9055_vm3, %v10492_v3 }
 0x401 PF: > { %s13_s12 = sadd.s32 1, %s12095_s12  }
 0x402   : > { %p10_p4 = scmp.ge.s32.totalorder %s13_s12, 6  }
 0x404   :  { %12 = sbr.rel (!%p10_p4) target bundleno = 1 (0x1), region = 62 }

// kernel: classifier_forward.6
= control target key start
LH: loop header
LB: loop body
LE: loop exit
PB: predicated region body
PF: predicated region fallthrough
CT: control target
= control target key end

     0   :  { %s6260_s12 = smov 0   ;;  %s7581_s0 = inlined_call_operand.vmem [shape: bf16[2,3136,54], index: 0, kind: input, shape index: {}]   ;;  %s7582_s1 = inlined_call_operand.vmem [shape: bf16[54,16], index: 1, kind: input, shape index: {}]   ;;  %s7583_s2 = inlined_call_operand.vmem [shape: f32[1,16], index: 2, kind: input, shape index: {}]   ;;  %s7584_s3 = inlined_call_operand.vmem [shape: bf16[2,784,16], index: 3, kind: output, shape index: {}]  }
   0x1 LB: > { %s4809_s13 = sadd.s32 4294967295, %s6238_s12   ;;  %p4813_p0 = scmp.ge.s32.totalorder %s6238_s12, 1  ;;  %s6238_s12 = sphi %s6260_s12, %s13_s12  }
   0x2   : > { %p137_p1 = scmp.lt.s32.totalorder %s6238_s12, 3 }
   0x4   : > { %p138_p2 = pnand %p4813_p0, %p137_p1 }
   0x6   : > { %141 = sbr.rel (%p138_p2) target bundleno = 640 (0x280), region = 32 }
   0xd   : > { %v6031_v0 = vld [vmem:[%s7582_s1] sm:$0xff]   ;;  %v6032_v1 = vld [vmem:[%s7582_s1 + $0x8] sm:$0xff]   ;;  %p161_p3 = scmp.lt.s32.totalorder %s4809_s13, 1  ;;  %v6033_v2 = vld [vmem:[%s7582_s1 + $0x10] sm:$0xff]   ;;  %vm1572_vm0 = vcmask 441344   ;;  %vm2161_vm1 = vcmask 1042432  }
   0xe   : > { %5611 = vmatprep.subr.bf16.mxu0 %v6031_v0  ;;  %6011 = vmatprep.subr.bf16.mxu1 %v6031_v0  ;;  %v6034_v3 = vld [vmem:[%s7582_s1 + $0x18] ss:$0 sps:$4 sm:$0x77]   ;;  %vm4655_vm2 = vcmask 125952  }
   0xf   : > { %5612 = vmatpush3.bf16.msra.mxu0 %v6031_v0  ;;  %6015 = vmatpush3.bf16.msra.mxu1 %v6031_v0  ;;  %s7878_s13 = smov (!%p161_p3, %s4809_s13), 1  ;;  %v2163_v6 = vsel %vm2161_vm1, %v6034_v3, 0 }
  0x10   : > { %5613 = vmatprep.subr.bf16.mxu0 %v6032_v1  ;;  %6012 = vmatprep.subr.bf16.mxu1 %v6032_v1  ;;  %s6021_s20 = smul.u32 1568, %s7878_s13 }
  0x11   : > { %s6022_s28 = smul.u32 392, %s7878_s13 }
  0x12   : > { %s6286_s25 = scalar_lea.vmem %s7581_s0, %s6021_s20 }
  0x13   : > { %5614 = vmatpush3.bf16.msra.mxu0 %v6032_v1  ;;  %6016 = vmatpush3.bf16.msra.mxu1 %v6032_v1  ;;  %v6035_v4 = vld [vmem:[%s6286_s25] sm:$0xff]   ;;  %v6036_v5 = vld [vmem:[%s6286_s25 + $0x310] sm:$0xff]   ;;  %v6037_v7 = vld [vmem:[%s6286_s25 + $0x8] sm:$0xff]   ;;  %s7087_s4 = scalar_lea.vmem %s7584_s3, %s6022_s28 }
  0x14   : > { %5615 = vmatprep.subr.bf16.mxu0 %v6033_v2  ;;  %6013 = vmatprep.subr.bf16.mxu1 %v6033_v2  ;;  %v6038_v8 = vld [vmem:[%s6286_s25 + $0x318] sm:$0xff]   ;;  %v6039_v9 = vld [vmem:[%s6286_s25 + $0x10] sm:$0xff]   ;;  %v6040_v10 = vld [vmem:[%s6286_s25 + $0x320] sm:$0xff]  }
  0x15   : > { %5619 = vmatprep.mubr.msk.bf16.mxu0 %vm1572_vm0, %v6035_v4  ;;  %5815 = vmatprep.mubr.msk.bf16.mxu1 %vm1572_vm0, %v6036_v5  ;;  %v6041_v11 = vld [vmem:[%s6286_s25 + $0x18] sm:$0xff]   ;;  %v6042_v12 = vld [vmem:[%s6286_s25 + $0x328] sm:$0xff]   ;;  %v6043_v13 = vld [vmem:[%s6286_s25 + $0x20] sm:$0xff]  }
  0x16   : > { %v6044_v14 = vld [vmem:[%s6286_s25 + $0x330] sm:$0xff]   ;;  %v6045_v15 = vld [vmem:[%s6286_s25 + $0x28] sm:$0xff]   ;;  %v6046_v16 = vld [vmem:[%s6286_s25 + $0x338] sm:$0xff]  }
  0x17   : > { %5616 = vmatpush3.bf16.msra.mxu0 %v6033_v2  ;;  %6017 = vmatpush3.bf16.msra.mxu1 %v6033_v2  ;;  %v6047_v17 = vld [vmem:[%s6286_s25 + $0x30] sm:$0xff]   ;;  %v6048_v18 = vld [vmem:[%s6286_s25 + $0x340] sm:$0xff]   ;;  %v6049_v19 = vld [vmem:[%s6286_s25 + $0x38] sm:$0xff]  }
  0x18   : > { %6019 = vmatprep.subr.msk.bf16.mxu0 %vm2161_vm1, %v6034_v3  ;;  %6020 = vmatprep.subr.msk.bf16.mxu1 %vm2161_vm1, %v6034_v3  ;;  %v6050_v20 = vld [vmem:[%s6286_s25 + $0x348] sm:$0xff]   ;;  %v6051_v21 = vld [vmem:[%s6286_s25 + $0x40] sm:$0xff]   ;;  %v6052_v22 = vld [vmem:[%s6286_s25 + $0x350] sm:$0xff]  }
  0x19   : > { %v6053_v23 = vld [vmem:[%s6286_s25 + $0x48] sm:$0xff]   ;;  %v6054_v24 = vld [vmem:[%s6286_s25 + $0x358] sm:$0xff]   ;;  %v6055_v25 = vld [vmem:[%s6286_s25 + $0x50] sm:$0xff]  }
  0x1a   : > { %v6056_v26 = vld [vmem:[%s6286_s25 + $0x360] sm:$0xff]   ;;  %v6057_v27 = vld [vmem:[%s6286_s25 + $0x58] sm:$0xff]   ;;  %v6058_v28 = vld [vmem:[%s6286_s25 + $0x368] sm:$0xff]  }
  0x1b   : > { %5618 = vmatpush3.bf16.msra.mxu0 %v2163_v6  ;;  %6018 = vmatpush3.bf16.msra.mxu1 %v2163_v6  ;;  %v6059_v29 = vld [vmem:[%s6286_s25 + $0x60] sm:$0xff]   ;;  %v6060_v30 = vld [vmem:[%s6286_s25 + $0x370] sm:$0xff]   ;;  %v6061_v31 = vld [vmem:[%s6286_s25 + $0x68] sm:$0xff]  }
  0x1c   : > { %v6062_v32 = vld [vmem:[%s6286_s25 + $0x378] sm:$0xff]   ;;  %v6063_v33 = vld [vmem:[%s6286_s25 + $0x70] sm:$0xff]   ;;  %v6064_v34 = vld [vmem:[%s6286_s25 + $0x380] sm:$0xff]  }
  0x1d   : > { %v6065_v35 = vld [vmem:[%s6286_s25 + $0x78] sm:$0xff]   ;;  %v6066_v36 = vld [vmem:[%s6286_s25 + $0x388] sm:$0xff]   ;;  %v6067_v37 = vld [vmem:[%s6286_s25 + $0x80] sm:$0xff]  }
  0x1e   : > { %5620 = vmatmul.mubr.msk.bf16.vlgmr.msra.gmra.mrb[0].mxu0 %vm1572_vm0, %v6037_v7  ;;  %5816 = vmatmul.mubr.msk.bf16.vlgmr.msra.gmra.mrb[0].mxu1 %vm1572_vm0, %v6038_v8  ;;  %v6068_v38 = vld [vmem:[%s6286_s25 + $0x390] sm:$0xff]   ;;  %v6069_v39 = vld [vmem:[%s6286_s25 + $0x88] sm:$0xff]   ;;  %v6070_v40 = vld [vmem:[%s6286_s25 + $0x398] sm:$0xff]  }
  0x1f   : > { %5623 = vmatprep.mubr.msk.bf16.mxu0 %vm1572_vm0, %v6039_v9  ;;  %5819 = vmatprep.mubr.msk.bf16.mxu1 %vm1572_vm0, %v6040_v10  ;;  %v6071_v41 = vld [vmem:[%s6286_s25 + $0x90] sm:$0xff]   ;;  %v6072_v42 = vld [vmem:[%s6286_s25 + $0x3a0] sm:$0xff]   ;;  %v6073_v43 = vld [vmem:[%s6286_s25 + $0x98] sm:$0xff]  }
  0x20   : > { %v6074_v44 = vld [vmem:[%s6286_s25 + $0x3a8] sm:$0xff]   ;;  %v6075_v45 = vld [vmem:[%s6286_s25 + $0xa0] sm:$0xff]   ;;  %v6076_v46 = vld [vmem:[%s6286_s25 + $0x3b0] sm:$0xff]  }
  0x21   : > { %v6077_v47 = vld [vmem:[%s6286_s25 + $0xa8] sm:$0xff]   ;;  %v6078_v48 = vld [vmem:[%s6286_s25 + $0x3b8] sm:$0xff]   ;;  %v6079_v49 = vld [vmem:[%s6286_s25 + $0xb0] sm:$0xff]  }
  0x22   : > { %v6080_v50 = vld [vmem:[%s6286_s25 + $0x3c0] sm:$0xff]   ;;  %v6081_v51 = vld [vmem:[%s6286_s25 + $0xb8] sm:$0xff]   ;;  %v6082_v52 = vld [vmem:[%s6286_s25 + $0x3c8] sm:$0xff]  }
  0x23   : > { %v6083_v53 = vld [vmem:[%s6286_s25 + $0xc0] sm:$0xff]   ;;  %v6084_v54 = vld [vmem:[%s6286_s25 + $0x3d0] sm:$0xff]   ;;  %v6085_v55 = vld [vmem:[%s6286_s25 + $0xc8] sm:$0xff]  }
  0x24   : > { %v6086_v56 = vld [vmem:[%s6286_s25 + $0x3d8] sm:$0xff]   ;;  %v6087_v57 = vld [vmem:[%s6286_s25 + $0xd0] sm:$0xff]   ;;  %v6088_v58 = vld [vmem:[%s6286_s25 + $0x3e0] sm:$0xff]  }
  0x25   : > { %v6089_v59 = vld [vmem:[%s6286_s25 + $0xd8] sm:$0xff]   ;;  %v6090_v60 = vld [vmem:[%s6286_s25 + $0x3e8] sm:$0xff]   ;;  %v6091_v61 = vld [vmem:[%s6286_s25 + $0xe0] sm:$0xff]  }
  0x26   : > { %5624 = vmatmul.mubr.msk.bf16.gmra.mrb[4].mxu0 %vm1572_vm0, %v6041_v11  ;;  %5820 = vmatmul.mubr.msk.bf16.gmra.mrb[4].mxu1 %vm1572_vm0, %v6042_v12  ;;  %v6092_v62 = vld [vmem:[%s6286_s25 + $0x3f0] sm:$0xff]   ;;  %v6093_v63 = vld [vmem:[%s6286_s25 + $0xe8] sm:$0xff]   ;;  %v6094_v0 = vld [vmem:[%s6286_s25 + $0x3f8] sm:$0xff]  }
  0x27   : > { %5627 = vmatprep.mubr.msk.bf16.mxu0 %vm1572_vm0, %v6043_v13  ;;  %5823 = vmatprep.mubr.msk.bf16.mxu1 %vm1572_vm0, %v6044_v14  ;;  %v6095_v1 = vld [vmem:[%s6286_s25 + $0xf0] sm:$0xff]   ;;  %v6096_v2 = vld [vmem:[%s6286_s25 + $0x400] sm:$0xff]   ;;  %v6097_v3 = vld [vmem:[%s6286_s25 + $0xf8] sm:$0xff]  }
  0x28   : > { %v6098_v4 = vld [vmem:[%s6286_s25 + $0x408] sm:$0xff]   ;;  %v6099_v5 = vld [vmem:[%s6286_s25 + $0x100] sm:$0xff]   ;;  %v6100_v6 = vld [vmem:[%s6286_s25 + $0x410] sm:$0xff]  }
  0x29   : > { %v6101_v7 = vld [vmem:[%s6286_s25 + $0x108] sm:$0xff]   ;;  %v6102_v8 = vld [vmem:[%s6286_s25 + $0x418] sm:$0xff]   ;;  %v6103_v9 = vld [vmem:[%s6286_s25 + $0x110] sm:$0xff]  }
  0x2a   : > { %v6104_v10 = vld [vmem:[%s6286_s25 + $0x420] sm:$0xff]   ;;  %v6105_v11 = vld [vmem:[%s6286_s25 + $0x118] sm:$0xff]   ;;  %v6106_v12 = vld [vmem:[%s6286_s25 + $0x428] sm:$0xff]  }
  0x2b   : > { %v6107_v13 = vld [vmem:[%s6286_s25 + $0x120] sm:$0xff]   ;;  %v6108_v14 = vld [vmem:[%s6286_s25 + $0x430] sm:$0xff]  }
  0x2e   : > { %5628 = vmatmul.mubr.msk.bf16.gmra.mrb[8].mxu0 %vm1572_vm0, %v6045_v15  ;;  %5824 = vmatmul.mubr.msk.bf16.gmra.mrb[8].mxu1 %vm1572_vm0, %v6046_v16  ;;  %v6109_v15 = vld [vmem:[%s6286_s25 + $0x128] sm:$0xff]   ;;  %v6110_v16 = vld [vmem:[%s6286_s25 + $0x438] sm:$0xff]  }
  0x2f   : > { %5631 = vmatprep.mubr.msk.bf16.mxu0 %vm1572_vm0, %v6047_v17  ;;  %5827 = vmatprep.mubr.msk.bf16.mxu1 %vm1572_vm0, %v6048_v18  ;;  %v6111_v17 = vld [vmem:[%s6286_s25 + $0x130] sm:$0xff]   ;;  %v6112_v18 = vld [vmem:[%s6286_s25 + $0x440] sm:$0xff]  }
  0x36   : > { %5632 = vmatmul.mubr.msk.bf16.gmra.mrb[12].mxu0 %vm1572_vm0, %v6049_v19  ;;  %5828 = vmatmul.mubr.msk.bf16.gmra.mrb[12].mxu1 %vm1572_vm0, %v6050_v20  ;;  %v6113_v19 = vld [vmem:[%s6286_s25 + $0x138] sm:$0xff]   ;;  %v6114_v20 = vld [vmem:[%s6286_s25 + $0x448] sm:$0xff]  }
  0x37   : > { %5635 = vmatprep.mubr.msk.bf16.mxu0 %vm1572_vm0, %v6051_v21  ;;  %5831 = vmatprep.mubr.msk.bf16.mxu1 %vm1572_vm0, %v6052_v22  ;;  %v6115_v21 = vld [vmem:[%s6286_s25 + $0x140] sm:$0xff]   ;;  %v6116_v22 = vld [vmem:[%s6286_s25 + $0x450] sm:$0xff]  }
  0x3e   : > { %5636 = vmatmul.mubr.msk.bf16.gmra.mrb[16].mxu0 %vm1572_vm0, %v6053_v23  ;;  %5832 = vmatmul.mubr.msk.bf16.gmra.mrb[16].mxu1 %vm1572_vm0, %v6054_v24  ;;  %v6117_v23 = vld [vmem:[%s6286_s25 + $0x148] sm:$0xff]   ;;  %v6118_v24 = vld [vmem:[%s6286_s25 + $0x458] sm:$0xff]  }
  0x3f   : > { %5639 = vmatprep.mubr.msk.bf16.mxu0 %vm1572_vm0, %v6055_v25  ;;  %5835 = vmatprep.mubr.msk.bf16.mxu1 %vm1572_vm0, %v6056_v26  ;;  %v6119_v25 = vld [vmem:[%s6286_s25 + $0x150] sm:$0xff]   ;;  %v6120_v26 = vld [vmem:[%s6286_s25 + $0x460] sm:$0xff]  }
  0x46   : > { %5640 = vmatmul.mubr.msk.bf16.gmra.mrb[20].mxu0 %vm1572_vm0, %v6057_v27  ;;  %5836 = vmatmul.mubr.msk.bf16.gmra.mrb[20].mxu1 %vm1572_vm0, %v6058_v28  ;;  %v6121_v27 = vld [vmem:[%s6286_s25 + $0x158] sm:$0xff]   ;;  %v6122_v28 = vld [vmem:[%s6286_s25 + $0x468] sm:$0xff]  }
  0x47   : > { %5643 = vmatprep.mubr.msk.bf16.mxu0 %vm1572_vm0, %v6059_v29  ;;  %5839 = vmatprep.mubr.msk.bf16.mxu1 %vm1572_vm0, %v6060_v30  ;;  %v6123_v29 = vld [vmem:[%s6286_s25 + $0x160] sm:$0xff]   ;;  %v6124_v30 = vld [vmem:[%s6286_s25 + $0x470] sm:$0xff]  }
  0x4e   : > { %5644 = vmatmul.mubr.msk.bf16.gmra.mrb[24].mxu0 %vm1572_vm0, %v6061_v31  ;;  %5840 = vmatmul.mubr.msk.bf16.gmra.mrb[24].mxu1 %vm1572_vm0, %v6062_v32  ;;  %v6125_v31 = vld [vmem:[%s6286_s25 + $0x168] sm:$0xff]   ;;  %v6126_v32 = vld [vmem:[%s6286_s25 + $0x478] sm:$0xff]  }
  0x4f   : > { %5647 = vmatprep.mubr.msk.bf16.mxu0 %vm1572_vm0, %v6063_v33  ;;  %5843 = vmatprep.mubr.msk.bf16.mxu1 %vm1572_vm0, %v6064_v34  ;;  %v6127_v33 = vld [vmem:[%s6286_s25 + $0x170] sm:$0xff]   ;;  %v6128_v34 = vld [vmem:[%s6286_s25 + $0x480] sm:$0xff]  }
  0x56   : > { %5648 = vmatmul.mubr.msk.bf16.gmra.mrb[28].mxu0 %vm1572_vm0, %v6065_v35  ;;  %5844 = vmatmul.mubr.msk.bf16.gmra.mrb[28].mxu1 %vm1572_vm0, %v6066_v36  ;;  %v6129_v35 = vld [vmem:[%s6286_s25 + $0x178] sm:$0xff]   ;;  %v6130_v36 = vld [vmem:[%s6286_s25 + $0x488] sm:$0xff]  }
  0x57   : > { %5651 = vmatprep.mubr.msk.bf16.mxu0 %vm1572_vm0, %v6067_v37  ;;  %5847 = vmatprep.mubr.msk.bf16.mxu1 %vm1572_vm0, %v6068_v38  ;;  %v6131_v37 = vld [vmem:[%s6286_s25 + $0x180] sm:$0xff]   ;;  %v6132_v38 = vld [vmem:[%s6286_s25 + $0x490] sm:$0xff]  }
  0x5e   : > { %5652 = vmatmul.mubr.msk.bf16.gmra.mrb[32].mxu0 %vm1572_vm0, %v6069_v39  ;;  %5848 = vmatmul.mubr.msk.bf16.gmra.mrb[32].mxu1 %vm1572_vm0, %v6070_v40  ;;  %v6133_v39 = vld [vmem:[%s6286_s25 + $0x188] sm:$0xff]   ;;  %v6134_v40 = vld [vmem:[%s6286_s25 + $0x498] sm:$0xff]  }
  0x5f   : > { %5655 = vmatprep.mubr.msk.bf16.mxu0 %vm1572_vm0, %v6071_v41  ;;  %5851 = vmatprep.mubr.msk.bf16.mxu1 %vm1572_vm0, %v6072_v42  ;;  %v6135_v41 = vld [vmem:[%s6286_s25 + $0x190] sm:$0xff]   ;;  %v6136_v42 = vld [vmem:[%s6286_s25 + $0x4a0] sm:$0xff]  }
  0x66   : > { %5656 = vmatmul.mubr.msk.bf16.gmra.mrb[36].mxu0 %vm1572_vm0, %v6073_v43  ;;  %5852 = vmatmul.mubr.msk.bf16.gmra.mrb[36].mxu1 %vm1572_vm0, %v6074_v44  ;;  %v6137_v43 = vld [vmem:[%s6286_s25 + $0x198] sm:$0xff]   ;;  %v6138_v44 = vld [vmem:[%s6286_s25 + $0x4a8] sm:$0xff]  }
  0x67   : > { %5659 = vmatprep.mubr.msk.bf16.mxu0 %vm1572_vm0, %v6075_v45  ;;  %5855 = vmatprep.mubr.msk.bf16.mxu1 %vm1572_vm0, %v6076_v46  ;;  %v6139_v45 = vld [vmem:[%s6286_s25 + $0x1a0] sm:$0xff]   ;;  %v6140_v46 = vld [vmem:[%s6286_s25 + $0x4b0] sm:$0xff]  }
  0x6e   : > { %5660 = vmatmul.mubr.msk.bf16.gmra.mrb[40].mxu0 %vm1572_vm0, %v6077_v47  ;;  %5856 = vmatmul.mubr.msk.bf16.gmra.mrb[40].mxu1 %vm1572_vm0, %v6078_v48  ;;  %v6141_v47 = vld [vmem:[%s6286_s25 + $0x1a8] sm:$0xff]   ;;  %v6142_v48 = vld [vmem:[%s6286_s25 + $0x4b8] sm:$0xff]  }
  0x6f   : > { %5663 = vmatprep.mubr.msk.bf16.mxu0 %vm1572_vm0, %v6079_v49  ;;  %5859 = vmatprep.mubr.msk.bf16.mxu1 %vm1572_vm0, %v6080_v50  ;;  %v6143_v49 = vld [vmem:[%s6286_s25 + $0x1b0] sm:$0xff]   ;;  %v6144_v50 = vld [vmem:[%s6286_s25 + $0x4c0] sm:$0xff]  }
  0x76   : > { %5664 = vmatmul.mubr.msk.bf16.gmra.mrb[44].mxu0 %vm1572_vm0, %v6081_v51  ;;  %5860 = vmatmul.mubr.msk.bf16.gmra.mrb[44].mxu1 %vm1572_vm0, %v6082_v52 }
  0x77   : > { %5667 = vmatprep.mubr.msk.bf16.mxu0 %vm1572_vm0, %v6083_v53  ;;  %5863 = vmatprep.mubr.msk.bf16.mxu1 %vm1572_vm0, %v6084_v54 }
  0x7e   : > { %5668 = vmatmul.mubr.msk.bf16.gmra.mrb[48].mxu0 %vm1572_vm0, %v6085_v55  ;;  %5864 = vmatmul.mubr.msk.bf16.gmra.mrb[48].mxu1 %vm1572_vm0, %v6086_v56  ;;  %v6145_v55 = vld [vmem:[%s6286_s25 + $0x1b8] sm:$0xff]   ;;  %v6146_v56 = vld [vmem:[%s6286_s25 + $0x4c8] sm:$0xff]  }
  0x7f   : > { %5671 = vmatprep.mubr.msk.bf16.mxu0 %vm1572_vm0, %v6087_v57  ;;  %5867 = vmatprep.mubr.msk.bf16.mxu1 %vm1572_vm0, %v6088_v58 }
  0x86   : > { %5672 = vmatmul.mubr.msk.bf16.gmra.mrb[52].mxu0 %vm1572_vm0, %v6089_v59  ;;  %5868 = vmatmul.mubr.msk.bf16.gmra.mrb[52].mxu1 %vm1572_vm0, %v6090_v60  ;;  %v6147_v59 = vld [vmem:[%s6286_s25 + $0x1c0] sm:$0xff]   ;;  %v6148_v60 = vld [vmem:[%s6286_s25 + $0x4d0] sm:$0xff]  }
  0x87   : > { %5675 = vmatprep.mubr.msk.bf16.mxu0 %vm1572_vm0, %v6091_v61  ;;  %5871 = vmatprep.mubr.msk.bf16.mxu1 %vm1572_vm0, %v6092_v62 }
  0x8e   : > { %5676 = vmatmul.mubr.msk.bf16.gmra.mrb[56].mxu0 %vm1572_vm0, %v6093_v63  ;;  %5872 = vmatmul.mubr.msk.bf16.gmra.mrb[56].mxu1 %vm1572_vm0, %v6094_v0 }
  0x8f   : > { %5679 = vmatprep.mubr.msk.bf16.mxu0 %vm1572_vm0, %v6095_v1  ;;  %5875 = vmatprep.mubr.msk.bf16.mxu1 %vm1572_vm0, %v6096_v2 }
  0x96   : > { %5680 = vmatmul.mubr.msk.bf16.gmra.mrb[60].mxu0 %vm1572_vm0, %v6097_v3  ;;  %5876 = vmatmul.mubr.msk.bf16.gmra.mrb[60].mxu1 %vm1572_vm0, %v6098_v4  ;;  %v6149_v3 = vld [vmem:[%s6286_s25 + $0x1c8] sm:$0xff]   ;;  %v6150_v4 = vld [vmem:[%s6286_s25 + $0x4d8] sm:$0xff]  }
  0x97   : > { %5683 = vmatprep.mubr.msk.bf16.mxu0 %vm1572_vm0, %v6099_v5  ;;  %5879 = vmatprep.mubr.msk.bf16.mxu1 %vm1572_vm0, %v6100_v6 }
  0x9e   : > { %5684 = vmatmul.mubr.msk.bf16.gmra.mrb[64].mxu0 %vm1572_vm0, %v6101_v7  ;;  %5880 = vmatmul.mubr.msk.bf16.gmra.mrb[64].mxu1 %vm1572_vm0, %v6102_v8  ;;  %v6151_v7 = vld [vmem:[%s6286_s25 + $0x1d0] sm:$0xff]   ;;  %v6152_v8 = vld [vmem:[%s6286_s25 + $0x4e0] sm:$0xff]  }
  0x9f   : > { %5687 = vmatprep.mubr.msk.bf16.mxu0 %vm1572_vm0, %v6103_v9  ;;  %5883 = vmatprep.mubr.msk.bf16.mxu1 %vm1572_vm0, %v6104_v10 }
  0xa6   : > { %5688 = vmatmul.mubr.msk.bf16.gmra.mrb[68].mxu0 %vm1572_vm0, %v6105_v11  ;;  %5884 = vmatmul.mubr.msk.bf16.gmra.mrb[68].mxu1 %vm1572_vm0, %v6106_v12 }
  0xa7   : > { %5691 = vmatprep.mubr.msk.bf16.mxu0 %vm1572_vm0, %v6107_v13  ;;  %5887 = vmatprep.mubr.msk.bf16.mxu1 %vm1572_vm0, %v6108_v14 }
  0xae   : > { %5692 = vmatmul.mubr.msk.bf16.gmra.mrb[72].mxu0 %vm1572_vm0, %v6109_v15  ;;  %5888 = vmatmul.mubr.msk.bf16.gmra.mrb[72].mxu1 %vm1572_vm0, %v6110_v16  ;;  %v6153_v15 = vld [vmem:[%s6286_s25 + $0x1d8] sm:$0xff]   ;;  %v6154_v16 = vld [vmem:[%s6286_s25 + $0x4e8] sm:$0xff]  }
  0xaf   : > { %5695 = vmatprep.mubr.msk.bf16.mxu0 %vm1572_vm0, %v6111_v17  ;;  %5891 = vmatprep.mubr.msk.bf16.mxu1 %vm1572_vm0, %v6112_v18 }
  0xb6   : > { %5696 = vmatmul.mubr.msk.bf16.gmra.mrb[76].mxu0 %vm1572_vm0, %v6113_v19  ;;  %5892 = vmatmul.mubr.msk.bf16.gmra.mrb[76].mxu1 %vm1572_vm0, %v6114_v20  ;;  %v6155_v19 = vld [vmem:[%s6286_s25 + $0x1e0] sm:$0xff]   ;;  %v6156_v20 = vld [vmem:[%s6286_s25 + $0x4f0] sm:$0xff]  }
  0xb7   : > { %5699 = vmatprep.mubr.msk.bf16.mxu0 %vm1572_vm0, %v6115_v21  ;;  %5895 = vmatprep.mubr.msk.bf16.mxu1 %vm1572_vm0, %v6116_v22 }
  0xbe   : > { %5700 = vmatmul.mubr.msk.bf16.gmra.mrb[80].mxu0 %vm1572_vm0, %v6117_v23  ;;  %5896 = vmatmul.mubr.msk.bf16.gmra.mrb[80].mxu1 %vm1572_vm0, %v6118_v24 }
  0xbf   : > { %5703 = vmatprep.mubr.msk.bf16.mxu0 %vm1572_vm0, %v6119_v25  ;;  %5899 = vmatprep.mubr.msk.bf16.mxu1 %vm1572_vm0, %v6120_v26 }
  0xc6   : > { %5704 = vmatmul.mubr.msk.bf16.gmra.mrb[84].mxu0 %vm1572_vm0, %v6121_v27  ;;  %5900 = vmatmul.mubr.msk.bf16.gmra.mrb[84].mxu1 %vm1572_vm0, %v6122_v28  ;;  %v6157_v27 = vld [vmem:[%s6286_s25 + $0x1e8] sm:$0xff]   ;;  %v6158_v28 = vld [vmem:[%s6286_s25 + $0x4f8] sm:$0xff]  }
  0xc7   : > { %5707 = vmatprep.mubr.msk.bf16.mxu0 %vm1572_vm0, %v6123_v29  ;;  %5903 = vmatprep.mubr.msk.bf16.mxu1 %vm1572_vm0, %v6124_v30 }
  0xce   : > { %5708 = vmatmul.mubr.msk.bf16.gmra.mrb[88].mxu0 %vm1572_vm0, %v6125_v31  ;;  %5904 = vmatmul.mubr.msk.bf16.gmra.mrb[88].mxu1 %vm1572_vm0, %v6126_v32  ;;  %v6159_v31 = vld [vmem:[%s6286_s25 + $0x1f0] sm:$0xff]   ;;  %v6160_v32 = vld [vmem:[%s6286_s25 + $0x500] sm:$0xff]  }
  0xcf   : > { %5711 = vmatprep.mubr.msk.bf16.mxu0 %vm1572_vm0, %v6127_v33  ;;  %5907 = vmatprep.mubr.msk.bf16.mxu1 %vm1572_vm0, %v6128_v34 }
  0xd6   : > { %5712 = vmatmul.mubr.msk.bf16.gmra.mrb[92].mxu0 %vm1572_vm0, %v6129_v35  ;;  %5908 = vmatmul.mubr.msk.bf16.gmra.mrb[92].mxu1 %vm1572_vm0, %v6130_v36 }
  0xd7   : > { %5715 = vmatprep.mubr.msk.bf16.mxu0 %vm1572_vm0, %v6131_v37  ;;  %5911 = vmatprep.mubr.msk.bf16.mxu1 %vm1572_vm0, %v6132_v38 }
  0xde   : > { %5716 = vmatmul.mubr.msk.bf16.gmra.mrb[96].mxu0 %vm1572_vm0, %v6133_v39  ;;  %5912 = vmatmul.mubr.msk.bf16.gmra.mrb[96].mxu1 %vm1572_vm0, %v6134_v40  ;;  %v6161_v39 = vld [vmem:[%s6286_s25 + $0x1f8] sm:$0xff]   ;;  %v6162_v40 = vld [vmem:[%s6286_s25 + $0x508] sm:$0xff]  }
  0xdf   : > { %5719 = vmatprep.mubr.msk.bf16.mxu0 %vm1572_vm0, %v6135_v41  ;;  %5915 = vmatprep.mubr.msk.bf16.mxu1 %vm1572_vm0, %v6136_v42 }
  0xe6   : > { %5720 = vmatmul.mubr.msk.bf16.gmra.mrb[100].mxu0 %vm1572_vm0, %v6137_v43  ;;  %5916 = vmatmul.mubr.msk.bf16.gmra.mrb[100].mxu1 %vm1572_vm0, %v6138_v44  ;;  %v6163_v43 = vld [vmem:[%s6286_s25 + $0x200] sm:$0xff]   ;;  %v6164_v44 = vld [vmem:[%s6286_s25 + $0x510] sm:$0xff]  }
  0xe7   : > { %5723 = vmatprep.mubr.msk.bf16.mxu0 %vm1572_vm0, %v6139_v45  ;;  %5919 = vmatprep.mubr.msk.bf16.mxu1 %vm1572_vm0, %v6140_v46 }
  0xee   : > { %5724 = vmatmul.mubr.msk.bf16.gmra.mrb[104].mxu0 %vm1572_vm0, %v6141_v47  ;;  %5920 = vmatmul.mubr.msk.bf16.gmra.mrb[104].mxu1 %vm1572_vm0, %v6142_v48 }
  0xef   : > { %5727 = vmatprep.mubr.msk.bf16.mxu0 %vm1572_vm0, %v6143_v49  ;;  %5923 = vmatprep.mubr.msk.bf16.mxu1 %vm1572_vm0, %v6144_v50 }
  0xf1   : > { %v6508_v51 = vpop.f32.mrb[0].mxu0  ;;  %v6510_v52 = vpop.f32.mrb[0].mxu1 }
  0xf2   : > { %v6512_v53 = vpop.f32.mrb[1].mxu0  ;;  %v6514_v54 = vpop.f32.mrb[1].mxu1 }
  0xf3   : > { %v6518_v57 = vpop.f32.mrb[2].mxu0  ;;  %v6520_v58 = vpop.f32.mrb[2].mxu1 }
  0xf4   : > { %v6524_v61 = vpop.f32.mrb[3].mxu0  ;;  %v6526_v62 = vpop.f32.mrb[3].mxu1 }
  0xf6   : > { %5728 = vmatmul.mubr.msk.bf16.gmra.mrb[108].mxu0 %vm1572_vm0, %v6145_v55  ;;  %5924 = vmatmul.mubr.msk.bf16.gmra.mrb[108].mxu1 %vm1572_vm0, %v6146_v56  ;;  %v6165_v55 = vld [vmem:[%s6286_s25 + $0x208] sm:$0xff]   ;;  %v6166_v56 = vld [vmem:[%s6286_s25 + $0x518] sm:$0xff]  }
  0xf7   : > { %5731 = vmatprep.mubr.msk.bf16.mxu0 %vm1572_vm0, %v6147_v59  ;;  %5927 = vmatprep.mubr.msk.bf16.mxu1 %vm1572_vm0, %v6148_v60 }
  0xf9   : > { %v6532_v63 = vpop.f32.mrb[4].mxu0  ;;  %v6534_v0 = vpop.f32.mrb[4].mxu1 }
  0xfa   : > { %v6536_v1 = vpop.f32.mrb[5].mxu0  ;;  %v6538_v2 = vpop.f32.mrb[5].mxu1 }
  0xfb   : > { %v6542_v5 = vpop.f32.mrb[6].mxu0  ;;  %v6544_v6 = vpop.f32.mrb[6].mxu1 }
  0xfc   : > { %v6548_v9 = vpop.f32.mrb[7].mxu0  ;;  %v6550_v10 = vpop.f32.mrb[7].mxu1 }
  0xfe   : > { %5732 = vmatmul.mubr.msk.bf16.gmra.mrb[112].mxu0 %vm1572_vm0, %v6149_v3  ;;  %5928 = vmatmul.mubr.msk.bf16.gmra.mrb[112].mxu1 %vm1572_vm0, %v6150_v4  ;;  %v6167_v3 = vld [vmem:[%s6286_s25 + $0x210] sm:$0xff]   ;;  %v6168_v4 = vld [vmem:[%s6286_s25 + $0x520] sm:$0xff]  }
  0xff   : > { %5735 = vmatprep.mubr.msk.bf16.mxu0 %vm1572_vm0, %v6151_v7  ;;  %5931 = vmatprep.mubr.msk.bf16.mxu1 %vm1572_vm0, %v6152_v8 }
 0x101   : > { %v6556_v11 = vpop.f32.mrb[8].mxu0  ;;  %v6558_v12 = vpop.f32.mrb[8].mxu1 }
 0x102   : > { %v6560_v13 = vpop.f32.mrb[9].mxu0  ;;  %v6562_v14 = vpop.f32.mrb[9].mxu1 }
 0x103   : > { %v6566_v17 = vpop.f32.mrb[10].mxu0  ;;  %v6568_v18 = vpop.f32.mrb[10].mxu1 }
 0x104   : > { %v6572_v21 = vpop.f32.mrb[11].mxu0  ;;  %v6574_v22 = vpop.f32.mrb[11].mxu1 }
 0x106   : > { %5736 = vmatmul.mubr.msk.bf16.gmra.mrb[116].mxu0 %vm1572_vm0, %v6153_v15  ;;  %5932 = vmatmul.mubr.msk.bf16.gmra.mrb[116].mxu1 %vm1572_vm0, %v6154_v16 }
 0x107   : > { %5739 = vmatprep.mubr.msk.bf16.mxu0 %vm1572_vm0, %v6155_v19  ;;  %5935 = vmatprep.mubr.msk.bf16.mxu1 %vm1572_vm0, %v6156_v20 }
 0x109   : > { %v6580_v23 = vpop.f32.mrb[12].mxu0  ;;  %v6582_v24 = vpop.f32.mrb[12].mxu1 }
 0x10a   : > { %v6584_v25 = vpop.f32.mrb[13].mxu0  ;;  %v6586_v26 = vpop.f32.mrb[13].mxu1 }
 0x10b   : > { %v6590_v29 = vpop.f32.mrb[14].mxu0  ;;  %v6592_v30 = vpop.f32.mrb[14].mxu1 }
 0x10c   : > { %v6596_v33 = vpop.f32.mrb[15].mxu0  ;;  %v6598_v34 = vpop.f32.mrb[15].mxu1 }
 0x10e   : > { %5740 = vmatmul.mubr.msk.bf16.gmra.mrb[120].mxu0 %vm1572_vm0, %v6157_v27  ;;  %5936 = vmatmul.mubr.msk.bf16.gmra.mrb[120].mxu1 %vm1572_vm0, %v6158_v28  ;;  %v6169_v27 = vld [vmem:[%s6286_s25 + $0x218] sm:$0xff]   ;;  %v6170_v28 = vld [vmem:[%s6286_s25 + $0x528] sm:$0xff]  }
 0x10f   : > { %5743 = vmatprep.mubr.msk.bf16.mxu0 %vm1572_vm0, %v6159_v31  ;;  %5939 = vmatprep.mubr.msk.bf16.mxu1 %vm1572_vm0, %v6160_v32 }
 0x111   : > { %v6604_v35 = vpop.f32.mrb[16].mxu0  ;;  %v6606_v36 = vpop.f32.mrb[16].mxu1 }
 0x112   : > { %v6608_v37 = vpop.f32.mrb[17].mxu0  ;;  %v6610_v38 = vpop.f32.mrb[17].mxu1 }
 0x113   : > { %v6614_v41 = vpop.f32.mrb[18].mxu0  ;;  %v6616_v42 = vpop.f32.mrb[18].mxu1 }
 0x114   : > { %v6620_v45 = vpop.f32.mrb[19].mxu0  ;;  %v6622_v46 = vpop.f32.mrb[19].mxu1 }
 0x116   : > { %5744 = vmatmul.mubr.msk.bf16.gmra.mrb[124].mxu0 %vm1572_vm0, %v6161_v39  ;;  %5940 = vmatmul.mubr.msk.bf16.gmra.mrb[124].mxu1 %vm1572_vm0, %v6162_v40  ;;  %v6171_v39 = vld [vmem:[%s6286_s25 + $0x220] sm:$0xff]   ;;  %v6172_v40 = vld [vmem:[%s6286_s25 + $0x530] sm:$0xff]  }
 0x117   : > { %5747 = vmatprep.mubr.msk.bf16.mxu0 %vm1572_vm0, %v6163_v43  ;;  %5943 = vmatprep.mubr.msk.bf16.mxu1 %vm1572_vm0, %v6164_v44 }
 0x119   : > { %v6628_v47 = vpop.f32.mrb[20].mxu0  ;;  %v6630_v48 = vpop.f32.mrb[20].mxu1 }
 0x11a   : > { %v6632_v49 = vpop.f32.mrb[21].mxu0  ;;  %v6634_v50 = vpop.f32.mrb[21].mxu1 }
 0x11b   : > { %v6638_v59 = vpop.f32.mrb[22].mxu0  ;;  %v6640_v60 = vpop.f32.mrb[22].mxu1 }
 0x11c   : > { %7585 = vst [vmem:[#allocation2_spill] sm:$0xff] %v6638_v59  ;;  %7586 = vst [vmem:[#allocation3_spill] sm:$0xff] %v6640_v60  ;;  %v6644_v7 = vpop.f32.mrb[23].mxu0  ;;  %v6646_v8 = vpop.f32.mrb[23].mxu1 }
 0x11e   : > { %5748 = vmatmul.mubr.msk.bf16.gmra.mrb[128].mxu0 %vm1572_vm0, %v6165_v55  ;;  %5944 = vmatmul.mubr.msk.bf16.gmra.mrb[128].mxu1 %vm1572_vm0, %v6166_v56 }
 0x11f   : > { %5751 = vmatprep.mubr.msk.bf16.mxu0 %vm1572_vm0, %v6167_v3  ;;  %5947 = vmatprep.mubr.msk.bf16.mxu1 %vm1572_vm0, %v6168_v4 }
 0x121   : > { %v6652_v15 = vpop.f32.mrb[24].mxu0  ;;  %v6654_v16 = vpop.f32.mrb[24].mxu1 }
 0x122   : > { %7587 = vst [vmem:[#allocation4_spill] sm:$0xff] %v6652_v15  ;;  %7588 = vst [vmem:[#allocation5_spill] sm:$0xff] %v6654_v16  ;;  %v6656_v19 = vpop.f32.mrb[25].mxu0  ;;  %v6658_v20 = vpop.f32.mrb[25].mxu1 }
 0x123   : > { %v6662_v31 = vpop.f32.mrb[26].mxu0  ;;  %v6664_v32 = vpop.f32.mrb[26].mxu1 }
 0x124   : > { %7589 = vst [vmem:[#allocation6_spill] sm:$0xff] %v6662_v31  ;;  %7590 = vst [vmem:[#allocation7_spill] sm:$0xff] %v6664_v32  ;;  %v6668_v43 = vpop.f32.mrb[27].mxu0  ;;  %v6670_v44 = vpop.f32.mrb[27].mxu1  ;;  %v6173_v32 = vld [vmem:[%s6286_s25 + $0x228] sm:$0xff]   ;;  %v6174_v31 = vld [vmem:[%s6286_s25 + $0x538] sm:$0xff]  }
 0x126   : > { %5752 = vmatmul.mubr.msk.bf16.gmra.mrb[132].mxu0 %vm1572_vm0, %v6169_v27  ;;  %5948 = vmatmul.mubr.msk.bf16.gmra.mrb[132].mxu1 %vm1572_vm0, %v6170_v28  ;;  %v6175_v28 = vld [vmem:[%s6286_s25 + $0x230] sm:$0xff]  }
 0x127   : > { %5755 = vmatprep.mubr.msk.bf16.mxu0 %vm1572_vm0, %v6171_v39  ;;  %5951 = vmatprep.mubr.msk.bf16.mxu1 %vm1572_vm0, %v6172_v40  ;;  %v6176_v39 = vld [vmem:[%s6286_s25 + $0x540] sm:$0xff]  }
 0x129   : > { %v6676_v55 = vpop.f32.mrb[28].mxu0  ;;  %v6678_v56 = vpop.f32.mrb[28].mxu1 }
 0x12a   : > { %7591 = vst [vmem:[#allocation8_spill] sm:$0xff] %v6676_v55  ;;  %7592 = vst [vmem:[#allocation9_spill] sm:$0xff] %v6678_v56  ;;  %v6680_v3 = vpop.f32.mrb[29].mxu0  ;;  %v6682_v4 = vpop.f32.mrb[29].mxu1 }
 0x12b   : > { %7593 = vst [vmem:[#allocation10_spill] sm:$0xff] %v6680_v3  ;;  %7594 = vst [vmem:[#allocation11_spill] sm:$0xff] %v6682_v4  ;;  %v6686_v16 = vpop.f32.mrb[30].mxu0  ;;  %v6688_v27 = vpop.f32.mrb[30].mxu1  ;;  %v6177_v4 = vld [vmem:[%s6286_s25 + $0x238] sm:$0xff]  }
 0x12c   : > { %7595 = vst [vmem:[#allocation12_spill] sm:$0xff] %v6686_v16  ;;  %7596 = vst [vmem:[#allocation13_spill] sm:$0xff] %v6688_v27  ;;  %v6692_v40 = vpop.f32.mrb[31].mxu0  ;;  %v6694_v55 = vpop.f32.mrb[31].mxu1 }
 0x12d   : > { %7597 = vst [vmem:[#allocation14_spill] sm:$0xff] %v6692_v40  ;;  %7598 = vst [vmem:[#allocation15_spill] sm:$0xff] %v6694_v55  ;;  %v6178_v40 = vld [vmem:[%s6286_s25 + $0x548] sm:$0xff]  }
 0x12e   : > { %5756 = vmatmul.mubr.msk.bf16.gmra.mrb[136].mxu0 %vm1572_vm0, %v6173_v32  ;;  %5952 = vmatmul.mubr.msk.bf16.gmra.mrb[136].mxu1 %vm1572_vm0, %v6174_v31  ;;  %v6179_v31 = vld [vmem:[%s6286_s25 + $0x240] sm:$0xff]  }
 0x12f   : > { %5759 = vmatprep.mubr.msk.bf16.mxu0 %vm1572_vm0, %v6175_v28  ;;  %5955 = vmatprep.mubr.msk.bf16.mxu1 %vm1572_vm0, %v6176_v39  ;;  %v6180_v28 = vld [vmem:[%s6286_s25 + $0x550] sm:$0xff]  }
 0x131   : > { %v6700_v56 = vpop.f32.mrb[32].mxu0  ;;  %v6702_v16 = vpop.f32.mrb[32].mxu1 }
 0x132   : > { %7599 = vst [vmem:[#allocation16_spill] sm:$0xff] %v6700_v56  ;;  %7600 = vst [vmem:[#allocation17_spill] sm:$0xff] %v6702_v16  ;;  %v6704_v27 = vpop.f32.mrb[33].mxu0  ;;  %v6706_v15 = vpop.f32.mrb[33].mxu1 }
 0x133   : > { %7601 = vst [vmem:[#allocation18_spill] sm:$0xff] %v6704_v27  ;;  %7602 = vst [vmem:[#allocation19_spill] sm:$0xff] %v6706_v15  ;;  %v6710_v55 = vpop.f32.mrb[34].mxu0  ;;  %v6712_v32 = vpop.f32.mrb[34].mxu1  ;;  %v6181_v27 = vld [vmem:[%s6286_s25 + $0x248] sm:$0xff]  }
 0x134   : > { %7603 = vst [vmem:[#allocation20_spill] sm:$0xff] %v6710_v55  ;;  %7604 = vst [vmem:[#allocation21_spill] sm:$0xff] %v6712_v32  ;;  %v6716_v39 = vpop.f32.mrb[35].mxu0  ;;  %v6718_v56 = vpop.f32.mrb[35].mxu1 }
 0x135   : > { %7605 = vst [vmem:[#allocation22_spill] sm:$0xff] %v6716_v39  ;;  %7606 = vst [vmem:[#allocation23_spill] sm:$0xff] %v6718_v56  ;;  %v6182_v39 = vld [vmem:[%s6286_s25 + $0x558] sm:$0xff]  }
 0x136   : > { %5760 = vmatmul.mubr.msk.bf16.gmra.mrb[140].mxu0 %vm1572_vm0, %v6177_v4  ;;  %5956 = vmatmul.mubr.msk.bf16.gmra.mrb[140].mxu1 %vm1572_vm0, %v6178_v40  ;;  %v6183_v40 = vld [vmem:[%s6286_s25 + $0x250] sm:$0xff]  }
 0x137   : > { %5763 = vmatprep.mubr.msk.bf16.mxu0 %vm1572_vm0, %v6179_v31  ;;  %5959 = vmatprep.mubr.msk.bf16.mxu1 %vm1572_vm0, %v6180_v28  ;;  %v6184_v31 = vld [vmem:[%s6286_s25 + $0x560] sm:$0xff]  }
 0x139   : > { %v6724_v16 = vpop.f32.mrb[36].mxu0  ;;  %v6726_v55 = vpop.f32.mrb[36].mxu1 }
 0x13a   : > { %7607 = vst [vmem:[#allocation24_spill] sm:$0xff] %v6724_v16  ;;  %7608 = vst [vmem:[#allocation25_spill] sm:$0xff] %v6726_v55  ;;  %v6728_v32 = vpop.f32.mrb[37].mxu0  ;;  %v6730_v15 = vpop.f32.mrb[37].mxu1 }
 0x13b   : > { %7609 = vst [vmem:[#allocation26_spill] sm:$0xff] %v6728_v32  ;;  %7610 = vst [vmem:[#allocation27_spill] sm:$0xff] %v6730_v15  ;;  %v6734_v56 = vpop.f32.mrb[38].mxu0  ;;  %v6736_v4 = vpop.f32.mrb[38].mxu1  ;;  %v6185_v32 = vld [vmem:[%s6286_s25 + $0x258] sm:$0xff]  }
 0x13c   : > { %7611 = vst [vmem:[#allocation28_spill] sm:$0xff] %v6734_v56  ;;  %7612 = vst [vmem:[#allocation29_spill] sm:$0xff] %v6736_v4  ;;  %v6740_v28 = vpop.f32.mrb[39].mxu0  ;;  %v6742_v16 = vpop.f32.mrb[39].mxu1 }
 0x13d   : > { %7613 = vst [vmem:[#allocation30_spill] sm:$0xff] %v6740_v28  ;;  %7614 = vst [vmem:[#allocation31_spill] sm:$0xff] %v6742_v16  ;;  %v6186_v28 = vld [vmem:[%s6286_s25 + $0x568] sm:$0xff]  }
 0x13e   : > { %5764 = vmatmul.mubr.msk.bf16.gmra.mrb[144].mxu0 %vm1572_vm0, %v6181_v27  ;;  %5960 = vmatmul.mubr.msk.bf16.gmra.mrb[144].mxu1 %vm1572_vm0, %v6182_v39  ;;  %v6187_v39 = vld [vmem:[%s6286_s25 + $0x260] sm:$0xff]  }
 0x13f   : > { %5767 = vmatprep.mubr.msk.bf16.mxu0 %vm1572_vm0, %v6183_v40  ;;  %5963 = vmatprep.mubr.msk.bf16.mxu1 %vm1572_vm0, %v6184_v31  ;;  %v6188_v40 = vld [vmem:[%s6286_s25 + $0x570] sm:$0xff]  }
 0x141   : > { %v6748_v55 = vpop.f32.mrb[40].mxu0  ;;  %v6750_v56 = vpop.f32.mrb[40].mxu1 }
 0x142   : > { %7615 = vst [vmem:[#allocation32_spill] sm:$0xff] %v6748_v55  ;;  %7616 = vst [vmem:[#allocation33_spill] sm:$0xff] %v6750_v56  ;;  %v6752_v4 = vpop.f32.mrb[41].mxu0  ;;  %v6754_v15 = vpop.f32.mrb[41].mxu1 }
 0x143   : > { %7617 = vst [vmem:[#allocation34_spill] sm:$0xff] %v6752_v4  ;;  %7618 = vst [vmem:[#allocation35_spill] sm:$0xff] %v6754_v15  ;;  %v6758_v16 = vpop.f32.mrb[42].mxu0  ;;  %v6760_v27 = vpop.f32.mrb[42].mxu1  ;;  %v6189_v4 = vld [vmem:[%s6286_s25 + $0x268] sm:$0xff]  }
 0x144   : > { %7619 = vst [vmem:[#allocation36_spill] sm:$0xff] %v6758_v16  ;;  %7620 = vst [vmem:[#allocation37_spill] sm:$0xff] %v6760_v27  ;;  %v6764_v31 = vpop.f32.mrb[43].mxu0  ;;  %v6766_v55 = vpop.f32.mrb[43].mxu1 }
 0x145   : > { %7621 = vst [vmem:[#allocation38_spill] sm:$0xff] %v6764_v31  ;;  %7622 = vst [vmem:[#allocation39_spill] sm:$0xff] %v6766_v55  ;;  %v6190_v31 = vld [vmem:[%s6286_s25 + $0x578] sm:$0xff]  }
 0x146   : > { %5768 = vmatmul.mubr.msk.bf16.gmra.mrb[148].mxu0 %vm1572_vm0, %v6185_v32  ;;  %5964 = vmatmul.mubr.msk.bf16.gmra.mrb[148].mxu1 %vm1572_vm0, %v6186_v28  ;;  %v6191_v28 = vld [vmem:[%s6286_s25 + $0x270] sm:$0xff]  }
 0x147   : > { %5771 = vmatprep.mubr.msk.bf16.mxu0 %vm1572_vm0, %v6187_v39  ;;  %5967 = vmatprep.mubr.msk.bf16.mxu1 %vm1572_vm0, %v6188_v40  ;;  %v6192_v39 = vld [vmem:[%s6286_s25 + $0x580] sm:$0xff]  }
 0x149   : > { %v6772_v56 = vpop.f32.mrb[44].mxu0  ;;  %v6774_v16 = vpop.f32.mrb[44].mxu1 }
 0x14a   : > { %7623 = vst [vmem:[#allocation40_spill] sm:$0xff] %v6772_v56  ;;  %7624 = vst [vmem:[#allocation41_spill] sm:$0xff] %v6774_v16  ;;  %v6776_v27 = vpop.f32.mrb[45].mxu0  ;;  %v6778_v15 = vpop.f32.mrb[45].mxu1 }
 0x14b   : > { %7625 = vst [vmem:[#allocation42_spill] sm:$0xff] %v6776_v27  ;;  %7626 = vst [vmem:[#allocation43_spill] sm:$0xff] %v6778_v15  ;;  %v6782_v55 = vpop.f32.mrb[46].mxu0  ;;  %v6784_v32 = vpop.f32.mrb[46].mxu1  ;;  %v6193_v27 = vld [vmem:[%s6286_s25 + $0x278] sm:$0xff]  }
 0x14c   : > { %7627 = vst [vmem:[#allocation44_spill] sm:$0xff] %v6782_v55  ;;  %7628 = vst [vmem:[#allocation45_spill] sm:$0xff] %v6784_v32  ;;  %v6788_v40 = vpop.f32.mrb[47].mxu0  ;;  %v6790_v56 = vpop.f32.mrb[47].mxu1 }
 0x14d   : > { %7629 = vst [vmem:[#allocation46_spill] sm:$0xff] %v6788_v40  ;;  %7630 = vst [vmem:[#allocation47_spill] sm:$0xff] %v6790_v56  ;;  %v6194_v40 = vld [vmem:[%s6286_s25 + $0x588] sm:$0xff]  }
 0x14e   : > { %5772 = vmatmul.mubr.msk.bf16.gmra.mrb[152].mxu0 %vm1572_vm0, %v6189_v4  ;;  %5968 = vmatmul.mubr.msk.bf16.gmra.mrb[152].mxu1 %vm1572_vm0, %v6190_v31  ;;  %v6195_v31 = vld [vmem:[%s6286_s25 + $0x280] sm:$0xff]  }
 0x14f   : > { %5775 = vmatprep.mubr.msk.bf16.mxu0 %vm1572_vm0, %v6191_v28  ;;  %5971 = vmatprep.mubr.msk.bf16.mxu1 %vm1572_vm0, %v6192_v39  ;;  %v6196_v28 = vld [vmem:[%s6286_s25 + $0x590] sm:$0xff]  }
 0x151   : > { %v6796_v16 = vpop.f32.mrb[48].mxu0  ;;  %v6798_v55 = vpop.f32.mrb[48].mxu1 }
 0x152   : > { %7631 = vst [vmem:[#allocation48_spill] sm:$0xff] %v6796_v16  ;;  %7632 = vst [vmem:[#allocation49_spill] sm:$0xff] %v6798_v55  ;;  %v6800_v32 = vpop.f32.mrb[49].mxu0  ;;  %v6802_v15 = vpop.f32.mrb[49].mxu1 }
 0x153   : > { %7633 = vst [vmem:[#allocation50_spill] sm:$0xff] %v6800_v32  ;;  %7634 = vst [vmem:[#allocation51_spill] sm:$0xff] %v6802_v15  ;;  %v6806_v56 = vpop.f32.mrb[50].mxu0  ;;  %v6808_v4 = vpop.f32.mrb[50].mxu1  ;;  %v6197_v32 = vld [vmem:[%s6286_s25 + $0x288] sm:$0xff]  }
 0x154   : > { %7635 = vst [vmem:[#allocation52_spill] sm:$0xff] %v6806_v56  ;;  %7636 = vst [vmem:[#allocation53_spill] sm:$0xff] %v6808_v4  ;;  %v6812_v39 = vpop.f32.mrb[51].mxu0  ;;  %v6814_v16 = vpop.f32.mrb[51].mxu1 }
 0x155   : > { %7637 = vst [vmem:[#allocation54_spill] sm:$0xff] %v6812_v39  ;;  %7638 = vst [vmem:[#allocation55_spill] sm:$0xff] %v6814_v16  ;;  %v6198_v39 = vld [vmem:[%s6286_s25 + $0x598] sm:$0xff]  }
 0x156   : > { %5776 = vmatmul.mubr.msk.bf16.gmra.mrb[156].mxu0 %vm1572_vm0, %v6193_v27  ;;  %5972 = vmatmul.mubr.msk.bf16.gmra.mrb[156].mxu1 %vm1572_vm0, %v6194_v40  ;;  %v6199_v40 = vld [vmem:[%s6286_s25 + $0x290] sm:$0xff]  }
 0x157   : > { %5779 = vmatprep.mubr.msk.bf16.mxu0 %vm1572_vm0, %v6195_v31  ;;  %5975 = vmatprep.mubr.msk.bf16.mxu1 %vm1572_vm0, %v6196_v28  ;;  %v6200_v31 = vld [vmem:[%s6286_s25 + $0x5a0] sm:$0xff]  }
 0x159   : > { %v6820_v55 = vpop.f32.mrb[52].mxu0  ;;  %v6822_v56 = vpop.f32.mrb[52].mxu1 }
 0x15a   : > { %7639 = vst [vmem:[#allocation56_spill] sm:$0xff] %v6820_v55  ;;  %7640 = vst [vmem:[#allocation57_spill] sm:$0xff] %v6822_v56  ;;  %v6824_v4 = vpop.f32.mrb[53].mxu0  ;;  %v6826_v15 = vpop.f32.mrb[53].mxu1 }
 0x15b   : > { %7641 = vst [vmem:[#allocation58_spill] sm:$0xff] %v6824_v4  ;;  %7642 = vst [vmem:[#allocation59_spill] sm:$0xff] %v6826_v15  ;;  %v6830_v16 = vpop.f32.mrb[54].mxu0  ;;  %v6832_v27 = vpop.f32.mrb[54].mxu1  ;;  %v6201_v4 = vld [vmem:[%s6286_s25 + $0x298] sm:$0xff]  }
 0x15c   : > { %7643 = vst [vmem:[#allocation60_spill] sm:$0xff] %v6830_v16  ;;  %7644 = vst [vmem:[#allocation61_spill] sm:$0xff] %v6832_v27  ;;  %v6836_v28 = vpop.f32.mrb[55].mxu0  ;;  %v6838_v55 = vpop.f32.mrb[55].mxu1 }
 0x15d   : > { %7645 = vst [vmem:[#allocation62_spill] sm:$0xff] %v6836_v28  ;;  %7646 = vst [vmem:[#allocation63_spill] sm:$0xff] %v6838_v55  ;;  %v6202_v28 = vld [vmem:[%s6286_s25 + $0x5a8] sm:$0xff]  }
 0x15e   : > { %5780 = vmatmul.mubr.msk.bf16.gmra.mrb[160].mxu0 %vm1572_vm0, %v6197_v32  ;;  %5976 = vmatmul.mubr.msk.bf16.gmra.mrb[160].mxu1 %vm1572_vm0, %v6198_v39  ;;  %v6203_v39 = vld [vmem:[%s6286_s25 + $0x2a0] sm:$0xff]  }
 0x15f   : > { %5783 = vmatprep.mubr.msk.bf16.mxu0 %vm1572_vm0, %v6199_v40  ;;  %5979 = vmatprep.mubr.msk.bf16.mxu1 %vm1572_vm0, %v6200_v31  ;;  %v6204_v40 = vld [vmem:[%s6286_s25 + $0x5b0] sm:$0xff]  }
 0x161   : > { %v6844_v56 = vpop.f32.mrb[56].mxu0  ;;  %v6846_v16 = vpop.f32.mrb[56].mxu1 }
 0x162   : > { %7647 = vst [vmem:[#allocation64_spill] sm:$0xff] %v6844_v56  ;;  %7648 = vst [vmem:[#allocation65_spill] sm:$0xff] %v6846_v16  ;;  %v6848_v27 = vpop.f32.mrb[57].mxu0  ;;  %v6850_v15 = vpop.f32.mrb[57].mxu1 }
 0x163   : > { %7649 = vst [vmem:[#allocation66_spill] sm:$0xff] %v6848_v27  ;;  %7650 = vst [vmem:[#allocation67_spill] sm:$0xff] %v6850_v15  ;;  %v6854_v55 = vpop.f32.mrb[58].mxu0  ;;  %v6856_v32 = vpop.f32.mrb[58].mxu1  ;;  %v6205_v27 = vld [vmem:[%s6286_s25 + $0x2a8] sm:$0xff]  }
 0x164   : > { %7651 = vst [vmem:[#allocation68_spill] sm:$0xff] %v6854_v55  ;;  %7652 = vst [vmem:[#allocation69_spill] sm:$0xff] %v6856_v32  ;;  %v6860_v31 = vpop.f32.mrb[59].mxu0  ;;  %v6862_v56 = vpop.f32.mrb[59].mxu1 }
 0x165   : > { %7653 = vst [vmem:[#allocation70_spill] sm:$0xff] %v6860_v31  ;;  %7654 = vst [vmem:[#allocation71_spill] sm:$0xff] %v6862_v56  ;;  %v6206_v31 = vld [vmem:[%s6286_s25 + $0x5b8] sm:$0xff]  }
 0x166   : > { %5784 = vmatmul.mubr.msk.bf16.gmra.mrb[164].mxu0 %vm1572_vm0, %v6201_v4  ;;  %5980 = vmatmul.mubr.msk.bf16.gmra.mrb[164].mxu1 %vm1572_vm0, %v6202_v28  ;;  %v6207_v28 = vld [vmem:[%s6286_s25 + $0x2b0] sm:$0xff]  }
 0x167   : > { %5787 = vmatprep.mubr.msk.bf16.mxu0 %vm1572_vm0, %v6203_v39  ;;  %5983 = vmatprep.mubr.msk.bf16.mxu1 %vm1572_vm0, %v6204_v40  ;;  %v6208_v39 = vld [vmem:[%s6286_s25 + $0x5c0] sm:$0xff]  }
 0x169   : > { %v6868_v16 = vpop.f32.mrb[60].mxu0  ;;  %v6870_v55 = vpop.f32.mrb[60].mxu1 }
 0x16a   : > { %7655 = vst [vmem:[#allocation72_spill] sm:$0xff] %v6868_v16  ;;  %7656 = vst [vmem:[#allocation73_spill] sm:$0xff] %v6870_v55  ;;  %v6872_v32 = vpop.f32.mrb[61].mxu0  ;;  %v6874_v15 = vpop.f32.mrb[61].mxu1 }
 0x16b   : > { %7657 = vst [vmem:[#allocation74_spill] sm:$0xff] %v6872_v32  ;;  %7658 = vst [vmem:[#allocation75_spill] sm:$0xff] %v6874_v15  ;;  %v6878_v56 = vpop.f32.mrb[62].mxu0  ;;  %v6880_v4 = vpop.f32.mrb[62].mxu1  ;;  %v6209_v32 = vld [vmem:[%s6286_s25 + $0x2b8] sm:$0xff]  }
 0x16c   : > { %7659 = vst [vmem:[#allocation76_spill] sm:$0xff] %v6878_v56  ;;  %7660 = vst [vmem:[#allocation77_spill] sm:$0xff] %v6880_v4  ;;  %v6884_v40 = vpop.f32.mrb[63].mxu0  ;;  %v6886_v16 = vpop.f32.mrb[63].mxu1 }
 0x16d   : > { %7661 = vst [vmem:[#allocation78_spill] sm:$0xff] %v6884_v40  ;;  %7662 = vst [vmem:[#allocation79_spill] sm:$0xff] %v6886_v16  ;;  %v6210_v40 = vld [vmem:[%s6286_s25 + $0x5c8] sm:$0xff]  }
 0x16e   : > { %5788 = vmatmul.mubr.msk.bf16.gmra.mrb[168].mxu0 %vm1572_vm0, %v6205_v27  ;;  %5984 = vmatmul.mubr.msk.bf16.gmra.mrb[168].mxu1 %vm1572_vm0, %v6206_v31  ;;  %v6211_v31 = vld [vmem:[%s6286_s25 + $0x2c0] sm:$0xff]  }
 0x16f   : > { %5791 = vmatprep.mubr.msk.bf16.mxu0 %vm1572_vm0, %v6207_v28  ;;  %5987 = vmatprep.mubr.msk.bf16.mxu1 %vm1572_vm0, %v6208_v39  ;;  %v6212_v28 = vld [vmem:[%s6286_s25 + $0x5d0] sm:$0xff]  }
 0x171   : > { %v6892_v55 = vpop.f32.mrb[64].mxu0  ;;  %v6894_v56 = vpop.f32.mrb[64].mxu1 }
 0x172   : > { %7663 = vst [vmem:[#allocation80_spill] sm:$0xff] %v6892_v55  ;;  %7664 = vst [vmem:[#allocation81_spill] sm:$0xff] %v6894_v56  ;;  %v6896_v4 = vpop.f32.mrb[65].mxu0  ;;  %v6898_v15 = vpop.f32.mrb[65].mxu1 }
 0x173   : > { %7665 = vst [vmem:[#allocation82_spill] sm:$0xff] %v6896_v4  ;;  %7666 = vst [vmem:[#allocation83_spill] sm:$0xff] %v6898_v15  ;;  %v6902_v16 = vpop.f32.mrb[66].mxu0  ;;  %v6904_v27 = vpop.f32.mrb[66].mxu1  ;;  %v6213_v4 = vld [vmem:[%s6286_s25 + $0x2c8] sm:$0xff]  }
 0x174   : > { %7667 = vst [vmem:[#allocation84_spill] sm:$0xff] %v6902_v16  ;;  %7668 = vst [vmem:[#allocation85_spill] sm:$0xff] %v6904_v27  ;;  %v6908_v39 = vpop.f32.mrb[67].mxu0  ;;  %v6910_v55 = vpop.f32.mrb[67].mxu1 }
 0x175   : > { %7669 = vst [vmem:[#allocation86_spill] sm:$0xff] %v6908_v39  ;;  %7670 = vst [vmem:[#allocation87_spill] sm:$0xff] %v6910_v55  ;;  %v6214_v39 = vld [vmem:[%s6286_s25 + $0x5d8] sm:$0xff]  }
 0x176   : > { %5792 = vmatmul.mubr.msk.bf16.gmra.mrb[172].mxu0 %vm1572_vm0, %v6209_v32  ;;  %5988 = vmatmul.mubr.msk.bf16.gmra.mrb[172].mxu1 %vm1572_vm0, %v6210_v40  ;;  %v6215_v40 = vld [vmem:[%s6286_s25 + $0x2d0] sm:$0xff]  }
 0x177   : > { %5795 = vmatprep.mubr.msk.bf16.mxu0 %vm1572_vm0, %v6211_v31  ;;  %5991 = vmatprep.mubr.msk.bf16.mxu1 %vm1572_vm0, %v6212_v28  ;;  %v6216_v31 = vld [vmem:[%s6286_s25 + $0x5e0] sm:$0xff]  }
 0x179   : > { %v6916_v56 = vpop.f32.mrb[68].mxu0  ;;  %v6918_v16 = vpop.f32.mrb[68].mxu1 }
 0x17a   : > { %7671 = vst [vmem:[#allocation88_spill] sm:$0xff] %v6916_v56  ;;  %7672 = vst [vmem:[#allocation89_spill] sm:$0xff] %v6918_v16  ;;  %v6920_v27 = vpop.f32.mrb[69].mxu0  ;;  %v6922_v15 = vpop.f32.mrb[69].mxu1 }
 0x17b   : > { %7673 = vst [vmem:[#allocation90_spill] sm:$0xff] %v6920_v27  ;;  %7674 = vst [vmem:[#allocation91_spill] sm:$0xff] %v6922_v15  ;;  %v6926_v55 = vpop.f32.mrb[70].mxu0  ;;  %v6928_v32 = vpop.f32.mrb[70].mxu1  ;;  %v6217_v27 = vld [vmem:[%s6286_s25 + $0x2d8] sm:$0xff]  }
 0x17c   : > { %7675 = vst [vmem:[#allocation92_spill] sm:$0xff] %v6926_v55  ;;  %7676 = vst [vmem:[#allocation93_spill] sm:$0xff] %v6928_v32  ;;  %v6932_v28 = vpop.f32.mrb[71].mxu0  ;;  %v6934_v56 = vpop.f32.mrb[71].mxu1 }
 0x17d   : > { %7677 = vst [vmem:[#allocation94_spill] sm:$0xff] %v6932_v28  ;;  %7678 = vst [vmem:[#allocation95_spill] sm:$0xff] %v6934_v56  ;;  %v6218_v28 = vld [vmem:[%s6286_s25 + $0x5e8] sm:$0xff]  }
 0x17e   : > { %5796 = vmatmul.mubr.msk.bf16.gmra.mrb[176].mxu0 %vm1572_vm0, %v6213_v4  ;;  %5992 = vmatmul.mubr.msk.bf16.gmra.mrb[176].mxu1 %vm1572_vm0, %v6214_v39  ;;  %v6219_v39 = vld [vmem:[%s6286_s25 + $0x2e0] sm:$0xff]  }
 0x17f   : > { %5799 = vmatprep.mubr.msk.bf16.mxu0 %vm1572_vm0, %v6215_v40  ;;  %5995 = vmatprep.mubr.msk.bf16.mxu1 %vm1572_vm0, %v6216_v31  ;;  %v6220_v40 = vld [vmem:[%s6286_s25 + $0x5f0] sm:$0xff]  }
 0x181   : > { %v6940_v16 = vpop.f32.mrb[72].mxu0  ;;  %v6942_v55 = vpop.f32.mrb[72].mxu1 }
 0x182   : > { %7679 = vst [vmem:[#allocation96_spill] sm:$0xff] %v6940_v16  ;;  %7680 = vst [vmem:[#allocation97_spill] sm:$0xff] %v6942_v55  ;;  %v6944_v32 = vpop.f32.mrb[73].mxu0  ;;  %v6946_v15 = vpop.f32.mrb[73].mxu1 }
 0x183   : > { %7681 = vst [vmem:[#allocation98_spill] sm:$0xff] %v6944_v32  ;;  %7682 = vst [vmem:[#allocation99_spill] sm:$0xff] %v6946_v15  ;;  %v6950_v56 = vpop.f32.mrb[74].mxu0  ;;  %v6952_v4 = vpop.f32.mrb[74].mxu1  ;;  %v6221_v32 = vld [vmem:[%s6286_s25 + $0x2e8] sm:$0xff]  }
 0x184   : > { %7683 = vst [vmem:[#allocation100_spill] sm:$0xff] %v6950_v56  ;;  %7684 = vst [vmem:[#allocation101_spill] sm:$0xff] %v6952_v4  ;;  %v6956_v31 = vpop.f32.mrb[75].mxu0  ;;  %v6958_v16 = vpop.f32.mrb[75].mxu1 }
 0x185   : > { %7685 = vst [vmem:[#allocation102_spill] sm:$0xff] %v6956_v31  ;;  %7686 = vst [vmem:[#allocation103_spill] sm:$0xff] %v6958_v16  ;;  %v6222_v31 = vld [vmem:[%s6286_s25 + $0x5f8] sm:$0xff]  }
 0x186   : > { %5800 = vmatmul.mubr.msk.bf16.gmra.mrb[180].mxu0 %vm1572_vm0, %v6217_v27  ;;  %5996 = vmatmul.mubr.msk.bf16.gmra.mrb[180].mxu1 %vm1572_vm0, %v6218_v28  ;;  %v6223_v28 = vld [vmem:[%s6286_s25 + $0x2f0] sm:$0xff]  }
 0x187   : > { %5803 = vmatprep.mubr.msk.bf16.mxu0 %vm1572_vm0, %v6219_v39  ;;  %5999 = vmatprep.mubr.msk.bf16.mxu1 %vm1572_vm0, %v6220_v40  ;;  %v6224_v39 = vld [vmem:[%s6286_s25 + $0x600] sm:$0xff]  }
 0x189   : > { %v6964_v55 = vpop.f32.mrb[76].mxu0  ;;  %v6966_v56 = vpop.f32.mrb[76].mxu1 }
 0x18a   : > { %7687 = vst [vmem:[#allocation104_spill] sm:$0xff] %v6964_v55  ;;  %7688 = vst [vmem:[#allocation105_spill] sm:$0xff] %v6966_v56  ;;  %v6968_v4 = vpop.f32.mrb[77].mxu0  ;;  %v6970_v15 = vpop.f32.mrb[77].mxu1 }
 0x18b   : > { %7689 = vst [vmem:[#allocation106_spill] sm:$0xff] %v6968_v4  ;;  %7690 = vst [vmem:[#allocation107_spill] sm:$0xff] %v6970_v15  ;;  %v6974_v16 = vpop.f32.mrb[78].mxu0  ;;  %v6976_v27 = vpop.f32.mrb[78].mxu1  ;;  %v6225_v4 = vld [vmem:[%s6286_s25 + $0x2f8] sm:$0xff]  }
 0x18c   : > { %7691 = vst [vmem:[#allocation108_spill] sm:$0xff] %v6974_v16  ;;  %7692 = vst [vmem:[#allocation109_spill] sm:$0xff] %v6976_v27  ;;  %v6980_v40 = vpop.f32.mrb[79].mxu0  ;;  %v6982_v55 = vpop.f32.mrb[79].mxu1 }
 0x18d   : > { %7693 = vst [vmem:[#allocation110_spill] sm:$0xff] %v6980_v40  ;;  %7694 = vst [vmem:[#allocation111_spill] sm:$0xff] %v6982_v55  ;;  %v6226_v40 = vld [vmem:[%s6286_s25 + $0x608] sm:$0xff]  }
 0x18e   : > { %5804 = vmatmul.mubr.msk.bf16.gmra.mrb[184].mxu0 %vm1572_vm0, %v6221_v32  ;;  %6000 = vmatmul.mubr.msk.bf16.gmra.mrb[184].mxu1 %vm1572_vm0, %v6222_v31  ;;  %v6227_v31 = vld [vmem:[%s6286_s25 + $0x300] sm:$0xff]  }
 0x18f   : > { %5807 = vmatprep.mubr.msk.bf16.mxu0 %vm1572_vm0, %v6223_v28  ;;  %6003 = vmatprep.mubr.msk.bf16.mxu1 %vm1572_vm0, %v6224_v39  ;;  %v6228_v28 = vld [vmem:[%s6286_s25 + $0x610] sm:$0xff]  }
 0x191   : > { %v6988_v56 = vpop.f32.mrb[80].mxu0  ;;  %v6990_v16 = vpop.f32.mrb[80].mxu1 }
 0x192   : > { %7695 = vst [vmem:[#allocation112_spill] sm:$0xff] %v6988_v56  ;;  %7696 = vst [vmem:[#allocation113_spill] sm:$0xff] %v6990_v16  ;;  %v6992_v27 = vpop.f32.mrb[81].mxu0  ;;  %v6994_v15 = vpop.f32.mrb[81].mxu1 }
 0x193   : > { %7697 = vst [vmem:[#allocation114_spill] sm:$0xff] %v6992_v27  ;;  %7698 = vst [vmem:[#allocation115_spill] sm:$0xff] %v6994_v15  ;;  %v6998_v55 = vpop.f32.mrb[82].mxu0  ;;  %v7000_v32 = vpop.f32.mrb[82].mxu1  ;;  %v6229_v15 = vld [vmem:[%s6286_s25 + $0x308] sm:$0xff]  }
 0x194   : > { %7699 = vst [vmem:[#allocation116_spill] sm:$0xff] %v6998_v55  ;;  %7700 = vst [vmem:[#allocation117_spill] sm:$0xff] %v7000_v32  ;;  %v7004_v3 = vpop.f32.mrb[83].mxu0  ;;  %v7006_v39 = vpop.f32.mrb[83].mxu1 }
 0x195   : > { %7701 = vst [vmem:[#allocation118_spill] sm:$0xff] %v7004_v3  ;;  %7702 = vst [vmem:[#allocation119_spill] sm:$0xff] %v7006_v39  ;;  %v6230_v3 = vld [vmem:[%s6286_s25 + $0x618] sm:$0xff]  }
 0x196   : > { %5808 = vmatmul.mubr.msk.bf16.gmra.mrb[188].mxu0 %vm1572_vm0, %v6225_v4  ;;  %6004 = vmatmul.mubr.msk.bf16.gmra.mrb[188].mxu1 %vm1572_vm0, %v6226_v40 }
 0x197   : > { %5811 = vmatprep.mubr.msk.bf16.mxu0 %vm1572_vm0, %v6227_v31  ;;  %6007 = vmatprep.mubr.msk.bf16.mxu1 %vm1572_vm0, %v6228_v28 }
 0x199   : > { %v7012_v16 = vpop.f32.mrb[84].mxu0  ;;  %v7014_v56 = vpop.f32.mrb[84].mxu1 }
 0x19a   : > { %7703 = vst [vmem:[#allocation120_spill] sm:$0xff] %v7012_v16  ;;  %7704 = vst [vmem:[#allocation121_spill] sm:$0xff] %v7014_v56  ;;  %v7016_v55 = vpop.f32.mrb[85].mxu0  ;;  %v7018_v32 = vpop.f32.mrb[85].mxu1 }
 0x19b   : > { %7705 = vst [vmem:[#allocation122_spill] sm:$0xff] %v7016_v55  ;;  %7706 = vst [vmem:[#allocation123_spill] sm:$0xff] %v7018_v32  ;;  %v7022_v27 = vpop.f32.mrb[86].mxu0  ;;  %v7024_v39 = vpop.f32.mrb[86].mxu1 }
 0x19c   : > { %7707 = vst [vmem:[#allocation124_spill] sm:$0xff] %v7022_v27  ;;  %7708 = vst [vmem:[#allocation125_spill] sm:$0xff] %v7024_v39  ;;  %v7026_v4 = vpop.f32.mrb[87].mxu0  ;;  %v7028_v40 = vpop.f32.mrb[87].mxu1 }
 0x19d   : > { %7709 = vst [vmem:[#allocation126_spill] sm:$0xff] %v7026_v4  ;;  %7710 = vst [vmem:[#allocation127_spill] sm:$0xff] %v7028_v40 }
 0x19e   : > { %5812 = vmatmul.mubr.msk.bf16.gmra.mrb[192].mxu0 %vm1572_vm0, %v6229_v15  ;;  %6008 = vmatmul.mubr.msk.bf16.gmra.mrb[192].mxu1 %vm1572_vm0, %v6230_v3 }
 0x1a1   : > { %v7032_v31 = vpop.f32.mrb[88].mxu0  ;;  %v7034_v28 = vpop.f32.mrb[88].mxu1 }
 0x1a2   : > { %7711 = vst [vmem:[#allocation128_spill] sm:$0xff] %v7032_v31  ;;  %7712 = vst [vmem:[#allocation129_spill] sm:$0xff] %v7034_v28  ;;  %v7036_v56 = vpop.f32.mrb[89].mxu0  ;;  %v7038_v16 = vpop.f32.mrb[89].mxu1 }
 0x1a3   : > { %7713 = vst [vmem:[#allocation130_spill] sm:$0xff] %v7036_v56  ;;  %7714 = vst [vmem:[#allocation131_spill] sm:$0xff] %v7038_v16  ;;  %v7040_v32 = vpop.f32.mrb[90].mxu0  ;;  %v7042_v27 = vpop.f32.mrb[90].mxu1 }
 0x1a4   : > { %7715 = vst [vmem:[#allocation132_spill] sm:$0xff] %v7040_v32  ;;  %7716 = vst [vmem:[#allocation133_spill] sm:$0xff] %v7042_v27  ;;  %v7044_v39 = vpop.f32.mrb[91].mxu0  ;;  %v7046_v4 = vpop.f32.mrb[91].mxu1 }
 0x1a5   : > { %7717 = vst [vmem:[#allocation134_spill] sm:$0xff] %v7044_v39  ;;  %7718 = vst [vmem:[#allocation135_spill] sm:$0xff] %v7046_v4 }
 0x1a9   : > { %v7048_v40 = vpop.f32.mrb[92].mxu0  ;;  %v7050_v15 = vpop.f32.mrb[92].mxu1 }
 0x1aa   : > { %7719 = vst [vmem:[#allocation136_spill] sm:$0xff] %v7048_v40  ;;  %7720 = vst [vmem:[#allocation137_spill] sm:$0xff] %v7050_v15  ;;  %v7052_v3 = vpop.f32.mrb[93].mxu0  ;;  %v7054_v31 = vpop.f32.mrb[93].mxu1 }
 0x1ab   : > { %7721 = vst [vmem:[#allocation138_spill] sm:$0xff] %v7052_v3  ;;  %7722 = vst [vmem:[#allocation139_spill] sm:$0xff] %v7054_v31  ;;  %v7056_v28 = vpop.f32.mrb[94].mxu0  ;;  %v7058_v56 = vpop.f32.mrb[94].mxu1 }
 0x1ac   : > { %7723 = vst [vmem:[#allocation140_spill] sm:$0xff] %v7056_v28  ;;  %7724 = vst [vmem:[#allocation141_spill] sm:$0xff] %v7058_v56  ;;  %v7060_v16 = vpop.f32.mrb[95].mxu0  ;;  %v7062_v27 = vpop.f32.mrb[95].mxu1  ;;  %v7073_v28 = vld [vmem:[%s7583_s2] ss:$0 sm:$0xff] }
 0x1ad   : > { %7725 = vst [vmem:[#allocation142_spill] sm:$0xff] %v7060_v16  ;;  %7726 = vst [vmem:[#allocation143_spill] sm:$0xff] %v7062_v27 }
 0x1b1   : > { %v5717_v32 = vpop.f32.mrb[96].mxu0  ;;  %v5913_v39 = vpop.f32.mrb[96].mxu1 }
 0x1b2   : > { %v3766_v4 = vmax.f32 %v6512_v53, %v5717_v32  ;;  %v3864_v40 = vmax.f32 %v6514_v54, %v5913_v39  ;;  %v7066_v15 = vpop.f32.mrb[97].mxu0  ;;  %v7068_v3 = vpop.f32.mrb[97].mxu1 }
 0x1b3   : > { %7727 = vst [vmem:[#allocation144_spill] sm:$0xff] %v7066_v15  ;;  %7728 = vst [vmem:[#allocation145_spill] sm:$0xff] %v7068_v3  ;;  %v5718_v56 = vpop.f32.mrb[98].mxu0  ;;  %v5914_v16 = vpop.f32.mrb[98].mxu1 }
 0x1b4   : > { %v3962_v31 = vmax.f32 %v3766_v4, %v3864_v40  ;;  %v3767_v27 = vmax.f32 %v6524_v61, %v5718_v56  ;;  %v3865_v55 = vmax.f32 %v6526_v62, %v5914_v16  ;;  %v7077_v60 = vpop.f32.mrb[99].mxu0  ;;  %v7079_v53 = vpop.f32.mrb[99].mxu1 }
 0x1b5   : > { %7729 = vst [vmem:[#allocation146_spill] sm:$0xff] %v7077_v60  ;;  %7730 = vst [vmem:[#allocation147_spill] sm:$0xff] %v7079_v53 }
 0x1b6   : > { %v4067_v54 = vadd.f32 %v7073_v28, %v3962_v31  ;;  %v3963_v32 = vmax.f32 %v3767_v27, %v3865_v55 }
 0x1b8   : > { %v4165_v39 = vmax.f32 %v4067_v54, 0.0  ;;  %v4068_v3 = vadd.f32 %v7073_v28, %v3963_v32 }
 0x1b9   : > { %v5721_v61 = vpop.f32.mrb[100].mxu0  ;;  %v5917_v62 = vpop.f32.mrb[100].mxu1 }
 0x1ba   : > { %v5313_v16 = vpack.c.bf16 %v4165_v39, %v4165_v39  ;;  %v4166_v56 = vmax.f32 %v4068_v3, 0.0  ;;  %v3770_v4 = vmax.f32 %v6536_v1, %v5721_v61  ;;  %v3868_v40 = vmax.f32 %v6538_v2, %v5917_v62  ;;  %v2599_v31 = vpop.f32.mrb[101].mxu0  ;;  %v3383_v55 = vpop.f32.mrb[101].mxu1 }
 0x1bb   : > { %v3768_v27 = vmax.f32 %v6508_v51, %v2599_v31  ;;  %v3866_v54 = vmax.f32 %v6510_v52, %v3383_v55  ;;  %v5722_v32 = vpop.f32.mrb[102].mxu0  ;;  %v5918_v53 = vpop.f32.mrb[102].mxu1 }
 0x1bc   : > { %4656 = vst.msk [vmem:[%s7087_s4] sm:$0xf] %vm4655_vm2, %v5313_v16  ;;  %v5314_v60 = vpack.c.bf16 %v4166_v56, %v4166_v56  ;;  %v3966_v15 = vmax.f32 %v3770_v4, %v3868_v40  ;;  %v3771_v39 = vmax.f32 %v6548_v9, %v5722_v32  ;;  %v3869_v3 = vmax.f32 %v6550_v10, %v5918_v53  ;;  %v2602_v1 = vpop.f32.mrb[103].mxu0  ;;  %v3386_v61 = vpop.f32.mrb[103].mxu1 }
 0x1bd   : > { %v3964_v2 = vmax.f32 %v3768_v27, %v3866_v54  ;;  %v3769_v62 = vmax.f32 %v6518_v57, %v2602_v1  ;;  %v3867_v59 = vmax.f32 %v6520_v58, %v3386_v61 }
 0x1be   : > { %4657 = vst.msk [vmem:[%s7087_s4 + $0x4] sm:$0xf] %vm4655_vm2, %v5314_v60  ;;  %v4071_v51 = vadd.f32 %v7073_v28, %v3966_v15  ;;  %v3967_v52 = vmax.f32 %v3771_v39, %v3869_v3 }
 0x1bf   : > { %v4069_v16 = vadd.f32 %v7073_v28, %v3964_v2  ;;  %v3965_v56 = vmax.f32 %v3769_v62, %v3867_v59 }
 0x1c0   : > { %v4169_v4 = vmax.f32 %v4071_v51, 0.0  ;;  %v4072_v9 = vadd.f32 %v7073_v28, %v3967_v52 }
 0x1c1   : > { %v4167_v40 = vmax.f32 %v4069_v16, 0.0  ;;  %v4070_v10 = vadd.f32 %v7073_v28, %v3965_v56  ;;  %v5725_v53 = vpop.f32.mrb[104].mxu0  ;;  %v5921_v31 = vpop.f32.mrb[104].mxu1 }
 0x1c2   : > { %v5317_v57 = vpack.c.bf16 %v4169_v4, %v4169_v4  ;;  %v4170_v55 = vmax.f32 %v4072_v9, 0.0  ;;  %v3774_v58 = vmax.f32 %v6560_v13, %v5725_v53  ;;  %v3872_v60 = vmax.f32 %v6562_v14, %v5921_v31  ;;  %v2615_v15 = vpop.f32.mrb[105].mxu0  ;;  %v3399_v27 = vpop.f32.mrb[105].mxu1 }
 0x1c3   : > { %v5315_v54 = vpack.c.bf16 %v4167_v40, %v4167_v40  ;;  %v4168_v59 = vmax.f32 %v4070_v10, 0.0  ;;  %v3772_v32 = vmax.f32 %v6532_v63, %v2615_v15  ;;  %v3870_v39 = vmax.f32 %v6534_v0, %v3399_v27  ;;  %v5726_v3 = vpop.f32.mrb[106].mxu0  ;;  %v5922_v1 = vpop.f32.mrb[106].mxu1 }
 0x1c4   : > { %4660 = vst.msk [vmem:[%s7087_s4 + $0x10] sm:$0xf] %vm4655_vm2, %v5317_v57  ;;  %v5318_v61 = vpack.c.bf16 %v4170_v55, %v4170_v55  ;;  %v3970_v2 = vmax.f32 %v3774_v58, %v3872_v60  ;;  %v3775_v13 = vmax.f32 %v6572_v21, %v5726_v3  ;;  %v3873_v14 = vmax.f32 %v6574_v22, %v5922_v1  ;;  %v2618_v62 = vpop.f32.mrb[107].mxu0  ;;  %v3402_v51 = vpop.f32.mrb[107].mxu1 }
 0x1c5   : > { %4658 = vst.msk [vmem:[%s7087_s4 + $0x8] sm:$0xf] %vm4655_vm2, %v5315_v54  ;;  %v5316_v52 = vpack.c.bf16 %v4168_v59, %v4168_v59  ;;  %v3968_v63 = vmax.f32 %v3772_v32, %v3870_v39  ;;  %v3773_v16 = vmax.f32 %v6542_v5, %v2618_v62  ;;  %v3871_v0 = vmax.f32 %v6544_v6, %v3402_v51 }
 0x1c6   : > { %4661 = vst.msk [vmem:[%s7087_s4 + $0x14] sm:$0xf] %vm4655_vm2, %v5318_v61  ;;  %v4075_v56 = vadd.f32 %v7073_v28, %v3970_v2  ;;  %v3971_v4 = vmax.f32 %v3775_v13, %v3873_v14 }
 0x1c7   : > { %4659 = vst.msk [vmem:[%s7087_s4 + $0xc] sm:$0xf] %vm4655_vm2, %v5316_v52  ;;  %v4073_v21 = vadd.f32 %v7073_v28, %v3968_v63  ;;  %v3969_v22 = vmax.f32 %v3773_v16, %v3871_v0 }
 0x1c8   : > { %v4173_v9 = vmax.f32 %v4075_v56, 0.0  ;;  %v4076_v40 = vadd.f32 %v7073_v28, %v3971_v4 }
 0x1c9   : > { %v4171_v10 = vmax.f32 %v4073_v21, 0.0  ;;  %v4074_v53 = vadd.f32 %v7073_v28, %v3969_v22  ;;  %v5729_v5 = vpop.f32.mrb[108].mxu0  ;;  %v5925_v31 = vpop.f32.mrb[108].mxu1 }
 0x1ca   : > { %v5321_v6 = vpack.c.bf16 %v4173_v9, %v4173_v9  ;;  %v4174_v57 = vmax.f32 %v4076_v40, 0.0  ;;  %v3778_v55 = vmax.f32 %v6584_v25, %v5729_v5  ;;  %v3876_v58 = vmax.f32 %v6586_v26, %v5925_v31  ;;  %v2631_v60 = vpop.f32.mrb[109].mxu0  ;;  %v3415_v15 = vpop.f32.mrb[109].mxu1 }
 0x1cb   : > { %v5319_v27 = vpack.c.bf16 %v4171_v10, %v4171_v10  ;;  %v4172_v54 = vmax.f32 %v4074_v53, 0.0  ;;  %v3776_v59 = vmax.f32 %v6556_v11, %v2631_v60  ;;  %v3874_v32 = vmax.f32 %v6558_v12, %v3415_v15  ;;  %v5730_v39 = vpop.f32.mrb[110].mxu0  ;;  %v5926_v3 = vpop.f32.mrb[110].mxu1 }
 0x1cc   : > { %4664 = vst.msk [vmem:[%s7087_s4 + $0x20] sm:$0xf] %vm4655_vm2, %v5321_v6  ;;  %v5322_v1 = vpack.c.bf16 %v4174_v57, %v4174_v57  ;;  %v3974_v61 = vmax.f32 %v3778_v55, %v3876_v58  ;;  %v3779_v25 = vmax.f32 %v6596_v33, %v5730_v39  ;;  %v3877_v26 = vmax.f32 %v6598_v34, %v5926_v3  ;;  %v2634_v2 = vpop.f32.mrb[111].mxu0  ;;  %v3418_v13 = vpop.f32.mrb[111].mxu1 }
 0x1cd   : > { %4662 = vst.msk [vmem:[%s7087_s4 + $0x18] sm:$0xf] %vm4655_vm2, %v5319_v27  ;;  %v5320_v14 = vpack.c.bf16 %v4172_v54, %v4172_v54  ;;  %v3972_v11 = vmax.f32 %v3776_v59, %v3874_v32  ;;  %v3777_v62 = vmax.f32 %v6566_v17, %v2634_v2  ;;  %v3875_v12 = vmax.f32 %v6568_v18, %v3418_v13 }
 0x1ce   : > { %4665 = vst.msk [vmem:[%s7087_s4 + $0x24] sm:$0xf] %vm4655_vm2, %v5322_v1  ;;  %v4079_v51 = vadd.f32 %v7073_v28, %v3974_v61  ;;  %v3975_v52 = vmax.f32 %v3779_v25, %v3877_v26 }
 0x1cf   : > { %4663 = vst.msk [vmem:[%s7087_s4 + $0x1c] sm:$0xf] %vm4655_vm2, %v5320_v14  ;;  %v4077_v33 = vadd.f32 %v7073_v28, %v3972_v11  ;;  %v3973_v34 = vmax.f32 %v3777_v62, %v3875_v12 }
 0x1d0   : > { %v4177_v63 = vmax.f32 %v4079_v51, 0.0  ;;  %v4080_v16 = vadd.f32 %v7073_v28, %v3975_v52 }
 0x1d1   : > { %v4175_v0 = vmax.f32 %v4077_v33, 0.0  ;;  %v4078_v56 = vadd.f32 %v7073_v28, %v3973_v34  ;;  %v5733_v17 = vpop.f32.mrb[112].mxu0  ;;  %v5929_v4 = vpop.f32.mrb[112].mxu1 }
 0x1d2   : > { %v5325_v18 = vpack.c.bf16 %v4177_v63, %v4177_v63  ;;  %v4178_v21 = vmax.f32 %v4080_v16, 0.0  ;;  %v3782_v22 = vmax.f32 %v6608_v37, %v5733_v17  ;;  %v3880_v9 = vmax.f32 %v6610_v38, %v5929_v4  ;;  %v2647_v40 = vpop.f32.mrb[113].mxu0  ;;  %v3431_v10 = vpop.f32.mrb[113].mxu1 }
 0x1d3   : > { %v5323_v53 = vpack.c.bf16 %v4175_v0, %v4175_v0  ;;  %v4176_v5 = vmax.f32 %v4078_v56, 0.0  ;;  %v3780_v31 = vmax.f32 %v6580_v23, %v2647_v40  ;;  %v3878_v6 = vmax.f32 %v6582_v24, %v3431_v10  ;;  %v5734_v57 = vpop.f32.mrb[114].mxu0  ;;  %v5930_v55 = vpop.f32.mrb[114].mxu1 }
 0x1d4   : > { %4668 = vst.msk [vmem:[%s7087_s4 + $0x30] sm:$0xf] %vm4655_vm2, %v5325_v18  ;;  %v5326_v58 = vpack.c.bf16 %v4178_v21, %v4178_v21  ;;  %v3978_v60 = vmax.f32 %v3782_v22, %v3880_v9  ;;  %v3783_v37 = vmax.f32 %v6620_v45, %v5734_v57  ;;  %v3881_v38 = vmax.f32 %v6622_v46, %v5930_v55  ;;  %v2650_v15 = vpop.f32.mrb[115].mxu0  ;;  %v3434_v27 = vpop.f32.mrb[115].mxu1 }
 0x1d5   : > { %4666 = vst.msk [vmem:[%s7087_s4 + $0x28] sm:$0xf] %vm4655_vm2, %v5323_v53  ;;  %v5324_v54 = vpack.c.bf16 %v4176_v5, %v4176_v5  ;;  %v3976_v23 = vmax.f32 %v3780_v31, %v3878_v6  ;;  %v3781_v59 = vmax.f32 %v6590_v29, %v2650_v15  ;;  %v3879_v24 = vmax.f32 %v6592_v30, %v3434_v27 }
 0x1d6   : > { %4669 = vst.msk [vmem:[%s7087_s4 + $0x34] sm:$0xf] %vm4655_vm2, %v5326_v58  ;;  %v4083_v32 = vadd.f32 %v7073_v28, %v3978_v60  ;;  %v3979_v39 = vmax.f32 %v3783_v37, %v3881_v38 }
 0x1d7   : > { %4667 = vst.msk [vmem:[%s7087_s4 + $0x2c] sm:$0xf] %vm4655_vm2, %v5324_v54  ;;  %v4081_v45 = vadd.f32 %v7073_v28, %v3976_v23  ;;  %v3977_v46 = vmax.f32 %v3781_v59, %v3879_v24 }
 0x1d8   : > { %v4181_v3 = vmax.f32 %v4083_v32, 0.0  ;;  %v4084_v1 = vadd.f32 %v7073_v28, %v3979_v39 }
 0x1d9   : > { %v4179_v61 = vmax.f32 %v4081_v45, 0.0  ;;  %v4082_v25 = vadd.f32 %v7073_v28, %v3977_v46  ;;  %v5737_v29 = vpop.f32.mrb[116].mxu0  ;;  %v5933_v26 = vpop.f32.mrb[116].mxu1  ;;  %v7731_v45 = vld [vmem:[#allocation2_spill] sm:$0xff] }
 0x1da   : > { %v5329_v30 = vpack.c.bf16 %v4181_v3, %v4181_v3  ;;  %v4182_v2 = vmax.f32 %v4084_v1, 0.0  ;;  %v3786_v13 = vmax.f32 %v6632_v49, %v5737_v29  ;;  %v3884_v14 = vmax.f32 %v6634_v50, %v5933_v26  ;;  %v2663_v11 = vpop.f32.mrb[117].mxu0  ;;  %v3447_v62 = vpop.f32.mrb[117].mxu1 }
 0x1db   : > { %v5327_v12 = vpack.c.bf16 %v4179_v61, %v4179_v61  ;;  %v4180_v51 = vmax.f32 %v4082_v25, 0.0  ;;  %v3784_v52 = vmax.f32 %v6604_v35, %v2663_v11  ;;  %v3882_v33 = vmax.f32 %v6606_v36, %v3447_v62  ;;  %v5738_v34 = vpop.f32.mrb[118].mxu0  ;;  %v5934_v63 = vpop.f32.mrb[118].mxu1  ;;  %v7733_v62 = vld [vmem:[#allocation10_spill] sm:$0xff] }
 0x1dc   : > { %4672 = vst.msk [vmem:[%s7087_s4 + $0x40] sm:$0xf] %vm4655_vm2, %v5329_v30  ;;  %v5330_v16 = vpack.c.bf16 %v4182_v2, %v4182_v2  ;;  %v3982_v0 = vmax.f32 %v3786_v13, %v3884_v14  ;;  %v3787_v49 = vmax.f32 %v6644_v7, %v5738_v34  ;;  %v3885_v50 = vmax.f32 %v6646_v8, %v5934_v63  ;;  %v2666_v56 = vpop.f32.mrb[119].mxu0  ;;  %v3450_v17 = vpop.f32.mrb[119].mxu1 }
 0x1dd   : > { %4670 = vst.msk [vmem:[%s7087_s4 + $0x38] sm:$0xf] %vm4655_vm2, %v5327_v12  ;;  %v5328_v4 = vpack.c.bf16 %v4180_v51, %v4180_v51  ;;  %v3980_v35 = vmax.f32 %v3784_v52, %v3882_v33  ;;  %v3785_v18 = vmax.f32 %v6614_v41, %v2666_v56  ;;  %v3883_v36 = vmax.f32 %v6616_v42, %v3450_v17  ;;  %v7734_v51 = vld [vmem:[#allocation11_spill] sm:$0xff] }
 0x1de   : > { %4673 = vst.msk [vmem:[%s7087_s4 + $0x44] sm:$0xf] %vm4655_vm2, %v5330_v16  ;;  %v4087_v21 = vadd.f32 %v7073_v28, %v3982_v0  ;;  %v3983_v22 = vmax.f32 %v3787_v49, %v3885_v50  ;;  %v7735_v0 = vld [vmem:[#allocation4_spill] sm:$0xff]  ;;  %v7736_v50 = vld [vmem:[#allocation5_spill] sm:$0xff] }
 0x1df   : > { %4671 = vst.msk [vmem:[%s7087_s4 + $0x3c] sm:$0xf] %vm4655_vm2, %v5328_v4  ;;  %v4085_v7 = vadd.f32 %v7073_v28, %v3980_v35  ;;  %v3981_v8 = vmax.f32 %v3785_v18, %v3883_v36  ;;  %v7737_v36 = vld [vmem:[#allocation14_spill] sm:$0xff] }
 0x1e0   : > { %v4185_v9 = vmax.f32 %v4087_v21, 0.0  ;;  %v4088_v40 = vadd.f32 %v7073_v28, %v3983_v22  ;;  %v7738_v22 = vld [vmem:[#allocation15_spill] sm:$0xff] }
 0x1e1   : > { %v4183_v10 = vmax.f32 %v4085_v7, 0.0  ;;  %v4086_v53 = vadd.f32 %v7073_v28, %v3981_v8  ;;  %v5741_v41 = vpop.f32.mrb[120].mxu0  ;;  %v5937_v5 = vpop.f32.mrb[120].mxu1 }
 0x1e2   : > { %v5333_v42 = vpack.c.bf16 %v4185_v9, %v4185_v9  ;;  %v4186_v31 = vmax.f32 %v4088_v40, 0.0  ;;  %v3790_v6 = vmax.f32 %v6656_v19, %v5741_v41  ;;  %v3888_v57 = vmax.f32 %v6658_v20, %v5937_v5  ;;  %v2679_v55 = vpop.f32.mrb[121].mxu0  ;;  %v3463_v58 = vpop.f32.mrb[121].mxu1  ;;  %v7740_v5 = vld [vmem:[#allocation7_spill] sm:$0xff] }
 0x1e3   : > { %v5331_v60 = vpack.c.bf16 %v4183_v10, %v4183_v10  ;;  %v4184_v37 = vmax.f32 %v4086_v53, 0.0  ;;  %v3788_v38 = vmax.f32 %v6628_v47, %v2679_v55  ;;  %v3886_v15 = vmax.f32 %v6630_v48, %v3463_v58  ;;  %v5742_v27 = vpop.f32.mrb[122].mxu0  ;;  %v5938_v54 = vpop.f32.mrb[122].mxu1  ;;  %v7732_v48 = vld [vmem:[#allocation3_spill] sm:$0xff]  ;;  %v7739_v53 = vld [vmem:[#allocation6_spill] sm:$0xff] }
 0x1e4   : > { %4676 = vst.msk [vmem:[%s7087_s4 + $0x50] sm:$0xf] %vm4655_vm2, %v5333_v42  ;;  %v5334_v23 = vpack.c.bf16 %v4186_v31, %v4186_v31  ;;  %v3986_v59 = vmax.f32 %v3790_v6, %v3888_v57  ;;  %v3791_v19 = vmax.f32 %v6668_v43, %v5742_v27  ;;  %v3889_v20 = vmax.f32 %v6670_v44, %v5938_v54  ;;  %v2682_v24 = vpop.f32.mrb[123].mxu0  ;;  %v3466_v32 = vpop.f32.mrb[123].mxu1 }
 0x1e5   : > { %4674 = vst.msk [vmem:[%s7087_s4 + $0x48] sm:$0xf] %vm4655_vm2, %v5331_v60  ;;  %v5332_v39 = vpack.c.bf16 %v4184_v37, %v4184_v37  ;;  %v3984_v47 = vmax.f32 %v3788_v38, %v3886_v15  ;;  %v3789_v46 = vmax.f32 %v7731_v45, %v2682_v24  ;;  %v3887_v3 = vmax.f32 %v7732_v48, %v3466_v32 }
 0x1e6   : > { %4677 = vst.msk [vmem:[%s7087_s4 + $0x54] sm:$0xf] %vm4655_vm2, %v5334_v23  ;;  %v4091_v1 = vadd.f32 %v7073_v28, %v3986_v59  ;;  %v3987_v61 = vmax.f32 %v3791_v19, %v3889_v20  ;;  %v7741_v59 = vld [vmem:[#allocation18_spill] sm:$0xff]  ;;  %v7742_v20 = vld [vmem:[#allocation19_spill] sm:$0xff] }
 0x1e7   : > { %4675 = vst.msk [vmem:[%s7087_s4 + $0x4c] sm:$0xf] %vm4655_vm2, %v5332_v39  ;;  %v4089_v43 = vadd.f32 %v7073_v28, %v3984_v47  ;;  %v3985_v44 = vmax.f32 %v3789_v46, %v3887_v3  ;;  %v7743_v46 = vld [vmem:[#allocation8_spill] sm:$0xff]  ;;  %v7744_v3 = vld [vmem:[#allocation9_spill] sm:$0xff] }
 0x1e8   : > { %v4189_v25 = vmax.f32 %v4091_v1, 0.0  ;;  %v4092_v29 = vadd.f32 %v7073_v28, %v3987_v61 }
 0x1e9   : > { %v4187_v26 = vmax.f32 %v4089_v43, 0.0  ;;  %v4090_v30 = vadd.f32 %v7073_v28, %v3985_v44  ;;  %v5745_v2 = vpop.f32.mrb[124].mxu0  ;;  %v5941_v13 = vpop.f32.mrb[124].mxu1 }
 0x1ea   : > { %v5337_v14 = vpack.c.bf16 %v4189_v25, %v4189_v25  ;;  %v4190_v11 = vmax.f32 %v4092_v29, 0.0  ;;  %v3794_v12 = vmax.f32 %v7733_v62, %v5745_v2  ;;  %v3892_v52 = vmax.f32 %v7734_v51, %v5941_v13  ;;  %v2695_v33 = vpop.f32.mrb[125].mxu0  ;;  %v3479_v34 = vpop.f32.mrb[125].mxu1  ;;  %v7745_v29 = vld [vmem:[#allocation22_spill] sm:$0xff] }
 0x1eb   : > { %v5335_v63 = vpack.c.bf16 %v4187_v26, %v4187_v26  ;;  %v4188_v16 = vmax.f32 %v4090_v30, 0.0  ;;  %v3792_v49 = vmax.f32 %v7735_v0, %v2695_v33  ;;  %v3890_v56 = vmax.f32 %v7736_v50, %v3479_v34  ;;  %v5746_v17 = vpop.f32.mrb[126].mxu0  ;;  %v5942_v4 = vpop.f32.mrb[126].mxu1  ;;  %v7746_v30 = vld [vmem:[#allocation23_spill] sm:$0xff] }
 0x1ec   : > { %4680 = vst.msk [vmem:[%s7087_s4 + $0x60] sm:$0xf] %vm4655_vm2, %v5337_v14  ;;  %v5338_v35 = vpack.c.bf16 %v4190_v11, %v4190_v11  ;;  %v3990_v18 = vmax.f32 %v3794_v12, %v3892_v52  ;;  %v3795_v21 = vmax.f32 %v7737_v36, %v5746_v17  ;;  %v3893_v7 = vmax.f32 %v7738_v22, %v5942_v4  ;;  %v2698_v8 = vpop.f32.mrb[127].mxu0  ;;  %v3482_v9 = vpop.f32.mrb[127].mxu1  ;;  %v7747_v12 = vld [vmem:[#allocation12_spill] sm:$0xff]  ;;  %v7748_v52 = vld [vmem:[#allocation13_spill] sm:$0xff] }
 0x1ed   : > { %4678 = vst.msk [vmem:[%s7087_s4 + $0x58] sm:$0xf] %vm4655_vm2, %v5335_v63  ;;  %v5336_v40 = vpack.c.bf16 %v4188_v16, %v4188_v16  ;;  %v3988_v10 = vmax.f32 %v3792_v49, %v3890_v56  ;;  %v3793_v41 = vmax.f32 %v7739_v53, %v2698_v8  ;;  %v3891_v42 = vmax.f32 %v7740_v5, %v3482_v9 }
 0x1ee   : > { %4681 = vst.msk [vmem:[%s7087_s4 + $0x64] sm:$0xf] %vm4655_vm2, %v5338_v35  ;;  %v4095_v31 = vadd.f32 %v7073_v28, %v3990_v18  ;;  %v3991_v6 = vmax.f32 %v3795_v21, %v3893_v7  ;;  %v7749_v21 = vld [vmem:[#allocation26_spill] sm:$0xff]  ;;  %v7750_v7 = vld [vmem:[#allocation27_spill] sm:$0xff] }
 0x1ef   : > { %4679 = vst.msk [vmem:[%s7087_s4 + $0x5c] sm:$0xf] %vm4655_vm2, %v5336_v40  ;;  %v4093_v57 = vadd.f32 %v7073_v28, %v3988_v10  ;;  %v3989_v55 = vmax.f32 %v3793_v41, %v3891_v42  ;;  %v7751_v41 = vld [vmem:[#allocation16_spill] sm:$0xff]  ;;  %v7752_v42 = vld [vmem:[#allocation17_spill] sm:$0xff] }
 0x1f0   : > { %v4193_v58 = vmax.f32 %v4095_v31, 0.0  ;;  %v4096_v60 = vadd.f32 %v7073_v28, %v3991_v6 }
 0x1f1   : > { %v4191_v37 = vmax.f32 %v4093_v57, 0.0  ;;  %v4094_v38 = vadd.f32 %v7073_v28, %v3989_v55  ;;  %v5749_v15 = vpop.f32.mrb[128].mxu0  ;;  %v5945_v27 = vpop.f32.mrb[128].mxu1 }
 0x1f2   : > { %v5341_v54 = vpack.c.bf16 %v4193_v58, %v4193_v58  ;;  %v4194_v23 = vmax.f32 %v4096_v60, 0.0  ;;  %v3798_v19 = vmax.f32 %v7741_v59, %v5749_v15  ;;  %v3896_v24 = vmax.f32 %v7742_v20, %v5945_v27  ;;  %v2711_v32 = vpop.f32.mrb[129].mxu0  ;;  %v3495_v39 = vpop.f32.mrb[129].mxu1  ;;  %v7753_v60 = vld [vmem:[#allocation30_spill] sm:$0xff] }
 0x1f3   : > { %v5339_v47 = vpack.c.bf16 %v4191_v37, %v4191_v37  ;;  %v4192_v45 = vmax.f32 %v4094_v38, 0.0  ;;  %v3796_v48 = vmax.f32 %v7743_v46, %v2711_v32  ;;  %v3894_v1 = vmax.f32 %v7744_v3, %v3495_v39  ;;  %v5750_v61 = vpop.f32.mrb[130].mxu0  ;;  %v5946_v43 = vpop.f32.mrb[130].mxu1  ;;  %v7754_v38 = vld [vmem:[#allocation31_spill] sm:$0xff] }
 0x1f4   : > { %4684 = vst.msk [vmem:[%s7087_s4 + $0x70] sm:$0xf] %vm4655_vm2, %v5341_v54  ;;  %v5342_v44 = vpack.c.bf16 %v4194_v23, %v4194_v23  ;;  %v3994_v25 = vmax.f32 %v3798_v19, %v3896_v24  ;;  %v3799_v26 = vmax.f32 %v7745_v29, %v5750_v61  ;;  %v3897_v2 = vmax.f32 %v7746_v30, %v5946_v43  ;;  %v2714_v13 = vpop.f32.mrb[131].mxu0  ;;  %v3498_v14 = vpop.f32.mrb[131].mxu1  ;;  %v7755_v19 = vld [vmem:[#allocation20_spill] sm:$0xff]  ;;  %v7756_v24 = vld [vmem:[#allocation21_spill] sm:$0xff] }
 0x1f5   : > { %4682 = vst.msk [vmem:[%s7087_s4 + $0x68] sm:$0xf] %vm4655_vm2, %v5339_v47  ;;  %v5340_v11 = vpack.c.bf16 %v4192_v45, %v4192_v45  ;;  %v3992_v62 = vmax.f32 %v3796_v48, %v3894_v1  ;;  %v3797_v51 = vmax.f32 %v7747_v12, %v2714_v13  ;;  %v3895_v33 = vmax.f32 %v7748_v52, %v3498_v14 }
 0x1f6   : > { %4685 = vst.msk [vmem:[%s7087_s4 + $0x74] sm:$0xf] %vm4655_vm2, %v5342_v44  ;;  %v4099_v34 = vadd.f32 %v7073_v28, %v3994_v25  ;;  %v3995_v63 = vmax.f32 %v3799_v26, %v3897_v2  ;;  %v7757_v26 = vld [vmem:[#allocation34_spill] sm:$0xff]  ;;  %v7758_v2 = vld [vmem:[#allocation35_spill] sm:$0xff] }
 0x1f7   : > { %4683 = vst.msk [vmem:[%s7087_s4 + $0x6c] sm:$0xf] %vm4655_vm2, %v5340_v11  ;;  %v4097_v16 = vadd.f32 %v7073_v28, %v3992_v62  ;;  %v3993_v0 = vmax.f32 %v3797_v51, %v3895_v33  ;;  %v7759_v51 = vld [vmem:[#allocation24_spill] sm:$0xff]  ;;  %v7760_v33 = vld [vmem:[#allocation25_spill] sm:$0xff] }
 0x1f8   : > { %v4197_v49 = vmax.f32 %v4099_v34, 0.0  ;;  %v4100_v50 = vadd.f32 %v7073_v28, %v3995_v63 }
 0x1f9   : > { %v4195_v56 = vmax.f32 %v4097_v16, 0.0  ;;  %v4098_v17 = vadd.f32 %v7073_v28, %v3993_v0  ;;  %v5753_v4 = vpop.f32.mrb[132].mxu0  ;;  %v5949_v35 = vpop.f32.mrb[132].mxu1 }
 0x1fa   : > { %v5345_v18 = vpack.c.bf16 %v4197_v49, %v4197_v49  ;;  %v4198_v36 = vmax.f32 %v4100_v50, 0.0  ;;  %v3802_v22 = vmax.f32 %v7749_v21, %v5753_v4  ;;  %v3900_v8 = vmax.f32 %v7750_v7, %v5949_v35  ;;  %v2727_v9 = vpop.f32.mrb[133].mxu0  ;;  %v3511_v40 = vpop.f32.mrb[133].mxu1  ;;  %v7761_v50 = vld [vmem:[#allocation38_spill] sm:$0xff] }
 0x1fb   : > { %v5343_v10 = vpack.c.bf16 %v4195_v56, %v4195_v56  ;;  %v4196_v53 = vmax.f32 %v4098_v17, 0.0  ;;  %v3800_v5 = vmax.f32 %v7751_v41, %v2727_v9  ;;  %v3898_v31 = vmax.f32 %v7752_v42, %v3511_v40  ;;  %v5754_v6 = vpop.f32.mrb[134].mxu0  ;;  %v5950_v57 = vpop.f32.mrb[134].mxu1  ;;  %v7762_v17 = vld [vmem:[#allocation39_spill] sm:$0xff] }
 0x1fc   : > { %4688 = vst.msk [vmem:[%s7087_s4 + $0x80] sm:$0xf] %vm4655_vm2, %v5345_v18  ;;  %v5346_v55 = vpack.c.bf16 %v4198_v36, %v4198_v36  ;;  %v3998_v58 = vmax.f32 %v3802_v22, %v3900_v8  ;;  %v3803_v37 = vmax.f32 %v7753_v60, %v5754_v6  ;;  %v3901_v15 = vmax.f32 %v7754_v38, %v5950_v57  ;;  %v2730_v27 = vpop.f32.mrb[135].mxu0  ;;  %v3514_v54 = vpop.f32.mrb[135].mxu1  ;;  %v7763_v22 = vld [vmem:[#allocation28_spill] sm:$0xff]  ;;  %v7764_v8 = vld [vmem:[#allocation29_spill] sm:$0xff] }
 0x1fd   : > { %4686 = vst.msk [vmem:[%s7087_s4 + $0x78] sm:$0xf] %vm4655_vm2, %v5343_v10  ;;  %v5344_v23 = vpack.c.bf16 %v4196_v53, %v4196_v53  ;;  %v3996_v59 = vmax.f32 %v3800_v5, %v3898_v31  ;;  %v3801_v20 = vmax.f32 %v7755_v19, %v2730_v27  ;;  %v3899_v32 = vmax.f32 %v7756_v24, %v3514_v54 }
 0x1fe   : > { %4689 = vst.msk [vmem:[%s7087_s4 + $0x84] sm:$0xf] %vm4655_vm2, %v5346_v55  ;;  %v4103_v39 = vadd.f32 %v7073_v28, %v3998_v58  ;;  %v3999_v47 = vmax.f32 %v3803_v37, %v3901_v15  ;;  %v7765_v37 = vld [vmem:[#allocation42_spill] sm:$0xff]  ;;  %v7766_v15 = vld [vmem:[#allocation43_spill] sm:$0xff] }
 0x1ff   : > { %4687 = vst.msk [vmem:[%s7087_s4 + $0x7c] sm:$0xf] %vm4655_vm2, %v5344_v23  ;;  %v4101_v45 = vadd.f32 %v7073_v28, %v3996_v59  ;;  %v3997_v46 = vmax.f32 %v3801_v20, %v3899_v32  ;;  %v7767_v20 = vld [vmem:[#allocation32_spill] sm:$0xff]  ;;  %v7768_v32 = vld [vmem:[#allocation33_spill] sm:$0xff] }
 0x200   : > { %v4201_v48 = vmax.f32 %v4103_v39, 0.0  ;;  %v4104_v3 = vadd.f32 %v7073_v28, %v3999_v47 }
 0x201   : > { %v4199_v1 = vmax.f32 %v4101_v45, 0.0  ;;  %v4102_v61 = vadd.f32 %v7073_v28, %v3997_v46  ;;  %v5757_v43 = vpop.f32.mrb[136].mxu0  ;;  %v5953_v44 = vpop.f32.mrb[136].mxu1 }
 0x202   : > { %v5349_v25 = vpack.c.bf16 %v4201_v48, %v4201_v48  ;;  %v4202_v29 = vmax.f32 %v4104_v3, 0.0  ;;  %v3806_v30 = vmax.f32 %v7757_v26, %v5757_v43  ;;  %v3904_v13 = vmax.f32 %v7758_v2, %v5953_v44  ;;  %v2743_v14 = vpop.f32.mrb[137].mxu0  ;;  %v3527_v11 = vpop.f32.mrb[137].mxu1  ;;  %v7769_v3 = vld [vmem:[#allocation46_spill] sm:$0xff] }
 0x203   : > { %v5347_v62 = vpack.c.bf16 %v4199_v1, %v4199_v1  ;;  %v4200_v12 = vmax.f32 %v4102_v61, 0.0  ;;  %v3804_v52 = vmax.f32 %v7759_v51, %v2743_v14  ;;  %v3902_v34 = vmax.f32 %v7760_v33, %v3527_v11  ;;  %v5758_v63 = vpop.f32.mrb[138].mxu0  ;;  %v5954_v16 = vpop.f32.mrb[138].mxu1  ;;  %v7770_v61 = vld [vmem:[#allocation47_spill] sm:$0xff] }
 0x204   : > { %4692 = vst.msk [vmem:[%s7087_s4 + $0x90] sm:$0xf] %vm4655_vm2, %v5349_v25  ;;  %v5350_v0 = vpack.c.bf16 %v4202_v29, %v4202_v29  ;;  %v4002_v49 = vmax.f32 %v3806_v30, %v3904_v13  ;;  %v3807_v56 = vmax.f32 %v7761_v50, %v5758_v63  ;;  %v3905_v4 = vmax.f32 %v7762_v17, %v5954_v16  ;;  %v2746_v35 = vpop.f32.mrb[139].mxu0  ;;  %v3530_v18 = vpop.f32.mrb[139].mxu1  ;;  %v7771_v30 = vld [vmem:[#allocation36_spill] sm:$0xff]  ;;  %v7772_v13 = vld [vmem:[#allocation37_spill] sm:$0xff] }
 0x205   : > { %4690 = vst.msk [vmem:[%s7087_s4 + $0x88] sm:$0xf] %vm4655_vm2, %v5347_v62  ;;  %v5348_v36 = vpack.c.bf16 %v4200_v12, %v4200_v12  ;;  %v4000_v21 = vmax.f32 %v3804_v52, %v3902_v34  ;;  %v3805_v7 = vmax.f32 %v7763_v22, %v2746_v35  ;;  %v3903_v9 = vmax.f32 %v7764_v8, %v3530_v18 }
 0x206   : > { %4693 = vst.msk [vmem:[%s7087_s4 + $0x94] sm:$0xf] %vm4655_vm2, %v5350_v0  ;;  %v4107_v40 = vadd.f32 %v7073_v28, %v4002_v49  ;;  %v4003_v10 = vmax.f32 %v3807_v56, %v3905_v4  ;;  %v7773_v56 = vld [vmem:[#allocation50_spill] sm:$0xff]  ;;  %v7774_v4 = vld [vmem:[#allocation51_spill] sm:$0xff] }
 0x207   : > { %4691 = vst.msk [vmem:[%s7087_s4 + $0x8c] sm:$0xf] %vm4655_vm2, %v5348_v36  ;;  %v4105_v53 = vadd.f32 %v7073_v28, %v4000_v21  ;;  %v4001_v41 = vmax.f32 %v3805_v7, %v3903_v9  ;;  %v7775_v7 = vld [vmem:[#allocation40_spill] sm:$0xff]  ;;  %v7776_v9 = vld [vmem:[#allocation41_spill] sm:$0xff] }
 0x208   : > { %v4205_v5 = vmax.f32 %v4107_v40, 0.0  ;;  %v4108_v42 = vadd.f32 %v7073_v28, %v4003_v10 }
 0x209   : > { %v4203_v31 = vmax.f32 %v4105_v53, 0.0  ;;  %v4106_v6 = vadd.f32 %v7073_v28, %v4001_v41  ;;  %v5761_v57 = vpop.f32.mrb[140].mxu0  ;;  %v5957_v55 = vpop.f32.mrb[140].mxu1 }
 0x20a   : > { %v5353_v58 = vpack.c.bf16 %v4205_v5, %v4205_v5  ;;  %v4206_v60 = vmax.f32 %v4108_v42, 0.0  ;;  %v3810_v38 = vmax.f32 %v7765_v37, %v5761_v57  ;;  %v3908_v27 = vmax.f32 %v7766_v15, %v5957_v55  ;;  %v2759_v54 = vpop.f32.mrb[141].mxu0  ;;  %v3543_v23 = vpop.f32.mrb[141].mxu1  ;;  %v7777_v42 = vld [vmem:[#allocation54_spill] sm:$0xff] }
 0x20b   : > { %v5351_v59 = vpack.c.bf16 %v4203_v31, %v4203_v31  ;;  %v4204_v19 = vmax.f32 %v4106_v6, 0.0  ;;  %v3808_v24 = vmax.f32 %v7767_v20, %v2759_v54  ;;  %v3906_v39 = vmax.f32 %v7768_v32, %v3543_v23  ;;  %v5762_v47 = vpop.f32.mrb[142].mxu0  ;;  %v5958_v45 = vpop.f32.mrb[142].mxu1  ;;  %v7778_v6 = vld [vmem:[#allocation55_spill] sm:$0xff] }
 0x20c   : > { %4696 = vst.msk [vmem:[%s7087_s4 + $0xa0] sm:$0xf] %vm4655_vm2, %v5353_v58  ;;  %v5354_v46 = vpack.c.bf16 %v4206_v60, %v4206_v60  ;;  %v4006_v48 = vmax.f32 %v3810_v38, %v3908_v27  ;;  %v3811_v1 = vmax.f32 %v7769_v3, %v5762_v47  ;;  %v3909_v43 = vmax.f32 %v7770_v61, %v5958_v45  ;;  %v2762_v44 = vpop.f32.mrb[143].mxu0  ;;  %v3546_v25 = vpop.f32.mrb[143].mxu1  ;;  %v7779_v38 = vld [vmem:[#allocation44_spill] sm:$0xff]  ;;  %v7780_v27 = vld [vmem:[#allocation45_spill] sm:$0xff] }
 0x20d   : > { %4694 = vst.msk [vmem:[%s7087_s4 + $0x98] sm:$0xf] %vm4655_vm2, %v5351_v59  ;;  %v5352_v29 = vpack.c.bf16 %v4204_v19, %v4204_v19  ;;  %v4004_v26 = vmax.f32 %v3808_v24, %v3906_v39  ;;  %v3809_v2 = vmax.f32 %v7771_v30, %v2762_v44  ;;  %v3907_v14 = vmax.f32 %v7772_v13, %v3546_v25 }
 0x20e   : > { %4697 = vst.msk [vmem:[%s7087_s4 + $0xa4] sm:$0xf] %vm4655_vm2, %v5354_v46  ;;  %v4111_v11 = vadd.f32 %v7073_v28, %v4006_v48  ;;  %v4007_v62 = vmax.f32 %v3811_v1, %v3909_v43  ;;  %v7781_v1 = vld [vmem:[#allocation58_spill] sm:$0xff]  ;;  %v7782_v43 = vld [vmem:[#allocation59_spill] sm:$0xff] }
 0x20f   : > { %4695 = vst.msk [vmem:[%s7087_s4 + $0x9c] sm:$0xf] %vm4655_vm2, %v5352_v29  ;;  %v4109_v12 = vadd.f32 %v7073_v28, %v4004_v26  ;;  %v4005_v51 = vmax.f32 %v3809_v2, %v3907_v14  ;;  %v7783_v2 = vld [vmem:[#allocation48_spill] sm:$0xff]  ;;  %v7784_v14 = vld [vmem:[#allocation49_spill] sm:$0xff] }
 0x210   : > { %v4209_v52 = vmax.f32 %v4111_v11, 0.0  ;;  %v4112_v33 = vadd.f32 %v7073_v28, %v4007_v62 }
 0x211   : > { %v4207_v34 = vmax.f32 %v4109_v12, 0.0  ;;  %v4110_v63 = vadd.f32 %v7073_v28, %v4005_v51  ;;  %v5765_v16 = vpop.f32.mrb[144].mxu0  ;;  %v5961_v0 = vpop.f32.mrb[144].mxu1 }
 0x212   : > { %v5357_v49 = vpack.c.bf16 %v4209_v52, %v4209_v52  ;;  %v4210_v50 = vmax.f32 %v4112_v33, 0.0  ;;  %v3814_v17 = vmax.f32 %v7773_v56, %v5765_v16  ;;  %v3912_v35 = vmax.f32 %v7774_v4, %v5961_v0  ;;  %v2775_v18 = vpop.f32.mrb[145].mxu0  ;;  %v3559_v36 = vpop.f32.mrb[145].mxu1  ;;  %v7785_v33 = vld [vmem:[#allocation62_spill] sm:$0xff] }
 0x213   : > { %v5355_v21 = vpack.c.bf16 %v4207_v34, %v4207_v34  ;;  %v4208_v22 = vmax.f32 %v4110_v63, 0.0  ;;  %v3812_v8 = vmax.f32 %v7775_v7, %v2775_v18  ;;  %v3910_v40 = vmax.f32 %v7776_v9, %v3559_v36  ;;  %v5766_v10 = vpop.f32.mrb[146].mxu0  ;;  %v5962_v53 = vpop.f32.mrb[146].mxu1  ;;  %v7786_v63 = vld [vmem:[#allocation63_spill] sm:$0xff] }
 0x214   : > { %4700 = vst.msk [vmem:[%s7087_s4 + $0xb0] sm:$0xf] %vm4655_vm2, %v5357_v49  ;;  %v5358_v41 = vpack.c.bf16 %v4210_v50, %v4210_v50  ;;  %v4010_v5 = vmax.f32 %v3814_v17, %v3912_v35  ;;  %v3815_v31 = vmax.f32 %v7777_v42, %v5766_v10  ;;  %v3913_v57 = vmax.f32 %v7778_v6, %v5962_v53  ;;  %v2778_v55 = vpop.f32.mrb[147].mxu0  ;;  %v3562_v58 = vpop.f32.mrb[147].mxu1  ;;  %v7787_v17 = vld [vmem:[#allocation52_spill] sm:$0xff]  ;;  %v7788_v35 = vld [vmem:[#allocation53_spill] sm:$0xff] }
 0x215   : > { %4698 = vst.msk [vmem:[%s7087_s4 + $0xa8] sm:$0xf] %vm4655_vm2, %v5355_v21  ;;  %v5356_v60 = vpack.c.bf16 %v4208_v22, %v4208_v22  ;;  %v4008_v37 = vmax.f32 %v3812_v8, %v3910_v40  ;;  %v3813_v15 = vmax.f32 %v7779_v38, %v2778_v55  ;;  %v3911_v54 = vmax.f32 %v7780_v27, %v3562_v58 }
 0x216   : > { %4701 = vst.msk [vmem:[%s7087_s4 + $0xb4] sm:$0xf] %vm4655_vm2, %v5358_v41  ;;  %v4115_v23 = vadd.f32 %v7073_v28, %v4010_v5  ;;  %v4011_v59 = vmax.f32 %v3815_v31, %v3913_v57  ;;  %v7789_v31 = vld [vmem:[#allocation66_spill] sm:$0xff]  ;;  %v7790_v57 = vld [vmem:[#allocation67_spill] sm:$0xff] }
 0x217   : > { %4699 = vst.msk [vmem:[%s7087_s4 + $0xac] sm:$0xf] %vm4655_vm2, %v5356_v60  ;;  %v4113_v19 = vadd.f32 %v7073_v28, %v4008_v37  ;;  %v4009_v20 = vmax.f32 %v3813_v15, %v3911_v54  ;;  %v7791_v15 = vld [vmem:[#allocation56_spill] sm:$0xff]  ;;  %v7792_v54 = vld [vmem:[#allocation57_spill] sm:$0xff] }
 0x218   : > { %v4213_v24 = vmax.f32 %v4115_v23, 0.0  ;;  %v4116_v32 = vadd.f32 %v7073_v28, %v4011_v59 }
 0x219   : > { %v4211_v39 = vmax.f32 %v4113_v19, 0.0  ;;  %v4114_v47 = vadd.f32 %v7073_v28, %v4009_v20  ;;  %v5769_v45 = vpop.f32.mrb[148].mxu0  ;;  %v5965_v46 = vpop.f32.mrb[148].mxu1 }
 0x21a   : > { %v5361_v48 = vpack.c.bf16 %v4213_v24, %v4213_v24  ;;  %v4214_v3 = vmax.f32 %v4116_v32, 0.0  ;;  %v3818_v61 = vmax.f32 %v7781_v1, %v5769_v45  ;;  %v3916_v44 = vmax.f32 %v7782_v43, %v5965_v46  ;;  %v2791_v25 = vpop.f32.mrb[149].mxu0  ;;  %v3575_v29 = vpop.f32.mrb[149].mxu1  ;;  %v7793_v32 = vld [vmem:[#allocation70_spill] sm:$0xff] }
 0x21b   : > { %v5359_v26 = vpack.c.bf16 %v4211_v39, %v4211_v39  ;;  %v4212_v30 = vmax.f32 %v4114_v47, 0.0  ;;  %v3816_v13 = vmax.f32 %v7783_v2, %v2791_v25  ;;  %v3914_v11 = vmax.f32 %v7784_v14, %v3575_v29  ;;  %v5770_v62 = vpop.f32.mrb[150].mxu0  ;;  %v5966_v12 = vpop.f32.mrb[150].mxu1  ;;  %v7794_v47 = vld [vmem:[#allocation71_spill] sm:$0xff] }
 0x21c   : > { %4704 = vst.msk [vmem:[%s7087_s4 + $0xc0] sm:$0xf] %vm4655_vm2, %v5361_v48  ;;  %v5362_v51 = vpack.c.bf16 %v4214_v3, %v4214_v3  ;;  %v4014_v52 = vmax.f32 %v3818_v61, %v3916_v44  ;;  %v3819_v34 = vmax.f32 %v7785_v33, %v5770_v62  ;;  %v3917_v16 = vmax.f32 %v7786_v63, %v5966_v12  ;;  %v2794_v0 = vpop.f32.mrb[151].mxu0  ;;  %v3578_v49 = vpop.f32.mrb[151].mxu1  ;;  %v7795_v61 = vld [vmem:[#allocation60_spill] sm:$0xff]  ;;  %v7796_v44 = vld [vmem:[#allocation61_spill] sm:$0xff] }
 0x21d   : > { %4702 = vst.msk [vmem:[%s7087_s4 + $0xb8] sm:$0xf] %vm4655_vm2, %v5359_v26  ;;  %v5360_v50 = vpack.c.bf16 %v4212_v30, %v4212_v30  ;;  %v4012_v56 = vmax.f32 %v3816_v13, %v3914_v11  ;;  %v3817_v4 = vmax.f32 %v7787_v17, %v2794_v0  ;;  %v3915_v18 = vmax.f32 %v7788_v35, %v3578_v49  ;;  %v7367_v62 = vld [vmem:[%s7583_s2] ss:$0 sm:$0xff]  ;;  %v7798_v0 = vld [vmem:[#allocation75_spill] sm:$0xff] }
 0x21e   : > { %4705 = vst.msk [vmem:[%s7087_s4 + $0xc4] sm:$0xf] %vm4655_vm2, %v5362_v51  ;;  %v4119_v36 = vadd.f32 %v7073_v28, %v4014_v52  ;;  %v4015_v21 = vmax.f32 %v3819_v34, %v3917_v16  ;;  %v7797_v63 = vld [vmem:[#allocation74_spill] sm:$0xff] }
 0x21f   : > { %4703 = vst.msk [vmem:[%s7087_s4 + $0xbc] sm:$0xf] %vm4655_vm2, %v5360_v50  ;;  %v4117_v22 = vadd.f32 %v7073_v28, %v4012_v56  ;;  %v4013_v7 = vmax.f32 %v3817_v4, %v3915_v18  ;;  %v7799_v4 = vld [vmem:[#allocation64_spill] sm:$0xff]  ;;  %v7800_v18 = vld [vmem:[#allocation65_spill] sm:$0xff] }
 0x220   : > { %v4217_v8 = vmax.f32 %v4119_v36, 0.0  ;;  %v4120_v9 = vadd.f32 %v7073_v28, %v4015_v21 }
 0x221   : > { %v4215_v40 = vmax.f32 %v4117_v22, 0.0  ;;  %v4118_v10 = vadd.f32 %v7073_v28, %v4013_v7  ;;  %v5773_v53 = vpop.f32.mrb[152].mxu0  ;;  %v5969_v41 = vpop.f32.mrb[152].mxu1 }
 0x222   : > { %v5365_v5 = vpack.c.bf16 %v4217_v8, %v4217_v8  ;;  %v4218_v42 = vmax.f32 %v4120_v9, 0.0  ;;  %v3822_v6 = vmax.f32 %v7789_v31, %v5773_v53  ;;  %v3920_v55 = vmax.f32 %v7790_v57, %v5969_v41  ;;  %v2807_v58 = vpop.f32.mrb[153].mxu0  ;;  %v3591_v60 = vpop.f32.mrb[153].mxu1  ;;  %v7801_v9 = vld [vmem:[#allocation78_spill] sm:$0xff] }
 0x223   : > { %v5363_v37 = vpack.c.bf16 %v4215_v40, %v4215_v40  ;;  %v4216_v38 = vmax.f32 %v4118_v10, 0.0  ;;  %v3820_v27 = vmax.f32 %v7791_v15, %v2807_v58  ;;  %v3918_v23 = vmax.f32 %v7792_v54, %v3591_v60  ;;  %v5774_v59 = vpop.f32.mrb[154].mxu0  ;;  %v5970_v19 = vpop.f32.mrb[154].mxu1  ;;  %v7802_v10 = vld [vmem:[#allocation79_spill] sm:$0xff] }
 0x224   : > { %4708 = vst.msk [vmem:[%s7087_s4 + $0xd0] sm:$0xf] %vm4655_vm2, %v5365_v5  ;;  %v5366_v20 = vpack.c.bf16 %v4218_v42, %v4218_v42  ;;  %v4018_v24 = vmax.f32 %v3822_v6, %v3920_v55  ;;  %v3823_v39 = vmax.f32 %v7793_v32, %v5774_v59  ;;  %v3921_v45 = vmax.f32 %v7794_v47, %v5970_v19  ;;  %v2810_v46 = vpop.f32.mrb[155].mxu0  ;;  %v3594_v48 = vpop.f32.mrb[155].mxu1  ;;  %v7803_v6 = vld [vmem:[#allocation68_spill] sm:$0xff]  ;;  %v7804_v55 = vld [vmem:[#allocation69_spill] sm:$0xff] }
 0x225   : > { %4706 = vst.msk [vmem:[%s7087_s4 + $0xc8] sm:$0xf] %vm4655_vm2, %v5363_v37  ;;  %v5364_v3 = vpack.c.bf16 %v4216_v38, %v4216_v38  ;;  %v4016_v1 = vmax.f32 %v3820_v27, %v3918_v23  ;;  %v3821_v43 = vmax.f32 %v7795_v61, %v2810_v46  ;;  %v3919_v25 = vmax.f32 %v7796_v44, %v3594_v48 }
 0x226   : > { %4709 = vst.msk [vmem:[%s7087_s4 + $0xd4] sm:$0xf] %vm4655_vm2, %v5366_v20  ;;  %v4123_v29 = vadd.f32 %v7073_v28, %v4018_v24  ;;  %v4019_v26 = vmax.f32 %v3823_v39, %v3921_v45  ;;  %v7805_v39 = vld [vmem:[#allocation82_spill] sm:$0xff]  ;;  %v7806_v45 = vld [vmem:[#allocation83_spill] sm:$0xff] }
 0x227   : > { %4707 = vst.msk [vmem:[%s7087_s4 + $0xcc] sm:$0xf] %vm4655_vm2, %v5364_v3  ;;  %v4121_v30 = vadd.f32 %v7073_v28, %v4016_v1  ;;  %v4017_v2 = vmax.f32 %v3821_v43, %v3919_v25  ;;  %v7807_v43 = vld [vmem:[#allocation72_spill] sm:$0xff]  ;;  %v7808_v25 = vld [vmem:[#allocation73_spill] sm:$0xff] }
 0x228   : > { %v4221_v13 = vmax.f32 %v4123_v29, 0.0  ;;  %v4124_v14 = vadd.f32 %v7073_v28, %v4019_v26 }
 0x229   : > { %v4219_v11 = vmax.f32 %v4121_v30, 0.0  ;;  %v4122_v12 = vadd.f32 %v7367_v62, %v4017_v2  ;;  %v5777_v51 = vpop.f32.mrb[156].mxu0  ;;  %v5973_v52 = vpop.f32.mrb[156].mxu1 }
 0x22a   : > { %v5369_v33 = vpack.c.bf16 %v4221_v13, %v4221_v13  ;;  %v4222_v34 = vmax.f32 %v4124_v14, 0.0  ;;  %v3826_v16 = vmax.f32 %v7797_v63, %v5777_v51  ;;  %v3924_v49 = vmax.f32 %v7798_v0, %v5973_v52  ;;  %v2823_v50 = vpop.f32.mrb[157].mxu0  ;;  %v3607_v28 = vpop.f32.mrb[157].mxu1  ;;  %v7809_v14 = vld [vmem:[#allocation86_spill] sm:$0xff] }
 0x22b   : > { %v5367_v56 = vpack.c.bf16 %v4219_v11, %v4219_v11  ;;  %v4220_v17 = vmax.f32 %v4122_v12, 0.0  ;;  %v3824_v35 = vmax.f32 %v7799_v4, %v2823_v50  ;;  %v3922_v36 = vmax.f32 %v7800_v18, %v3607_v28  ;;  %v5778_v21 = vpop.f32.mrb[158].mxu0  ;;  %v5974_v22 = vpop.f32.mrb[158].mxu1  ;;  %v7810_v12 = vld [vmem:[#allocation87_spill] sm:$0xff] }
 0x22c   : > { %4712 = vst.msk [vmem:[%s7087_s4 + $0xe0] sm:$0xf] %vm4655_vm2, %v5369_v33  ;;  %v5370_v7 = vpack.c.bf16 %v4222_v34, %v4222_v34  ;;  %v4022_v8 = vmax.f32 %v3826_v16, %v3924_v49  ;;  %v3827_v40 = vmax.f32 %v7801_v9, %v5778_v21  ;;  %v3925_v53 = vmax.f32 %v7802_v10, %v5974_v22  ;;  %v2826_v41 = vpop.f32.mrb[159].mxu0  ;;  %v3610_v5 = vpop.f32.mrb[159].mxu1  ;;  %v7811_v16 = vld [vmem:[#allocation76_spill] sm:$0xff]  ;;  %v7812_v49 = vld [vmem:[#allocation77_spill] sm:$0xff] }
 0x22d   : > { %4710 = vst.msk [vmem:[%s7087_s4 + $0xd8] sm:$0xf] %vm4655_vm2, %v5367_v56  ;;  %v5368_v42 = vpack.c.bf16 %v4220_v17, %v4220_v17  ;;  %v4020_v31 = vmax.f32 %v3824_v35, %v3922_v36  ;;  %v3825_v57 = vmax.f32 %v7803_v6, %v2826_v41  ;;  %v3923_v58 = vmax.f32 %v7804_v55, %v3610_v5 }
 0x22e   : > { %4713 = vst.msk [vmem:[%s7087_s4 + $0xe4] sm:$0xf] %vm4655_vm2, %v5370_v7  ;;  %v4127_v60 = vadd.f32 %v7367_v62, %v4022_v8  ;;  %v4023_v37 = vmax.f32 %v3827_v40, %v3925_v53  ;;  %v7813_v40 = vld [vmem:[#allocation90_spill] sm:$0xff]  ;;  %v7814_v53 = vld [vmem:[#allocation91_spill] sm:$0xff] }
 0x22f   : > { %4711 = vst.msk [vmem:[%s7087_s4 + $0xdc] sm:$0xf] %vm4655_vm2, %v5368_v42  ;;  %v4125_v38 = vadd.f32 %v7367_v62, %v4020_v31  ;;  %v4021_v15 = vmax.f32 %v3825_v57, %v3923_v58  ;;  %v7815_v57 = vld [vmem:[#allocation80_spill] sm:$0xff]  ;;  %v7816_v58 = vld [vmem:[#allocation81_spill] sm:$0xff] }
 0x230   : > { %v4225_v27 = vmax.f32 %v4127_v60, 0.0  ;;  %v4128_v54 = vadd.f32 %v7367_v62, %v4023_v37 }
 0x231   : > { %v4223_v23 = vmax.f32 %v4125_v38, 0.0  ;;  %v4126_v59 = vadd.f32 %v7367_v62, %v4021_v15  ;;  %v5781_v19 = vpop.f32.mrb[160].mxu0  ;;  %v5977_v20 = vpop.f32.mrb[160].mxu1 }
 0x232   : > { %v5373_v24 = vpack.c.bf16 %v4225_v27, %v4225_v27  ;;  %v4226_v32 = vmax.f32 %v4128_v54, 0.0  ;;  %v3830_v47 = vmax.f32 %v7805_v39, %v5781_v19  ;;  %v3928_v46 = vmax.f32 %v7806_v45, %v5977_v20  ;;  %v2839_v48 = vpop.f32.mrb[161].mxu0  ;;  %v3623_v3 = vpop.f32.mrb[161].mxu1  ;;  %v7817_v54 = vld [vmem:[#allocation94_spill] sm:$0xff] }
 0x233   : > { %v5371_v1 = vpack.c.bf16 %v4223_v23, %v4223_v23  ;;  %v4224_v61 = vmax.f32 %v4126_v59, 0.0  ;;  %v3828_v44 = vmax.f32 %v7807_v43, %v2839_v48  ;;  %v3926_v29 = vmax.f32 %v7808_v25, %v3623_v3  ;;  %v5782_v26 = vpop.f32.mrb[162].mxu0  ;;  %v5978_v30 = vpop.f32.mrb[162].mxu1  ;;  %v7818_v59 = vld [vmem:[#allocation95_spill] sm:$0xff] }
 0x234   : > { %4716 = vst.msk [vmem:[%s7087_s4 + $0xf0] sm:$0xf] %vm4655_vm2, %v5373_v24  ;;  %v5374_v2 = vpack.c.bf16 %v4226_v32, %v4226_v32  ;;  %v4026_v13 = vmax.f32 %v3830_v47, %v3928_v46  ;;  %v3831_v11 = vmax.f32 %v7809_v14, %v5782_v26  ;;  %v3929_v51 = vmax.f32 %v7810_v12, %v5978_v30  ;;  %v2842_v52 = vpop.f32.mrb[163].mxu0  ;;  %v3626_v33 = vpop.f32.mrb[163].mxu1  ;;  %v7819_v47 = vld [vmem:[#allocation84_spill] sm:$0xff]  ;;  %v7820_v46 = vld [vmem:[#allocation85_spill] sm:$0xff] }
 0x235   : > { %4714 = vst.msk [vmem:[%s7087_s4 + $0xe8] sm:$0xf] %vm4655_vm2, %v5371_v1  ;;  %v5372_v34 = vpack.c.bf16 %v4224_v61, %v4224_v61  ;;  %v4024_v63 = vmax.f32 %v3828_v44, %v3926_v29  ;;  %v3829_v0 = vmax.f32 %v7811_v16, %v2842_v52  ;;  %v3927_v50 = vmax.f32 %v7812_v49, %v3626_v33 }
 0x236   : > { %4717 = vst.msk [vmem:[%s7087_s4 + $0xf4] sm:$0xf] %vm4655_vm2, %v5374_v2  ;;  %v4131_v28 = vadd.f32 %v7367_v62, %v4026_v13  ;;  %v4027_v56 = vmax.f32 %v3831_v11, %v3929_v51  ;;  %v7821_v11 = vld [vmem:[#allocation98_spill] sm:$0xff]  ;;  %v7822_v51 = vld [vmem:[#allocation99_spill] sm:$0xff] }
 0x237   : > { %4715 = vst.msk [vmem:[%s7087_s4 + $0xec] sm:$0xf] %vm4655_vm2, %v5372_v34  ;;  %v4129_v17 = vadd.f32 %v7367_v62, %v4024_v63  ;;  %v4025_v4 = vmax.f32 %v3829_v0, %v3927_v50  ;;  %v7823_v0 = vld [vmem:[#allocation88_spill] sm:$0xff]  ;;  %v7824_v50 = vld [vmem:[#allocation89_spill] sm:$0xff] }
 0x238   : > { %v4229_v35 = vmax.f32 %v4131_v28, 0.0  ;;  %v4132_v18 = vadd.f32 %v7367_v62, %v4027_v56 }
 0x239   : > { %v4227_v36 = vmax.f32 %v4129_v17, 0.0  ;;  %v4130_v21 = vadd.f32 %v7367_v62, %v4025_v4  ;;  %v5785_v22 = vpop.f32.mrb[164].mxu0  ;;  %v5981_v7 = vpop.f32.mrb[164].mxu1 }
 0x23a   : > { %v5377_v8 = vpack.c.bf16 %v4229_v35, %v4229_v35  ;;  %v4230_v9 = vmax.f32 %v4132_v18, 0.0  ;;  %v3834_v10 = vmax.f32 %v7813_v40, %v5785_v22  ;;  %v3932_v41 = vmax.f32 %v7814_v53, %v5981_v7  ;;  %v2855_v5 = vpop.f32.mrb[165].mxu0  ;;  %v3639_v42 = vpop.f32.mrb[165].mxu1  ;;  %v7825_v18 = vld [vmem:[#allocation102_spill] sm:$0xff] }
 0x23b   : > { %v5375_v31 = vpack.c.bf16 %v4227_v36, %v4227_v36  ;;  %v4228_v6 = vmax.f32 %v4130_v21, 0.0  ;;  %v3832_v55 = vmax.f32 %v7815_v57, %v2855_v5  ;;  %v3930_v60 = vmax.f32 %v7816_v58, %v3639_v42  ;;  %v5786_v37 = vpop.f32.mrb[166].mxu0  ;;  %v5982_v38 = vpop.f32.mrb[166].mxu1  ;;  %v7826_v21 = vld [vmem:[#allocation103_spill] sm:$0xff] }
 0x23c   : > { %4720 = vst.msk [vmem:[%s7087_s4 + $0x100] sm:$0xf] %vm4655_vm2, %v5377_v8  ;;  %v5378_v15 = vpack.c.bf16 %v4230_v9, %v4230_v9  ;;  %v4030_v27 = vmax.f32 %v3834_v10, %v3932_v41  ;;  %v3835_v23 = vmax.f32 %v7817_v54, %v5786_v37  ;;  %v3933_v19 = vmax.f32 %v7818_v59, %v5982_v38  ;;  %v2858_v20 = vpop.f32.mrb[167].mxu0  ;;  %v3642_v24 = vpop.f32.mrb[167].mxu1  ;;  %v7827_v10 = vld [vmem:[#allocation92_spill] sm:$0xff]  ;;  %v7828_v41 = vld [vmem:[#allocation93_spill] sm:$0xff] }
 0x23d   : > { %4718 = vst.msk [vmem:[%s7087_s4 + $0xf8] sm:$0xf] %vm4655_vm2, %v5375_v31  ;;  %v5376_v32 = vpack.c.bf16 %v4228_v6, %v4228_v6  ;;  %v4028_v39 = vmax.f32 %v3832_v55, %v3930_v60  ;;  %v3833_v45 = vmax.f32 %v7819_v47, %v2858_v20  ;;  %v3931_v48 = vmax.f32 %v7820_v46, %v3642_v24 }
 0x23e   : > { %4721 = vst.msk [vmem:[%s7087_s4 + $0x104] sm:$0xf] %vm4655_vm2, %v5378_v15  ;;  %v4135_v3 = vadd.f32 %v7367_v62, %v4030_v27  ;;  %v4031_v1 = vmax.f32 %v3835_v23, %v3933_v19  ;;  %v7829_v23 = vld [vmem:[#allocation106_spill] sm:$0xff]  ;;  %v7830_v19 = vld [vmem:[#allocation107_spill] sm:$0xff] }
 0x23f   : > { %4719 = vst.msk [vmem:[%s7087_s4 + $0xfc] sm:$0xf] %vm4655_vm2, %v5376_v32  ;;  %v4133_v61 = vadd.f32 %v7367_v62, %v4028_v39  ;;  %v4029_v43 = vmax.f32 %v3833_v45, %v3931_v48  ;;  %v7831_v45 = vld [vmem:[#allocation96_spill] sm:$0xff]  ;;  %v7832_v48 = vld [vmem:[#allocation97_spill] sm:$0xff] }
 0x240   : > { %v4233_v44 = vmax.f32 %v4135_v3, 0.0  ;;  %v4136_v25 = vadd.f32 %v7367_v62, %v4031_v1 }
 0x241   : > { %v4231_v29 = vmax.f32 %v4133_v61, 0.0  ;;  %v4134_v26 = vadd.f32 %v7367_v62, %v4029_v43  ;;  %v5789_v30 = vpop.f32.mrb[168].mxu0  ;;  %v5985_v2 = vpop.f32.mrb[168].mxu1 }
 0x242   : > { %v5381_v13 = vpack.c.bf16 %v4233_v44, %v4233_v44  ;;  %v4234_v14 = vmax.f32 %v4136_v25, 0.0  ;;  %v3838_v12 = vmax.f32 %v7821_v11, %v5789_v30  ;;  %v3936_v52 = vmax.f32 %v7822_v51, %v5985_v2  ;;  %v2871_v33 = vpop.f32.mrb[169].mxu0  ;;  %v3655_v34 = vpop.f32.mrb[169].mxu1  ;;  %v7833_v25 = vld [vmem:[#allocation110_spill] sm:$0xff] }
 0x243   : > { %v5379_v63 = vpack.c.bf16 %v4231_v29, %v4231_v29  ;;  %v4232_v16 = vmax.f32 %v4134_v26, 0.0  ;;  %v3836_v49 = vmax.f32 %v7823_v0, %v2871_v33  ;;  %v3934_v28 = vmax.f32 %v7824_v50, %v3655_v34  ;;  %v5790_v56 = vpop.f32.mrb[170].mxu0  ;;  %v5986_v17 = vpop.f32.mrb[170].mxu1  ;;  %v7834_v26 = vld [vmem:[#allocation111_spill] sm:$0xff] }
 0x244   : > { %4724 = vst.msk [vmem:[%s7087_s4 + $0x110] sm:$0xf] %vm4655_vm2, %v5381_v13  ;;  %v5382_v4 = vpack.c.bf16 %v4234_v14, %v4234_v14  ;;  %v4034_v35 = vmax.f32 %v3838_v12, %v3936_v52  ;;  %v3839_v36 = vmax.f32 %v7825_v18, %v5790_v56  ;;  %v3937_v22 = vmax.f32 %v7826_v21, %v5986_v17  ;;  %v2874_v7 = vpop.f32.mrb[171].mxu0  ;;  %v3658_v8 = vpop.f32.mrb[171].mxu1  ;;  %v7835_v12 = vld [vmem:[#allocation100_spill] sm:$0xff]  ;;  %v7836_v52 = vld [vmem:[#allocation101_spill] sm:$0xff] }
 0x245   : > { %4722 = vst.msk [vmem:[%s7087_s4 + $0x108] sm:$0xf] %vm4655_vm2, %v5379_v63  ;;  %v5380_v9 = vpack.c.bf16 %v4232_v16, %v4232_v16  ;;  %v4032_v40 = vmax.f32 %v3836_v49, %v3934_v28  ;;  %v3837_v53 = vmax.f32 %v7827_v10, %v2874_v7  ;;  %v3935_v5 = vmax.f32 %v7828_v41, %v3658_v8 }
 0x246   : > { %4725 = vst.msk [vmem:[%s7087_s4 + $0x114] sm:$0xf] %vm4655_vm2, %v5382_v4  ;;  %v4139_v42 = vadd.f32 %v7367_v62, %v4034_v35  ;;  %v4035_v31 = vmax.f32 %v3839_v36, %v3937_v22  ;;  %v7837_v36 = vld [vmem:[#allocation114_spill] sm:$0xff]  ;;  %v7838_v22 = vld [vmem:[#allocation115_spill] sm:$0xff] }
 0x247   : > { %4723 = vst.msk [vmem:[%s7087_s4 + $0x10c] sm:$0xf] %vm4655_vm2, %v5380_v9  ;;  %v4137_v6 = vadd.f32 %v7367_v62, %v4032_v40  ;;  %v4033_v57 = vmax.f32 %v3837_v53, %v3935_v5  ;;  %v7839_v53 = vld [vmem:[#allocation104_spill] sm:$0xff]  ;;  %v7840_v5 = vld [vmem:[#allocation105_spill] sm:$0xff] }
 0x248   : > { %v4237_v55 = vmax.f32 %v4139_v42, 0.0  ;;  %v4140_v58 = vadd.f32 %v7367_v62, %v4035_v31 }
 0x249   : > { %v4235_v60 = vmax.f32 %v4137_v6, 0.0  ;;  %v4138_v37 = vadd.f32 %v7367_v62, %v4033_v57  ;;  %v5793_v38 = vpop.f32.mrb[172].mxu0  ;;  %v5989_v15 = vpop.f32.mrb[172].mxu1 }
 0x24a   : > { %v5385_v27 = vpack.c.bf16 %v4237_v55, %v4237_v55  ;;  %v4238_v54 = vmax.f32 %v4140_v58, 0.0  ;;  %v3842_v59 = vmax.f32 %v7829_v23, %v5793_v38  ;;  %v3940_v20 = vmax.f32 %v7830_v19, %v5989_v15  ;;  %v2887_v24 = vpop.f32.mrb[173].mxu0  ;;  %v3671_v32 = vpop.f32.mrb[173].mxu1  ;;  %v7841_v58 = vld [vmem:[#allocation118_spill] sm:$0xff] }
 0x24b   : > { %v5383_v39 = vpack.c.bf16 %v4235_v60, %v4235_v60  ;;  %v4236_v47 = vmax.f32 %v4138_v37, 0.0  ;;  %v3840_v46 = vmax.f32 %v7831_v45, %v2887_v24  ;;  %v3938_v3 = vmax.f32 %v7832_v48, %v3671_v32  ;;  %v5794_v1 = vpop.f32.mrb[174].mxu0  ;;  %v5990_v61 = vpop.f32.mrb[174].mxu1  ;;  %v7842_v37 = vld [vmem:[#allocation119_spill] sm:$0xff] }
 0x24c   : > { %4728 = vst.msk [vmem:[%s7087_s4 + $0x120] sm:$0xf] %vm4655_vm2, %v5385_v27  ;;  %v5386_v43 = vpack.c.bf16 %v4238_v54, %v4238_v54  ;;  %v4038_v44 = vmax.f32 %v3842_v59, %v3940_v20  ;;  %v3843_v29 = vmax.f32 %v7833_v25, %v5794_v1  ;;  %v3941_v30 = vmax.f32 %v7834_v26, %v5990_v61  ;;  %v2890_v2 = vpop.f32.mrb[175].mxu0  ;;  %v3674_v13 = vpop.f32.mrb[175].mxu1  ;;  %v7843_v59 = vld [vmem:[#allocation108_spill] sm:$0xff]  ;;  %v7844_v20 = vld [vmem:[#allocation109_spill] sm:$0xff] }
 0x24d   : > { %4726 = vst.msk [vmem:[%s7087_s4 + $0x118] sm:$0xf] %vm4655_vm2, %v5383_v39  ;;  %v5384_v14 = vpack.c.bf16 %v4236_v47, %v4236_v47  ;;  %v4036_v11 = vmax.f32 %v3840_v46, %v3938_v3  ;;  %v3841_v51 = vmax.f32 %v7835_v12, %v2890_v2  ;;  %v3939_v33 = vmax.f32 %v7836_v52, %v3674_v13 }
 0x24e   : > { %4729 = vst.msk [vmem:[%s7087_s4 + $0x124] sm:$0xf] %vm4655_vm2, %v5386_v43  ;;  %v4143_v34 = vadd.f32 %v7367_v62, %v4038_v44  ;;  %v4039_v63 = vmax.f32 %v3843_v29, %v3941_v30  ;;  %v7845_v29 = vld [vmem:[#allocation122_spill] sm:$0xff]  ;;  %v7846_v30 = vld [vmem:[#allocation123_spill] sm:$0xff] }
 0x24f   : > { %4727 = vst.msk [vmem:[%s7087_s4 + $0x11c] sm:$0xf] %vm4655_vm2, %v5384_v14  ;;  %v4141_v16 = vadd.f32 %v7367_v62, %v4036_v11  ;;  %v4037_v0 = vmax.f32 %v3841_v51, %v3939_v33  ;;  %v7847_v51 = vld [vmem:[#allocation112_spill] sm:$0xff]  ;;  %v7848_v33 = vld [vmem:[#allocation113_spill] sm:$0xff] }
 0x250   : > { %v4241_v49 = vmax.f32 %v4143_v34, 0.0  ;;  %v4144_v50 = vadd.f32 %v7367_v62, %v4039_v63 }
 0x251   : > { %v4239_v28 = vmax.f32 %v4141_v16, 0.0  ;;  %v4142_v56 = vadd.f32 %v7367_v62, %v4037_v0  ;;  %v5797_v17 = vpop.f32.mrb[176].mxu0  ;;  %v5993_v4 = vpop.f32.mrb[176].mxu1 }
 0x252   : > { %v5389_v35 = vpack.c.bf16 %v4241_v49, %v4241_v49  ;;  %v4242_v18 = vmax.f32 %v4144_v50, 0.0  ;;  %v3846_v21 = vmax.f32 %v7837_v36, %v5797_v17  ;;  %v3944_v7 = vmax.f32 %v7838_v22, %v5993_v4  ;;  %v2903_v8 = vpop.f32.mrb[177].mxu0  ;;  %v3687_v9 = vpop.f32.mrb[177].mxu1  ;;  %v7849_v50 = vld [vmem:[#allocation126_spill] sm:$0xff] }
 0x253   : > { %v5387_v40 = vpack.c.bf16 %v4239_v28, %v4239_v28  ;;  %v4240_v10 = vmax.f32 %v4142_v56, 0.0  ;;  %v3844_v41 = vmax.f32 %v7839_v53, %v2903_v8  ;;  %v3942_v42 = vmax.f32 %v7840_v5, %v3687_v9  ;;  %v5798_v31 = vpop.f32.mrb[178].mxu0  ;;  %v5994_v6 = vpop.f32.mrb[178].mxu1  ;;  %v7850_v56 = vld [vmem:[#allocation127_spill] sm:$0xff] }
 0x254   : > { %4732 = vst.msk [vmem:[%s7087_s4 + $0x130] sm:$0xf] %vm4655_vm2, %v5389_v35  ;;  %v5390_v57 = vpack.c.bf16 %v4242_v18, %v4242_v18  ;;  %v4042_v55 = vmax.f32 %v3846_v21, %v3944_v7  ;;  %v3847_v60 = vmax.f32 %v7841_v58, %v5798_v31  ;;  %v3945_v38 = vmax.f32 %v7842_v37, %v5994_v6  ;;  %v2906_v15 = vpop.f32.mrb[179].mxu0  ;;  %v3690_v27 = vpop.f32.mrb[179].mxu1  ;;  %v7851_v21 = vld [vmem:[#allocation116_spill] sm:$0xff]  ;;  %v7852_v7 = vld [vmem:[#allocation117_spill] sm:$0xff] }
 0x255   : > { %4730 = vst.msk [vmem:[%s7087_s4 + $0x128] sm:$0xf] %vm4655_vm2, %v5387_v40  ;;  %v5388_v54 = vpack.c.bf16 %v4240_v10, %v4240_v10  ;;  %v4040_v23 = vmax.f32 %v3844_v41, %v3942_v42  ;;  %v3845_v19 = vmax.f32 %v7843_v59, %v2906_v15  ;;  %v3943_v24 = vmax.f32 %v7844_v20, %v3690_v27 }
 0x256   : > { %4733 = vst.msk [vmem:[%s7087_s4 + $0x134] sm:$0xf] %vm4655_vm2, %v5390_v57  ;;  %v4147_v32 = vadd.f32 %v7367_v62, %v4042_v55  ;;  %v4043_v39 = vmax.f32 %v3847_v60, %v3945_v38  ;;  %v7853_v60 = vld [vmem:[#allocation130_spill] sm:$0xff]  ;;  %v7854_v38 = vld [vmem:[#allocation131_spill] sm:$0xff] }
 0x257   : > { %4731 = vst.msk [vmem:[%s7087_s4 + $0x12c] sm:$0xf] %vm4655_vm2, %v5388_v54  ;;  %v4145_v47 = vadd.f32 %v7367_v62, %v4040_v23  ;;  %v4041_v45 = vmax.f32 %v3845_v19, %v3943_v24  ;;  %v7855_v19 = vld [vmem:[#allocation120_spill] sm:$0xff]  ;;  %v7856_v24 = vld [vmem:[#allocation121_spill] sm:$0xff] }
 0x258   : > { %v4245_v46 = vmax.f32 %v4147_v32, 0.0  ;;  %v4148_v48 = vadd.f32 %v7367_v62, %v4043_v39 }
 0x259   : > { %v4243_v3 = vmax.f32 %v4145_v47, 0.0  ;;  %v4146_v1 = vadd.f32 %v7367_v62, %v4041_v45  ;;  %v5801_v61 = vpop.f32.mrb[180].mxu0  ;;  %v5997_v43 = vpop.f32.mrb[180].mxu1 }
 0x25a   : > { %v5393_v44 = vpack.c.bf16 %v4245_v46, %v4245_v46  ;;  %v4246_v25 = vmax.f32 %v4148_v48, 0.0  ;;  %v3850_v26 = vmax.f32 %v7845_v29, %v5801_v61  ;;  %v3948_v2 = vmax.f32 %v7846_v30, %v5997_v43  ;;  %v2919_v13 = vpop.f32.mrb[181].mxu0  ;;  %v3703_v14 = vpop.f32.mrb[181].mxu1  ;;  %v7857_v48 = vld [vmem:[#allocation134_spill] sm:$0xff] }
 0x25b   : > { %v5391_v11 = vpack.c.bf16 %v4243_v3, %v4243_v3  ;;  %v4244_v12 = vmax.f32 %v4146_v1, 0.0  ;;  %v3848_v52 = vmax.f32 %v7847_v51, %v2919_v13  ;;  %v3946_v34 = vmax.f32 %v7848_v33, %v3703_v14  ;;  %v5802_v63 = vpop.f32.mrb[182].mxu0  ;;  %v5998_v16 = vpop.f32.mrb[182].mxu1  ;;  %v7858_v1 = vld [vmem:[#allocation135_spill] sm:$0xff] }
 0x25c   : > { %4736 = vst.msk [vmem:[%s7087_s4 + $0x140] sm:$0xf] %vm4655_vm2, %v5393_v44  ;;  %v5394_v0 = vpack.c.bf16 %v4246_v25, %v4246_v25  ;;  %v4046_v49 = vmax.f32 %v3850_v26, %v3948_v2  ;;  %v3851_v28 = vmax.f32 %v7849_v50, %v5802_v63  ;;  %v3949_v17 = vmax.f32 %v7850_v56, %v5998_v16  ;;  %v2922_v4 = vpop.f32.mrb[183].mxu0  ;;  %v3706_v35 = vpop.f32.mrb[183].mxu1  ;;  %v7859_v26 = vld [vmem:[#allocation124_spill] sm:$0xff]  ;;  %v7860_v2 = vld [vmem:[#allocation125_spill] sm:$0xff] }
 0x25d   : > { %4734 = vst.msk [vmem:[%s7087_s4 + $0x138] sm:$0xf] %vm4655_vm2, %v5391_v11  ;;  %v5392_v18 = vpack.c.bf16 %v4244_v12, %v4244_v12  ;;  %v4044_v36 = vmax.f32 %v3848_v52, %v3946_v34  ;;  %v3849_v22 = vmax.f32 %v7851_v21, %v2922_v4  ;;  %v3947_v8 = vmax.f32 %v7852_v7, %v3706_v35 }
 0x25e   : > { %4737 = vst.msk [vmem:[%s7087_s4 + $0x144] sm:$0xf] %vm4655_vm2, %v5394_v0  ;;  %v4151_v9 = vadd.f32 %v7367_v62, %v4046_v49  ;;  %v4047_v40 = vmax.f32 %v3851_v28, %v3949_v17  ;;  %v7861_v28 = vld [vmem:[#allocation138_spill] sm:$0xff]  ;;  %v7862_v17 = vld [vmem:[#allocation139_spill] sm:$0xff] }
 0x25f   : > { %4735 = vst.msk [vmem:[%s7087_s4 + $0x13c] sm:$0xf] %vm4655_vm2, %v5392_v18  ;;  %v4149_v10 = vadd.f32 %v7367_v62, %v4044_v36  ;;  %v4045_v53 = vmax.f32 %v3849_v22, %v3947_v8  ;;  %v7863_v22 = vld [vmem:[#allocation128_spill] sm:$0xff]  ;;  %v7864_v8 = vld [vmem:[#allocation129_spill] sm:$0xff] }
 0x260   : > { %v4249_v41 = vmax.f32 %v4151_v9, 0.0  ;;  %v4152_v5 = vadd.f32 %v7367_v62, %v4047_v40 }
 0x261   : > { %v4247_v42 = vmax.f32 %v4149_v10, 0.0  ;;  %v4150_v31 = vadd.f32 %v7367_v62, %v4045_v53  ;;  %v5805_v6 = vpop.f32.mrb[184].mxu0  ;;  %v6001_v57 = vpop.f32.mrb[184].mxu1 }
 0x262   : > { %v5397_v55 = vpack.c.bf16 %v4249_v41, %v4249_v41  ;;  %v4250_v58 = vmax.f32 %v4152_v5, 0.0  ;;  %v3854_v37 = vmax.f32 %v7853_v60, %v5805_v6  ;;  %v3952_v15 = vmax.f32 %v7854_v38, %v6001_v57  ;;  %v2935_v27 = vpop.f32.mrb[185].mxu0  ;;  %v3719_v54 = vpop.f32.mrb[185].mxu1  ;;  %v7865_v5 = vld [vmem:[#allocation142_spill] sm:$0xff] }
 0x263   : > { %v5395_v23 = vpack.c.bf16 %v4247_v42, %v4247_v42  ;;  %v4248_v59 = vmax.f32 %v4150_v31, 0.0  ;;  %v3852_v20 = vmax.f32 %v7855_v19, %v2935_v27  ;;  %v3950_v32 = vmax.f32 %v7856_v24, %v3719_v54  ;;  %v5806_v39 = vpop.f32.mrb[186].mxu0  ;;  %v6002_v47 = vpop.f32.mrb[186].mxu1  ;;  %v7866_v31 = vld [vmem:[#allocation143_spill] sm:$0xff] }
 0x264   : > { %4740 = vst.msk [vmem:[%s7087_s4 + $0x150] sm:$0xf] %vm4655_vm2, %v5397_v55  ;;  %v5398_v45 = vpack.c.bf16 %v4250_v58, %v4250_v58  ;;  %v4050_v46 = vmax.f32 %v3854_v37, %v3952_v15  ;;  %v3855_v3 = vmax.f32 %v7857_v48, %v5806_v39  ;;  %v3953_v61 = vmax.f32 %v7858_v1, %v6002_v47  ;;  %v2938_v43 = vpop.f32.mrb[187].mxu0  ;;  %v3722_v44 = vpop.f32.mrb[187].mxu1  ;;  %v7867_v37 = vld [vmem:[#allocation132_spill] sm:$0xff]  ;;  %v7868_v15 = vld [vmem:[#allocation133_spill] sm:$0xff] }
 0x265   : > { %4738 = vst.msk [vmem:[%s7087_s4 + $0x148] sm:$0xf] %vm4655_vm2, %v5395_v23  ;;  %v5396_v25 = vpack.c.bf16 %v4248_v59, %v4248_v59  ;;  %v4048_v29 = vmax.f32 %v3852_v20, %v3950_v32  ;;  %v3853_v30 = vmax.f32 %v7859_v26, %v2938_v43  ;;  %v3951_v13 = vmax.f32 %v7860_v2, %v3722_v44 }
 0x266   : > { %4741 = vst.msk [vmem:[%s7087_s4 + $0x154] sm:$0xf] %vm4655_vm2, %v5398_v45  ;;  %v4155_v14 = vadd.f32 %v7367_v62, %v4050_v46  ;;  %v4051_v11 = vmax.f32 %v3855_v3, %v3953_v61  ;;  %v7869_v3 = vld [vmem:[#allocation144_spill] sm:$0xff]  ;;  %v7870_v61 = vld [vmem:[#allocation145_spill] sm:$0xff] }
 0x267   : > { %4739 = vst.msk [vmem:[%s7087_s4 + $0x14c] sm:$0xf] %vm4655_vm2, %v5396_v25  ;;  %v4153_v12 = vadd.f32 %v7367_v62, %v4048_v29  ;;  %v4049_v51 = vmax.f32 %v3853_v30, %v3951_v13  ;;  %v7871_v30 = vld [vmem:[#allocation136_spill] sm:$0xff]  ;;  %v7872_v13 = vld [vmem:[#allocation137_spill] sm:$0xff] }
 0x268   : > { %v4253_v52 = vmax.f32 %v4155_v14, 0.0  ;;  %v4156_v33 = vadd.f32 %v7367_v62, %v4051_v11 }
 0x269   : > { %v4251_v34 = vmax.f32 %v4153_v12, 0.0  ;;  %v4154_v63 = vadd.f32 %v7367_v62, %v4049_v51  ;;  %v5809_v16 = vpop.f32.mrb[188].mxu0  ;;  %v6005_v0 = vpop.f32.mrb[188].mxu1 }
 0x26a   : > { %v5401_v49 = vpack.c.bf16 %v4253_v52, %v4253_v52  ;;  %v4254_v50 = vmax.f32 %v4156_v33, 0.0  ;;  %v3858_v56 = vmax.f32 %v7861_v28, %v5809_v16  ;;  %v3956_v4 = vmax.f32 %v7862_v17, %v6005_v0  ;;  %v2951_v35 = vpop.f32.mrb[189].mxu0  ;;  %v3735_v18 = vpop.f32.mrb[189].mxu1  ;;  %v7873_v33 = vld [vmem:[#allocation146_spill] sm:$0xff] }
 0x26b   : > { %v5399_v36 = vpack.c.bf16 %v4251_v34, %v4251_v34  ;;  %v4252_v21 = vmax.f32 %v4154_v63, 0.0  ;;  %v3856_v7 = vmax.f32 %v7863_v22, %v2951_v35  ;;  %v3954_v9 = vmax.f32 %v7864_v8, %v3735_v18  ;;  %v5810_v40 = vpop.f32.mrb[190].mxu0  ;;  %v6006_v10 = vpop.f32.mrb[190].mxu1  ;;  %v7874_v63 = vld [vmem:[#allocation147_spill] sm:$0xff] }
 0x26c   : > { %4744 = vst.msk [vmem:[%s7087_s4 + $0x160] sm:$0xf] %vm4655_vm2, %v5401_v49  ;;  %v5402_v53 = vpack.c.bf16 %v4254_v50, %v4254_v50  ;;  %v4054_v41 = vmax.f32 %v3858_v56, %v3956_v4  ;;  %v3859_v42 = vmax.f32 %v7865_v5, %v5810_v40  ;;  %v3957_v6 = vmax.f32 %v7866_v31, %v6006_v10  ;;  %v2954_v57 = vpop.f32.mrb[191].mxu0  ;;  %v3738_v55 = vpop.f32.mrb[191].mxu1  ;;  %v7875_v56 = vld [vmem:[#allocation140_spill] sm:$0xff]  ;;  %v7876_v4 = vld [vmem:[#allocation141_spill] sm:$0xff] }
 0x26d   : > { %4742 = vst.msk [vmem:[%s7087_s4 + $0x158] sm:$0xf] %vm4655_vm2, %v5399_v36  ;;  %v5400_v58 = vpack.c.bf16 %v4252_v21, %v4252_v21  ;;  %v4052_v60 = vmax.f32 %v3856_v7, %v3954_v9  ;;  %v3857_v38 = vmax.f32 %v7867_v37, %v2954_v57  ;;  %v3955_v27 = vmax.f32 %v7868_v15, %v3738_v55 }
 0x26e   : > { %4745 = vst.msk [vmem:[%s7087_s4 + $0x164] sm:$0xf] %vm4655_vm2, %v5402_v53  ;;  %v4159_v54 = vadd.f32 %v7367_v62, %v4054_v41  ;;  %v4055_v23 = vmax.f32 %v3859_v42, %v3957_v6 }
 0x26f   : > { %4743 = vst.msk [vmem:[%s7087_s4 + $0x15c] sm:$0xf] %vm4655_vm2, %v5400_v58  ;;  %v4157_v59 = vadd.f32 %v7367_v62, %v4052_v60  ;;  %v4053_v19 = vmax.f32 %v3857_v38, %v3955_v27 }
 0x270   : > { %v4257_v20 = vmax.f32 %v4159_v54, 0.0  ;;  %v4160_v24 = vadd.f32 %v7367_v62, %v4055_v23 }
 0x271   : > { %v4255_v32 = vmax.f32 %v4157_v59, 0.0  ;;  %v4158_v39 = vadd.f32 %v7367_v62, %v4053_v19  ;;  %v5813_v47 = vpop.f32.mrb[192].mxu0  ;;  %v6009_v45 = vpop.f32.mrb[192].mxu1 }
 0x272   : > { %v5405_v46 = vpack.c.bf16 %v4257_v20, %v4257_v20  ;;  %v4258_v48 = vmax.f32 %v4160_v24, 0.0  ;;  %v3862_v1 = vmax.f32 %v7869_v3, %v5813_v47  ;;  %v3960_v43 = vmax.f32 %v7870_v61, %v6009_v45  ;;  %v2967_v44 = vpop.f32.mrb[193].mxu0  ;;  %v3751_v25 = vpop.f32.mrb[193].mxu1 }
 0x273   : > { %v5403_v29 = vpack.c.bf16 %v4255_v32, %v4255_v32  ;;  %v4256_v26 = vmax.f32 %v4158_v39, 0.0  ;;  %v3860_v2 = vmax.f32 %v7871_v30, %v2967_v44  ;;  %v3958_v14 = vmax.f32 %v7872_v13, %v3751_v25  ;;  %v5814_v11 = vpop.f32.mrb[194].mxu0  ;;  %v6010_v12 = vpop.f32.mrb[194].mxu1 }
 0x274   : > { %4748 = vst.msk [vmem:[%s7087_s4 + $0x170] sm:$0xf] %vm4655_vm2, %v5405_v46  ;;  %v5406_v51 = vpack.c.bf16 %v4258_v48, %v4258_v48  ;;  %v4058_v52 = vmax.f32 %v3862_v1, %v3960_v43  ;;  %v3863_v34 = vmax.f32 %v7873_v33, %v5814_v11  ;;  %v3961_v16 = vmax.f32 %v7874_v63, %v6010_v12  ;;  %v2970_v0 = vpop.f32.mrb[195].mxu0  ;;  %v3754_v49 = vpop.f32.mrb[195].mxu1 }
 0x275   : > { %4746 = vst.msk [vmem:[%s7087_s4 + $0x168] sm:$0xf] %vm4655_vm2, %v5403_v29  ;;  %v5404_v50 = vpack.c.bf16 %v4256_v26, %v4256_v26  ;;  %v4056_v28 = vmax.f32 %v3860_v2, %v3958_v14  ;;  %v3861_v17 = vmax.f32 %v7875_v56, %v2970_v0  ;;  %v3959_v35 = vmax.f32 %v7876_v4, %v3754_v49 }
 0x276   : > { %4749 = vst.msk [vmem:[%s7087_s4 + $0x174] sm:$0xf] %vm4655_vm2, %v5406_v51  ;;  %v4163_v18 = vadd.f32 %v7367_v62, %v4058_v52  ;;  %v4059_v36 = vmax.f32 %v3863_v34, %v3961_v16 }
 0x277   : > { %4747 = vst.msk [vmem:[%s7087_s4 + $0x16c] sm:$0xf] %vm4655_vm2, %v5404_v50  ;;  %v4161_v21 = vadd.f32 %v7367_v62, %v4056_v28  ;;  %v4057_v22 = vmax.f32 %v3861_v17, %v3959_v35 }
 0x278   : > { %v4261_v7 = vmax.f32 %v4163_v18, 0.0  ;;  %v4164_v8 = vadd.f32 %v7367_v62, %v4059_v36 }
 0x279   : > { %v4259_v9 = vmax.f32 %v4161_v21, 0.0  ;;  %v4162_v40 = vadd.f32 %v7367_v62, %v4057_v22 }
 0x27a   : > { %v5409_v10 = vpack.c.bf16 %v4261_v7, %v4261_v7  ;;  %v4262_v53 = vmax.f32 %v4164_v8, 0.0 }
 0x27b   : > { %v5407_v41 = vpack.c.bf16 %v4259_v9, %v4259_v9  ;;  %v4260_v5 = vmax.f32 %v4162_v40, 0.0 }
 0x27c   : > { %4752 = vst.msk [vmem:[%s7087_s4 + $0x180] sm:$0xf] %vm4655_vm2, %v5409_v10  ;;  %v5410_v42 = vpack.c.bf16 %v4262_v53, %v4262_v53 }
 0x27d   : > { %4750 = vst.msk [vmem:[%s7087_s4 + $0x178] sm:$0xf] %vm4655_vm2, %v5407_v41  ;;  %v5408_v31 = vpack.c.bf16 %v4260_v5, %v4260_v5 }
 0x27e   : > { %4753 = vst.msk [vmem:[%s7087_s4 + $0x184] sm:$0xf] %vm4655_vm2, %v5410_v42 }
 0x27f   : > { %4751 = vst.msk [vmem:[%s7087_s4 + $0x17c] sm:$0xf] %vm4655_vm2, %v5408_v31 }
 0x280 PF: > { %s13_s12 = sadd.s32 1, %s6238_s12  }
 0x281   : > { %p10_p4 = scmp.ge.s32.totalorder %s13_s12, 4  }
 0x283   :  { %12 = sbr.rel (!%p10_p4) target bundleno = 1 (0x1), region = 62 }

// kernel: classifier_forward.7
= control target key start
LH: loop header
LB: loop body
LE: loop exit
PB: predicated region body
PF: predicated region fallthrough
CT: control target
= control target key end

     0   :  { %s2128_s12 = smov 0   ;;  %s2560_s0 = inlined_call_operand.vmem [shape: bf16[2,800,144], index: 0, kind: input, shape index: {}]   ;;  %s2561_s1 = inlined_call_operand.vmem [shape: bf16[144,26], index: 1, kind: input, shape index: {}]   ;;  %s2562_s2 = inlined_call_operand.vmem [shape: f32[1,26], index: 2, kind: input, shape index: {}]   ;;  %s2563_s3 = inlined_call_operand.vmem [shape: bf16[2,200,26], index: 3, kind: output, shape index: {}]  }
   0x1 LB: > { %s1692_s13 = sadd.s32 4294967295, %s2105_s12   ;;  %p1696_p0 = scmp.ge.s32.totalorder %s2105_s12, 1  ;;  %s2105_s12 = sphi %s2128_s12, %s13_s12  }
   0x2   : > { %p137_p1 = scmp.lt.s32.totalorder %s2105_s12, 3 }
   0x4   : > { %p138_p2 = pnand %p1696_p0, %p137_p1 }
   0x5   : > { %v1940_v0 = vld [vmem:[%s2561_s1] sm:$0xff] (!%p138_p2)   ;;  %v2107_v1 = vmov (!%p138_p2), 0   ;;  %p161_p3 = scmp.lt.s32.totalorder (!%p138_p2), %s1692_s13, 1  ;;  %v1941_v2 = vld [vmem:[%s2561_s1 + $0x8] sm:$0xff] (!%p138_p2)   ;;  %v1942_v3 = vld [vmem:[%s2561_s1 + $0x10] sm:$0xff] (!%p138_p2)   ;;  %vm794_vm0 = vcmask (!%p138_p2), 130048  }
   0x6   : > { %141 = sbr.rel (%p138_p2) target bundleno = 459 (0x1cb), region = 32  ;;  %945 = vmatprep.subr.bf16.mxu0 (!%p138_p2), %v2107_v1  ;;  %1911 = vmatprep.subr.bf16.mxu1 (!%p138_p2), %v2107_v1  ;;  %v1943_v4 = vld [vmem:[%s2561_s1 + $0x18] sm:$0xff] (!%p138_p2)   ;;  %v1944_v7 = vld [vmem:[%s2561_s1 + $0x20] sm:$0xff] (!%p138_p2)   ;;  %v1945_v8 = vld [vmem:[%s2561_s1 + $0x28] sm:$0xff] (!%p138_p2)   ;;  %vm1611_vm1 = vcmask (!%p138_p2), 207872  }
   0x7   : > { %946 = vmatpush1.bf16.msra.mxu0 (!%p138_p2), %v1940_v0  ;;  %1920 = vmatpush1.bf16.msra.mxu1 (!%p138_p2), %v1940_v0  ;;  %v1946_v9 = vld [vmem:[%s2561_s1 + $0x30] sm:$0xff] (!%p138_p2)   ;;  %v1947_v10 = vld [vmem:[%s2561_s1 + $0x38] sm:$0xff] (!%p138_p2)   ;;  %v1948_v11 = vld [vmem:[%s2561_s1 + $0x40] sm:$0xff] (!%p138_p2)  }
   0x8   : > { %947 = vmatprep.subr.bf16.mxu0 (!%p138_p2), %v2107_v1  ;;  %1912 = vmatprep.subr.bf16.mxu1 (!%p138_p2), %v2107_v1 }
   0xb   : > { %948 = vmatpush1.bf16.msra.mxu0 (!%p138_p2), %v1941_v2  ;;  %1921 = vmatpush1.bf16.msra.mxu1 (!%p138_p2), %v1941_v2 }
   0xc   : > { %949 = vmatprep.subr.bf16.mxu0 (!%p138_p2), %v2107_v1  ;;  %1913 = vmatprep.subr.bf16.mxu1 (!%p138_p2), %v2107_v1 }
   0xd   : > { %s2565_s13 = smov (!%p161_p3, %s1692_s13), 1 }
   0xe   : > { %s1929_s18 = smul.u32 800, %s2565_s13 }
   0xf   : > { %950 = vmatpush1.bf16.msra.mxu0 %v1942_v3  ;;  %1922 = vmatpush1.bf16.msra.mxu1 %v1942_v3  ;;  %s1930_s11 = smul.u32 100, %s2565_s13 }
  0x10   : > { %s2151_s23 = scalar_lea.vmem %s2560_s0, %s1929_s18  ;;  %951 = vmatprep.subr.bf16.mxu0 %v2107_v1  ;;  %1914 = vmatprep.subr.bf16.mxu1 %v2107_v1 }
  0x11   : > { %v1951_v5 = vld [vmem:[%s2151_s23 + $0x4] ss:$8 sps:$4 sm:$0xff]   ;;  %v1954_v6 = vld [vmem:[%s2151_s23 + $0x194] ss:$8 sps:$4 sm:$0xff]   ;;  %v1949_v12 = vld [vmem:[%s2151_s23] ss:$8 sps:$4 sm:$0xff]   ;;  %s2435_s16 = scalar_lea.vmem %s2563_s3, %s1930_s11 }
  0x12   : > { %1808 = vmatprep.mubr.msk.bf16.mxu0 %vm794_vm0, %v1951_v5  ;;  %1833 = vmatprep.mubr.msk.bf16.mxu1 %vm794_vm0, %v1954_v6  ;;  %v1952_v13 = vld [vmem:[%s2151_s23 + $0x190] ss:$8 sps:$4 sm:$0xff]   ;;  %v1955_v14 = vld [vmem:[%s2151_s23 + $0x14] ss:$8 sps:$4 sm:$0xff]   ;;  %v1957_v15 = vld [vmem:[%s2151_s23 + $0x1a4] ss:$8 sps:$4 sm:$0xff]  }
  0x13   : > { %952 = vmatpush1.bf16.msra.mxu0 %v1943_v4  ;;  %1923 = vmatpush1.bf16.msra.mxu1 %v1943_v4  ;;  %v1959_v16 = vld [vmem:[%s2151_s23 + $0x10] ss:$8 sps:$4 sm:$0xff]   ;;  %v1960_v17 = vld [vmem:[%s2151_s23 + $0x1a0] ss:$8 sps:$4 sm:$0xff]   ;;  %v1961_v18 = vld [vmem:[%s2151_s23 + $0x24] ss:$8 sps:$4 sm:$0xff]  }
  0x14   : > { %953 = vmatprep.subr.bf16.mxu0 %v2107_v1  ;;  %1915 = vmatprep.subr.bf16.mxu1 %v2107_v1  ;;  %v1963_v19 = vld [vmem:[%s2151_s23 + $0x1b4] ss:$8 sps:$4 sm:$0xff]   ;;  %v1965_v20 = vld [vmem:[%s2151_s23 + $0x20] ss:$8 sps:$4 sm:$0xff]   ;;  %v1966_v21 = vld [vmem:[%s2151_s23 + $0x1b0] ss:$8 sps:$4 sm:$0xff]  }
  0x15   : > { %v1967_v22 = vld [vmem:[%s2151_s23 + $0x34] ss:$8 sps:$4 sm:$0xff]   ;;  %v1969_v23 = vld [vmem:[%s2151_s23 + $0x1c4] ss:$8 sps:$4 sm:$0xff]   ;;  %v1971_v24 = vld [vmem:[%s2151_s23 + $0x30] ss:$8 sps:$4 sm:$0xff]  }
  0x16   : > { %v1972_v25 = vld [vmem:[%s2151_s23 + $0x1c0] ss:$8 sps:$4 sm:$0xff]   ;;  %v1973_v26 = vld [vmem:[%s2151_s23 + $0x44] ss:$8 sps:$4 sm:$0xff]   ;;  %v1975_v27 = vld [vmem:[%s2151_s23 + $0x1d4] ss:$8 sps:$4 sm:$0xff]  }
  0x17   : > { %954 = vmatpush1.bf16.msra.mxu0 %v1944_v7  ;;  %1924 = vmatpush1.bf16.msra.mxu1 %v1944_v7  ;;  %v1977_v28 = vld [vmem:[%s2151_s23 + $0x40] ss:$8 sps:$4 sm:$0xff]   ;;  %v1978_v29 = vld [vmem:[%s2151_s23 + $0x1d0] ss:$8 sps:$4 sm:$0xff]   ;;  %v1979_v30 = vld [vmem:[%s2151_s23 + $0x54] ss:$8 sps:$4 sm:$0xff]  }
  0x18   : > { %955 = vmatprep.subr.bf16.mxu0 %v2107_v1  ;;  %1916 = vmatprep.subr.bf16.mxu1 %v2107_v1  ;;  %v1981_v31 = vld [vmem:[%s2151_s23 + $0x1e4] ss:$8 sps:$4 sm:$0xff]   ;;  %v1983_v32 = vld [vmem:[%s2151_s23 + $0x50] ss:$8 sps:$4 sm:$0xff]   ;;  %v1984_v33 = vld [vmem:[%s2151_s23 + $0x1e0] ss:$8 sps:$4 sm:$0xff]  }
  0x19   : > { %v1985_v34 = vld [vmem:[%s2151_s23 + $0x64] ss:$8 sps:$4 sm:$0xff]   ;;  %v1987_v35 = vld [vmem:[%s2151_s23 + $0x1f4] ss:$8 sps:$4 sm:$0xff]   ;;  %v1989_v36 = vld [vmem:[%s2151_s23 + $0x60] ss:$8 sps:$4 sm:$0xff]  }
  0x1a   : > { %v1990_v37 = vld [vmem:[%s2151_s23 + $0x1f0] ss:$8 sps:$4 sm:$0xff]   ;;  %v1991_v38 = vld [vmem:[%s2151_s23 + $0x74] ss:$8 sps:$4 sm:$0xff]   ;;  %v1993_v39 = vld [vmem:[%s2151_s23 + $0x204] ss:$8 sps:$4 sm:$0xff]  }
  0x1b   : > { %956 = vmatpush1.bf16.msra.mxu0 %v1945_v8  ;;  %1925 = vmatpush1.bf16.msra.mxu1 %v1945_v8  ;;  %v1995_v40 = vld [vmem:[%s2151_s23 + $0x70] ss:$8 sps:$4 sm:$0xff]   ;;  %v1996_v41 = vld [vmem:[%s2151_s23 + $0x200] ss:$8 sps:$4 sm:$0xff]   ;;  %v1997_v42 = vld [vmem:[%s2151_s23 + $0x84] ss:$8 sps:$4 sm:$0xff]  }
  0x1c   : > { %957 = vmatprep.subr.bf16.mxu0 %v2107_v1  ;;  %1917 = vmatprep.subr.bf16.mxu1 %v2107_v1  ;;  %v1999_v43 = vld [vmem:[%s2151_s23 + $0x214] ss:$8 sps:$4 sm:$0xff]   ;;  %v2001_v44 = vld [vmem:[%s2151_s23 + $0x80] ss:$8 sps:$4 sm:$0xff]   ;;  %v2002_v45 = vld [vmem:[%s2151_s23 + $0x210] ss:$8 sps:$4 sm:$0xff]  }
  0x1d   : > { %v2003_v46 = vld [vmem:[%s2151_s23 + $0x94] ss:$8 sps:$4 sm:$0xff]   ;;  %v2005_v47 = vld [vmem:[%s2151_s23 + $0x224] ss:$8 sps:$4 sm:$0xff]   ;;  %v2007_v48 = vld [vmem:[%s2151_s23 + $0x90] ss:$8 sps:$4 sm:$0xff]  }
  0x1e   : > { %v2008_v49 = vld [vmem:[%s2151_s23 + $0x220] ss:$8 sps:$4 sm:$0xff]   ;;  %v2009_v50 = vld [vmem:[%s2151_s23 + $0xa4] ss:$8 sps:$4 sm:$0xff]   ;;  %v2011_v51 = vld [vmem:[%s2151_s23 + $0x234] ss:$8 sps:$4 sm:$0xff]  }
  0x1f   : > { %958 = vmatpush1.bf16.msra.mxu0 %v1946_v9  ;;  %1926 = vmatpush1.bf16.msra.mxu1 %v1946_v9  ;;  %v2013_v52 = vld [vmem:[%s2151_s23 + $0xa0] ss:$8 sps:$4 sm:$0xff]   ;;  %v2014_v53 = vld [vmem:[%s2151_s23 + $0x230] ss:$8 sps:$4 sm:$0xff]   ;;  %v2015_v54 = vld [vmem:[%s2151_s23 + $0xb4] ss:$8 sps:$4 sm:$0xff]  }
  0x20   : > { %959 = vmatprep.subr.bf16.mxu0 %v2107_v1  ;;  %1918 = vmatprep.subr.bf16.mxu1 %v2107_v1  ;;  %v2017_v55 = vld [vmem:[%s2151_s23 + $0x244] ss:$8 sps:$4 sm:$0xff]   ;;  %v2019_v56 = vld [vmem:[%s2151_s23 + $0xb0] ss:$8 sps:$4 sm:$0xff]   ;;  %v2020_v57 = vld [vmem:[%s2151_s23 + $0x240] ss:$8 sps:$4 sm:$0xff]  }
  0x21   : > { %v2021_v58 = vld [vmem:[%s2151_s23 + $0xc4] ss:$8 sps:$4 sm:$0xff]   ;;  %v2023_v59 = vld [vmem:[%s2151_s23 + $0x254] ss:$8 sps:$4 sm:$0xff]   ;;  %v2025_v60 = vld [vmem:[%s2151_s23 + $0xc0] ss:$8 sps:$4 sm:$0xff]  }
  0x22   : > { %v2026_v61 = vld [vmem:[%s2151_s23 + $0x250] ss:$8 sps:$4 sm:$0xff]   ;;  %v2027_v62 = vld [vmem:[%s2151_s23 + $0xd4] ss:$8 sps:$4 sm:$0xff]   ;;  %v2029_v63 = vld [vmem:[%s2151_s23 + $0x264] ss:$8 sps:$4 sm:$0xff]  }
  0x23   : > { %960 = vmatpush1.bf16.msra.mxu0 %v1947_v10  ;;  %1927 = vmatpush1.bf16.msra.mxu1 %v1947_v10  ;;  %v2031_v0 = vld [vmem:[%s2151_s23 + $0xd0] ss:$8 sps:$4 sm:$0xff]   ;;  %v2033_v2 = vld [vmem:[%s2151_s23 + $0xe4] ss:$8 sps:$4 sm:$0xff]   ;;  %v2035_v3 = vld [vmem:[%s2151_s23 + $0x274] ss:$8 sps:$4 sm:$0xff]  }
  0x24   : > { %961 = vmatprep.subr.bf16.mxu0 %v2107_v1  ;;  %1919 = vmatprep.subr.bf16.mxu1 %v2107_v1  ;;  %v2032_v1 = vld [vmem:[%s2151_s23 + $0x260] ss:$8 sps:$4 sm:$0xff]   ;;  %v2038_v5 = vld [vmem:[%s2151_s23 + $0x270] ss:$8 sps:$4 sm:$0xff]   ;;  %v2039_v6 = vld [vmem:[%s2151_s23 + $0xf4] ss:$8 sps:$4 sm:$0xff]  }
  0x25   : > { %v2037_v4 = vld [vmem:[%s2151_s23 + $0xe0] ss:$8 sps:$4 sm:$0xff]   ;;  %v2041_v7 = vld [vmem:[%s2151_s23 + $0x284] ss:$8 sps:$4 sm:$0xff]   ;;  %v2043_v8 = vld [vmem:[%s2151_s23 + $0xf0] ss:$8 sps:$4 sm:$0xff]  }
  0x26   : > { %v2044_v9 = vld [vmem:[%s2151_s23 + $0x280] ss:$8 sps:$4 sm:$0xff]   ;;  %v2045_v10 = vld [vmem:[%s2151_s23 + $0x104] ss:$8 sps:$4 sm:$0xff]  }
  0x27   : > { %962 = vmatpush1.bf16.msra.mxu0 %v1948_v11  ;;  %1928 = vmatpush1.bf16.msra.mxu1 %v1948_v11  ;;  %v2047_v11 = vld [vmem:[%s2151_s23 + $0x294] ss:$8 sps:$4 sm:$0xff]  }
  0x2a   : > { %978 = vmatmul.mubr.bf16.vlgmr.msra.gmra.mrb[0].mxu0 %v1949_v12  ;;  %1178 = vmatmul.mubr.bf16.vlgmr.msra.gmra.mrb[0].mxu1 %v1952_v13  ;;  %v2049_v12 = vld [vmem:[%s2151_s23 + $0x100] ss:$8 sps:$4 sm:$0xff]   ;;  %v2050_v13 = vld [vmem:[%s2151_s23 + $0x290] ss:$8 sps:$4 sm:$0xff]  }
  0x2b   : > { %1809 = vmatprep.mubr.msk.bf16.mxu0 %vm794_vm0, %v1955_v14  ;;  %1834 = vmatprep.mubr.msk.bf16.mxu1 %vm794_vm0, %v1957_v15  ;;  %v2051_v14 = vld [vmem:[%s2151_s23 + $0x114] ss:$8 sps:$4 sm:$0xff]   ;;  %v2053_v15 = vld [vmem:[%s2151_s23 + $0x2a4] ss:$8 sps:$4 sm:$0xff]  }
  0x32   : > { %986 = vmatmul.mubr.bf16.gmra.mrb[4].mxu0 %v1959_v16  ;;  %1186 = vmatmul.mubr.bf16.gmra.mrb[4].mxu1 %v1960_v17  ;;  %v2055_v16 = vld [vmem:[%s2151_s23 + $0x110] ss:$8 sps:$4 sm:$0xff]   ;;  %v2056_v17 = vld [vmem:[%s2151_s23 + $0x2a0] ss:$8 sps:$4 sm:$0xff]  }
  0x33   : > { %1810 = vmatprep.mubr.msk.bf16.mxu0 %vm794_vm0, %v1961_v18  ;;  %1835 = vmatprep.mubr.msk.bf16.mxu1 %vm794_vm0, %v1963_v19  ;;  %v2057_v18 = vld [vmem:[%s2151_s23 + $0x124] ss:$8 sps:$4 sm:$0xff]   ;;  %v2059_v19 = vld [vmem:[%s2151_s23 + $0x2b4] ss:$8 sps:$4 sm:$0xff]  }
  0x3a   : > { %994 = vmatmul.mubr.bf16.gmra.mrb[8].mxu0 %v1965_v20  ;;  %1194 = vmatmul.mubr.bf16.gmra.mrb[8].mxu1 %v1966_v21  ;;  %v2061_v20 = vld [vmem:[%s2151_s23 + $0x120] ss:$8 sps:$4 sm:$0xff]   ;;  %v2062_v21 = vld [vmem:[%s2151_s23 + $0x2b0] ss:$8 sps:$4 sm:$0xff]  }
  0x3b   : > { %1811 = vmatprep.mubr.msk.bf16.mxu0 %vm794_vm0, %v1967_v22  ;;  %1836 = vmatprep.mubr.msk.bf16.mxu1 %vm794_vm0, %v1969_v23  ;;  %v2063_v22 = vld [vmem:[%s2151_s23 + $0x134] ss:$8 sps:$4 sm:$0xff]   ;;  %v2065_v23 = vld [vmem:[%s2151_s23 + $0x2c4] ss:$8 sps:$4 sm:$0xff]  }
  0x42   : > { %1002 = vmatmul.mubr.bf16.gmra.mrb[12].mxu0 %v1971_v24  ;;  %1202 = vmatmul.mubr.bf16.gmra.mrb[12].mxu1 %v1972_v25  ;;  %v2067_v24 = vld [vmem:[%s2151_s23 + $0x130] ss:$8 sps:$4 sm:$0xff]   ;;  %v2068_v25 = vld [vmem:[%s2151_s23 + $0x2c0] ss:$8 sps:$4 sm:$0xff]  }
  0x43   : > { %1812 = vmatprep.mubr.msk.bf16.mxu0 %vm794_vm0, %v1973_v26  ;;  %1837 = vmatprep.mubr.msk.bf16.mxu1 %vm794_vm0, %v1975_v27  ;;  %v2069_v26 = vld [vmem:[%s2151_s23 + $0x144] ss:$8 sps:$4 sm:$0xff]   ;;  %v2071_v27 = vld [vmem:[%s2151_s23 + $0x2d4] ss:$8 sps:$4 sm:$0xff]  }
  0x4a   : > { %1010 = vmatmul.mubr.bf16.gmra.mrb[16].mxu0 %v1977_v28  ;;  %1210 = vmatmul.mubr.bf16.gmra.mrb[16].mxu1 %v1978_v29  ;;  %v2073_v28 = vld [vmem:[%s2151_s23 + $0x140] ss:$8 sps:$4 sm:$0xff]   ;;  %v2074_v29 = vld [vmem:[%s2151_s23 + $0x2d0] ss:$8 sps:$4 sm:$0xff]  }
  0x4b   : > { %1813 = vmatprep.mubr.msk.bf16.mxu0 %vm794_vm0, %v1979_v30  ;;  %1838 = vmatprep.mubr.msk.bf16.mxu1 %vm794_vm0, %v1981_v31  ;;  %v2075_v30 = vld [vmem:[%s2151_s23 + $0x154] ss:$8 sps:$4 sm:$0xff]   ;;  %v2077_v31 = vld [vmem:[%s2151_s23 + $0x2e4] ss:$8 sps:$4 sm:$0xff]  }
  0x52   : > { %1018 = vmatmul.mubr.bf16.gmra.mrb[20].mxu0 %v1983_v32  ;;  %1218 = vmatmul.mubr.bf16.gmra.mrb[20].mxu1 %v1984_v33  ;;  %v2079_v32 = vld [vmem:[%s2151_s23 + $0x150] ss:$8 sps:$4 sm:$0xff]   ;;  %v2080_v33 = vld [vmem:[%s2151_s23 + $0x2e0] ss:$8 sps:$4 sm:$0xff]  }
  0x53   : > { %1814 = vmatprep.mubr.msk.bf16.mxu0 %vm794_vm0, %v1985_v34  ;;  %1839 = vmatprep.mubr.msk.bf16.mxu1 %vm794_vm0, %v1987_v35  ;;  %v2081_v34 = vld [vmem:[%s2151_s23 + $0x164] ss:$8 sps:$4 sm:$0xff]   ;;  %v2083_v35 = vld [vmem:[%s2151_s23 + $0x2f4] ss:$8 sps:$4 sm:$0xff]  }
  0x5a   : > { %1026 = vmatmul.mubr.bf16.gmra.mrb[24].mxu0 %v1989_v36  ;;  %1226 = vmatmul.mubr.bf16.gmra.mrb[24].mxu1 %v1990_v37  ;;  %v2085_v36 = vld [vmem:[%s2151_s23 + $0x160] ss:$8 sps:$4 sm:$0xff]   ;;  %v2086_v37 = vld [vmem:[%s2151_s23 + $0x2f0] ss:$8 sps:$4 sm:$0xff]  }
  0x5b   : > { %1815 = vmatprep.mubr.msk.bf16.mxu0 %vm794_vm0, %v1991_v38  ;;  %1840 = vmatprep.mubr.msk.bf16.mxu1 %vm794_vm0, %v1993_v39  ;;  %v2087_v38 = vld [vmem:[%s2151_s23 + $0x174] ss:$8 sps:$4 sm:$0xff]   ;;  %v2089_v39 = vld [vmem:[%s2151_s23 + $0x304] ss:$8 sps:$4 sm:$0xff]  }
  0x62   : > { %1034 = vmatmul.mubr.bf16.gmra.mrb[28].mxu0 %v1995_v40  ;;  %1234 = vmatmul.mubr.bf16.gmra.mrb[28].mxu1 %v1996_v41  ;;  %v2091_v40 = vld [vmem:[%s2151_s23 + $0x170] ss:$8 sps:$4 sm:$0xff]   ;;  %v2092_v41 = vld [vmem:[%s2151_s23 + $0x300] ss:$8 sps:$4 sm:$0xff]  }
  0x63   : > { %1816 = vmatprep.mubr.msk.bf16.mxu0 %vm794_vm0, %v1997_v42  ;;  %1841 = vmatprep.mubr.msk.bf16.mxu1 %vm794_vm0, %v1999_v43  ;;  %v2093_v42 = vld [vmem:[%s2151_s23 + $0x184] ss:$8 sps:$4 sm:$0xff]   ;;  %v2095_v43 = vld [vmem:[%s2151_s23 + $0x314] ss:$8 sps:$4 sm:$0xff]  }
  0x6a   : > { %1042 = vmatmul.mubr.bf16.gmra.mrb[32].mxu0 %v2001_v44  ;;  %1242 = vmatmul.mubr.bf16.gmra.mrb[32].mxu1 %v2002_v45  ;;  %v2097_v44 = vld [vmem:[%s2151_s23 + $0x180] ss:$8 sps:$4 sm:$0xff]   ;;  %v2098_v45 = vld [vmem:[%s2151_s23 + $0x310] ss:$8 sps:$4 sm:$0xff]  }
  0x6b   : > { %1817 = vmatprep.mubr.msk.bf16.mxu0 %vm794_vm0, %v2003_v46  ;;  %1842 = vmatprep.mubr.msk.bf16.mxu1 %vm794_vm0, %v2005_v47 }
  0x72   : > { %1050 = vmatmul.mubr.bf16.gmra.mrb[36].mxu0 %v2007_v48  ;;  %1250 = vmatmul.mubr.bf16.gmra.mrb[36].mxu1 %v2008_v49 }
  0x73   : > { %1818 = vmatprep.mubr.msk.bf16.mxu0 %vm794_vm0, %v2009_v50  ;;  %1843 = vmatprep.mubr.msk.bf16.mxu1 %vm794_vm0, %v2011_v51 }
  0x7a   : > { %1058 = vmatmul.mubr.bf16.gmra.mrb[40].mxu0 %v2013_v52  ;;  %1258 = vmatmul.mubr.bf16.gmra.mrb[40].mxu1 %v2014_v53 }
  0x7b   : > { %1819 = vmatprep.mubr.msk.bf16.mxu0 %vm794_vm0, %v2015_v54  ;;  %1844 = vmatprep.mubr.msk.bf16.mxu1 %vm794_vm0, %v2017_v55 }
  0x82   : > { %1066 = vmatmul.mubr.bf16.gmra.mrb[44].mxu0 %v2019_v56  ;;  %1266 = vmatmul.mubr.bf16.gmra.mrb[44].mxu1 %v2020_v57 }
  0x83   : > { %1820 = vmatprep.mubr.msk.bf16.mxu0 %vm794_vm0, %v2021_v58  ;;  %1845 = vmatprep.mubr.msk.bf16.mxu1 %vm794_vm0, %v2023_v59 }
  0x8a   : > { %1074 = vmatmul.mubr.bf16.gmra.mrb[48].mxu0 %v2025_v60  ;;  %1274 = vmatmul.mubr.bf16.gmra.mrb[48].mxu1 %v2026_v61 }
  0x8b   : > { %1821 = vmatprep.mubr.msk.bf16.mxu0 %vm794_vm0, %v2027_v62  ;;  %1846 = vmatprep.mubr.msk.bf16.mxu1 %vm794_vm0, %v2029_v63 }
  0x92   : > { %1082 = vmatmul.mubr.bf16.gmra.mrb[52].mxu0 %v2031_v0  ;;  %1282 = vmatmul.mubr.bf16.gmra.mrb[52].mxu1 %v2032_v1 }
  0x93   : > { %1822 = vmatprep.mubr.msk.bf16.mxu0 %vm794_vm0, %v2033_v2  ;;  %1847 = vmatprep.mubr.msk.bf16.mxu1 %vm794_vm0, %v2035_v3 }
  0x9a   : > { %1090 = vmatmul.mubr.bf16.gmra.mrb[56].mxu0 %v2037_v4  ;;  %1290 = vmatmul.mubr.bf16.gmra.mrb[56].mxu1 %v2038_v5 }
  0x9b   : > { %1823 = vmatprep.mubr.msk.bf16.mxu0 %vm794_vm0, %v2039_v6  ;;  %1848 = vmatprep.mubr.msk.bf16.mxu1 %vm794_vm0, %v2041_v7 }
  0xa2   : > { %1098 = vmatmul.mubr.bf16.gmra.mrb[60].mxu0 %v2043_v8  ;;  %1298 = vmatmul.mubr.bf16.gmra.mrb[60].mxu1 %v2044_v9 }
  0xa3   : > { %1824 = vmatprep.mubr.msk.bf16.mxu0 %vm794_vm0, %v2045_v10  ;;  %1849 = vmatprep.mubr.msk.bf16.mxu1 %vm794_vm0, %v2047_v11 }
  0xaa   : > { %1106 = vmatmul.mubr.bf16.gmra.mrb[64].mxu0 %v2049_v12  ;;  %1306 = vmatmul.mubr.bf16.gmra.mrb[64].mxu1 %v2050_v13 }
  0xab   : > { %1825 = vmatprep.mubr.msk.bf16.mxu0 %vm794_vm0, %v2051_v14  ;;  %1850 = vmatprep.mubr.msk.bf16.mxu1 %vm794_vm0, %v2053_v15 }
  0xb2   : > { %1114 = vmatmul.mubr.bf16.gmra.mrb[68].mxu0 %v2055_v16  ;;  %1314 = vmatmul.mubr.bf16.gmra.mrb[68].mxu1 %v2056_v17 }
  0xb3   : > { %1826 = vmatprep.mubr.msk.bf16.mxu0 %vm794_vm0, %v2057_v18  ;;  %1851 = vmatprep.mubr.msk.bf16.mxu1 %vm794_vm0, %v2059_v19 }
  0xba   : > { %1122 = vmatmul.mubr.bf16.gmra.mrb[72].mxu0 %v2061_v20  ;;  %1322 = vmatmul.mubr.bf16.gmra.mrb[72].mxu1 %v2062_v21 }
  0xbb   : > { %1827 = vmatprep.mubr.msk.bf16.mxu0 %vm794_vm0, %v2063_v22  ;;  %1852 = vmatprep.mubr.msk.bf16.mxu1 %vm794_vm0, %v2065_v23 }
  0xc2   : > { %1130 = vmatmul.mubr.bf16.gmra.mrb[76].mxu0 %v2067_v24  ;;  %1330 = vmatmul.mubr.bf16.gmra.mrb[76].mxu1 %v2068_v25 }
  0xc3   : > { %1828 = vmatprep.mubr.msk.bf16.mxu0 %vm794_vm0, %v2069_v26  ;;  %1853 = vmatprep.mubr.msk.bf16.mxu1 %vm794_vm0, %v2071_v27 }
  0xca   : > { %1138 = vmatmul.mubr.bf16.gmra.mrb[80].mxu0 %v2073_v28  ;;  %1338 = vmatmul.mubr.bf16.gmra.mrb[80].mxu1 %v2074_v29 }
  0xcb   : > { %1829 = vmatprep.mubr.msk.bf16.mxu0 %vm794_vm0, %v2075_v30  ;;  %1854 = vmatprep.mubr.msk.bf16.mxu1 %vm794_vm0, %v2077_v31 }
  0xd2   : > { %1146 = vmatmul.mubr.bf16.gmra.mrb[84].mxu0 %v2079_v32  ;;  %1346 = vmatmul.mubr.bf16.gmra.mrb[84].mxu1 %v2080_v33 }
  0xd3   : > { %1830 = vmatprep.mubr.msk.bf16.mxu0 %vm794_vm0, %v2081_v34  ;;  %1855 = vmatprep.mubr.msk.bf16.mxu1 %vm794_vm0, %v2083_v35 }
  0xda   : > { %1154 = vmatmul.mubr.bf16.gmra.mrb[88].mxu0 %v2085_v36  ;;  %1354 = vmatmul.mubr.bf16.gmra.mrb[88].mxu1 %v2086_v37 }
  0xdb   : > { %1831 = vmatprep.mubr.msk.bf16.mxu0 %vm794_vm0, %v2087_v38  ;;  %1856 = vmatprep.mubr.msk.bf16.mxu1 %vm794_vm0, %v2089_v39 }
  0xe2   : > { %1162 = vmatmul.mubr.bf16.gmra.mrb[92].mxu0 %v2091_v40  ;;  %1362 = vmatmul.mubr.bf16.gmra.mrb[92].mxu1 %v2092_v41 }
  0xe3   : > { %1832 = vmatprep.mubr.msk.bf16.mxu0 %vm794_vm0, %v2093_v42  ;;  %1857 = vmatprep.mubr.msk.bf16.mxu1 %vm794_vm0, %v2095_v43 }
  0xea   : > { %1170 = vmatmul.mubr.bf16.gmra.mrb[96].mxu0 %v2097_v44  ;;  %1370 = vmatmul.mubr.bf16.gmra.mrb[96].mxu1 %v2098_v45 }
  0xfd   : > { %v2321_v46 = vpop.f32.mrb[0].mxu0  ;;  %v2323_v47 = vpop.f32.mrb[0].mxu1 }
  0xfe   : > { %v981_v48 = vpop.f32.mrb[1].mxu0  ;;  %v1181_v49 = vpop.f32.mrb[1].mxu1 }
  0xff   : > { %v2325_v50 = vpop.f32.mrb[2].mxu0  ;;  %v2327_v51 = vpop.f32.mrb[2].mxu1 }
 0x100   : > { %v984_v52 = vpop.f32.mrb[3].mxu0  ;;  %v1184_v53 = vpop.f32.mrb[3].mxu1 }
 0x105   : > { %v2329_v54 = vpop.f32.mrb[4].mxu0  ;;  %v2331_v55 = vpop.f32.mrb[4].mxu1 }
 0x106   : > { %v989_v56 = vpop.f32.mrb[5].mxu0  ;;  %v1189_v57 = vpop.f32.mrb[5].mxu1 }
 0x107   : > { %v2333_v58 = vpop.f32.mrb[6].mxu0  ;;  %v2335_v59 = vpop.f32.mrb[6].mxu1 }
 0x108   : > { %v992_v60 = vpop.f32.mrb[7].mxu0  ;;  %v1192_v61 = vpop.f32.mrb[7].mxu1 }
 0x10d   : > { %v2337_v62 = vpop.f32.mrb[8].mxu0  ;;  %v2339_v63 = vpop.f32.mrb[8].mxu1 }
 0x10e   : > { %v997_v0 = vpop.f32.mrb[9].mxu0  ;;  %v1197_v1 = vpop.f32.mrb[9].mxu1 }
 0x10f   : > { %v2341_v2 = vpop.f32.mrb[10].mxu0  ;;  %v2343_v3 = vpop.f32.mrb[10].mxu1 }
 0x110   : > { %v1000_v4 = vpop.f32.mrb[11].mxu0  ;;  %v1200_v5 = vpop.f32.mrb[11].mxu1 }
 0x115   : > { %v2345_v6 = vpop.f32.mrb[12].mxu0  ;;  %v2347_v7 = vpop.f32.mrb[12].mxu1 }
 0x116   : > { %v1005_v8 = vpop.f32.mrb[13].mxu0  ;;  %v1205_v9 = vpop.f32.mrb[13].mxu1 }
 0x117   : > { %v2349_v10 = vpop.f32.mrb[14].mxu0  ;;  %v2351_v11 = vpop.f32.mrb[14].mxu1 }
 0x118   : > { %v1008_v12 = vpop.f32.mrb[15].mxu0  ;;  %v1208_v13 = vpop.f32.mrb[15].mxu1 }
 0x11d   : > { %v2353_v14 = vpop.f32.mrb[16].mxu0  ;;  %v2355_v15 = vpop.f32.mrb[16].mxu1 }
 0x11e   : > { %v1013_v16 = vpop.f32.mrb[17].mxu0  ;;  %v1213_v17 = vpop.f32.mrb[17].mxu1 }
 0x11f   : > { %v2357_v18 = vpop.f32.mrb[18].mxu0  ;;  %v2359_v19 = vpop.f32.mrb[18].mxu1 }
 0x120   : > { %v1016_v20 = vpop.f32.mrb[19].mxu0  ;;  %v1216_v21 = vpop.f32.mrb[19].mxu1 }
 0x125   : > { %v2361_v22 = vpop.f32.mrb[20].mxu0  ;;  %v2363_v23 = vpop.f32.mrb[20].mxu1 }
 0x126   : > { %v1021_v24 = vpop.f32.mrb[21].mxu0  ;;  %v1221_v25 = vpop.f32.mrb[21].mxu1 }
 0x127   : > { %v2365_v26 = vpop.f32.mrb[22].mxu0  ;;  %v2367_v27 = vpop.f32.mrb[22].mxu1 }
 0x128   : > { %v1024_v28 = vpop.f32.mrb[23].mxu0  ;;  %v1224_v29 = vpop.f32.mrb[23].mxu1 }
 0x12d   : > { %v2369_v30 = vpop.f32.mrb[24].mxu0  ;;  %v2371_v31 = vpop.f32.mrb[24].mxu1 }
 0x12e   : > { %v1029_v32 = vpop.f32.mrb[25].mxu0  ;;  %v1229_v33 = vpop.f32.mrb[25].mxu1 }
 0x12f   : > { %v2373_v34 = vpop.f32.mrb[26].mxu0  ;;  %v2375_v35 = vpop.f32.mrb[26].mxu1 }
 0x130   : > { %v1032_v36 = vpop.f32.mrb[27].mxu0  ;;  %v1232_v37 = vpop.f32.mrb[27].mxu1 }
 0x135   : > { %v2377_v38 = vpop.f32.mrb[28].mxu0  ;;  %v2379_v39 = vpop.f32.mrb[28].mxu1 }
 0x136   : > { %v1037_v40 = vpop.f32.mrb[29].mxu0  ;;  %v1237_v41 = vpop.f32.mrb[29].mxu1 }
 0x137   : > { %v2381_v42 = vpop.f32.mrb[30].mxu0  ;;  %v2383_v43 = vpop.f32.mrb[30].mxu1 }
 0x138   : > { %v1040_v44 = vpop.f32.mrb[31].mxu0  ;;  %v1240_v45 = vpop.f32.mrb[31].mxu1 }
 0x13d   : > { %v2385_v48 = vpop.f32.mrb[32].mxu0  ;;  %v2387_v49 = vpop.f32.mrb[32].mxu1 }
 0x13e   : > { %v1045_v52 = vpop.f32.mrb[33].mxu0  ;;  %v1245_v53 = vpop.f32.mrb[33].mxu1 }
 0x13f   : > { %v2389_v56 = vpop.f32.mrb[34].mxu0  ;;  %v2391_v57 = vpop.f32.mrb[34].mxu1 }
 0x140   : > { %v1048_v60 = vpop.f32.mrb[35].mxu0  ;;  %v1248_v61 = vpop.f32.mrb[35].mxu1 }
 0x145   : > { %v2393_v0 = vpop.f32.mrb[36].mxu0  ;;  %v2395_v1 = vpop.f32.mrb[36].mxu1 }
 0x146   : > { %v1053_v4 = vpop.f32.mrb[37].mxu0  ;;  %v1253_v5 = vpop.f32.mrb[37].mxu1 }
 0x147   : > { %v2397_v8 = vpop.f32.mrb[38].mxu0  ;;  %v2399_v9 = vpop.f32.mrb[38].mxu1 }
 0x148   : > { %v1056_v12 = vpop.f32.mrb[39].mxu0  ;;  %v1256_v13 = vpop.f32.mrb[39].mxu1 }
 0x14d   : > { %v2401_v16 = vpop.f32.mrb[40].mxu0  ;;  %v2403_v17 = vpop.f32.mrb[40].mxu1 }
 0x14e   : > { %v1061_v20 = vpop.f32.mrb[41].mxu0  ;;  %v1261_v21 = vpop.f32.mrb[41].mxu1 }
 0x14f   : > { %v2405_v24 = vpop.f32.mrb[42].mxu0  ;;  %v2407_v25 = vpop.f32.mrb[42].mxu1 }
 0x150   : > { %v1064_v28 = vpop.f32.mrb[43].mxu0  ;;  %v1264_v29 = vpop.f32.mrb[43].mxu1 }
 0x151   : > { %v2426_v28 = vld [vmem:[%s2562_s2] ss:$0 sm:$0xff] }
 0x155   : > { %v2409_v32 = vpop.f32.mrb[44].mxu0  ;;  %v2411_v33 = vpop.f32.mrb[44].mxu1 }
 0x156   : > { %v1069_v36 = vpop.f32.mrb[45].mxu0  ;;  %v1269_v37 = vpop.f32.mrb[45].mxu1 }
 0x157   : > { %v2413_v40 = vpop.f32.mrb[46].mxu0  ;;  %v2415_v41 = vpop.f32.mrb[46].mxu1 }
 0x158   : > { %v1072_v44 = vpop.f32.mrb[47].mxu0  ;;  %v1272_v45 = vpop.f32.mrb[47].mxu1 }
 0x15d   : > { %v2417_v52 = vpop.f32.mrb[48].mxu0  ;;  %v2419_v53 = vpop.f32.mrb[48].mxu1 }
 0x15e   : > { %v1077_v60 = vpop.f32.mrb[49].mxu0  ;;  %v1277_v61 = vpop.f32.mrb[49].mxu1 }
 0x15f   : > { %v1078_v4 = vpop.f32.mrb[50].mxu0  ;;  %v1278_v5 = vpop.f32.mrb[50].mxu1 }
 0x160   : > { %v1378_v12 = vmax.f32 %v2321_v46, %v1078_v4  ;;  %v1403_v13 = vmax.f32 %v2323_v47, %v1278_v5  ;;  %v1080_v20 = vpop.f32.mrb[51].mxu0  ;;  %v1280_v21 = vpop.f32.mrb[51].mxu1 }
 0x162   : > { %v1428_v29 = vmax.f32 %v1378_v12, %v1403_v13 }
 0x164   : > { %v1460_v36 = vadd.f32 %v2426_v28, %v1428_v29 }
 0x165   : > { %v1083_v37 = vpop.f32.mrb[52].mxu0  ;;  %v1283_v44 = vpop.f32.mrb[52].mxu1 }
 0x166   : > { %v1485_v45 = vmax.f32 %v1460_v36, 0.0  ;;  %v1379_v60 = vmax.f32 %v2325_v50, %v1083_v37  ;;  %v1404_v46 = vmax.f32 %v2327_v51, %v1283_v44  ;;  %v1085_v61 = vpop.f32.mrb[53].mxu0  ;;  %v1285_v47 = vpop.f32.mrb[53].mxu1 }
 0x167   : > { %v1086_v4 = vpop.f32.mrb[54].mxu0  ;;  %v1286_v5 = vpop.f32.mrb[54].mxu1 }
 0x168   : > { %v1886_v12 = vpack.c.bf16 %v1485_v45, %v1485_v45  ;;  %v1429_v13 = vmax.f32 %v1379_v60, %v1404_v46  ;;  %v1380_v20 = vmax.f32 %v2329_v54, %v1086_v4  ;;  %v1405_v21 = vmax.f32 %v2331_v55, %v1286_v5  ;;  %v1088_v50 = vpop.f32.mrb[55].mxu0  ;;  %v1288_v29 = vpop.f32.mrb[55].mxu1 }
 0x16a   : > { %1612 = vst.msk [vmem:[%s2435_s16] sm:$0xf] %vm1611_vm1, %v1886_v12  ;;  %v1461_v51 = vadd.f32 %v2426_v28, %v1429_v13  ;;  %v1430_v36 = vmax.f32 %v1380_v20, %v1405_v21 }
 0x16c   : > { %v1486_v37 = vmax.f32 %v1461_v51, 0.0  ;;  %v1462_v44 = vadd.f32 %v2426_v28, %v1430_v36 }
 0x16d   : > { %v1091_v61 = vpop.f32.mrb[56].mxu0  ;;  %v1291_v47 = vpop.f32.mrb[56].mxu1 }
 0x16e   : > { %v1887_v45 = vpack.c.bf16 %v1486_v37, %v1486_v37  ;;  %v1487_v60 = vmax.f32 %v1462_v44, 0.0  ;;  %v1381_v54 = vmax.f32 %v2333_v58, %v1091_v61  ;;  %v1406_v55 = vmax.f32 %v2335_v59, %v1291_v47  ;;  %v1093_v46 = vpop.f32.mrb[57].mxu0  ;;  %v1293_v4 = vpop.f32.mrb[57].mxu1 }
 0x16f   : > { %v1094_v5 = vpop.f32.mrb[58].mxu0  ;;  %v1294_v50 = vpop.f32.mrb[58].mxu1 }
 0x170   : > { %1613 = vst.msk [vmem:[%s2435_s16 + $0x4] sm:$0xf] %vm1611_vm1, %v1887_v45  ;;  %v1888_v12 = vpack.c.bf16 %v1487_v60, %v1487_v60  ;;  %v1431_v13 = vmax.f32 %v1381_v54, %v1406_v55  ;;  %v1382_v20 = vmax.f32 %v2337_v62, %v1094_v5  ;;  %v1407_v21 = vmax.f32 %v2339_v63, %v1294_v50  ;;  %v1096_v29 = vpop.f32.mrb[59].mxu0  ;;  %v1296_v51 = vpop.f32.mrb[59].mxu1 }
 0x172   : > { %1614 = vst.msk [vmem:[%s2435_s16 + $0x8] sm:$0xf] %vm1611_vm1, %v1888_v12  ;;  %v1463_v58 = vadd.f32 %v2426_v28, %v1431_v13  ;;  %v1432_v59 = vmax.f32 %v1382_v20, %v1407_v21 }
 0x174   : > { %v1488_v36 = vmax.f32 %v1463_v58, 0.0  ;;  %v1464_v37 = vadd.f32 %v2426_v28, %v1432_v59 }
 0x175   : > { %v1099_v44 = vpop.f32.mrb[60].mxu0  ;;  %v1299_v61 = vpop.f32.mrb[60].mxu1 }
 0x176   : > { %v1889_v47 = vpack.c.bf16 %v1488_v36, %v1488_v36  ;;  %v1489_v45 = vmax.f32 %v1464_v37, 0.0  ;;  %v1383_v62 = vmax.f32 %v2341_v2, %v1099_v44  ;;  %v1408_v63 = vmax.f32 %v2343_v3, %v1299_v61  ;;  %v1101_v60 = vpop.f32.mrb[61].mxu0  ;;  %v1301_v54 = vpop.f32.mrb[61].mxu1 }
 0x177   : > { %v1102_v55 = vpop.f32.mrb[62].mxu0  ;;  %v1302_v46 = vpop.f32.mrb[62].mxu1 }
 0x178   : > { %1615 = vst.msk [vmem:[%s2435_s16 + $0xc] sm:$0xf] %vm1611_vm1, %v1889_v47  ;;  %v1890_v4 = vpack.c.bf16 %v1489_v45, %v1489_v45  ;;  %v1433_v5 = vmax.f32 %v1383_v62, %v1408_v63  ;;  %v1384_v50 = vmax.f32 %v2345_v6, %v1102_v55  ;;  %v1409_v12 = vmax.f32 %v2347_v7, %v1302_v46  ;;  %v1104_v13 = vpop.f32.mrb[63].mxu0  ;;  %v1304_v20 = vpop.f32.mrb[63].mxu1 }
 0x17a   : > { %1616 = vst.msk [vmem:[%s2435_s16 + $0x10] sm:$0xf] %vm1611_vm1, %v1890_v4  ;;  %v1465_v2 = vadd.f32 %v2426_v28, %v1433_v5  ;;  %v1434_v3 = vmax.f32 %v1384_v50, %v1409_v12 }
 0x17c   : > { %v1490_v21 = vmax.f32 %v1465_v2, 0.0  ;;  %v1466_v29 = vadd.f32 %v2426_v28, %v1434_v3 }
 0x17d   : > { %v1107_v51 = vpop.f32.mrb[64].mxu0  ;;  %v1307_v58 = vpop.f32.mrb[64].mxu1 }
 0x17e   : > { %v1891_v59 = vpack.c.bf16 %v1490_v21, %v1490_v21  ;;  %v1491_v36 = vmax.f32 %v1466_v29, 0.0  ;;  %v1385_v6 = vmax.f32 %v2349_v10, %v1107_v51  ;;  %v1410_v7 = vmax.f32 %v2351_v11, %v1307_v58  ;;  %v1109_v37 = vpop.f32.mrb[65].mxu0  ;;  %v1309_v44 = vpop.f32.mrb[65].mxu1 }
 0x17f   : > { %v1110_v61 = vpop.f32.mrb[66].mxu0  ;;  %v1310_v47 = vpop.f32.mrb[66].mxu1 }
 0x180   : > { %1617 = vst.msk [vmem:[%s2435_s16 + $0x14] sm:$0xf] %vm1611_vm1, %v1891_v59  ;;  %v1892_v45 = vpack.c.bf16 %v1491_v36, %v1491_v36  ;;  %v1435_v62 = vmax.f32 %v1385_v6, %v1410_v7  ;;  %v1386_v63 = vmax.f32 %v2353_v14, %v1110_v61  ;;  %v1411_v60 = vmax.f32 %v2355_v15, %v1310_v47  ;;  %v1112_v54 = vpop.f32.mrb[67].mxu0  ;;  %v1312_v55 = vpop.f32.mrb[67].mxu1 }
 0x182   : > { %1618 = vst.msk [vmem:[%s2435_s16 + $0x18] sm:$0xf] %vm1611_vm1, %v1892_v45  ;;  %v1467_v10 = vadd.f32 %v2426_v28, %v1435_v62  ;;  %v1436_v11 = vmax.f32 %v1386_v63, %v1411_v60 }
 0x184   : > { %v1492_v46 = vmax.f32 %v1467_v10, 0.0  ;;  %v1468_v4 = vadd.f32 %v2426_v28, %v1436_v11 }
 0x185   : > { %v1115_v5 = vpop.f32.mrb[68].mxu0  ;;  %v1315_v50 = vpop.f32.mrb[68].mxu1 }
 0x186   : > { %v1893_v12 = vpack.c.bf16 %v1492_v46, %v1492_v46  ;;  %v1493_v13 = vmax.f32 %v1468_v4, 0.0  ;;  %v1387_v14 = vmax.f32 %v2357_v18, %v1115_v5  ;;  %v1412_v15 = vmax.f32 %v2359_v19, %v1315_v50  ;;  %v1117_v20 = vpop.f32.mrb[69].mxu0  ;;  %v1317_v2 = vpop.f32.mrb[69].mxu1 }
 0x187   : > { %v1118_v3 = vpop.f32.mrb[70].mxu0  ;;  %v1318_v21 = vpop.f32.mrb[70].mxu1 }
 0x188   : > { %1619 = vst.msk [vmem:[%s2435_s16 + $0x1c] sm:$0xf] %vm1611_vm1, %v1893_v12  ;;  %v1894_v29 = vpack.c.bf16 %v1493_v13, %v1493_v13  ;;  %v1437_v51 = vmax.f32 %v1387_v14, %v1412_v15  ;;  %v1388_v58 = vmax.f32 %v2361_v22, %v1118_v3  ;;  %v1413_v59 = vmax.f32 %v2363_v23, %v1318_v21  ;;  %v1120_v36 = vpop.f32.mrb[71].mxu0  ;;  %v1320_v6 = vpop.f32.mrb[71].mxu1 }
 0x18a   : > { %1620 = vst.msk [vmem:[%s2435_s16 + $0x20] sm:$0xf] %vm1611_vm1, %v1894_v29  ;;  %v1469_v18 = vadd.f32 %v2426_v28, %v1437_v51  ;;  %v1438_v19 = vmax.f32 %v1388_v58, %v1413_v59 }
 0x18c   : > { %v1494_v7 = vmax.f32 %v1469_v18, 0.0  ;;  %v1470_v37 = vadd.f32 %v2426_v28, %v1438_v19 }
 0x18d   : > { %v1123_v44 = vpop.f32.mrb[72].mxu0  ;;  %v1323_v61 = vpop.f32.mrb[72].mxu1 }
 0x18e   : > { %v1895_v47 = vpack.c.bf16 %v1494_v7, %v1494_v7  ;;  %v1495_v45 = vmax.f32 %v1470_v37, 0.0  ;;  %v1389_v22 = vmax.f32 %v2365_v26, %v1123_v44  ;;  %v1414_v23 = vmax.f32 %v2367_v27, %v1323_v61  ;;  %v1125_v62 = vpop.f32.mrb[73].mxu0  ;;  %v1325_v63 = vpop.f32.mrb[73].mxu1 }
 0x18f   : > { %v1126_v60 = vpop.f32.mrb[74].mxu0  ;;  %v1326_v54 = vpop.f32.mrb[74].mxu1 }
 0x190   : > { %1621 = vst.msk [vmem:[%s2435_s16 + $0x24] sm:$0xf] %vm1611_vm1, %v1895_v47  ;;  %v1896_v55 = vpack.c.bf16 %v1495_v45, %v1495_v45  ;;  %v1439_v10 = vmax.f32 %v1389_v22, %v1414_v23  ;;  %v1390_v11 = vmax.f32 %v2369_v30, %v1126_v60  ;;  %v1415_v46 = vmax.f32 %v2371_v31, %v1326_v54  ;;  %v1128_v4 = vpop.f32.mrb[75].mxu0  ;;  %v1328_v5 = vpop.f32.mrb[75].mxu1 }
 0x192   : > { %1622 = vst.msk [vmem:[%s2435_s16 + $0x28] sm:$0xf] %vm1611_vm1, %v1896_v55  ;;  %v1471_v26 = vadd.f32 %v2426_v28, %v1439_v10  ;;  %v1440_v27 = vmax.f32 %v1390_v11, %v1415_v46 }
 0x194   : > { %v1496_v50 = vmax.f32 %v1471_v26, 0.0  ;;  %v1472_v12 = vadd.f32 %v2426_v28, %v1440_v27 }
 0x195   : > { %v1131_v13 = vpop.f32.mrb[76].mxu0  ;;  %v1331_v14 = vpop.f32.mrb[76].mxu1 }
 0x196   : > { %v1897_v15 = vpack.c.bf16 %v1496_v50, %v1496_v50  ;;  %v1497_v20 = vmax.f32 %v1472_v12, 0.0  ;;  %v1391_v30 = vmax.f32 %v2373_v34, %v1131_v13  ;;  %v1416_v31 = vmax.f32 %v2375_v35, %v1331_v14  ;;  %v1133_v2 = vpop.f32.mrb[77].mxu0  ;;  %v1333_v3 = vpop.f32.mrb[77].mxu1 }
 0x197   : > { %v1134_v21 = vpop.f32.mrb[78].mxu0  ;;  %v1334_v29 = vpop.f32.mrb[78].mxu1 }
 0x198   : > { %1623 = vst.msk [vmem:[%s2435_s16 + $0x2c] sm:$0xf] %vm1611_vm1, %v1897_v15  ;;  %v1898_v51 = vpack.c.bf16 %v1497_v20, %v1497_v20  ;;  %v1441_v58 = vmax.f32 %v1391_v30, %v1416_v31  ;;  %v1392_v59 = vmax.f32 %v2377_v38, %v1134_v21  ;;  %v1417_v36 = vmax.f32 %v2379_v39, %v1334_v29  ;;  %v1136_v6 = vpop.f32.mrb[79].mxu0  ;;  %v1336_v18 = vpop.f32.mrb[79].mxu1 }
 0x19a   : > { %1624 = vst.msk [vmem:[%s2435_s16 + $0x30] sm:$0xf] %vm1611_vm1, %v1898_v51  ;;  %v1473_v34 = vadd.f32 %v2426_v28, %v1441_v58  ;;  %v1442_v35 = vmax.f32 %v1392_v59, %v1417_v36 }
 0x19c   : > { %v1498_v19 = vmax.f32 %v1473_v34, 0.0  ;;  %v1474_v7 = vadd.f32 %v2426_v28, %v1442_v35 }
 0x19d   : > { %v1139_v37 = vpop.f32.mrb[80].mxu0  ;;  %v1339_v44 = vpop.f32.mrb[80].mxu1 }
 0x19e   : > { %v1899_v61 = vpack.c.bf16 %v1498_v19, %v1498_v19  ;;  %v1499_v47 = vmax.f32 %v1474_v7, 0.0  ;;  %v1393_v38 = vmax.f32 %v2381_v42, %v1139_v37  ;;  %v1418_v39 = vmax.f32 %v2383_v43, %v1339_v44  ;;  %v1141_v45 = vpop.f32.mrb[81].mxu0  ;;  %v1341_v22 = vpop.f32.mrb[81].mxu1 }
 0x19f   : > { %v1142_v23 = vpop.f32.mrb[82].mxu0  ;;  %v1342_v62 = vpop.f32.mrb[82].mxu1 }
 0x1a0   : > { %1625 = vst.msk [vmem:[%s2435_s16 + $0x34] sm:$0xf] %vm1611_vm1, %v1899_v61  ;;  %v1900_v63 = vpack.c.bf16 %v1499_v47, %v1499_v47  ;;  %v1443_v60 = vmax.f32 %v1393_v38, %v1418_v39  ;;  %v1394_v54 = vmax.f32 %v2385_v48, %v1142_v23  ;;  %v1419_v55 = vmax.f32 %v2387_v49, %v1342_v62  ;;  %v1144_v10 = vpop.f32.mrb[83].mxu0  ;;  %v1344_v11 = vpop.f32.mrb[83].mxu1 }
 0x1a2   : > { %1626 = vst.msk [vmem:[%s2435_s16 + $0x38] sm:$0xf] %vm1611_vm1, %v1900_v63  ;;  %v1475_v42 = vadd.f32 %v2426_v28, %v1443_v60  ;;  %v1444_v43 = vmax.f32 %v1394_v54, %v1419_v55 }
 0x1a4   : > { %v1500_v46 = vmax.f32 %v1475_v42, 0.0  ;;  %v1476_v4 = vadd.f32 %v2426_v28, %v1444_v43 }
 0x1a5   : > { %v1147_v5 = vpop.f32.mrb[84].mxu0  ;;  %v1347_v26 = vpop.f32.mrb[84].mxu1 }
 0x1a6   : > { %v1901_v27 = vpack.c.bf16 %v1500_v46, %v1500_v46  ;;  %v1501_v50 = vmax.f32 %v1476_v4, 0.0  ;;  %v1395_v48 = vmax.f32 %v2389_v56, %v1147_v5  ;;  %v1420_v49 = vmax.f32 %v2391_v57, %v1347_v26  ;;  %v1149_v12 = vpop.f32.mrb[85].mxu0  ;;  %v1349_v13 = vpop.f32.mrb[85].mxu1 }
 0x1a7   : > { %v1150_v14 = vpop.f32.mrb[86].mxu0  ;;  %v1350_v15 = vpop.f32.mrb[86].mxu1 }
 0x1a8   : > { %1627 = vst.msk [vmem:[%s2435_s16 + $0x3c] sm:$0xf] %vm1611_vm1, %v1901_v27  ;;  %v1902_v20 = vpack.c.bf16 %v1501_v50, %v1501_v50  ;;  %v1445_v30 = vmax.f32 %v1395_v48, %v1420_v49  ;;  %v1396_v31 = vmax.f32 %v2393_v0, %v1150_v14  ;;  %v1421_v2 = vmax.f32 %v2395_v1, %v1350_v15  ;;  %v1152_v3 = vpop.f32.mrb[87].mxu0  ;;  %v1352_v21 = vpop.f32.mrb[87].mxu1 }
 0x1aa   : > { %1628 = vst.msk [vmem:[%s2435_s16 + $0x40] sm:$0xf] %vm1611_vm1, %v1902_v20  ;;  %v1477_v56 = vadd.f32 %v2426_v28, %v1445_v30  ;;  %v1446_v57 = vmax.f32 %v1396_v31, %v1421_v2 }
 0x1ac   : > { %v1502_v29 = vmax.f32 %v1477_v56, 0.0  ;;  %v1478_v51 = vadd.f32 %v2426_v28, %v1446_v57 }
 0x1ad   : > { %v1155_v58 = vpop.f32.mrb[88].mxu0  ;;  %v1355_v59 = vpop.f32.mrb[88].mxu1 }
 0x1ae   : > { %v1903_v36 = vpack.c.bf16 %v1502_v29, %v1502_v29  ;;  %v1503_v6 = vmax.f32 %v1478_v51, 0.0  ;;  %v1397_v0 = vmax.f32 %v2397_v8, %v1155_v58  ;;  %v1422_v1 = vmax.f32 %v2399_v9, %v1355_v59  ;;  %v1157_v18 = vpop.f32.mrb[89].mxu0  ;;  %v1357_v34 = vpop.f32.mrb[89].mxu1 }
 0x1af   : > { %v1158_v35 = vpop.f32.mrb[90].mxu0  ;;  %v1358_v19 = vpop.f32.mrb[90].mxu1 }
 0x1b0   : > { %1629 = vst.msk [vmem:[%s2435_s16 + $0x44] sm:$0xf] %vm1611_vm1, %v1903_v36  ;;  %v1904_v7 = vpack.c.bf16 %v1503_v6, %v1503_v6  ;;  %v1447_v37 = vmax.f32 %v1397_v0, %v1422_v1  ;;  %v1398_v44 = vmax.f32 %v2401_v16, %v1158_v35  ;;  %v1423_v61 = vmax.f32 %v2403_v17, %v1358_v19  ;;  %v1160_v47 = vpop.f32.mrb[91].mxu0  ;;  %v1360_v38 = vpop.f32.mrb[91].mxu1 }
 0x1b2   : > { %1630 = vst.msk [vmem:[%s2435_s16 + $0x48] sm:$0xf] %vm1611_vm1, %v1904_v7  ;;  %v1479_v8 = vadd.f32 %v2426_v28, %v1447_v37  ;;  %v1448_v9 = vmax.f32 %v1398_v44, %v1423_v61 }
 0x1b4   : > { %v1504_v39 = vmax.f32 %v1479_v8, 0.0  ;;  %v1480_v45 = vadd.f32 %v2426_v28, %v1448_v9 }
 0x1b5   : > { %v1163_v22 = vpop.f32.mrb[92].mxu0  ;;  %v1363_v23 = vpop.f32.mrb[92].mxu1 }
 0x1b6   : > { %v1905_v62 = vpack.c.bf16 %v1504_v39, %v1504_v39  ;;  %v1505_v63 = vmax.f32 %v1480_v45, 0.0  ;;  %v1399_v16 = vmax.f32 %v2405_v24, %v1163_v22  ;;  %v1424_v17 = vmax.f32 %v2407_v25, %v1363_v23  ;;  %v1165_v60 = vpop.f32.mrb[93].mxu0  ;;  %v1365_v54 = vpop.f32.mrb[93].mxu1 }
 0x1b7   : > { %v1166_v55 = vpop.f32.mrb[94].mxu0  ;;  %v1366_v10 = vpop.f32.mrb[94].mxu1 }
 0x1b8   : > { %1631 = vst.msk [vmem:[%s2435_s16 + $0x4c] sm:$0xf] %vm1611_vm1, %v1905_v62  ;;  %v1906_v11 = vpack.c.bf16 %v1505_v63, %v1505_v63  ;;  %v1449_v42 = vmax.f32 %v1399_v16, %v1424_v17  ;;  %v1400_v43 = vmax.f32 %v2409_v32, %v1166_v55  ;;  %v1425_v46 = vmax.f32 %v2411_v33, %v1366_v10  ;;  %v1168_v4 = vpop.f32.mrb[95].mxu0  ;;  %v1368_v5 = vpop.f32.mrb[95].mxu1 }
 0x1ba   : > { %1632 = vst.msk [vmem:[%s2435_s16 + $0x50] sm:$0xf] %vm1611_vm1, %v1906_v11  ;;  %v1481_v24 = vadd.f32 %v2426_v28, %v1449_v42  ;;  %v1450_v25 = vmax.f32 %v1400_v43, %v1425_v46 }
 0x1bc   : > { %v1506_v26 = vmax.f32 %v1481_v24, 0.0  ;;  %v1482_v27 = vadd.f32 %v2426_v28, %v1450_v25 }
 0x1bd   : > { %v1171_v50 = vpop.f32.mrb[96].mxu0  ;;  %v1371_v48 = vpop.f32.mrb[96].mxu1 }
 0x1be   : > { %v1907_v49 = vpack.c.bf16 %v1506_v26, %v1506_v26  ;;  %v1507_v12 = vmax.f32 %v1482_v27, 0.0  ;;  %v1401_v32 = vmax.f32 %v2413_v40, %v1171_v50  ;;  %v1426_v33 = vmax.f32 %v2415_v41, %v1371_v48  ;;  %v1173_v13 = vpop.f32.mrb[97].mxu0  ;;  %v1373_v14 = vpop.f32.mrb[97].mxu1 }
 0x1bf   : > { %v1174_v15 = vpop.f32.mrb[98].mxu0  ;;  %v1374_v20 = vpop.f32.mrb[98].mxu1 }
 0x1c0   : > { %1633 = vst.msk [vmem:[%s2435_s16 + $0x54] sm:$0xf] %vm1611_vm1, %v1907_v49  ;;  %v1908_v30 = vpack.c.bf16 %v1507_v12, %v1507_v12  ;;  %v1451_v31 = vmax.f32 %v1401_v32, %v1426_v33  ;;  %v1402_v2 = vmax.f32 %v2417_v52, %v1174_v15  ;;  %v1427_v3 = vmax.f32 %v2419_v53, %v1374_v20  ;;  %v1176_v21 = vpop.f32.mrb[99].mxu0  ;;  %v1376_v56 = vpop.f32.mrb[99].mxu1 }
 0x1c2   : > { %1634 = vst.msk [vmem:[%s2435_s16 + $0x58] sm:$0xf] %vm1611_vm1, %v1908_v30  ;;  %v1483_v40 = vadd.f32 %v2426_v28, %v1451_v31  ;;  %v1452_v41 = vmax.f32 %v1402_v2, %v1427_v3 }
 0x1c4   : > { %v1508_v57 = vmax.f32 %v1483_v40, 0.0  ;;  %v1484_v29 = vadd.f32 %v2426_v28, %v1452_v41 }
 0x1c6   : > { %v1909_v51 = vpack.c.bf16 %v1508_v57, %v1508_v57  ;;  %v1509_v58 = vmax.f32 %v1484_v29, 0.0 }
 0x1c8   : > { %1635 = vst.msk [vmem:[%s2435_s16 + $0x5c] sm:$0xf] %vm1611_vm1, %v1909_v51  ;;  %v1910_v59 = vpack.c.bf16 %v1509_v58, %v1509_v58 }
 0x1ca   : > { %1636 = vst.msk [vmem:[%s2435_s16 + $0x60] sm:$0xf] %vm1611_vm1, %v1910_v59 }
 0x1cb PF: > { %s13_s12 = sadd.s32 1, %s2105_s12  }
 0x1cc   : > { %p10_p4 = scmp.ge.s32.totalorder %s13_s12, 4  }
 0x1ce   :  { %12 = sbr.rel (!%p10_p4) target bundleno = 1 (0x1), region = 62 }

// kernel: classifier_forward.8
= control target key start
LH: loop header
LB: loop body
LE: loop exit
PB: predicated region body
PF: predicated region fallthrough
CT: control target
= control target key end

     0   :  { %s979_s12 = smov 0   ;;  %s1165_s0 = inlined_call_operand.vmem [shape: bf16[2,224,234], index: 0, kind: input, shape index: {}]   ;;  %s1166_s1 = inlined_call_operand.vmem [shape: bf16[234,32], index: 1, kind: input, shape index: {}]   ;;  %s1167_s2 = inlined_call_operand.vmem [shape: f32[1,32], index: 2, kind: input, shape index: {}]   ;;  %s1168_s3 = inlined_call_operand.vmem [shape: bf16[2,56,32], index: 3, kind: output, shape index: {}]  }
   0x1 LB: > { %s771_s13 = sadd.s32 4294967295, %s956_s12   ;;  %p775_p0 = scmp.ge.s32.totalorder %s956_s12, 1  ;;  %s956_s12 = sphi %s979_s12, %s13_s12  }
   0x2   : > { %p137_p1 = scmp.lt.s32.totalorder %s956_s12, 3 }
   0x4   : > { %p138_p2 = pnand %p775_p0, %p137_p1 }
   0x5   : > { %v893_v0 = vld [vmem:[%s1166_s1] sm:$0xff] (!%p138_p2)   ;;  %v958_v1 = vmov (!%p138_p2), 0   ;;  %v894_v2 = vld [vmem:[%s1166_s1 + $0x8] sm:$0xff] (!%p138_p2)   ;;  %p161_p3 = scmp.lt.s32.totalorder (!%p138_p2), %s771_s13, 1  ;;  %v895_v3 = vld [vmem:[%s1166_s1 + $0x10] sm:$0xff] (!%p138_p2)   ;;  %vm445_vm0 = vcmask (!%p138_p2), 867328  }
   0x6   : > { %141 = sbr.rel (%p138_p2) target bundleno = 339 (0x153), region = 32  ;;  %492 = vmatprep.subr.bf16.mxu0 (!%p138_p2), %v958_v1  ;;  %852 = vmatprep.subr.bf16.mxu1 (!%p138_p2), %v958_v1  ;;  %v896_v4 = vld [vmem:[%s1166_s1 + $0x18] sm:$0xff] (!%p138_p2)   ;;  %v897_v5 = vld [vmem:[%s1166_s1 + $0x20] sm:$0xff] (!%p138_p2)   ;;  %v898_v8 = vld [vmem:[%s1166_s1 + $0x28] sm:$0xff] (!%p138_p2)   ;;  %vm488_vm1 = vcmask (!%p138_p2), 1044480   ;;  %vm708_vm2 = vcmask (!%p138_p2), 257024  }
   0x7   : > { %493 = vmatpush1.bf16.msra.mxu0 (!%p138_p2), %v893_v0  ;;  %867 = vmatpush1.bf16.msra.mxu1 (!%p138_p2), %v893_v0  ;;  %v899_v9 = vld [vmem:[%s1166_s1 + $0x30] sm:$0xff] (!%p138_p2)   ;;  %v900_v10 = vld [vmem:[%s1166_s1 + $0x38] sm:$0xff] (!%p138_p2)   ;;  %v901_v11 = vld [vmem:[%s1166_s1 + $0x40] sm:$0xff] (!%p138_p2)  }
   0x8   : > { %494 = vmatprep.subr.bf16.mxu0 (!%p138_p2), %v958_v1  ;;  %853 = vmatprep.subr.bf16.mxu1 (!%p138_p2), %v958_v1  ;;  %v902_v12 = vld [vmem:[%s1166_s1 + $0x48] sm:$0xff] (!%p138_p2)   ;;  %v903_v13 = vld [vmem:[%s1166_s1 + $0x50] sm:$0xff] (!%p138_p2)   ;;  %v904_v14 = vld [vmem:[%s1166_s1 + $0x58] sm:$0xff] (!%p138_p2)  }
   0x9   : > { %v905_v15 = vld [vmem:[%s1166_s1 + $0x60] sm:$0xff] (!%p138_p2)   ;;  %v906_v16 = vld [vmem:[%s1166_s1 + $0x68] sm:$0xff] (!%p138_p2)   ;;  %v907_v17 = vld [vmem:[%s1166_s1 + $0x70] sm:$0x1f] (!%p138_p2)  }
   0xa   : > { %v490_v18 = vsel (!%p138_p2), %vm488_vm1, %v907_v17, 0 }
   0xb   : > { %495 = vmatpush1.bf16.msra.mxu0 (!%p138_p2), %v894_v2  ;;  %868 = vmatpush1.bf16.msra.mxu1 (!%p138_p2), %v894_v2 }
   0xc   : > { %496 = vmatprep.subr.bf16.mxu0 (!%p138_p2), %v958_v1  ;;  %854 = vmatprep.subr.bf16.mxu1 (!%p138_p2), %v958_v1 }
   0xd   : > { %s1170_s13 = smov (!%p161_p3, %s771_s13), 1 }
   0xe   : > { %s882_s20 = smul.u32 224, %s1170_s13 }
   0xf   : > { %497 = vmatpush1.bf16.msra.mxu0 %v895_v3  ;;  %869 = vmatpush1.bf16.msra.mxu1 %v895_v3 }
  0x10   : > { %498 = vmatprep.subr.bf16.mxu0 %v958_v1  ;;  %855 = vmatprep.subr.bf16.mxu1 %v958_v1  ;;  %s1013_s25 = scalar_lea.vmem %s1165_s0, %s882_s20 }
  0x11   : > { %v910_v6 = vld [vmem:[%s1013_s25 + $0x4] ss:$8 sps:$4 sm:$0xff]   ;;  %v913_v7 = vld [vmem:[%s1013_s25 + $0x74] ss:$8 sps:$4 sm:$0xff]   ;;  %v908_v19 = vld [vmem:[%s1013_s25] ss:$8 sps:$4 sm:$0xff]  }
  0x12   : > { %821 = vmatprep.mubr.msk.bf16.mxu0 %vm445_vm0, %v910_v6  ;;  %828 = vmatprep.mubr.msk.bf16.mxu1 %vm445_vm0, %v913_v7  ;;  %v911_v20 = vld [vmem:[%s1013_s25 + $0x70] ss:$8 sps:$4 sm:$0xff]   ;;  %v914_v21 = vld [vmem:[%s1013_s25 + $0x14] ss:$8 sps:$4 sm:$0xff]   ;;  %v916_v22 = vld [vmem:[%s1013_s25 + $0x84] ss:$8 sps:$4 sm:$0xff]  }
  0x13   : > { %499 = vmatpush1.bf16.msra.mxu0 %v896_v4  ;;  %870 = vmatpush1.bf16.msra.mxu1 %v896_v4  ;;  %v918_v23 = vld [vmem:[%s1013_s25 + $0x10] ss:$8 sps:$4 sm:$0xff]   ;;  %v919_v24 = vld [vmem:[%s1013_s25 + $0x80] ss:$8 sps:$4 sm:$0xff]   ;;  %v920_v25 = vld [vmem:[%s1013_s25 + $0x24] ss:$8 sps:$4 sm:$0xff]  }
  0x14   : > { %500 = vmatprep.subr.bf16.mxu0 %v958_v1  ;;  %856 = vmatprep.subr.bf16.mxu1 %v958_v1  ;;  %v922_v26 = vld [vmem:[%s1013_s25 + $0x94] ss:$8 sps:$4 sm:$0xff]   ;;  %v924_v27 = vld [vmem:[%s1013_s25 + $0x20] ss:$8 sps:$4 sm:$0xff]   ;;  %v925_v28 = vld [vmem:[%s1013_s25 + $0x90] ss:$8 sps:$4 sm:$0xff]  }
  0x15   : > { %v926_v29 = vld [vmem:[%s1013_s25 + $0x34] ss:$8 sps:$4 sm:$0xff]   ;;  %v928_v30 = vld [vmem:[%s1013_s25 + $0xa4] ss:$8 sps:$4 sm:$0xff]   ;;  %v930_v31 = vld [vmem:[%s1013_s25 + $0x30] ss:$8 sps:$4 sm:$0xff]  }
  0x16   : > { %v931_v32 = vld [vmem:[%s1013_s25 + $0xa0] ss:$8 sps:$4 sm:$0xff]   ;;  %v932_v33 = vld [vmem:[%s1013_s25 + $0x44] ss:$8 sps:$4 sm:$0xff]   ;;  %v934_v34 = vld [vmem:[%s1013_s25 + $0xb4] ss:$8 sps:$4 sm:$0xff]  }
  0x17   : > { %501 = vmatpush1.bf16.msra.mxu0 %v897_v5  ;;  %871 = vmatpush1.bf16.msra.mxu1 %v897_v5  ;;  %v936_v35 = vld [vmem:[%s1013_s25 + $0x40] ss:$8 sps:$4 sm:$0xff]   ;;  %v937_v36 = vld [vmem:[%s1013_s25 + $0xb0] ss:$8 sps:$4 sm:$0xff]   ;;  %v938_v37 = vld [vmem:[%s1013_s25 + $0x54] ss:$8 sps:$4 sm:$0xff]  }
  0x18   : > { %502 = vmatprep.subr.bf16.mxu0 %v958_v1  ;;  %857 = vmatprep.subr.bf16.mxu1 %v958_v1  ;;  %v940_v38 = vld [vmem:[%s1013_s25 + $0xc4] ss:$8 sps:$4 sm:$0xff]   ;;  %v942_v39 = vld [vmem:[%s1013_s25 + $0x50] ss:$8 sps:$4 sm:$0xff]   ;;  %v943_v40 = vld [vmem:[%s1013_s25 + $0xc0] ss:$8 sps:$4 sm:$0xff]  }
  0x19   : > { %v944_v41 = vld [vmem:[%s1013_s25 + $0x64] ss:$8 sps:$4 sm:$0xff]   ;;  %v946_v42 = vld [vmem:[%s1013_s25 + $0xd4] ss:$8 sps:$4 sm:$0xff]   ;;  %v948_v43 = vld [vmem:[%s1013_s25 + $0x60] ss:$8 sps:$4 sm:$0xff]  }
  0x1a   : > { %v949_v44 = vld [vmem:[%s1013_s25 + $0xd0] ss:$8 sps:$4 sm:$0xff]   ;;  %s883_s25 = smul.u32 28, %s1170_s13 }
  0x1b   : > { %503 = vmatpush1.bf16.msra.mxu0 %v898_v8  ;;  %872 = vmatpush1.bf16.msra.mxu1 %v898_v8 }
  0x1c   : > { %504 = vmatprep.subr.bf16.mxu0 %v958_v1  ;;  %858 = vmatprep.subr.bf16.mxu1 %v958_v1  ;;  %s1134_s28 = scalar_lea.vmem %s1168_s3, %s883_s25 }
  0x1f   : > { %505 = vmatpush1.bf16.msra.mxu0 %v899_v9  ;;  %873 = vmatpush1.bf16.msra.mxu1 %v899_v9 }
  0x20   : > { %506 = vmatprep.subr.bf16.mxu0 %v958_v1  ;;  %859 = vmatprep.subr.bf16.mxu1 %v958_v1 }
  0x23   : > { %507 = vmatpush1.bf16.msra.mxu0 %v900_v10  ;;  %874 = vmatpush1.bf16.msra.mxu1 %v900_v10 }
  0x24   : > { %508 = vmatprep.subr.bf16.mxu0 %v958_v1  ;;  %860 = vmatprep.subr.bf16.mxu1 %v958_v1 }
  0x27   : > { %509 = vmatpush1.bf16.msra.mxu0 %v901_v11  ;;  %875 = vmatpush1.bf16.msra.mxu1 %v901_v11 }
  0x28   : > { %510 = vmatprep.subr.bf16.mxu0 %v958_v1  ;;  %861 = vmatprep.subr.bf16.mxu1 %v958_v1 }
  0x2b   : > { %511 = vmatpush1.bf16.msra.mxu0 %v902_v12  ;;  %876 = vmatpush1.bf16.msra.mxu1 %v902_v12 }
  0x2c   : > { %512 = vmatprep.subr.bf16.mxu0 %v958_v1  ;;  %862 = vmatprep.subr.bf16.mxu1 %v958_v1 }
  0x2f   : > { %513 = vmatpush1.bf16.msra.mxu0 %v903_v13  ;;  %877 = vmatpush1.bf16.msra.mxu1 %v903_v13 }
  0x30   : > { %514 = vmatprep.subr.bf16.mxu0 %v958_v1  ;;  %863 = vmatprep.subr.bf16.mxu1 %v958_v1 }
  0x33   : > { %515 = vmatpush1.bf16.msra.mxu0 %v904_v14  ;;  %878 = vmatpush1.bf16.msra.mxu1 %v904_v14 }
  0x34   : > { %516 = vmatprep.subr.bf16.mxu0 %v958_v1  ;;  %864 = vmatprep.subr.bf16.mxu1 %v958_v1 }
  0x37   : > { %517 = vmatpush1.bf16.msra.mxu0 %v905_v15  ;;  %879 = vmatpush1.bf16.msra.mxu1 %v905_v15  ;;  %v1127_v15 = vld [vmem:[%s1167_s2] ss:$0 sm:$0xff] }
  0x38   : > { %518 = vmatprep.subr.bf16.mxu0 %v958_v1  ;;  %865 = vmatprep.subr.bf16.mxu1 %v958_v1 }
  0x3b   : > { %519 = vmatpush1.bf16.msra.mxu0 %v906_v16  ;;  %880 = vmatpush1.bf16.msra.mxu1 %v906_v16 }
  0x3c   : > { %520 = vmatprep.subr.bf16.mxu0 %v958_v1  ;;  %866 = vmatprep.subr.bf16.mxu1 %v958_v1 }
  0x3f   : > { %521 = vmatpush1.bf16.msra.mxu0 %v490_v18  ;;  %881 = vmatpush1.bf16.msra.mxu1 %v490_v18 }
  0x42   : > { %525 = vmatmul.mubr.bf16.vlgmr.msra.gmra.mrb[0].mxu0 %v908_v19  ;;  %581 = vmatmul.mubr.bf16.vlgmr.msra.gmra.mrb[0].mxu1 %v911_v20 }
  0x43   : > { %822 = vmatprep.mubr.msk.bf16.mxu0 %vm445_vm0, %v914_v21  ;;  %829 = vmatprep.mubr.msk.bf16.mxu1 %vm445_vm0, %v916_v22 }
  0x4a   : > { %533 = vmatmul.mubr.bf16.gmra.mrb[4].mxu0 %v918_v23  ;;  %589 = vmatmul.mubr.bf16.gmra.mrb[4].mxu1 %v919_v24 }
  0x4b   : > { %823 = vmatprep.mubr.msk.bf16.mxu0 %vm445_vm0, %v920_v25  ;;  %830 = vmatprep.mubr.msk.bf16.mxu1 %vm445_vm0, %v922_v26 }
  0x52   : > { %541 = vmatmul.mubr.bf16.gmra.mrb[8].mxu0 %v924_v27  ;;  %597 = vmatmul.mubr.bf16.gmra.mrb[8].mxu1 %v925_v28 }
  0x53   : > { %824 = vmatprep.mubr.msk.bf16.mxu0 %vm445_vm0, %v926_v29  ;;  %831 = vmatprep.mubr.msk.bf16.mxu1 %vm445_vm0, %v928_v30 }
  0x5a   : > { %549 = vmatmul.mubr.bf16.gmra.mrb[12].mxu0 %v930_v31  ;;  %605 = vmatmul.mubr.bf16.gmra.mrb[12].mxu1 %v931_v32 }
  0x5b   : > { %825 = vmatprep.mubr.msk.bf16.mxu0 %vm445_vm0, %v932_v33  ;;  %832 = vmatprep.mubr.msk.bf16.mxu1 %vm445_vm0, %v934_v34 }
  0x62   : > { %557 = vmatmul.mubr.bf16.gmra.mrb[16].mxu0 %v936_v35  ;;  %613 = vmatmul.mubr.bf16.gmra.mrb[16].mxu1 %v937_v36 }
  0x63   : > { %826 = vmatprep.mubr.msk.bf16.mxu0 %vm445_vm0, %v938_v37  ;;  %833 = vmatprep.mubr.msk.bf16.mxu1 %vm445_vm0, %v940_v38 }
  0x6a   : > { %565 = vmatmul.mubr.bf16.gmra.mrb[20].mxu0 %v942_v39  ;;  %621 = vmatmul.mubr.bf16.gmra.mrb[20].mxu1 %v943_v40 }
  0x6b   : > { %827 = vmatprep.mubr.msk.bf16.mxu0 %vm445_vm0, %v944_v41  ;;  %834 = vmatprep.mubr.msk.bf16.mxu1 %vm445_vm0, %v946_v42 }
  0x72   : > { %573 = vmatmul.mubr.bf16.gmra.mrb[24].mxu0 %v948_v43  ;;  %629 = vmatmul.mubr.bf16.gmra.mrb[24].mxu1 %v949_v44 }
 0x115   : > { %v526_v45 = vpop.f32.mrb[0].mxu0  ;;  %v582_v46 = vpop.f32.mrb[0].mxu1 }
 0x116   : > { %v528_v47 = vpop.f32.mrb[1].mxu0  ;;  %v584_v48 = vpop.f32.mrb[1].mxu1 }
 0x117   : > { %v529_v49 = vpop.f32.mrb[2].mxu0  ;;  %v585_v50 = vpop.f32.mrb[2].mxu1 }
 0x118   : > { %v531_v51 = vpop.f32.mrb[3].mxu0  ;;  %v587_v52 = vpop.f32.mrb[3].mxu1 }
 0x11d   : > { %v534_v53 = vpop.f32.mrb[4].mxu0  ;;  %v590_v54 = vpop.f32.mrb[4].mxu1 }
 0x11e   : > { %v536_v55 = vpop.f32.mrb[5].mxu0  ;;  %v592_v56 = vpop.f32.mrb[5].mxu1 }
 0x11f   : > { %v537_v57 = vpop.f32.mrb[6].mxu0  ;;  %v593_v58 = vpop.f32.mrb[6].mxu1 }
 0x120   : > { %v539_v59 = vpop.f32.mrb[7].mxu0  ;;  %v595_v60 = vpop.f32.mrb[7].mxu1 }
 0x125   : > { %v1112_v61 = vpop.f32.mrb[8].mxu0  ;;  %v1114_v62 = vpop.f32.mrb[8].mxu1 }
 0x126   : > { %v544_v63 = vpop.f32.mrb[9].mxu0  ;;  %v600_v0 = vpop.f32.mrb[9].mxu1 }
 0x127   : > { %v1116_v1 = vpop.f32.mrb[10].mxu0  ;;  %v1118_v2 = vpop.f32.mrb[10].mxu1 }
 0x128   : > { %v547_v3 = vpop.f32.mrb[11].mxu0  ;;  %v603_v4 = vpop.f32.mrb[11].mxu1 }
 0x12d   : > { %v1120_v5 = vpop.f32.mrb[12].mxu0  ;;  %v1122_v6 = vpop.f32.mrb[12].mxu1 }
 0x12e   : > { %v552_v7 = vpop.f32.mrb[13].mxu0  ;;  %v608_v8 = vpop.f32.mrb[13].mxu1 }
 0x12f   : > { %v553_v9 = vpop.f32.mrb[14].mxu0  ;;  %v609_v10 = vpop.f32.mrb[14].mxu1 }
 0x130   : > { %v637_v11 = vmax.f32 %v526_v45, %v553_v9  ;;  %v644_v12 = vmax.f32 %v582_v46, %v609_v10  ;;  %v555_v13 = vpop.f32.mrb[15].mxu0  ;;  %v611_v14 = vpop.f32.mrb[15].mxu1 }
 0x132   : > { %v651_v16 = vmax.f32 %v637_v11, %v644_v12 }
 0x134   : > { %v665_v17 = vadd.f32 %v1127_v15, %v651_v16 }
 0x135   : > { %v558_v18 = vpop.f32.mrb[16].mxu0  ;;  %v614_v19 = vpop.f32.mrb[16].mxu1 }
 0x136   : > { %v672_v20 = vmax.f32 %v665_v17, 0.0  ;;  %v638_v21 = vmax.f32 %v529_v49, %v558_v18  ;;  %v645_v22 = vmax.f32 %v585_v50, %v614_v19  ;;  %v560_v23 = vpop.f32.mrb[17].mxu0  ;;  %v616_v24 = vpop.f32.mrb[17].mxu1 }
 0x137   : > { %v561_v25 = vpop.f32.mrb[18].mxu0  ;;  %v617_v26 = vpop.f32.mrb[18].mxu1 }
 0x138   : > { %v845_v27 = vpack.c.bf16 %v672_v20, %v672_v20  ;;  %v652_v28 = vmax.f32 %v638_v21, %v645_v22  ;;  %v639_v29 = vmax.f32 %v534_v53, %v561_v25  ;;  %v646_v30 = vmax.f32 %v590_v54, %v617_v26  ;;  %v563_v31 = vpop.f32.mrb[19].mxu0  ;;  %v619_v32 = vpop.f32.mrb[19].mxu1 }
 0x13a   : > { %709 = vst.msk [vmem:[%s1134_s28] sm:$0xf] %vm708_vm2, %v845_v27  ;;  %v666_v33 = vadd.f32 %v1127_v15, %v652_v28  ;;  %v653_v34 = vmax.f32 %v639_v29, %v646_v30 }
 0x13c   : > { %v673_v35 = vmax.f32 %v666_v33, 0.0  ;;  %v667_v36 = vadd.f32 %v1127_v15, %v653_v34 }
 0x13d   : > { %v566_v37 = vpop.f32.mrb[20].mxu0  ;;  %v622_v38 = vpop.f32.mrb[20].mxu1 }
 0x13e   : > { %v846_v39 = vpack.c.bf16 %v673_v35, %v673_v35  ;;  %v674_v40 = vmax.f32 %v667_v36, 0.0  ;;  %v640_v41 = vmax.f32 %v537_v57, %v566_v37  ;;  %v647_v42 = vmax.f32 %v593_v58, %v622_v38  ;;  %v568_v43 = vpop.f32.mrb[21].mxu0  ;;  %v624_v44 = vpop.f32.mrb[21].mxu1 }
 0x13f   : > { %v569_v45 = vpop.f32.mrb[22].mxu0  ;;  %v625_v46 = vpop.f32.mrb[22].mxu1 }
 0x140   : > { %710 = vst.msk [vmem:[%s1134_s28 + $0x4] sm:$0xf] %vm708_vm2, %v846_v39  ;;  %v847_v47 = vpack.c.bf16 %v674_v40, %v674_v40  ;;  %v654_v48 = vmax.f32 %v640_v41, %v647_v42  ;;  %v641_v49 = vmax.f32 %v1112_v61, %v569_v45  ;;  %v648_v50 = vmax.f32 %v1114_v62, %v625_v46  ;;  %v571_v51 = vpop.f32.mrb[23].mxu0  ;;  %v627_v52 = vpop.f32.mrb[23].mxu1 }
 0x142   : > { %711 = vst.msk [vmem:[%s1134_s28 + $0x8] sm:$0xf] %vm708_vm2, %v847_v47  ;;  %v668_v53 = vadd.f32 %v1127_v15, %v654_v48  ;;  %v655_v54 = vmax.f32 %v641_v49, %v648_v50 }
 0x144   : > { %v675_v55 = vmax.f32 %v668_v53, 0.0  ;;  %v669_v56 = vadd.f32 %v1127_v15, %v655_v54 }
 0x145   : > { %v574_v57 = vpop.f32.mrb[24].mxu0  ;;  %v630_v58 = vpop.f32.mrb[24].mxu1 }
 0x146   : > { %v848_v59 = vpack.c.bf16 %v675_v55, %v675_v55  ;;  %v676_v60 = vmax.f32 %v669_v56, 0.0  ;;  %v642_v61 = vmax.f32 %v1116_v1, %v574_v57  ;;  %v649_v62 = vmax.f32 %v1118_v2, %v630_v58  ;;  %v576_v63 = vpop.f32.mrb[25].mxu0  ;;  %v632_v0 = vpop.f32.mrb[25].mxu1 }
 0x147   : > { %v577_v3 = vpop.f32.mrb[26].mxu0  ;;  %v633_v4 = vpop.f32.mrb[26].mxu1 }
 0x148   : > { %712 = vst.msk [vmem:[%s1134_s28 + $0xc] sm:$0xf] %vm708_vm2, %v848_v59  ;;  %v849_v7 = vpack.c.bf16 %v676_v60, %v676_v60  ;;  %v656_v8 = vmax.f32 %v642_v61, %v649_v62  ;;  %v643_v9 = vmax.f32 %v1120_v5, %v577_v3  ;;  %v650_v10 = vmax.f32 %v1122_v6, %v633_v4  ;;  %v579_v11 = vpop.f32.mrb[27].mxu0  ;;  %v635_v12 = vpop.f32.mrb[27].mxu1 }
 0x14a   : > { %713 = vst.msk [vmem:[%s1134_s28 + $0x10] sm:$0xf] %vm708_vm2, %v849_v7  ;;  %v670_v1 = vadd.f32 %v1127_v15, %v656_v8  ;;  %v657_v2 = vmax.f32 %v643_v9, %v650_v10 }
 0x14c   : > { %v677_v13 = vmax.f32 %v670_v1, 0.0  ;;  %v671_v14 = vadd.f32 %v1127_v15, %v657_v2 }
 0x14e   : > { %v850_v16 = vpack.c.bf16 %v677_v13, %v677_v13  ;;  %v678_v17 = vmax.f32 %v671_v14, 0.0 }
 0x150   : > { %714 = vst.msk [vmem:[%s1134_s28 + $0x14] sm:$0xf] %vm708_vm2, %v850_v16  ;;  %v851_v18 = vpack.c.bf16 %v678_v17, %v678_v17 }
 0x152   : > { %715 = vst.msk [vmem:[%s1134_s28 + $0x18] sm:$0xf] %vm708_vm2, %v851_v18 }
 0x153 PF: > { %s13_s12 = sadd.s32 1, %s956_s12  }
 0x154   : > { %p10_p4 = scmp.ge.s32.totalorder %s13_s12, 4  }
 0x156   :  { %12 = sbr.rel (!%p10_p4) target bundleno = 1 (0x1), region = 62 }

// kernel: classifier_forward.9
= control target key start
LH: loop header
LB: loop body
LE: loop exit
PB: predicated region body
PF: predicated region fallthrough
CT: control target
= control target key end

     0   :  { %v239_v29 = vlaneseq  ;;  %v1912_v35 = vmov 1966171168   ;;  %s2359_s0 = inlined_call_operand.vmem [shape: bf16[2,1568], index: 0, kind: input, shape index: {}]   ;;  %s2360_s1 = inlined_call_operand.vmem [shape: bf16[1568,120], index: 1, kind: input, shape index: {}]   ;;  %s2361_s2 = inlined_call_operand.vmem [shape: f32[1,120], index: 2, kind: input, shape index: {}]   ;;  %s2362_s3 = inlined_call_operand.vmem [shape: bf16[120,84], index: 3, kind: input, shape index: {}]   ;;  %s2363_s4 = inlined_call_operand.vmem [shape: f32[1,84], index: 4, kind: input, shape index: {}]   ;;  %s2364_s5 = inlined_call_operand.vmem [shape: bf16[84,10], index: 5, kind: input, shape index: {}]   ;;  %s2365_s6 = inlined_call_operand.vmem [shape: f32[1,10], index: 6, kind: input, shape index: {}]   ;;  %s2366_s7 = inlined_call_operand.hbm [shape: f32[2,10], index: 7, kind: output, shape index: {}]  }
   0x1   :  { %v1770_v0 = vld [vmem:[%s2360_s1 + $0x40] sm:$0xff]   ;;  %v1774_v4 = vld [vmem:[%s2360_s1 + $0x48] sm:$0xff]   ;;  %v1778_v8 = vld [vmem:[%s2360_s1 + $0x50] sm:$0xff]   ;;  %v237_v36 = vunpack.c.l.s4 %v1912_v35 }
   0x2   :  { %v1771_v1 = vld [vmem:[%s2360_s1] sm:$0xff]   ;;  %1571 = vmatprep.subr.bf16.mxu0 %v1770_v0  ;;  %v1775_v5 = vld [vmem:[%s2360_s1 + $0x8] sm:$0xff]   ;;  %v1779_v9 = vld [vmem:[%s2360_s1 + $0x10] sm:$0xff]   ;;  %v240_v33 = vshrl.u32 %v239_v29, 7 }
   0x3   :  { %v1772_v2 = vld [vmem:[%s2360_s1 + $0xc0] sm:$0xff]   ;;  %1572 = vmatpush3.bf16.msra.mxu0 %v1771_v1  ;;  %v1776_v6 = vld [vmem:[%s2360_s1 + $0xc8] sm:$0xff]   ;;  %v1780_v10 = vld [vmem:[%s2360_s1 + $0xd0] sm:$0xff]   ;;  %v238_v39 = vunpack.c.0.s8 %v237_v36 }
   0x4   :  { %v1773_v3 = vld [vmem:[%s2360_s1 + $0x80] sm:$0xff]   ;;  %1593 = vmatprep.subr.bf16.mxu1 %v1772_v2  ;;  %1573 = vmatprep.subr.bf16.mxu0 %v1774_v4  ;;  %v1777_v7 = vld [vmem:[%s2360_s1 + $0x88] sm:$0xff]   ;;  %v1781_v11 = vld [vmem:[%s2360_s1 + $0x90] sm:$0xff]  }
   0x5   :  { %1594 = vmatpush3.bf16.msra.mxu1 %v1773_v3  ;;  %v1782_v12 = vld [vmem:[%s2360_s1 + $0x58] sm:$0xff]   ;;  %v1786_v16 = vld [vmem:[%s2360_s1 + $0x60] sm:$0xff]   ;;  %v1790_v20 = vld [vmem:[%s2360_s1 + $0x68] sm:$0xff]   ;;  %v2061_v41 = vsub.s32 %v238_v39, %v240_v33 }
   0x6   :  { %1595 = vmatprep.subr.bf16.mxu1 %v1776_v6  ;;  %v1783_v13 = vld [vmem:[%s2360_s1 + $0x18] sm:$0xff]   ;;  %v1787_v17 = vld [vmem:[%s2360_s1 + $0x20] sm:$0xff]   ;;  %v1791_v21 = vld [vmem:[%s2360_s1 + $0x28] sm:$0xff]  }
   0x7   :  { %1574 = vmatpush3.bf16.msra.mxu0 %v1775_v5  ;;  %v1784_v14 = vld [vmem:[%s2360_s1 + $0xd8] sm:$0xff]   ;;  %v1788_v18 = vld [vmem:[%s2360_s1 + $0xe0] sm:$0xff]   ;;  %v1792_v22 = vld [vmem:[%s2360_s1 + $0xe8] sm:$0xff]  }
   0x8   :  { %1575 = vmatprep.subr.bf16.mxu0 %v1778_v8  ;;  %v1785_v15 = vld [vmem:[%s2360_s1 + $0x98] sm:$0xff]   ;;  %v1789_v19 = vld [vmem:[%s2360_s1 + $0xa0] sm:$0xff]   ;;  %v1793_v23 = vld [vmem:[%s2360_s1 + $0xa8] sm:$0xff]  }
   0x9   :  { %1596 = vmatpush3.bf16.msra.mxu1 %v1777_v7  ;;  %v1794_v24 = vld [vmem:[%s2360_s1 + $0x70] sm:$0xff]   ;;  %v1798_v28 = vld [vmem:[%s2360_s1 + $0x78] sm:$0xff]   ;;  %v1803_v34 = vld [vmem:[%s2360_s1 + $0x140] sm:$0xff]  }
   0xa   :  { %1597 = vmatprep.subr.bf16.mxu1 %v1780_v10  ;;  %v1795_v25 = vld [vmem:[%s2360_s1 + $0x30] sm:$0xff]   ;;  %v1799_v30 = vld [vmem:[%s2360_s1 + $0x38] sm:$0xff]   ;;  %v28_v37 = vld [vmem:[%s2359_s0] sm:$0xff] }
   0xb   :  { %1576 = vmatpush3.bf16.msra.mxu0 %v1779_v9  ;;  %v1796_v26 = vld [vmem:[%s2360_s1 + $0xf0] sm:$0xff]   ;;  %v1800_v31 = vld [vmem:[%s2360_s1 + $0xf8] sm:$0xff]   ;;  %v235_v38 = vcombine.high %v28_v37, %v28_v37  ;;  %v1805_v40 = vld [vmem:[%s2360_s1 + $0x1c0] sm:$0xff]   ;;  %v242_v42 = vrot.slane %v28_v37, %v2061_v41 }
   0xc   :  { %1577 = vmatprep.subr.bf16.mxu0 %v1782_v12  ;;  %v1797_v27 = vld [vmem:[%s2360_s1 + $0xb0] sm:$0xff]   ;;  %v1801_v32 = vld [vmem:[%s2360_s1 + $0xb8] sm:$0xff]   ;;  %v1804_v47 = vld [vmem:[%s2360_s1 + $0x100] sm:$0xff]  }
   0xd   :  { %1598 = vmatpush3.bf16.msra.mxu1 %v1781_v11  ;;  %v2065_v43 = vrot.slane %v235_v38, %v2061_v41  ;;  %v250_v44 = vcombine.high %v242_v42, %v242_v42  ;;  %v258_v45 = vrot.slane %v242_v42, %v2061_v41  ;;  %v1806_v49 = vld [vmem:[%s2360_s1 + $0x180] sm:$0xff]   ;;  %v1807_v52 = vld [vmem:[%s2360_s1 + $0x148] sm:$0xff]   ;;  %v1811_v58 = vld [vmem:[%s2360_s1 + $0x150] sm:$0xff]  }
   0xe   :  { %1599 = vmatprep.subr.bf16.mxu1 %v1784_v14  ;;  %v1808_v54 = vld [vmem:[%s2360_s1 + $0x108] sm:$0xff]   ;;  %v1812_v59 = vld [vmem:[%s2360_s1 + $0x110] sm:$0xff]   ;;  %v1815_v62 = vld [vmem:[%s2360_s1 + $0x158] sm:$0xff]  }
   0xf   :  { %1578 = vmatpush3.bf16.msra.mxu0 %v1783_v13  ;;  %v251_v46 = vcombine.high %v2065_v43, %v2065_v43  ;;  %v272_v48 = vrot.slane %v250_v44, %v2061_v41  ;;  %v280_v51 = vcombine.high %v258_v45, %v258_v45  ;;  %v1809_v55 = vld [vmem:[%s2360_s1 + $0x1c8] sm:$0xff]   ;;  %v1813_v60 = vld [vmem:[%s2360_s1 + $0x1d0] sm:$0xff]   ;;  %v1816_v63 = vld [vmem:[%s2360_s1 + $0x118] sm:$0xff]  }
  0x10   :  { %1579 = vmatprep.subr.bf16.mxu0 %v1786_v16  ;;  %v1810_v57 = vld [vmem:[%s2360_s1 + $0x188] sm:$0xff]   ;;  %v1814_v61 = vld [vmem:[%s2360_s1 + $0x190] sm:$0xff]   ;;  %v1817_v0 = vld [vmem:[%s2360_s1 + $0x1d8] sm:$0xff]  }
  0x11   :  { %1600 = vmatpush3.bf16.msra.mxu1 %v1785_v15  ;;  %v279_v50 = vrot.slane %v251_v46, %v2061_v41  ;;  %959 = vmatprep.mubr.bf16.mxu0 %v272_v48  ;;  %v282_v53 = vcombine.high %v272_v48, %v272_v48  ;;  %v1818_v1 = vld [vmem:[%s2360_s1 + $0x198] sm:$0xff]   ;;  %v1819_v2 = vld [vmem:[%s2360_s1 + $0x160] sm:$0xff]   ;;  %v1823_v6 = vld [vmem:[%s2360_s1 + $0x168] sm:$0xff]  }
  0x12   :  { %1601 = vmatprep.subr.bf16.mxu1 %v1788_v18  ;;  %v1820_v3 = vld [vmem:[%s2360_s1 + $0x120] sm:$0xff]   ;;  %v1824_v7 = vld [vmem:[%s2360_s1 + $0x128] sm:$0xff]   ;;  %v1827_v10 = vld [vmem:[%s2360_s1 + $0x170] sm:$0xff]   ;;  %v265_v18 = vrot.slane %v2065_v43, %v2061_v41 }
  0x13   :  { %1580 = vmatpush3.bf16.msra.mxu0 %v1787_v17  ;;  %v283_v56 = vcombine.high %v279_v50, %v279_v50  ;;  %999 = vmatprep.mubr.bf16.mxu1 %v282_v53  ;;  %v1821_v4 = vld [vmem:[%s2360_s1 + $0x1e0] sm:$0xff]   ;;  %v1825_v8 = vld [vmem:[%s2360_s1 + $0x1e8] sm:$0xff]   ;;  %v1828_v11 = vld [vmem:[%s2360_s1 + $0x130] sm:$0xff]  }
  0x14   :  { %1581 = vmatprep.subr.bf16.mxu0 %v1790_v20  ;;  %v1822_v5 = vld [vmem:[%s2360_s1 + $0x1a0] sm:$0xff]   ;;  %v1826_v9 = vld [vmem:[%s2360_s1 + $0x1a8] sm:$0xff]   ;;  %v1829_v12 = vld [vmem:[%s2360_s1 + $0x1f0] sm:$0xff]  }
  0x15   :  { %1602 = vmatpush3.bf16.msra.mxu1 %v1789_v19  ;;  %v1830_v13 = vld [vmem:[%s2360_s1 + $0x1b0] sm:$0xff]   ;;  %v1831_v14 = vld [vmem:[%s2360_s1 + $0x178] sm:$0xff]   ;;  %v1835_v19 = vld [vmem:[%s2360_s1 + $0x240] sm:$0xff]  }
  0x16   :  { %1603 = vmatprep.subr.bf16.mxu1 %v1792_v22  ;;  %v1832_v15 = vld [vmem:[%s2360_s1 + $0x138] sm:$0xff]   ;;  %v1836_v20 = vld [vmem:[%s2360_s1 + $0x200] sm:$0xff]   ;;  %v1844_v29 = vld [vmem:[%s2360_s1 + $0x210] sm:$0xff]  }
  0x17   :  { %1582 = vmatpush3.bf16.msra.mxu0 %v1791_v21  ;;  %v1833_v16 = vld [vmem:[%s2360_s1 + $0x1f8] sm:$0xff]   ;;  %v1837_v21 = vld [vmem:[%s2360_s1 + $0x2c0] sm:$0xff]   ;;  %v1856_v42 = vld [vmem:[%s2360_s1 + $0x228] sm:$0xff]  }
  0x18   :  { %1583 = vmatprep.subr.bf16.mxu0 %v1794_v24  ;;  %v1834_v17 = vld [vmem:[%s2360_s1 + $0x1b8] sm:$0xff]   ;;  %v1838_v22 = vld [vmem:[%s2360_s1 + $0x280] sm:$0xff]   ;;  %v1839_v24 = vld [vmem:[%s2360_s1 + $0x248] sm:$0xff]  }
  0x19   :  { %1604 = vmatpush3.bf16.msra.mxu1 %v1793_v23  ;;  %v281_v23 = vcombine.high %v265_v18, %v265_v18  ;;  %v1848_v33 = vld [vmem:[%s2360_s1 + $0x218] sm:$0xff]   ;;  %v1851_v36 = vld [vmem:[%s2360_s1 + $0x260] sm:$0xff]   ;;  %v1857_v43 = vld [vmem:[%s2360_s1 + $0x2e8] sm:$0xff]  }
  0x1a   :  { %1605 = vmatprep.subr.bf16.mxu1 %v1796_v26  ;;  %v1841_v26 = vld [vmem:[%s2360_s1 + $0x2c8] sm:$0xff]   ;;  %v1850_v35 = vld [vmem:[%s2360_s1 + $0x298] sm:$0xff]   ;;  %v1852_v37 = vld [vmem:[%s2360_s1 + $0x220] sm:$0xff]  }
  0x1b   :  { %1584 = vmatpush3.bf16.msra.mxu0 %v1795_v25  ;;  %v1840_v25 = vld [vmem:[%s2360_s1 + $0x208] sm:$0xff]   ;;  %v1853_v38 = vld [vmem:[%s2360_s1 + $0x2e0] sm:$0xff]   ;;  %v1861_v48 = vld [vmem:[%s2360_s1 + $0x2f0] sm:$0xff]  }
  0x1c   :  { %1585 = vmatprep.subr.bf16.mxu0 %v1798_v28  ;;  %v1843_v28 = vld [vmem:[%s2360_s1 + $0x250] sm:$0xff]   ;;  %v1854_v39 = vld [vmem:[%s2360_s1 + $0x2a0] sm:$0xff]   ;;  %v1858_v44 = vld [vmem:[%s2360_s1 + $0x2a8] sm:$0xff]  }
  0x1d   :  { %1606 = vmatpush3.bf16.msra.mxu1 %v1797_v27  ;;  %v1842_v27 = vld [vmem:[%s2360_s1 + $0x288] sm:$0xff]   ;;  %v1865_v53 = vld [vmem:[%s2360_s1 + $0x2f8] sm:$0xff]  }
  0x1e   :  { %1607 = vmatprep.subr.bf16.mxu1 %v1800_v31  ;;  %v1846_v31 = vld [vmem:[%s2360_s1 + $0x290] sm:$0xff]   ;;  %v29_v46 = vld [vmem:[%s2359_s0 + $0x8] sm:$0x1f] }
  0x1f   :  { %1586 = vmatpush3.bf16.msra.mxu0 %v1799_v30  ;;  %v1845_v30 = vld [vmem:[%s2360_s1 + $0x2d0] sm:$0xff]  }
  0x20   :  { %1615 = vmatprep.subr.bf16.mxu0 %v1803_v34  ;;  %v1849_v34 = vld [vmem:[%s2360_s1 + $0x2d8] sm:$0xff]  }
  0x21   :  { %1608 = vmatpush3.bf16.msra.mxu1 %v1801_v32  ;;  %v1847_v32 = vld [vmem:[%s2360_s1 + $0x258] sm:$0xff]  }
  0x22   :  { %1637 = vmatprep.subr.bf16.mxu1 %v1805_v40  ;;  %960 = vmatmul.mubr.bf16.vlgmr.msra.gmra.mrb[0].mxu0 %v258_v45  ;;  %v1855_v40 = vld [vmem:[%s2360_s1 + $0x268] sm:$0xff]   ;;  %v1859_v45 = vld [vmem:[%s2360_s1 + $0x270] sm:$0xff]  }
  0x23   :  { %1616 = vmatpush3.bf16.msra.mxu0 %v1804_v47  ;;  %1039 = vmatprep.mubr.bf16.mxu0 %v279_v50  ;;  %v1860_v47 = vld [vmem:[%s2360_s1 + $0x230] sm:$0xff]   ;;  %v1863_v50 = vld [vmem:[%s2360_s1 + $0x278] sm:$0xff]  }
  0x24   :  { %1000 = vmatmul.mubr.bf16.vlgmr.msra.gmra.mrb[0].mxu1 %v280_v51  ;;  %1617 = vmatprep.subr.bf16.mxu0 %v1807_v52  ;;  %v1862_v51 = vld [vmem:[%s2360_s1 + $0x2b0] sm:$0xff]  }
  0x25   :  { %1638 = vmatpush3.bf16.msra.mxu1 %v1806_v49  ;;  %1079 = vmatprep.mubr.bf16.mxu1 %v283_v56  ;;  %v291_v49 = vrot.slane %v29_v46, %v2061_v41  ;;  %v1866_v56 = vld [vmem:[%s2360_s1 + $0x2b8] sm:$0xff]  }
  0x26   :  { %1639 = vmatprep.subr.bf16.mxu1 %v1809_v55 }
  0x27   :  { %1618 = vmatpush3.bf16.msra.mxu0 %v1808_v54  ;;  %v299_v52 = vcombine.high %v291_v49, %v291_v49  ;;  %v1864_v54 = vld [vmem:[%s2360_s1 + $0x238] sm:$0xff]  }
  0x28   :  { %1619 = vmatprep.subr.bf16.mxu0 %v1811_v58  ;;  %v306_v58 = vrot.slane %v291_v49, %v2061_v41 }
  0x29   :  { %1640 = vmatpush3.bf16.msra.mxu1 %v1810_v57  ;;  %v320_v55 = vrot.slane %v299_v52, %v2061_v41 }
  0x2a   :  { %1641 = vmatprep.subr.bf16.mxu1 %v1813_v60  ;;  %v1868_v60 = vld [vmem:[%s2360_s1 + $0x300] sm:$0xff]  }
  0x2b   :  { %1620 = vmatpush3.bf16.msra.mxu0 %v1812_v59  ;;  %v322_v57 = vcombine.high %v320_v55, %v320_v55  ;;  %v284_v59 = vcombine.high %v29_v46, %v29_v46 }
  0x2c   :  { %1621 = vmatprep.subr.bf16.mxu0 %v1815_v62 }
  0x2d   :  { %1642 = vmatpush3.bf16.msra.mxu1 %v1814_v61 }
  0x2e   :  { %1643 = vmatprep.subr.bf16.mxu1 %v1817_v0 }
  0x2f   :  { %1622 = vmatpush3.bf16.msra.mxu0 %v1816_v63 }
  0x30   :  { %1623 = vmatprep.subr.bf16.mxu0 %v1819_v2 }
  0x31   :  { %1644 = vmatpush3.bf16.msra.mxu1 %v1818_v1 }
  0x32   :  { %1645 = vmatprep.subr.bf16.mxu1 %v1821_v4 }
  0x33   :  { %1624 = vmatpush3.bf16.msra.mxu0 %v1820_v3 }
  0x34   :  { %1625 = vmatprep.subr.bf16.mxu0 %v1823_v6 }
  0x35   :  { %1646 = vmatpush3.bf16.msra.mxu1 %v1822_v5 }
  0x36   :  { %1647 = vmatprep.subr.bf16.mxu1 %v1825_v8 }
  0x37   :  { %1626 = vmatpush3.bf16.msra.mxu0 %v1824_v7 }
  0x38   :  { %1627 = vmatprep.subr.bf16.mxu0 %v1827_v10 }
  0x39   :  { %1648 = vmatpush3.bf16.msra.mxu1 %v1826_v9 }
  0x3a   :  { %1649 = vmatprep.subr.bf16.mxu1 %v1829_v12 }
  0x3b   :  { %1628 = vmatpush3.bf16.msra.mxu0 %v1828_v11 }
  0x3c   :  { %1629 = vmatprep.subr.bf16.mxu0 %v1831_v14 }
  0x3d   :  { %1650 = vmatpush3.bf16.msra.mxu1 %v1830_v13 }
  0x3e   :  { %1651 = vmatprep.subr.bf16.mxu1 %v1833_v16 }
  0x3f   :  { %1630 = vmatpush3.bf16.msra.mxu0 %v1832_v15 }
  0x40   :  { %1659 = vmatprep.subr.bf16.mxu0 %v1835_v19 }
  0x41   :  { %1652 = vmatpush3.bf16.msra.mxu1 %v1834_v17 }
  0x42   :  { %1040 = vmatmul.mubr.bf16.vlgmr.msra.gmra.mrb[4].mxu0 %v265_v18  ;;  %1681 = vmatprep.subr.bf16.mxu1 %v1837_v21 }
  0x43   :  { %1660 = vmatpush3.bf16.msra.mxu0 %v1836_v20  ;;  %1119 = vmatprep.mubr.bf16.mxu0 %v320_v55 }
  0x44   :  { %1080 = vmatmul.mubr.bf16.vlgmr.msra.gmra.mrb[4].mxu1 %v281_v23  ;;  %1661 = vmatprep.subr.bf16.mxu0 %v1839_v24 }
  0x45   :  { %1682 = vmatpush3.bf16.msra.mxu1 %v1838_v22  ;;  %1159 = vmatprep.mubr.bf16.mxu1 %v322_v57 }
  0x46   :  { %1683 = vmatprep.subr.bf16.mxu1 %v1841_v26 }
  0x47   :  { %1662 = vmatpush3.bf16.msra.mxu0 %v1840_v25 }
  0x48   :  { %1663 = vmatprep.subr.bf16.mxu0 %v1843_v28 }
  0x49   :  { %1684 = vmatpush3.bf16.msra.mxu1 %v1842_v27 }
  0x4a   :  { %1685 = vmatprep.subr.bf16.mxu1 %v1845_v30 }
  0x4b   :  { %1664 = vmatpush3.bf16.msra.mxu0 %v1844_v29 }
  0x4c   :  { %1665 = vmatprep.subr.bf16.mxu0 %v1847_v32 }
  0x4d   :  { %1686 = vmatpush3.bf16.msra.mxu1 %v1846_v31 }
  0x4e   :  { %1687 = vmatprep.subr.bf16.mxu1 %v1849_v34 }
  0x4f   :  { %1666 = vmatpush3.bf16.msra.mxu0 %v1848_v33 }
  0x50   :  { %1667 = vmatprep.subr.bf16.mxu0 %v1851_v36 }
  0x51   :  { %1688 = vmatpush3.bf16.msra.mxu1 %v1850_v35 }
  0x52   :  { %1689 = vmatprep.subr.bf16.mxu1 %v1853_v38 }
  0x53   :  { %1668 = vmatpush3.bf16.msra.mxu0 %v1852_v37 }
  0x54   :  { %1669 = vmatprep.subr.bf16.mxu0 %v1855_v40 }
  0x55   :  { %1690 = vmatpush3.bf16.msra.mxu1 %v1854_v39 }
  0x56   :  { %1691 = vmatprep.subr.bf16.mxu1 %v1857_v43 }
  0x57   :  { %1670 = vmatpush3.bf16.msra.mxu0 %v1856_v42 }
  0x58   :  { %1671 = vmatprep.subr.bf16.mxu0 %v1859_v45 }
  0x59   :  { %1692 = vmatpush3.bf16.msra.mxu1 %v1858_v44 }
  0x5a   :  { %1693 = vmatprep.subr.bf16.mxu1 %v1861_v48 }
  0x5b   :  { %1672 = vmatpush3.bf16.msra.mxu0 %v1860_v47 }
  0x5c   :  { %1673 = vmatprep.subr.bf16.mxu0 %v1863_v50 }
  0x5d   :  { %1694 = vmatpush3.bf16.msra.mxu1 %v1862_v51 }
  0x5e   :  { %1695 = vmatprep.subr.bf16.mxu1 %v1865_v53 }
  0x5f   :  { %1674 = vmatpush3.bf16.msra.mxu0 %v1864_v54 }
  0x60   :  { %12 = vsyncpa [#allocation3], 0  ;;  %v1913_v61 = vmov 0.0   ;;  %v321_v62 = vcombine.high %v306_v58, %v306_v58  ;;  %v298_v63 = vrot.slane %v284_v59, %v2061_v41  ;;  %v1869_v0 = vld [vmem:[%s2360_s1 + $0x308] sm:$0xff]   ;;  %vm1914_vm0 = vmmov 0   ;;  %v1870_v2 = vld [vmem:[%s2362_s3] sm:$0xff]  }
  0x61   :  { %1722 = vmatprep.subr.bf16.mxu0 %v1913_v61  ;;  %1696 = vmatpush3.bf16.msra.mxu1 %v1866_v56  ;;  %vm923_vm1 = vcmask 261120   ;;  %v1871_v3 = vld [vmem:[%s2362_s3 + $0x8] sm:$0xff]   ;;  %v1873_v4 = vld [vmem:[%s2362_s3 + $0x18] sm:$0xff]   ;;  %v1874_v5 = vld [vmem:[%s2362_s3 + $0x20] sm:$0xff]   ;;  %vm1280_vm2 = vcmask 1043456   ;;  %vm1276_vm3 = vcmask 982016  }
  0x62   :  { %1120 = vmatmul.mubr.bf16.vlgmr.msra.gmra.mrb[8].mxu0 %v306_v58  ;;  %1730 = vmatprep.subr.bf16.mxu1 %v1913_v61  ;;  %v313_v1 = vrot.slane %v298_v63, %v2061_v41  ;;  %v1872_v41 = vld [vmem:[%s2362_s3 + $0x10] sm:$0xff]   ;;  %v1875_v6 = vld [vmem:[%s2362_s3 + $0x28] sm:$0xff]   ;;  %v1877_v8 = vld [vmem:[%s2362_s3 + $0x38] ss:$0 sps:$4 sm:$0xff]   ;;  %vm1381_vm4 = vcmask 1041408   ;;  %vm1377_vm5 = vcmask 687104  }
  0x63   :  { %1723 = vmatpush3.bf16.msra.mxu0 %v1868_v60  ;;  %1726 = vmatprep.mubr.msk.bf16.mxu0 %vm1914_vm0, %v1913_v61  ;;  %v1876_v7 = vld [vmem:[%s2362_s3 + $0x30] sm:$0xff]   ;;  %v1282_v9 = vsel %vm1280_vm2, %v1877_v8, 0  ;;  %v1878_v10 = vld [vmem:[%s2364_s5] sm:$0xff]   ;;  %v1879_v11 = vld [vmem:[%s2364_s5 + $0x8] sm:$0xff]   ;;  %vm1425_vm6 = vcmask 74752  }
  0x64   :  { %1160 = vmatmul.mubr.bf16.vlgmr.msra.gmra.mrb[8].mxu1 %v321_v62  ;;  %1724 = vmatprep.subr.bf16.mxu0 %v1913_v61  ;;  %v1880_v12 = vld [vmem:[%s2364_s5 + $0x10] sm:$0xff]   ;;  %v1881_v13 = vld [vmem:[%s2364_s5 + $0x18] sm:$0xff]   ;;  %v1453_v15 = vld [vmem:[%s2361_s2] ss:$0 sm:$0xff] }
  0x65   :  { %1746 = vmatprep.mubr.msk.bf16.mxu1 %vm1914_vm0, %v1913_v61  ;;  %1731 = vmatpush3.bf16.msra.mxu1 %v1870_v2  ;;  %v1882_v59 = vld [vmem:[%s2364_s5 + $0x20] sm:$0xff]   ;;  %v1883_v60 = vld [vmem:[%s2364_s5 + $0x28] ss:$0 sps:$4 sm:$0x33]  }
  0x66   :  { %1732 = vmatprep.subr.bf16.mxu1 %v1913_v61  ;;  %v1383_v62 = vsel %vm1381_vm4, %v1883_v60, 0  ;;  %v1553_v63 = vld [vmem:[%s2363_s4] ss:$0 sm:$0xff]  ;;  %s1915_s4 = smov [#allocation2]  }
  0x67   :  { %1725 = vmatpush3.bf16.msra.mxu0 %v1869_v0  ;;  %s1445_s5 = sshll.u32 %s1915_s4, 4  ;;  %s1446_s5 = int_to_ptr.vmem [resolvable:$true] %s1445_s5 }
  0x68   :  { %1750 = vmatprep.subr.bf16.mxu0 %v1913_v61  ;;  %p1893_p1 = scmp.lt.s32.totalorder %s1446_s5, %s1446_s5 }
  0x69   :  { %1733 = vmatpush3.bf16.msra.mxu1 %v1871_v3 }
  0x6a   :  { %1727 = vmatmul.mubr.msk.bf16.vlgmr.msra.gmra.mrb[12].mxu0 %vm923_vm1, %v313_v1  ;;  %1734 = vmatprep.subr.bf16.mxu1 %v1913_v61 }
  0x6b   :  { %1762 = vmatprep.mubr.msk.bf16.mxu0 %vm1914_vm0, %v1913_v61  ;;  %1751 = vmatpush3.bf16.msra.mxu0 %v1878_v10 }
  0x6c   :  { %1752 = vmatprep.subr.bf16.mxu0 %v1913_v61 }
  0x6d   :  { %1735 = vmatpush3.bf16.msra.mxu1 %v1872_v41 }
  0x6e   :  { %1736 = vmatprep.subr.bf16.mxu1 %v1913_v61 }
  0x6f   :  { %1753 = vmatpush3.bf16.msra.mxu0 %v1879_v11 }
  0x70   :  { %1754 = vmatprep.subr.bf16.mxu0 %v1913_v61 }
  0x71   :  { %1737 = vmatpush3.bf16.msra.mxu1 %v1873_v4 }
  0x72   :  { %1738 = vmatprep.subr.bf16.mxu1 %v1913_v61 }
  0x73   :  { %1755 = vmatpush3.bf16.msra.mxu0 %v1880_v12 }
  0x74   :  { %1756 = vmatprep.subr.bf16.mxu0 %v1913_v61 }
  0x75   :  { %1739 = vmatpush3.bf16.msra.mxu1 %v1874_v5 }
  0x76   :  { %1740 = vmatprep.subr.bf16.mxu1 %v1913_v61 }
  0x77   :  { %1757 = vmatpush3.bf16.msra.mxu0 %v1881_v13 }
  0x78   :  { %1758 = vmatprep.subr.bf16.mxu0 %v1913_v61 }
  0x79   :  { %1741 = vmatpush3.bf16.msra.mxu1 %v1875_v6 }
  0x7a   :  { %1742 = vmatprep.subr.bf16.mxu1 %v1913_v61 }
  0x7b   :  { %1759 = vmatpush3.bf16.msra.mxu0 %v1882_v59 }
  0x7c   :  { %1760 = vmatprep.subr.bf16.mxu0 %v1913_v61 }
  0x7d   :  { %1743 = vmatpush3.bf16.msra.mxu1 %v1876_v7 }
  0x7e   :  { %1744 = vmatprep.subr.bf16.mxu1 %v1913_v61  ;;  %v1563_v61 = vld [vmem:[%s2365_s6] ss:$0 sm:$0xff]  ;;  %s1888_s6 = scalar_lea.vmem %s1446_s5, 32 }
  0x7f   :  { %1761 = vmatpush3.bf16.msra.mxu0 %v1383_v62  ;;  %p1889_p0 = scmp.ne.s32.totalorder %s1446_s5, %s1888_s6  ;;  %p1894_p2 = scmp.lt.s32.totalorder %s1888_s6, %s1888_s6 }
  0x81   :  { %1745 = vmatpush3.bf16.msra.mxu1 %v1282_v9  ;;  %p1895_p3 = por %p1894_p2, %p1893_p1 }
  0x83   :  { %p1896_p4 = pnand %p1895_p3, %p1889_p0 }
  0xf5   :  { %v1587_v14 = vpop.f32.mrb[0].mxu0 }
  0xf6   :  { %v1588_v16 = vpop.f32.mrb[1].mxu0 }
  0xf7   :  { %v1589_v17 = vadd.f32 %v1588_v16, %v1587_v14  ;;  %v1590_v18 = vpop.f32.mrb[2].mxu0  ;;  %v1609_v19 = vpop.f32.mrb[0].mxu1 }
  0xf8   :  { %v1591_v20 = vpop.f32.mrb[3].mxu0  ;;  %v1610_v21 = vpop.f32.mrb[1].mxu1 }
  0xf9   :  { %v962_v22 = vadd.f32 %v1589_v17, %v1453_v15  ;;  %v1611_v23 = vadd.f32 %v1610_v21, %v1609_v19  ;;  %v1612_v24 = vpop.f32.mrb[2].mxu1 }
  0xfa   :  { %v1613_v25 = vpop.f32.mrb[3].mxu1 }
  0xfb   :  { %v1002_v26 = vadd.f32 %v1611_v23, %v962_v22 }
 0x115   :  { %v1631_v27 = vpop.f32.mrb[4].mxu0 }
 0x116   :  { %v1632_v28 = vpop.f32.mrb[5].mxu0 }
 0x117   :  { %v1633_v29 = vadd.f32 %v1632_v28, %v1631_v27  ;;  %v1634_v30 = vpop.f32.mrb[6].mxu0  ;;  %v1653_v31 = vpop.f32.mrb[4].mxu1 }
 0x118   :  { %v1635_v32 = vpop.f32.mrb[7].mxu0  ;;  %v1654_v33 = vpop.f32.mrb[5].mxu1 }
 0x119   :  { %v1042_v34 = vadd.f32 %v1633_v29, %v1002_v26  ;;  %v1655_v35 = vadd.f32 %v1654_v33, %v1653_v31  ;;  %v1656_v36 = vpop.f32.mrb[6].mxu1 }
 0x11a   :  { %v1657_v37 = vpop.f32.mrb[7].mxu1 }
 0x11b   :  { %v1082_v38 = vadd.f32 %v1655_v35, %v1042_v34 }
 0x135   :  { %v1675_v39 = vpop.f32.mrb[8].mxu0 }
 0x136   :  { %v1676_v40 = vpop.f32.mrb[9].mxu0 }
 0x137   :  { %v1677_v42 = vadd.f32 %v1676_v40, %v1675_v39  ;;  %v1697_v43 = vpop.f32.mrb[8].mxu1  ;;  %v1678_v44 = vpop.f32.mrb[10].mxu0 }
 0x138   :  { %v1698_v45 = vpop.f32.mrb[9].mxu1  ;;  %v1679_v46 = vpop.f32.mrb[11].mxu0 }
 0x139   :  { %v1122_v47 = vadd.f32 %v1677_v42, %v1082_v38  ;;  %v1699_v48 = vadd.f32 %v1698_v45, %v1697_v43  ;;  %v1700_v49 = vpop.f32.mrb[10].mxu1 }
 0x13a   :  { %v1701_v50 = vpop.f32.mrb[11].mxu1 }
 0x13b   :  { %v1162_v51 = vadd.f32 %v1699_v48, %v1122_v47 }
 0x13d   :  { %v1201_v52 = vpop.f32.mrb[12].mxu0 }
 0x13e   :  { %v1202_v53 = vadd.f32 %v1201_v52, %v1162_v51  ;;  %v1728_v54 = vpop.f32.mrb[13].mxu0 }
 0x13f   :  { %v1204_v55 = vpop.f32.mrb[14].mxu0 }
 0x140   :  { %v1207_v56 = vmax.f32 %v1202_v53, 0.0  ;;  %v1729_v57 = vpop.f32.mrb[15].mxu0 }
 0x142   :  { %v1208_v58 = vpack.c.bf16 %v1207_v56, %v1207_v56 }
 0x144   :  { %1747 = vmatmul.mubr.msk.bf16.vlgmr.msra.gmra.mrb[12].mxu1 %vm1276_vm3, %v1208_v58 }
 0x217   :  { %v1318_v0 = vpop.f32.mrb[12].mxu1 }
 0x218   :  { %v1319_v1 = vadd.f32 %v1553_v63, %v1318_v0  ;;  %v1748_v2 = vpop.f32.mrb[13].mxu1 }
 0x219   :  { %v1321_v3 = vpop.f32.mrb[14].mxu1 }
 0x21a   :  { %v1324_v41 = vmax.f32 %v1319_v1, 0.0  ;;  %v1749_v4 = vpop.f32.mrb[15].mxu1 }
 0x21c   :  { %v1325_v5 = vpack.c.bf16 %v1324_v41, %v1324_v41 }
 0x21e   :  { %1763 = vmatmul.mubr.msk.bf16.vlgmr.msra.gmra.mrb[16].mxu0 %vm1377_vm5, %v1325_v5 }
 0x2f1   :  { %v1419_v6 = vpop.f32.mrb[16].mxu0 }
 0x2f2   :  { %v1420_v7 = vadd.f32 %v1563_v61, %v1419_v6  ;;  %v1764_v8 = vpop.f32.mrb[17].mxu0 }
 0x2f3   :  { %v1422_v9 = vpop.f32.mrb[18].mxu0 }
 0x2f4   :  { %v1765_v10 = vpop.f32.mrb[19].mxu0  ;;  %v1426_v11 = vsel %vm1425_vm6, %v1420_v7, -inf }
 0x2f5   :  { %1427 = vmax.xlane.f32.xlu0 %v1426_v11 }
 0x382   :  { %v1428_v12 = vpop.xlane.xlu0 %1427 }
 0x383   :  { %v1429_v13 = vsub.f32 %v1420_v7, %v1428_v12 }
 0x385   :  { %v1430_v14 = vmul.f32 1.442695, %v1429_v13 }
 0x387   :  { %1884 = vpow2.f32 %v1430_v14 }
 0x391   :  { %v1885_v15 = vpop.eup %1884 }
 0x392   :  { %v1432_v16 = vsel %vm1425_vm6, %v1885_v15, 0.0 }
 0x393   :  { %1433 = vadd.xlane.f32.xlu0 %v1432_v16 }
 0x420   :  { %v1434_v17 = vpop.xlane.xlu0 %1433 }
 0x421   :  { %1886 = vlog2.f32 %v1434_v17 }
 0x42b   :  { %v1887_v18 = vpop.eup %1886 }
 0x42c   :  { %v1436_v19 = vmul.f32 0.6931472, %v1887_v18 }
 0x42e   :  { %v1437_v20 = vsub.f32 %v1429_v13, %v1436_v19 }
 0x430   :  { %1438 = vst.msk [vmem:[#allocation2] sm:$0x3] %vm1425_vm6, %v1437_v20 }
 0x431   :  { %1899 = shalt.err (!%p1896_p4)
}
 0x432   :  { %s1900_s24 = scalar_lea.hbm %s2366_s7, 32 }
 0x433   :  { %p1901_p5 = scmp.ne.s32.totalorder %s2366_s7, %s1900_s24  ;;  %p1904_p6 = scmp.lt.u32.totalorder %s1900_s24, %s2366_s7 }
 0x435   :  { %p1906_p7 = pnand %p1904_p6, %p1901_p5 }
 0x437   :  { %1909 = shalt.err (!%p1906_p7)
}
 0x438   :  { %1448 = dma.vmem_to_hbm [thread:$0]  %s1446_s5, 32, %s2366_s7, [#allocation3]  }
 0x439   :  { %1910 = dma.done.wait [#allocation3], 32  }
 0x43a   :  { %1911 = vsyncadd [#allocation3], 4294967264 }
 0x43b   :  { %1452 = vsyncpa [#allocation3], 1 }

</bundles_post_ra>
